<compile_context>
chip_gen: v7x
topology: tpu7x:2x2x1
jax: 0.10.0
libtpu: 0.0.40
codegen_flags: <defaults>
</compile_context>

<pallas_src>
import jax
import jax.numpy as jnp
from jax import lax
from jax.experimental import pallas as pl
from jax.experimental.pallas import tpu as pltpu


def _round_up(x, m):
    return ((x + m - 1) // m) * m


# -----------------------------------------------------------------------------
# Fused kernel: 4 x (im2col matmul + bias + ReLU), one image per grid step.
# -----------------------------------------------------------------------------
def _make_fused_encoder_kernel(cins, ksize, pad, H, W):
    K, KK, HW = ksize, ksize * ksize, H * W
    n_layers = len(cins)

    def kernel(*refs):
        x_ref, mask_ref = refs[0], refs[1]
        wb_refs = [(refs[2 + 2 * i], refs[3 + 2 * i]) for i in range(n_layers)]
        out_ref = refs[2 + 2 * n_layers]
        patch_ref = refs[3 + 2 * n_layers]        # VMEM scratch (K*K*Cmax, HW)

        a = x_ref[0]                               # (Cin0, HW), lane-dense f32
        for li, (w_ref, b_ref) in enumerate(wb_refs):
            cin = cins[li]
            # --- im2col: patch[tap*cin:(tap+1)*cin, :] = shifted & masked map.
            #     Tap shift = XLU lane roll on the flattened (C, H*W) map;
            #     SAME zero-padding realized by the precomputed 0/1 mask.
            for kh in range(K):
                for kw in range(K):
                    tap = kh * K + kw
                    off = (kh - pad) * W + (kw - pad)      # flat source offset
                    shifted = a if off == 0 else pltpu.roll(
                        a, shift=(-off) % HW, axis=1)
                    valid = mask_ref[tap:tap + 1, :]       # (1, HW)
                    patch_ref[tap * cin:(tap + 1) * cin, :] = shifted * valid
            # --- whole conv layer as ONE lane-dense MXU matmul:
            #     (Cout, K*K*Cin) @ (K*K*Cin, HW) -> (Cout, HW)
            acc = jnp.dot(w_ref[...], patch_ref[0:KK * cin, :],
                          preferred_element_type=jnp.float32)
            a = jnp.maximum(acc + b_ref[...], 0.0)         # bias + ReLU (VPU)
        out_ref[0] = a.astype(out_ref.dtype)

    return kernel


# -----------------------------------------------------------------------------
# Host-side glue: tap masks, 2-D im2col weights, wrapper.
# -----------------------------------------------------------------------------
def _tap_masks(ksize, pad, H, W):
    """(K*K, H*W) f32 validity masks implementing SAME zero-padding."""
    idx = jnp.arange(H * W, dtype=jnp.int32)
    row, col = idx // W, idx % W
    rows = []
    for kh in range(ksize):
        for kw in range(ksize):
            dh, dw = kh - pad, kw - pad
            ok = ((row + dh >= 0) & (row + dh < H) &
                  (col + dw >= 0) & (col + dw < W))
            rows.append(ok)
    return jnp.stack(rows, axis=0).astype(jnp.float32)


def _im2col_weight(w_oihw, cin_target):
    """OIHW conv weight -> 2-D (Cout, K*K*Cin) im2col layout (tap-major,
    cin-minor), zero-padding Cin up to cin_target for sublane alignment."""
    cout, cin, kh, kw = w_oihw.shape
    if cin_target > cin:
        w_oihw = jnp.pad(w_oihw, ((0, 0), (0, cin_target - cin), (0, 0), (0, 0)))
    return jnp.transpose(w_oihw, (0, 2, 3, 1)).reshape(cout, kh * kw * cin_target)


@jax.jit
def encoder_forward(x, params):
    """x: [B, C_in, H, W] (NCHW, as the PyTorch module receives).
    Returns [B, H*W, C_last] = conv_bone(x).flatten(2,3).permute(0,2,1)."""
    B, c_in, H, W = x.shape
    HW = H * W
    ws = [w for (w, _) in params]
    bs = [b for (_, b) in params]
    ksize = ws[0].shape[2]
    pad = (ksize - 1) // 2                       # SAME padding, stride 1
    KK = ksize * ksize

    couts = [w.shape[0] for w in ws]
    cin0p = _round_up(c_in, 8)                   # sublane-align layer-1 input
    cins = [cin0p] + couts[:-1]
    cmax = max(cins)

    # Host-side glue: channel-pad + flatten input, 2-D weights, tap masks.
    x_flat = jnp.pad(x, ((0, 0), (0, cin0p - c_in), (0, 0), (0, 0))
                     ).reshape(B, cin0p, HW).astype(jnp.float32)
    masks = _tap_masks(ksize, pad, H, W)
    w2d = [_im2col_weight(w, cin) for w, cin in zip(ws, cins)]
    bcol = [b.reshape(-1, 1).astype(jnp.float32) for b in bs]

    kernel = _make_fused_encoder_kernel(tuple(cins), ksize, pad, H, W)

    const2 = lambda b: (0, 0)
    in_specs = [
        pl.BlockSpec((1, cin0p, HW), lambda b: (b, 0, 0)),   # x (per image)
        pl.BlockSpec((KK, HW), const2),                      # tap masks
    ]
    operands = [masks]
    for wi, bi in zip(w2d, bcol):
        in_specs.append(pl.BlockSpec(wi.shape, const2))
        in_specs.append(pl.BlockSpec(bi.shape, const2))
        operands += [wi, bi]

    conv_chw = pl.pallas_call(
        kernel,
        out_shape=jax.ShapeDtypeStruct((B, couts[-1], HW), jnp.float32),
        grid=(B,),
        in_specs=in_specs,
        out_specs=pl.BlockSpec((1, couts[-1], HW), lambda b: (b, 0, 0)),
        scratch_shapes=[pltpu.VMEM((KK * cmax, HW), jnp.float32)],
        compiler_params=pltpu.CompilerParams(
            dimension_semantics=("parallel",)),
    )(x_flat, *operands)

    # flatten(2,3) is already embodied by the (C, H*W) layout; the module's
    # final permute(0,2,1) is a tiny XLA transpose of the lane-dense output.
    return jnp.transpose(conv_chw, (0, 2, 1))


# -----------------------------------------------------------------------------
# Reference + params
# -----------------------------------------------------------------------------
def encoder_reference(x, params):
    a = x
    for w, b in params:
        p = (w.shape[2] - 1) // 2
        a = lax.conv_general_dilated(
            a, w, window_strides=(1, 1), padding=((p, p), (p, p)),
            dimension_numbers=("NCHW", "OIHW", "NCHW"),
            precision=lax.Precision.HIGHEST)
        a = jnp.maximum(a + b.reshape(1, -1, 1, 1), 0.0)
    B, C, H, W = a.shape
    return jnp.transpose(a.reshape(B, C, H * W), (0, 2, 1))


def make_encoder_params(key, in_channels, channels, ksize):
    """Synthetic Conv2d parameters (OIHW weight + bias), nn.Conv2d-style init."""
    params = []
    cin = in_channels
    for cout in channels:
        key, kw_, kb_ = jax.random.split(key, 3)
        bound = 1.0 / float(cin * ksize * ksize) ** 0.5
        w = jax.random.uniform(kw_, (cout, cin, ksize, ksize), jnp.float32,
                               minval=-bound, maxval=bound)
        b = jax.random.uniform(kb_, (cout,), jnp.float32,
                               minval=-bound, maxval=bound)
        params.append((w, b))
        cin = cout
    return params


if __name__ == "__main__":
    B, C_IN, H, W = 2, 3, 16, 16
    CHANNELS = (32, 32, 32, 32)      # module default channels
    KSIZE = 5                        # 5x5, stride 1, pad 2, ReLU each layer

    key = jax.random.PRNGKey(0)
    kx, kp = jax.random.split(key)
    x = jax.random.normal(kx, (B, C_IN, H, W), jnp.float32)
    params = make_encoder_params(kp, C_IN, CHANNELS, KSIZE)

    out = encoder_forward(x, params)
    jax.block_until_ready(out)

    ref = encoder_reference(x, params)
    assert out.shape == (B, H * W, CHANNELS[-1]), out.shape
    assert jnp.allclose(out, ref, atol=2e-3, rtol=2e-3), \
        float(jnp.max(jnp.abs(out - ref)))

    print("KERNEL_OK")
</pallas_src>

<mosaic_0001>
module attributes {stable_mosaic.version = 11 : i64} {
  func.func @kernel(%arg0: i32, %arg1: memref<1x8x256xf32, #tpu.memory_space<vmem>>, %arg2: memref<25x256xf32, #tpu.memory_space<vmem>>, %arg3: memref<32x200xf32, #tpu.memory_space<vmem>>, %arg4: memref<32x1xf32, #tpu.memory_space<vmem>>, %arg5: memref<32x800xf32, #tpu.memory_space<vmem>>, %arg6: memref<32x1xf32, #tpu.memory_space<vmem>>, %arg7: memref<32x800xf32, #tpu.memory_space<vmem>>, %arg8: memref<32x1xf32, #tpu.memory_space<vmem>>, %arg9: memref<32x800xf32, #tpu.memory_space<vmem>>, %arg10: memref<32x1xf32, #tpu.memory_space<vmem>>, %arg11: memref<1x32x256xf32, #tpu.memory_space<vmem>>, %arg12: memref<800x256xf32, #tpu.memory_space<vmem>>) attributes {dimension_semantics = [#tpu.dimension_semantics<parallel>], iteration_bounds = array<i64: 2>, scalar_prefetch = 0 : i64, scratch_operands = 1 : i64, tpu.core_type = #tpu.core_type<tc>, window_params = [{transform_indices = @transform_0, window_bounds = array<i64: 1, 8, 256>}, {pipeline_mode = #tpu.pipeline_mode<synchronous>, transform_indices = @transform_1, window_bounds = array<i64: 25, 256>}, {pipeline_mode = #tpu.pipeline_mode<synchronous>, transform_indices = @transform_2, window_bounds = array<i64: 32, 200>}, {pipeline_mode = #tpu.pipeline_mode<synchronous>, transform_indices = @transform_3, window_bounds = array<i64: 32, 1>}, {pipeline_mode = #tpu.pipeline_mode<synchronous>, transform_indices = @transform_4, window_bounds = array<i64: 32, 800>}, {pipeline_mode = #tpu.pipeline_mode<synchronous>, transform_indices = @transform_5, window_bounds = array<i64: 32, 1>}, {pipeline_mode = #tpu.pipeline_mode<synchronous>, transform_indices = @transform_6, window_bounds = array<i64: 32, 800>}, {pipeline_mode = #tpu.pipeline_mode<synchronous>, transform_indices = @transform_7, window_bounds = array<i64: 32, 1>}, {pipeline_mode = #tpu.pipeline_mode<synchronous>, transform_indices = @transform_8, window_bounds = array<i64: 32, 800>}, {pipeline_mode = #tpu.pipeline_mode<synchronous>, transform_indices = @transform_9, window_bounds = array<i64: 32, 1>}, {transform_indices = @transform_10, window_bounds = array<i64: 1, 32, 256>}]} {
    %c0 = arith.constant 0 : index
    %c0_0 = arith.constant 0 : index
    %c0_1 = arith.constant 0 : index
    %0 = vector.load %arg1[%c0, %c0_0, %c0_1] : memref<1x8x256xf32, #tpu.memory_space<vmem>>, vector<1x8x256xf32>
    %1 = vector.shape_cast %0 : vector<1x8x256xf32> to vector<8x256xf32>
    %c34_i32 = arith.constant 34 : i32
    %2 = tpu.dynamic_rotate %1 by %c34_i32 dim 1 : vector<8x256xf32>, i32 -> vector<8x256xf32>
    %c0_2 = arith.constant 0 : index
    %c0_3 = arith.constant 0 : index
    %3 = vector.load %arg2[%c0_2, %c0_3] : memref<25x256xf32, #tpu.memory_space<vmem>>, vector<1x256xf32>
    %4 = vector.broadcast %3 : vector<1x256xf32> to vector<8x256xf32>
    %5 = arith.mulf %2, %4 : vector<8x256xf32>
    %c0_4 = arith.constant 0 : index
    %c0_5 = arith.constant 0 : index
    %6 = vector.load %arg12[%c0_4, %c0_5] : memref<800x256xf32, #tpu.memory_space<vmem>>, vector<8x256xf32>
    tpu.vector_store %arg12[%c0_4, %c0_5], %5 {strides = array<i32>} : memref<800x256xf32, #tpu.memory_space<vmem>>, vector<8x256xf32>,
    %c33_i32 = arith.constant 33 : i32
    %7 = tpu.dynamic_rotate %1 by %c33_i32 dim 1 : vector<8x256xf32>, i32 -> vector<8x256xf32>
    %c1 = arith.constant 1 : index
    %c0_6 = arith.constant 0 : index
    %8 = vector.load %arg2[%c1, %c0_6] : memref<25x256xf32, #tpu.memory_space<vmem>>, vector<1x256xf32>
    %9 = vector.broadcast %8 : vector<1x256xf32> to vector<8x256xf32>
    %10 = arith.mulf %7, %9 : vector<8x256xf32>
    %c8 = arith.constant 8 : index
    %c0_7 = arith.constant 0 : index
    %11 = vector.load %arg12[%c8, %c0_7] : memref<800x256xf32, #tpu.memory_space<vmem>>, vector<8x256xf32>
    tpu.vector_store %arg12[%c8, %c0_7], %10 {strides = array<i32>} : memref<800x256xf32, #tpu.memory_space<vmem>>, vector<8x256xf32>,
    %c32_i32 = arith.constant 32 : i32
    %12 = tpu.dynamic_rotate %1 by %c32_i32 dim 1 : vector<8x256xf32>, i32 -> vector<8x256xf32>
    %c2 = arith.constant 2 : index
    %c0_8 = arith.constant 0 : index
    %13 = vector.load %arg2[%c2, %c0_8] : memref<25x256xf32, #tpu.memory_space<vmem>>, vector<1x256xf32>
    %14 = vector.broadcast %13 : vector<1x256xf32> to vector<8x256xf32>
    %15 = arith.mulf %12, %14 : vector<8x256xf32>
    %c16 = arith.constant 16 : index
    %c0_9 = arith.constant 0 : index
    %16 = vector.load %arg12[%c16, %c0_9] : memref<800x256xf32, #tpu.memory_space<vmem>>, vector<8x256xf32>
    tpu.vector_store %arg12[%c16, %c0_9], %15 {strides = array<i32>} : memref<800x256xf32, #tpu.memory_space<vmem>>, vector<8x256xf32>,
    %c31_i32 = arith.constant 31 : i32
    %17 = tpu.dynamic_rotate %1 by %c31_i32 dim 1 : vector<8x256xf32>, i32 -> vector<8x256xf32>
    %c3 = arith.constant 3 : index
    %c0_10 = arith.constant 0 : index
    %18 = vector.load %arg2[%c3, %c0_10] : memref<25x256xf32, #tpu.memory_space<vmem>>, vector<1x256xf32>
    %19 = vector.broadcast %18 : vector<1x256xf32> to vector<8x256xf32>
    %20 = arith.mulf %17, %19 : vector<8x256xf32>
    %c24 = arith.constant 24 : index
    %c0_11 = arith.constant 0 : index
    %21 = vector.load %arg12[%c24, %c0_11] : memref<800x256xf32, #tpu.memory_space<vmem>>, vector<8x256xf32>
    tpu.vector_store %arg12[%c24, %c0_11], %20 {strides = array<i32>} : memref<800x256xf32, #tpu.memory_space<vmem>>, vector<8x256xf32>,
    %c30_i32 = arith.constant 30 : i32
    %22 = tpu.dynamic_rotate %1 by %c30_i32 dim 1 : vector<8x256xf32>, i32 -> vector<8x256xf32>
    %c4 = arith.constant 4 : index
    %c0_12 = arith.constant 0 : index
    %23 = vector.load %arg2[%c4, %c0_12] : memref<25x256xf32, #tpu.memory_space<vmem>>, vector<1x256xf32>
    %24 = vector.broadcast %23 : vector<1x256xf32> to vector<8x256xf32>
    %25 = arith.mulf %22, %24 : vector<8x256xf32>
    %c32 = arith.constant 32 : index
    %c0_13 = arith.constant 0 : index
    %26 = vector.load %arg12[%c32, %c0_13] : memref<800x256xf32, #tpu.memory_space<vmem>>, vector<8x256xf32>
    tpu.vector_store %arg12[%c32, %c0_13], %25 {strides = array<i32>} : memref<800x256xf32, #tpu.memory_space<vmem>>, vector<8x256xf32>,
    %c18_i32 = arith.constant 18 : i32
    %27 = tpu.dynamic_rotate %1 by %c18_i32 dim 1 : vector<8x256xf32>, i32 -> vector<8x256xf32>
    %c5 = arith.constant 5 : index
    %c0_14 = arith.constant 0 : index
    %28 = vector.load %arg2[%c5, %c0_14] : memref<25x256xf32, #tpu.memory_space<vmem>>, vector<1x256xf32>
    %29 = vector.broadcast %28 : vector<1x256xf32> to vector<8x256xf32>
    %30 = arith.mulf %27, %29 : vector<8x256xf32>
    %c40 = arith.constant 40 : index
    %c0_15 = arith.constant 0 : index
    %31 = vector.load %arg12[%c40, %c0_15] : memref<800x256xf32, #tpu.memory_space<vmem>>, vector<8x256xf32>
    tpu.vector_store %arg12[%c40, %c0_15], %30 {strides = array<i32>} : memref<800x256xf32, #tpu.memory_space<vmem>>, vector<8x256xf32>,
    %c17_i32 = arith.constant 17 : i32
    %32 = tpu.dynamic_rotate %1 by %c17_i32 dim 1 : vector<8x256xf32>, i32 -> vector<8x256xf32>
    %c6 = arith.constant 6 : index
    %c0_16 = arith.constant 0 : index
    %33 = vector.load %arg2[%c6, %c0_16] : memref<25x256xf32, #tpu.memory_space<vmem>>, vector<1x256xf32>
    %34 = vector.broadcast %33 : vector<1x256xf32> to vector<8x256xf32>
    %35 = arith.mulf %32, %34 : vector<8x256xf32>
    %c48 = arith.constant 48 : index
    %c0_17 = arith.constant 0 : index
    %36 = vector.load %arg12[%c48, %c0_17] : memref<800x256xf32, #tpu.memory_space<vmem>>, vector<8x256xf32>
    tpu.vector_store %arg12[%c48, %c0_17], %35 {strides = array<i32>} : memref<800x256xf32, #tpu.memory_space<vmem>>, vector<8x256xf32>,
    %c16_i32 = arith.constant 16 : i32
    %37 = tpu.dynamic_rotate %1 by %c16_i32 dim 1 : vector<8x256xf32>, i32 -> vector<8x256xf32>
    %c7 = arith.constant 7 : index
    %c0_18 = arith.constant 0 : index
    %38 = vector.load %arg2[%c7, %c0_18] : memref<25x256xf32, #tpu.memory_space<vmem>>, vector<1x256xf32>
    %39 = vector.broadcast %38 : vector<1x256xf32> to vector<8x256xf32>
    %40 = arith.mulf %37, %39 : vector<8x256xf32>
    %c56 = arith.constant 56 : index
    %c0_19 = arith.constant 0 : index
    %41 = vector.load %arg12[%c56, %c0_19] : memref<800x256xf32, #tpu.memory_space<vmem>>, vector<8x256xf32>
    tpu.vector_store %arg12[%c56, %c0_19], %40 {strides = array<i32>} : memref<800x256xf32, #tpu.memory_space<vmem>>, vector<8x256xf32>,
    %c15_i32 = arith.constant 15 : i32
    %42 = tpu.dynamic_rotate %1 by %c15_i32 dim 1 : vector<8x256xf32>, i32 -> vector<8x256xf32>
    %c8_20 = arith.constant 8 : index
    %c0_21 = arith.constant 0 : index
    %43 = vector.load %arg2[%c8_20, %c0_21] : memref<25x256xf32, #tpu.memory_space<vmem>>, vector<1x256xf32>
    %44 = vector.broadcast %43 : vector<1x256xf32> to vector<8x256xf32>
    %45 = arith.mulf %42, %44 : vector<8x256xf32>
    %c64 = arith.constant 64 : index
    %c0_22 = arith.constant 0 : index
    %46 = vector.load %arg12[%c64, %c0_22] : memref<800x256xf32, #tpu.memory_space<vmem>>, vector<8x256xf32>
    tpu.vector_store %arg12[%c64, %c0_22], %45 {strides = array<i32>} : memref<800x256xf32, #tpu.memory_space<vmem>>, vector<8x256xf32>,
    %c14_i32 = arith.constant 14 : i32
    %47 = tpu.dynamic_rotate %1 by %c14_i32 dim 1 : vector<8x256xf32>, i32 -> vector<8x256xf32>
    %c9 = arith.constant 9 : index
    %c0_23 = arith.constant 0 : index
    %48 = vector.load %arg2[%c9, %c0_23] : memref<25x256xf32, #tpu.memory_space<vmem>>, vector<1x256xf32>
    %49 = vector.broadcast %48 : vector<1x256xf32> to vector<8x256xf32>
    %50 = arith.mulf %47, %49 : vector<8x256xf32>
    %c72 = arith.constant 72 : index
    %c0_24 = arith.constant 0 : index
    %51 = vector.load %arg12[%c72, %c0_24] : memref<800x256xf32, #tpu.memory_space<vmem>>, vector<8x256xf32>
    tpu.vector_store %arg12[%c72, %c0_24], %50 {strides = array<i32>} : memref<800x256xf32, #tpu.memory_space<vmem>>, vector<8x256xf32>,
    %c2_i32 = arith.constant 2 : i32
    %52 = tpu.dynamic_rotate %1 by %c2_i32 dim 1 : vector<8x256xf32>, i32 -> vector<8x256xf32>
    %c10 = arith.constant 10 : index
    %c0_25 = arith.constant 0 : index
    %53 = vector.load %arg2[%c10, %c0_25] : memref<25x256xf32, #tpu.memory_space<vmem>>, vector<1x256xf32>
    %54 = vector.broadcast %53 : vector<1x256xf32> to vector<8x256xf32>
    %55 = arith.mulf %52, %54 : vector<8x256xf32>
    %c80 = arith.constant 80 : index
    %c0_26 = arith.constant 0 : index
    %56 = vector.load %arg12[%c80, %c0_26] : memref<800x256xf32, #tpu.memory_space<vmem>>, vector<8x256xf32>
    tpu.vector_store %arg12[%c80, %c0_26], %55 {strides = array<i32>} : memref<800x256xf32, #tpu.memory_space<vmem>>, vector<8x256xf32>,
    %c1_i32 = arith.constant 1 : i32
    %57 = tpu.dynamic_rotate %1 by %c1_i32 dim 1 : vector<8x256xf32>, i32 -> vector<8x256xf32>
    %c11 = arith.constant 11 : index
    %c0_27 = arith.constant 0 : index
    %58 = vector.load %arg2[%c11, %c0_27] : memref<25x256xf32, #tpu.memory_space<vmem>>, vector<1x256xf32>
    %59 = vector.broadcast %58 : vector<1x256xf32> to vector<8x256xf32>
    %60 = arith.mulf %57, %59 : vector<8x256xf32>
    %c88 = arith.constant 88 : index
    %c0_28 = arith.constant 0 : index
    %61 = vector.load %arg12[%c88, %c0_28] : memref<800x256xf32, #tpu.memory_space<vmem>>, vector<8x256xf32>
    tpu.vector_store %arg12[%c88, %c0_28], %60 {strides = array<i32>} : memref<800x256xf32, #tpu.memory_space<vmem>>, vector<8x256xf32>,
    %c12 = arith.constant 12 : index
    %c0_29 = arith.constant 0 : index
    %62 = vector.load %arg2[%c12, %c0_29] : memref<25x256xf32, #tpu.memory_space<vmem>>, vector<1x256xf32>
    %63 = vector.broadcast %62 : vector<1x256xf32> to vector<8x256xf32>
    %64 = arith.mulf %1, %63 : vector<8x256xf32>
    %c96 = arith.constant 96 : index
    %c0_30 = arith.constant 0 : index
    %65 = vector.load %arg12[%c96, %c0_30] : memref<800x256xf32, #tpu.memory_space<vmem>>, vector<8x256xf32>
    tpu.vector_store %arg12[%c96, %c0_30], %64 {strides = array<i32>} : memref<800x256xf32, #tpu.memory_space<vmem>>, vector<8x256xf32>,
    %c255_i32 = arith.constant 255 : i32
    %66 = tpu.dynamic_rotate %1 by %c255_i32 dim 1 : vector<8x256xf32>, i32 -> vector<8x256xf32>
    %c13 = arith.constant 13 : index
    %c0_31 = arith.constant 0 : index
    %67 = vector.load %arg2[%c13, %c0_31] : memref<25x256xf32, #tpu.memory_space<vmem>>, vector<1x256xf32>
    %68 = vector.broadcast %67 : vector<1x256xf32> to vector<8x256xf32>
    %69 = arith.mulf %66, %68 : vector<8x256xf32>
    %c104 = arith.constant 104 : index
    %c0_32 = arith.constant 0 : index
    %70 = vector.load %arg12[%c104, %c0_32] : memref<800x256xf32, #tpu.memory_space<vmem>>, vector<8x256xf32>
    tpu.vector_store %arg12[%c104, %c0_32], %69 {strides = array<i32>} : memref<800x256xf32, #tpu.memory_space<vmem>>, vector<8x256xf32>,
    %c254_i32 = arith.constant 254 : i32
    %71 = tpu.dynamic_rotate %1 by %c254_i32 dim 1 : vector<8x256xf32>, i32 -> vector<8x256xf32>
    %c14 = arith.constant 14 : index
    %c0_33 = arith.constant 0 : index
    %72 = vector.load %arg2[%c14, %c0_33] : memref<25x256xf32, #tpu.memory_space<vmem>>, vector<1x256xf32>
    %73 = vector.broadcast %72 : vector<1x256xf32> to vector<8x256xf32>
    %74 = arith.mulf %71, %73 : vector<8x256xf32>
    %c112 = arith.constant 112 : index
    %c0_34 = arith.constant 0 : index
    %75 = vector.load %arg12[%c112, %c0_34] : memref<800x256xf32, #tpu.memory_space<vmem>>, vector<8x256xf32>
    tpu.vector_store %arg12[%c112, %c0_34], %74 {strides = array<i32>} : memref<800x256xf32, #tpu.memory_space<vmem>>, vector<8x256xf32>,
    %c242_i32 = arith.constant 242 : i32
    %76 = tpu.dynamic_rotate %1 by %c242_i32 dim 1 : vector<8x256xf32>, i32 -> vector<8x256xf32>
    %c15 = arith.constant 15 : index
    %c0_35 = arith.constant 0 : index
    %77 = vector.load %arg2[%c15, %c0_35] : memref<25x256xf32, #tpu.memory_space<vmem>>, vector<1x256xf32>
    %78 = vector.broadcast %77 : vector<1x256xf32> to vector<8x256xf32>
    %79 = arith.mulf %76, %78 : vector<8x256xf32>
    %c120 = arith.constant 120 : index
    %c0_36 = arith.constant 0 : index
    %80 = vector.load %arg12[%c120, %c0_36] : memref<800x256xf32, #tpu.memory_space<vmem>>, vector<8x256xf32>
    tpu.vector_store %arg12[%c120, %c0_36], %79 {strides = array<i32>} : memref<800x256xf32, #tpu.memory_space<vmem>>, vector<8x256xf32>,
    %c241_i32 = arith.constant 241 : i32
    %81 = tpu.dynamic_rotate %1 by %c241_i32 dim 1 : vector<8x256xf32>, i32 -> vector<8x256xf32>
    %c16_37 = arith.constant 16 : index
    %c0_38 = arith.constant 0 : index
    %82 = vector.load %arg2[%c16_37, %c0_38] : memref<25x256xf32, #tpu.memory_space<vmem>>, vector<1x256xf32>
    %83 = vector.broadcast %82 : vector<1x256xf32> to vector<8x256xf32>
    %84 = arith.mulf %81, %83 : vector<8x256xf32>
    %c128 = arith.constant 128 : index
    %c0_39 = arith.constant 0 : index
    %85 = vector.load %arg12[%c128, %c0_39] : memref<800x256xf32, #tpu.memory_space<vmem>>, vector<8x256xf32>
    tpu.vector_store %arg12[%c128, %c0_39], %84 {strides = array<i32>} : memref<800x256xf32, #tpu.memory_space<vmem>>, vector<8x256xf32>,
    %c240_i32 = arith.constant 240 : i32
    %86 = tpu.dynamic_rotate %1 by %c240_i32 dim 1 : vector<8x256xf32>, i32 -> vector<8x256xf32>
    %c17 = arith.constant 17 : index
    %c0_40 = arith.constant 0 : index
    %87 = vector.load %arg2[%c17, %c0_40] : memref<25x256xf32, #tpu.memory_space<vmem>>, vector<1x256xf32>
    %88 = vector.broadcast %87 : vector<1x256xf32> to vector<8x256xf32>
    %89 = arith.mulf %86, %88 : vector<8x256xf32>
    %c136 = arith.constant 136 : index
    %c0_41 = arith.constant 0 : index
    %90 = vector.load %arg12[%c136, %c0_41] : memref<800x256xf32, #tpu.memory_space<vmem>>, vector<8x256xf32>
    tpu.vector_store %arg12[%c136, %c0_41], %89 {strides = array<i32>} : memref<800x256xf32, #tpu.memory_space<vmem>>, vector<8x256xf32>,
    %c239_i32 = arith.constant 239 : i32
    %91 = tpu.dynamic_rotate %1 by %c239_i32 dim 1 : vector<8x256xf32>, i32 -> vector<8x256xf32>
    %c18 = arith.constant 18 : index
    %c0_42 = arith.constant 0 : index
    %92 = vector.load %arg2[%c18, %c0_42] : memref<25x256xf32, #tpu.memory_space<vmem>>, vector<1x256xf32>
    %93 = vector.broadcast %92 : vector<1x256xf32> to vector<8x256xf32>
    %94 = arith.mulf %91, %93 : vector<8x256xf32>
    %c144 = arith.constant 144 : index
    %c0_43 = arith.constant 0 : index
    %95 = vector.load %arg12[%c144, %c0_43] : memref<800x256xf32, #tpu.memory_space<vmem>>, vector<8x256xf32>
    tpu.vector_store %arg12[%c144, %c0_43], %94 {strides = array<i32>} : memref<800x256xf32, #tpu.memory_space<vmem>>, vector<8x256xf32>,
    %c238_i32 = arith.constant 238 : i32
    %96 = tpu.dynamic_rotate %1 by %c238_i32 dim 1 : vector<8x256xf32>, i32 -> vector<8x256xf32>
    %c19 = arith.constant 19 : index
    %c0_44 = arith.constant 0 : index
    %97 = vector.load %arg2[%c19, %c0_44] : memref<25x256xf32, #tpu.memory_space<vmem>>, vector<1x256xf32>
    %98 = vector.broadcast %97 : vector<1x256xf32> to vector<8x256xf32>
    %99 = arith.mulf %96, %98 : vector<8x256xf32>
    %c152 = arith.constant 152 : index
    %c0_45 = arith.constant 0 : index
    %100 = vector.load %arg12[%c152, %c0_45] : memref<800x256xf32, #tpu.memory_space<vmem>>, vector<8x256xf32>
    tpu.vector_store %arg12[%c152, %c0_45], %99 {strides = array<i32>} : memref<800x256xf32, #tpu.memory_space<vmem>>, vector<8x256xf32>,
    %c226_i32 = arith.constant 226 : i32
    %101 = tpu.dynamic_rotate %1 by %c226_i32 dim 1 : vector<8x256xf32>, i32 -> vector<8x256xf32>
    %c20 = arith.constant 20 : index
    %c0_46 = arith.constant 0 : index
    %102 = vector.load %arg2[%c20, %c0_46] : memref<25x256xf32, #tpu.memory_space<vmem>>, vector<1x256xf32>
    %103 = vector.broadcast %102 : vector<1x256xf32> to vector<8x256xf32>
    %104 = arith.mulf %101, %103 : vector<8x256xf32>
    %c160 = arith.constant 160 : index
    %c0_47 = arith.constant 0 : index
    %105 = vector.load %arg12[%c160, %c0_47] : memref<800x256xf32, #tpu.memory_space<vmem>>, vector<8x256xf32>
    tpu.vector_store %arg12[%c160, %c0_47], %104 {strides = array<i32>} : memref<800x256xf32, #tpu.memory_space<vmem>>, vector<8x256xf32>,
    %c225_i32 = arith.constant 225 : i32
    %106 = tpu.dynamic_rotate %1 by %c225_i32 dim 1 : vector<8x256xf32>, i32 -> vector<8x256xf32>
    %c21 = arith.constant 21 : index
    %c0_48 = arith.constant 0 : index
    %107 = vector.load %arg2[%c21, %c0_48] : memref<25x256xf32, #tpu.memory_space<vmem>>, vector<1x256xf32>
    %108 = vector.broadcast %107 : vector<1x256xf32> to vector<8x256xf32>
    %109 = arith.mulf %106, %108 : vector<8x256xf32>
    %c168 = arith.constant 168 : index
    %c0_49 = arith.constant 0 : index
    %110 = vector.load %arg12[%c168, %c0_49] : memref<800x256xf32, #tpu.memory_space<vmem>>, vector<8x256xf32>
    tpu.vector_store %arg12[%c168, %c0_49], %109 {strides = array<i32>} : memref<800x256xf32, #tpu.memory_space<vmem>>, vector<8x256xf32>,
    %c224_i32 = arith.constant 224 : i32
    %111 = tpu.dynamic_rotate %1 by %c224_i32 dim 1 : vector<8x256xf32>, i32 -> vector<8x256xf32>
    %c22 = arith.constant 22 : index
    %c0_50 = arith.constant 0 : index
    %112 = vector.load %arg2[%c22, %c0_50] : memref<25x256xf32, #tpu.memory_space<vmem>>, vector<1x256xf32>
    %113 = vector.broadcast %112 : vector<1x256xf32> to vector<8x256xf32>
    %114 = arith.mulf %111, %113 : vector<8x256xf32>
    %c176 = arith.constant 176 : index
    %c0_51 = arith.constant 0 : index
    %115 = vector.load %arg12[%c176, %c0_51] : memref<800x256xf32, #tpu.memory_space<vmem>>, vector<8x256xf32>
    tpu.vector_store %arg12[%c176, %c0_51], %114 {strides = array<i32>} : memref<800x256xf32, #tpu.memory_space<vmem>>, vector<8x256xf32>,
    %c223_i32 = arith.constant 223 : i32
    %116 = tpu.dynamic_rotate %1 by %c223_i32 dim 1 : vector<8x256xf32>, i32 -> vector<8x256xf32>
    %c23 = arith.constant 23 : index
    %c0_52 = arith.constant 0 : index
    %117 = vector.load %arg2[%c23, %c0_52] : memref<25x256xf32, #tpu.memory_space<vmem>>, vector<1x256xf32>
    %118 = vector.broadcast %117 : vector<1x256xf32> to vector<8x256xf32>
    %119 = arith.mulf %116, %118 : vector<8x256xf32>
    %c184 = arith.constant 184 : index
    %c0_53 = arith.constant 0 : index
    %120 = vector.load %arg12[%c184, %c0_53] : memref<800x256xf32, #tpu.memory_space<vmem>>, vector<8x256xf32>
    tpu.vector_store %arg12[%c184, %c0_53], %119 {strides = array<i32>} : memref<800x256xf32, #tpu.memory_space<vmem>>, vector<8x256xf32>,
    %c222_i32 = arith.constant 222 : i32
    %121 = tpu.dynamic_rotate %1 by %c222_i32 dim 1 : vector<8x256xf32>, i32 -> vector<8x256xf32>
    %c24_54 = arith.constant 24 : index
    %c0_55 = arith.constant 0 : index
    %122 = vector.load %arg2[%c24_54, %c0_55] : memref<25x256xf32, #tpu.memory_space<vmem>>, vector<1x256xf32>
    %123 = vector.broadcast %122 : vector<1x256xf32> to vector<8x256xf32>
    %124 = arith.mulf %121, %123 : vector<8x256xf32>
    %c192 = arith.constant 192 : index
    %c0_56 = arith.constant 0 : index
    %125 = vector.load %arg12[%c192, %c0_56] : memref<800x256xf32, #tpu.memory_space<vmem>>, vector<8x256xf32>
    tpu.vector_store %arg12[%c192, %c0_56], %124 {strides = array<i32>} : memref<800x256xf32, #tpu.memory_space<vmem>>, vector<8x256xf32>,
    %c0_57 = arith.constant 0 : index
    %c0_58 = arith.constant 0 : index
    %126 = vector.load %arg3[%c0_57, %c0_58] : memref<32x200xf32, #tpu.memory_space<vmem>>, vector<32x200xf32>
    %c0_59 = arith.constant 0 : index
    %c0_60 = arith.constant 0 : index
    %127 = vector.load %arg12[%c0_59, %c0_60] : memref<800x256xf32, #tpu.memory_space<vmem>>, vector<200x256xf32>
    %cst = arith.constant dense<0.000000e+00> : vector<32x256xf32>
    %128 = tpu.matmul %126, %127, %cst {dimension_numbers = #tpu.dot_dimension_numbers<[1], [0], [0], [1], [0, 0, 1, 1], [], []>} : vector<32x200xf32>, vector<200x256xf32>, vector<32x256xf32> -> vector<32x256xf32>
    %c0_61 = arith.constant 0 : index
    %c0_62 = arith.constant 0 : index
    %129 = vector.load %arg4[%c0_61, %c0_62] : memref<32x1xf32, #tpu.memory_space<vmem>>, vector<32x1xf32>
    %130 = vector.broadcast %129 : vector<32x1xf32> to vector<32x256xf32>
    %131 = arith.addf %128, %130 : vector<32x256xf32>
    %cst_63 = arith.constant 0.000000e+00 : f32
    %132 = vector.broadcast %cst_63 : f32 to vector<32x256xf32>
    %133 = arith.maximumf %131, %132 : vector<32x256xf32>
    %c34_i32_64 = arith.constant 34 : i32
    %134 = tpu.dynamic_rotate %133 by %c34_i32_64 dim 1 : vector<32x256xf32>, i32 -> vector<32x256xf32>
    %c0_65 = arith.constant 0 : index
    %c0_66 = arith.constant 0 : index
    %135 = vector.load %arg2[%c0_65, %c0_66] : memref<25x256xf32, #tpu.memory_space<vmem>>, vector<1x256xf32>
    %136 = vector.broadcast %135 : vector<1x256xf32> to vector<32x256xf32>
    %137 = arith.mulf %134, %136 : vector<32x256xf32>
    %c0_67 = arith.constant 0 : index
    %c0_68 = arith.constant 0 : index
    %138 = vector.load %arg12[%c0_67, %c0_68] : memref<800x256xf32, #tpu.memory_space<vmem>>, vector<32x256xf32>
    tpu.vector_store %arg12[%c0_67, %c0_68], %137 {strides = array<i32>} : memref<800x256xf32, #tpu.memory_space<vmem>>, vector<32x256xf32>,
    %c33_i32_69 = arith.constant 33 : i32
    %139 = tpu.dynamic_rotate %133 by %c33_i32_69 dim 1 : vector<32x256xf32>, i32 -> vector<32x256xf32>
    %c1_70 = arith.constant 1 : index
    %c0_71 = arith.constant 0 : index
    %140 = vector.load %arg2[%c1_70, %c0_71] : memref<25x256xf32, #tpu.memory_space<vmem>>, vector<1x256xf32>
    %141 = vector.broadcast %140 : vector<1x256xf32> to vector<32x256xf32>
    %142 = arith.mulf %139, %141 : vector<32x256xf32>
    %c32_72 = arith.constant 32 : index
    %c0_73 = arith.constant 0 : index
    %143 = vector.load %arg12[%c32_72, %c0_73] : memref<800x256xf32, #tpu.memory_space<vmem>>, vector<32x256xf32>
    tpu.vector_store %arg12[%c32_72, %c0_73], %142 {strides = array<i32>} : memref<800x256xf32, #tpu.memory_space<vmem>>, vector<32x256xf32>,
    %c32_i32_74 = arith.constant 32 : i32
    %144 = tpu.dynamic_rotate %133 by %c32_i32_74 dim 1 : vector<32x256xf32>, i32 -> vector<32x256xf32>
    %c2_75 = arith.constant 2 : index
    %c0_76 = arith.constant 0 : index
    %145 = vector.load %arg2[%c2_75, %c0_76] : memref<25x256xf32, #tpu.memory_space<vmem>>, vector<1x256xf32>
    %146 = vector.broadcast %145 : vector<1x256xf32> to vector<32x256xf32>
    %147 = arith.mulf %144, %146 : vector<32x256xf32>
    %c64_77 = arith.constant 64 : index
    %c0_78 = arith.constant 0 : index
    %148 = vector.load %arg12[%c64_77, %c0_78] : memref<800x256xf32, #tpu.memory_space<vmem>>, vector<32x256xf32>
    tpu.vector_store %arg12[%c64_77, %c0_78], %147 {strides = array<i32>} : memref<800x256xf32, #tpu.memory_space<vmem>>, vector<32x256xf32>,
    %c31_i32_79 = arith.constant 31 : i32
    %149 = tpu.dynamic_rotate %133 by %c31_i32_79 dim 1 : vector<32x256xf32>, i32 -> vector<32x256xf32>
    %c3_80 = arith.constant 3 : index
    %c0_81 = arith.constant 0 : index
    %150 = vector.load %arg2[%c3_80, %c0_81] : memref<25x256xf32, #tpu.memory_space<vmem>>, vector<1x256xf32>
    %151 = vector.broadcast %150 : vector<1x256xf32> to vector<32x256xf32>
    %152 = arith.mulf %149, %151 : vector<32x256xf32>
    %c96_82 = arith.constant 96 : index
    %c0_83 = arith.constant 0 : index
    %153 = vector.load %arg12[%c96_82, %c0_83] : memref<800x256xf32, #tpu.memory_space<vmem>>, vector<32x256xf32>
    tpu.vector_store %arg12[%c96_82, %c0_83], %152 {strides = array<i32>} : memref<800x256xf32, #tpu.memory_space<vmem>>, vector<32x256xf32>,
    %c30_i32_84 = arith.constant 30 : i32
    %154 = tpu.dynamic_rotate %133 by %c30_i32_84 dim 1 : vector<32x256xf32>, i32 -> vector<32x256xf32>
    %c4_85 = arith.constant 4 : index
    %c0_86 = arith.constant 0 : index
    %155 = vector.load %arg2[%c4_85, %c0_86] : memref<25x256xf32, #tpu.memory_space<vmem>>, vector<1x256xf32>
    %156 = vector.broadcast %155 : vector<1x256xf32> to vector<32x256xf32>
    %157 = arith.mulf %154, %156 : vector<32x256xf32>
    %c128_87 = arith.constant 128 : index
    %c0_88 = arith.constant 0 : index
    %158 = vector.load %arg12[%c128_87, %c0_88] : memref<800x256xf32, #tpu.memory_space<vmem>>, vector<32x256xf32>
    tpu.vector_store %arg12[%c128_87, %c0_88], %157 {strides = array<i32>} : memref<800x256xf32, #tpu.memory_space<vmem>>, vector<32x256xf32>,
    %c18_i32_89 = arith.constant 18 : i32
    %159 = tpu.dynamic_rotate %133 by %c18_i32_89 dim 1 : vector<32x256xf32>, i32 -> vector<32x256xf32>
    %c5_90 = arith.constant 5 : index
    %c0_91 = arith.constant 0 : index
    %160 = vector.load %arg2[%c5_90, %c0_91] : memref<25x256xf32, #tpu.memory_space<vmem>>, vector<1x256xf32>
    %161 = vector.broadcast %160 : vector<1x256xf32> to vector<32x256xf32>
    %162 = arith.mulf %159, %161 : vector<32x256xf32>
    %c160_92 = arith.constant 160 : index
    %c0_93 = arith.constant 0 : index
    %163 = vector.load %arg12[%c160_92, %c0_93] : memref<800x256xf32, #tpu.memory_space<vmem>>, vector<32x256xf32>
    tpu.vector_store %arg12[%c160_92, %c0_93], %162 {strides = array<i32>} : memref<800x256xf32, #tpu.memory_space<vmem>>, vector<32x256xf32>,
    %c17_i32_94 = arith.constant 17 : i32
    %164 = tpu.dynamic_rotate %133 by %c17_i32_94 dim 1 : vector<32x256xf32>, i32 -> vector<32x256xf32>
    %c6_95 = arith.constant 6 : index
    %c0_96 = arith.constant 0 : index
    %165 = vector.load %arg2[%c6_95, %c0_96] : memref<25x256xf32, #tpu.memory_space<vmem>>, vector<1x256xf32>
    %166 = vector.broadcast %165 : vector<1x256xf32> to vector<32x256xf32>
    %167 = arith.mulf %164, %166 : vector<32x256xf32>
    %c192_97 = arith.constant 192 : index
    %c0_98 = arith.constant 0 : index
    %168 = vector.load %arg12[%c192_97, %c0_98] : memref<800x256xf32, #tpu.memory_space<vmem>>, vector<32x256xf32>
    tpu.vector_store %arg12[%c192_97, %c0_98], %167 {strides = array<i32>} : memref<800x256xf32, #tpu.memory_space<vmem>>, vector<32x256xf32>,
    %c16_i32_99 = arith.constant 16 : i32
    %169 = tpu.dynamic_rotate %133 by %c16_i32_99 dim 1 : vector<32x256xf32>, i32 -> vector<32x256xf32>
    %c7_100 = arith.constant 7 : index
    %c0_101 = arith.constant 0 : index
    %170 = vector.load %arg2[%c7_100, %c0_101] : memref<25x256xf32, #tpu.memory_space<vmem>>, vector<1x256xf32>
    %171 = vector.broadcast %170 : vector<1x256xf32> to vector<32x256xf32>
    %172 = arith.mulf %169, %171 : vector<32x256xf32>
    %c224 = arith.constant 224 : index
    %c0_102 = arith.constant 0 : index
    %173 = vector.load %arg12[%c224, %c0_102] : memref<800x256xf32, #tpu.memory_space<vmem>>, vector<32x256xf32>
    tpu.vector_store %arg12[%c224, %c0_102], %172 {strides = array<i32>} : memref<800x256xf32, #tpu.memory_space<vmem>>, vector<32x256xf32>,
    %c15_i32_103 = arith.constant 15 : i32
    %174 = tpu.dynamic_rotate %133 by %c15_i32_103 dim 1 : vector<32x256xf32>, i32 -> vector<32x256xf32>
    %c8_104 = arith.constant 8 : index
    %c0_105 = arith.constant 0 : index
    %175 = vector.load %arg2[%c8_104, %c0_105] : memref<25x256xf32, #tpu.memory_space<vmem>>, vector<1x256xf32>
    %176 = vector.broadcast %175 : vector<1x256xf32> to vector<32x256xf32>
    %177 = arith.mulf %174, %176 : vector<32x256xf32>
    %c256 = arith.constant 256 : index
    %c0_106 = arith.constant 0 : index
    %178 = vector.load %arg12[%c256, %c0_106] : memref<800x256xf32, #tpu.memory_space<vmem>>, vector<32x256xf32>
    tpu.vector_store %arg12[%c256, %c0_106], %177 {strides = array<i32>} : memref<800x256xf32, #tpu.memory_space<vmem>>, vector<32x256xf32>,
    %c14_i32_107 = arith.constant 14 : i32
    %179 = tpu.dynamic_rotate %133 by %c14_i32_107 dim 1 : vector<32x256xf32>, i32 -> vector<32x256xf32>
    %c9_108 = arith.constant 9 : index
    %c0_109 = arith.constant 0 : index
    %180 = vector.load %arg2[%c9_108, %c0_109] : memref<25x256xf32, #tpu.memory_space<vmem>>, vector<1x256xf32>
    %181 = vector.broadcast %180 : vector<1x256xf32> to vector<32x256xf32>
    %182 = arith.mulf %179, %181 : vector<32x256xf32>
    %c288 = arith.constant 288 : index
    %c0_110 = arith.constant 0 : index
    %183 = vector.load %arg12[%c288, %c0_110] : memref<800x256xf32, #tpu.memory_space<vmem>>, vector<32x256xf32>
    tpu.vector_store %arg12[%c288, %c0_110], %182 {strides = array<i32>} : memref<800x256xf32, #tpu.memory_space<vmem>>, vector<32x256xf32>,
    %c2_i32_111 = arith.constant 2 : i32
    %184 = tpu.dynamic_rotate %133 by %c2_i32_111 dim 1 : vector<32x256xf32>, i32 -> vector<32x256xf32>
    %c10_112 = arith.constant 10 : index
    %c0_113 = arith.constant 0 : index
    %185 = vector.load %arg2[%c10_112, %c0_113] : memref<25x256xf32, #tpu.memory_space<vmem>>, vector<1x256xf32>
    %186 = vector.broadcast %185 : vector<1x256xf32> to vector<32x256xf32>
    %187 = arith.mulf %184, %186 : vector<32x256xf32>
    %c320 = arith.constant 320 : index
    %c0_114 = arith.constant 0 : index
    %188 = vector.load %arg12[%c320, %c0_114] : memref<800x256xf32, #tpu.memory_space<vmem>>, vector<32x256xf32>
    tpu.vector_store %arg12[%c320, %c0_114], %187 {strides = array<i32>} : memref<800x256xf32, #tpu.memory_space<vmem>>, vector<32x256xf32>,
    %c1_i32_115 = arith.constant 1 : i32
    %189 = tpu.dynamic_rotate %133 by %c1_i32_115 dim 1 : vector<32x256xf32>, i32 -> vector<32x256xf32>
    %c11_116 = arith.constant 11 : index
    %c0_117 = arith.constant 0 : index
    %190 = vector.load %arg2[%c11_116, %c0_117] : memref<25x256xf32, #tpu.memory_space<vmem>>, vector<1x256xf32>
    %191 = vector.broadcast %190 : vector<1x256xf32> to vector<32x256xf32>
    %192 = arith.mulf %189, %191 : vector<32x256xf32>
    %c352 = arith.constant 352 : index
    %c0_118 = arith.constant 0 : index
    %193 = vector.load %arg12[%c352, %c0_118] : memref<800x256xf32, #tpu.memory_space<vmem>>, vector<32x256xf32>
    tpu.vector_store %arg12[%c352, %c0_118], %192 {strides = array<i32>} : memref<800x256xf32, #tpu.memory_space<vmem>>, vector<32x256xf32>,
    %c12_119 = arith.constant 12 : index
    %c0_120 = arith.constant 0 : index
    %194 = vector.load %arg2[%c12_119, %c0_120] : memref<25x256xf32, #tpu.memory_space<vmem>>, vector<1x256xf32>
    %195 = vector.broadcast %194 : vector<1x256xf32> to vector<32x256xf32>
    %196 = arith.mulf %133, %195 : vector<32x256xf32>
    %c384 = arith.constant 384 : index
    %c0_121 = arith.constant 0 : index
    %197 = vector.load %arg12[%c384, %c0_121] : memref<800x256xf32, #tpu.memory_space<vmem>>, vector<32x256xf32>
    tpu.vector_store %arg12[%c384, %c0_121], %196 {strides = array<i32>} : memref<800x256xf32, #tpu.memory_space<vmem>>, vector<32x256xf32>,
    %c255_i32_122 = arith.constant 255 : i32
    %198 = tpu.dynamic_rotate %133 by %c255_i32_122 dim 1 : vector<32x256xf32>, i32 -> vector<32x256xf32>
    %c13_123 = arith.constant 13 : index
    %c0_124 = arith.constant 0 : index
    %199 = vector.load %arg2[%c13_123, %c0_124] : memref<25x256xf32, #tpu.memory_space<vmem>>, vector<1x256xf32>
    %200 = vector.broadcast %199 : vector<1x256xf32> to vector<32x256xf32>
    %201 = arith.mulf %198, %200 : vector<32x256xf32>
    %c416 = arith.constant 416 : index
    %c0_125 = arith.constant 0 : index
    %202 = vector.load %arg12[%c416, %c0_125] : memref<800x256xf32, #tpu.memory_space<vmem>>, vector<32x256xf32>
    tpu.vector_store %arg12[%c416, %c0_125], %201 {strides = array<i32>} : memref<800x256xf32, #tpu.memory_space<vmem>>, vector<32x256xf32>,
    %c254_i32_126 = arith.constant 254 : i32
    %203 = tpu.dynamic_rotate %133 by %c254_i32_126 dim 1 : vector<32x256xf32>, i32 -> vector<32x256xf32>
    %c14_127 = arith.constant 14 : index
    %c0_128 = arith.constant 0 : index
    %204 = vector.load %arg2[%c14_127, %c0_128] : memref<25x256xf32, #tpu.memory_space<vmem>>, vector<1x256xf32>
    %205 = vector.broadcast %204 : vector<1x256xf32> to vector<32x256xf32>
    %206 = arith.mulf %203, %205 : vector<32x256xf32>
    %c448 = arith.constant 448 : index
    %c0_129 = arith.constant 0 : index
    %207 = vector.load %arg12[%c448, %c0_129] : memref<800x256xf32, #tpu.memory_space<vmem>>, vector<32x256xf32>
    tpu.vector_store %arg12[%c448, %c0_129], %206 {strides = array<i32>} : memref<800x256xf32, #tpu.memory_space<vmem>>, vector<32x256xf32>,
    %c242_i32_130 = arith.constant 242 : i32
    %208 = tpu.dynamic_rotate %133 by %c242_i32_130 dim 1 : vector<32x256xf32>, i32 -> vector<32x256xf32>
    %c15_131 = arith.constant 15 : index
    %c0_132 = arith.constant 0 : index
    %209 = vector.load %arg2[%c15_131, %c0_132] : memref<25x256xf32, #tpu.memory_space<vmem>>, vector<1x256xf32>
    %210 = vector.broadcast %209 : vector<1x256xf32> to vector<32x256xf32>
    %211 = arith.mulf %208, %210 : vector<32x256xf32>
    %c480 = arith.constant 480 : index
    %c0_133 = arith.constant 0 : index
    %212 = vector.load %arg12[%c480, %c0_133] : memref<800x256xf32, #tpu.memory_space<vmem>>, vector<32x256xf32>
    tpu.vector_store %arg12[%c480, %c0_133], %211 {strides = array<i32>} : memref<800x256xf32, #tpu.memory_space<vmem>>, vector<32x256xf32>,
    %c241_i32_134 = arith.constant 241 : i32
    %213 = tpu.dynamic_rotate %133 by %c241_i32_134 dim 1 : vector<32x256xf32>, i32 -> vector<32x256xf32>
    %c16_135 = arith.constant 16 : index
    %c0_136 = arith.constant 0 : index
    %214 = vector.load %arg2[%c16_135, %c0_136] : memref<25x256xf32, #tpu.memory_space<vmem>>, vector<1x256xf32>
    %215 = vector.broadcast %214 : vector<1x256xf32> to vector<32x256xf32>
    %216 = arith.mulf %213, %215 : vector<32x256xf32>
    %c512 = arith.constant 512 : index
    %c0_137 = arith.constant 0 : index
    %217 = vector.load %arg12[%c512, %c0_137] : memref<800x256xf32, #tpu.memory_space<vmem>>, vector<32x256xf32>
    tpu.vector_store %arg12[%c512, %c0_137], %216 {strides = array<i32>} : memref<800x256xf32, #tpu.memory_space<vmem>>, vector<32x256xf32>,
    %c240_i32_138 = arith.constant 240 : i32
    %218 = tpu.dynamic_rotate %133 by %c240_i32_138 dim 1 : vector<32x256xf32>, i32 -> vector<32x256xf32>
    %c17_139 = arith.constant 17 : index
    %c0_140 = arith.constant 0 : index
    %219 = vector.load %arg2[%c17_139, %c0_140] : memref<25x256xf32, #tpu.memory_space<vmem>>, vector<1x256xf32>
    %220 = vector.broadcast %219 : vector<1x256xf32> to vector<32x256xf32>
    %221 = arith.mulf %218, %220 : vector<32x256xf32>
    %c544 = arith.constant 544 : index
    %c0_141 = arith.constant 0 : index
    %222 = vector.load %arg12[%c544, %c0_141] : memref<800x256xf32, #tpu.memory_space<vmem>>, vector<32x256xf32>
    tpu.vector_store %arg12[%c544, %c0_141], %221 {strides = array<i32>} : memref<800x256xf32, #tpu.memory_space<vmem>>, vector<32x256xf32>,
    %c239_i32_142 = arith.constant 239 : i32
    %223 = tpu.dynamic_rotate %133 by %c239_i32_142 dim 1 : vector<32x256xf32>, i32 -> vector<32x256xf32>
    %c18_143 = arith.constant 18 : index
    %c0_144 = arith.constant 0 : index
    %224 = vector.load %arg2[%c18_143, %c0_144] : memref<25x256xf32, #tpu.memory_space<vmem>>, vector<1x256xf32>
    %225 = vector.broadcast %224 : vector<1x256xf32> to vector<32x256xf32>
    %226 = arith.mulf %223, %225 : vector<32x256xf32>
    %c576 = arith.constant 576 : index
    %c0_145 = arith.constant 0 : index
    %227 = vector.load %arg12[%c576, %c0_145] : memref<800x256xf32, #tpu.memory_space<vmem>>, vector<32x256xf32>
    tpu.vector_store %arg12[%c576, %c0_145], %226 {strides = array<i32>} : memref<800x256xf32, #tpu.memory_space<vmem>>, vector<32x256xf32>,
    %c238_i32_146 = arith.constant 238 : i32
    %228 = tpu.dynamic_rotate %133 by %c238_i32_146 dim 1 : vector<32x256xf32>, i32 -> vector<32x256xf32>
    %c19_147 = arith.constant 19 : index
    %c0_148 = arith.constant 0 : index
    %229 = vector.load %arg2[%c19_147, %c0_148] : memref<25x256xf32, #tpu.memory_space<vmem>>, vector<1x256xf32>
    %230 = vector.broadcast %229 : vector<1x256xf32> to vector<32x256xf32>
    %231 = arith.mulf %228, %230 : vector<32x256xf32>
    %c608 = arith.constant 608 : index
    %c0_149 = arith.constant 0 : index
    %232 = vector.load %arg12[%c608, %c0_149] : memref<800x256xf32, #tpu.memory_space<vmem>>, vector<32x256xf32>
    tpu.vector_store %arg12[%c608, %c0_149], %231 {strides = array<i32>} : memref<800x256xf32, #tpu.memory_space<vmem>>, vector<32x256xf32>,
    %c226_i32_150 = arith.constant 226 : i32
    %233 = tpu.dynamic_rotate %133 by %c226_i32_150 dim 1 : vector<32x256xf32>, i32 -> vector<32x256xf32>
    %c20_151 = arith.constant 20 : index
    %c0_152 = arith.constant 0 : index
    %234 = vector.load %arg2[%c20_151, %c0_152] : memref<25x256xf32, #tpu.memory_space<vmem>>, vector<1x256xf32>
    %235 = vector.broadcast %234 : vector<1x256xf32> to vector<32x256xf32>
    %236 = arith.mulf %233, %235 : vector<32x256xf32>
    %c640 = arith.constant 640 : index
    %c0_153 = arith.constant 0 : index
    %237 = vector.load %arg12[%c640, %c0_153] : memref<800x256xf32, #tpu.memory_space<vmem>>, vector<32x256xf32>
    tpu.vector_store %arg12[%c640, %c0_153], %236 {strides = array<i32>} : memref<800x256xf32, #tpu.memory_space<vmem>>, vector<32x256xf32>,
    %c225_i32_154 = arith.constant 225 : i32
    %238 = tpu.dynamic_rotate %133 by %c225_i32_154 dim 1 : vector<32x256xf32>, i32 -> vector<32x256xf32>
    %c21_155 = arith.constant 21 : index
    %c0_156 = arith.constant 0 : index
    %239 = vector.load %arg2[%c21_155, %c0_156] : memref<25x256xf32, #tpu.memory_space<vmem>>, vector<1x256xf32>
    %240 = vector.broadcast %239 : vector<1x256xf32> to vector<32x256xf32>
    %241 = arith.mulf %238, %240 : vector<32x256xf32>
    %c672 = arith.constant 672 : index
    %c0_157 = arith.constant 0 : index
    %242 = vector.load %arg12[%c672, %c0_157] : memref<800x256xf32, #tpu.memory_space<vmem>>, vector<32x256xf32>
    tpu.vector_store %arg12[%c672, %c0_157], %241 {strides = array<i32>} : memref<800x256xf32, #tpu.memory_space<vmem>>, vector<32x256xf32>,
    %c224_i32_158 = arith.constant 224 : i32
    %243 = tpu.dynamic_rotate %133 by %c224_i32_158 dim 1 : vector<32x256xf32>, i32 -> vector<32x256xf32>
    %c22_159 = arith.constant 22 : index
    %c0_160 = arith.constant 0 : index
    %244 = vector.load %arg2[%c22_159, %c0_160] : memref<25x256xf32, #tpu.memory_space<vmem>>, vector<1x256xf32>
    %245 = vector.broadcast %244 : vector<1x256xf32> to vector<32x256xf32>
    %246 = arith.mulf %243, %245 : vector<32x256xf32>
    %c704 = arith.constant 704 : index
    %c0_161 = arith.constant 0 : index
    %247 = vector.load %arg12[%c704, %c0_161] : memref<800x256xf32, #tpu.memory_space<vmem>>, vector<32x256xf32>
    tpu.vector_store %arg12[%c704, %c0_161], %246 {strides = array<i32>} : memref<800x256xf32, #tpu.memory_space<vmem>>, vector<32x256xf32>,
    %c223_i32_162 = arith.constant 223 : i32
    %248 = tpu.dynamic_rotate %133 by %c223_i32_162 dim 1 : vector<32x256xf32>, i32 -> vector<32x256xf32>
    %c23_163 = arith.constant 23 : index
    %c0_164 = arith.constant 0 : index
    %249 = vector.load %arg2[%c23_163, %c0_164] : memref<25x256xf32, #tpu.memory_space<vmem>>, vector<1x256xf32>
    %250 = vector.broadcast %249 : vector<1x256xf32> to vector<32x256xf32>
    %251 = arith.mulf %248, %250 : vector<32x256xf32>
    %c736 = arith.constant 736 : index
    %c0_165 = arith.constant 0 : index
    %252 = vector.load %arg12[%c736, %c0_165] : memref<800x256xf32, #tpu.memory_space<vmem>>, vector<32x256xf32>
    tpu.vector_store %arg12[%c736, %c0_165], %251 {strides = array<i32>} : memref<800x256xf32, #tpu.memory_space<vmem>>, vector<32x256xf32>,
    %c222_i32_166 = arith.constant 222 : i32
    %253 = tpu.dynamic_rotate %133 by %c222_i32_166 dim 1 : vector<32x256xf32>, i32 -> vector<32x256xf32>
    %c24_167 = arith.constant 24 : index
    %c0_168 = arith.constant 0 : index
    %254 = vector.load %arg2[%c24_167, %c0_168] : memref<25x256xf32, #tpu.memory_space<vmem>>, vector<1x256xf32>
    %255 = vector.broadcast %254 : vector<1x256xf32> to vector<32x256xf32>
    %256 = arith.mulf %253, %255 : vector<32x256xf32>
    %c768 = arith.constant 768 : index
    %c0_169 = arith.constant 0 : index
    %257 = vector.load %arg12[%c768, %c0_169] : memref<800x256xf32, #tpu.memory_space<vmem>>, vector<32x256xf32>
    tpu.vector_store %arg12[%c768, %c0_169], %256 {strides = array<i32>} : memref<800x256xf32, #tpu.memory_space<vmem>>, vector<32x256xf32>,
    %c0_170 = arith.constant 0 : index
    %c0_171 = arith.constant 0 : index
    %258 = vector.load %arg5[%c0_170, %c0_171] : memref<32x800xf32, #tpu.memory_space<vmem>>, vector<32x800xf32>
    %c0_172 = arith.constant 0 : index
    %c0_173 = arith.constant 0 : index
    %259 = vector.load %arg12[%c0_172, %c0_173] : memref<800x256xf32, #tpu.memory_space<vmem>>, vector<800x256xf32>
    %cst_174 = arith.constant dense<0.000000e+00> : vector<32x256xf32>
    %260 = tpu.matmul %258, %259, %cst_174 {dimension_numbers = #tpu.dot_dimension_numbers<[1], [0], [0], [1], [0, 0, 1, 1], [], []>} : vector<32x800xf32>, vector<800x256xf32>, vector<32x256xf32> -> vector<32x256xf32>
    %c0_175 = arith.constant 0 : index
    %c0_176 = arith.constant 0 : index
    %261 = vector.load %arg6[%c0_175, %c0_176] : memref<32x1xf32, #tpu.memory_space<vmem>>, vector<32x1xf32>
    %262 = vector.broadcast %261 : vector<32x1xf32> to vector<32x256xf32>
    %263 = arith.addf %260, %262 : vector<32x256xf32>
    %cst_177 = arith.constant 0.000000e+00 : f32
    %264 = vector.broadcast %cst_177 : f32 to vector<32x256xf32>
    %265 = arith.maximumf %263, %264 : vector<32x256xf32>
    %c34_i32_178 = arith.constant 34 : i32
    %266 = tpu.dynamic_rotate %265 by %c34_i32_178 dim 1 : vector<32x256xf32>, i32 -> vector<32x256xf32>
    %c0_179 = arith.constant 0 : index
    %c0_180 = arith.constant 0 : index
    %267 = vector.load %arg2[%c0_179, %c0_180] : memref<25x256xf32, #tpu.memory_space<vmem>>, vector<1x256xf32>
    %268 = vector.broadcast %267 : vector<1x256xf32> to vector<32x256xf32>
    %269 = arith.mulf %266, %268 : vector<32x256xf32>
    %c0_181 = arith.constant 0 : index
    %c0_182 = arith.constant 0 : index
    %270 = vector.load %arg12[%c0_181, %c0_182] : memref<800x256xf32, #tpu.memory_space<vmem>>, vector<32x256xf32>
    tpu.vector_store %arg12[%c0_181, %c0_182], %269 {strides = array<i32>} : memref<800x256xf32, #tpu.memory_space<vmem>>, vector<32x256xf32>,
    %c33_i32_183 = arith.constant 33 : i32
    %271 = tpu.dynamic_rotate %265 by %c33_i32_183 dim 1 : vector<32x256xf32>, i32 -> vector<32x256xf32>
    %c1_184 = arith.constant 1 : index
    %c0_185 = arith.constant 0 : index
    %272 = vector.load %arg2[%c1_184, %c0_185] : memref<25x256xf32, #tpu.memory_space<vmem>>, vector<1x256xf32>
    %273 = vector.broadcast %272 : vector<1x256xf32> to vector<32x256xf32>
    %274 = arith.mulf %271, %273 : vector<32x256xf32>
    %c32_186 = arith.constant 32 : index
    %c0_187 = arith.constant 0 : index
    %275 = vector.load %arg12[%c32_186, %c0_187] : memref<800x256xf32, #tpu.memory_space<vmem>>, vector<32x256xf32>
    tpu.vector_store %arg12[%c32_186, %c0_187], %274 {strides = array<i32>} : memref<800x256xf32, #tpu.memory_space<vmem>>, vector<32x256xf32>,
    %c32_i32_188 = arith.constant 32 : i32
    %276 = tpu.dynamic_rotate %265 by %c32_i32_188 dim 1 : vector<32x256xf32>, i32 -> vector<32x256xf32>
    %c2_189 = arith.constant 2 : index
    %c0_190 = arith.constant 0 : index
    %277 = vector.load %arg2[%c2_189, %c0_190] : memref<25x256xf32, #tpu.memory_space<vmem>>, vector<1x256xf32>
    %278 = vector.broadcast %277 : vector<1x256xf32> to vector<32x256xf32>
    %279 = arith.mulf %276, %278 : vector<32x256xf32>
    %c64_191 = arith.constant 64 : index
    %c0_192 = arith.constant 0 : index
    %280 = vector.load %arg12[%c64_191, %c0_192] : memref<800x256xf32, #tpu.memory_space<vmem>>, vector<32x256xf32>
    tpu.vector_store %arg12[%c64_191, %c0_192], %279 {strides = array<i32>} : memref<800x256xf32, #tpu.memory_space<vmem>>, vector<32x256xf32>,
    %c31_i32_193 = arith.constant 31 : i32
    %281 = tpu.dynamic_rotate %265 by %c31_i32_193 dim 1 : vector<32x256xf32>, i32 -> vector<32x256xf32>
    %c3_194 = arith.constant 3 : index
    %c0_195 = arith.constant 0 : index
    %282 = vector.load %arg2[%c3_194, %c0_195] : memref<25x256xf32, #tpu.memory_space<vmem>>, vector<1x256xf32>
    %283 = vector.broadcast %282 : vector<1x256xf32> to vector<32x256xf32>
    %284 = arith.mulf %281, %283 : vector<32x256xf32>
    %c96_196 = arith.constant 96 : index
    %c0_197 = arith.constant 0 : index
    %285 = vector.load %arg12[%c96_196, %c0_197] : memref<800x256xf32, #tpu.memory_space<vmem>>, vector<32x256xf32>
    tpu.vector_store %arg12[%c96_196, %c0_197], %284 {strides = array<i32>} : memref<800x256xf32, #tpu.memory_space<vmem>>, vector<32x256xf32>,
    %c30_i32_198 = arith.constant 30 : i32
    %286 = tpu.dynamic_rotate %265 by %c30_i32_198 dim 1 : vector<32x256xf32>, i32 -> vector<32x256xf32>
    %c4_199 = arith.constant 4 : index
    %c0_200 = arith.constant 0 : index
    %287 = vector.load %arg2[%c4_199, %c0_200] : memref<25x256xf32, #tpu.memory_space<vmem>>, vector<1x256xf32>
    %288 = vector.broadcast %287 : vector<1x256xf32> to vector<32x256xf32>
    %289 = arith.mulf %286, %288 : vector<32x256xf32>
    %c128_201 = arith.constant 128 : index
    %c0_202 = arith.constant 0 : index
    %290 = vector.load %arg12[%c128_201, %c0_202] : memref<800x256xf32, #tpu.memory_space<vmem>>, vector<32x256xf32>
    tpu.vector_store %arg12[%c128_201, %c0_202], %289 {strides = array<i32>} : memref<800x256xf32, #tpu.memory_space<vmem>>, vector<32x256xf32>,
    %c18_i32_203 = arith.constant 18 : i32
    %291 = tpu.dynamic_rotate %265 by %c18_i32_203 dim 1 : vector<32x256xf32>, i32 -> vector<32x256xf32>
    %c5_204 = arith.constant 5 : index
    %c0_205 = arith.constant 0 : index
    %292 = vector.load %arg2[%c5_204, %c0_205] : memref<25x256xf32, #tpu.memory_space<vmem>>, vector<1x256xf32>
    %293 = vector.broadcast %292 : vector<1x256xf32> to vector<32x256xf32>
    %294 = arith.mulf %291, %293 : vector<32x256xf32>
    %c160_206 = arith.constant 160 : index
    %c0_207 = arith.constant 0 : index
    %295 = vector.load %arg12[%c160_206, %c0_207] : memref<800x256xf32, #tpu.memory_space<vmem>>, vector<32x256xf32>
    tpu.vector_store %arg12[%c160_206, %c0_207], %294 {strides = array<i32>} : memref<800x256xf32, #tpu.memory_space<vmem>>, vector<32x256xf32>,
    %c17_i32_208 = arith.constant 17 : i32
    %296 = tpu.dynamic_rotate %265 by %c17_i32_208 dim 1 : vector<32x256xf32>, i32 -> vector<32x256xf32>
    %c6_209 = arith.constant 6 : index
    %c0_210 = arith.constant 0 : index
    %297 = vector.load %arg2[%c6_209, %c0_210] : memref<25x256xf32, #tpu.memory_space<vmem>>, vector<1x256xf32>
    %298 = vector.broadcast %297 : vector<1x256xf32> to vector<32x256xf32>
    %299 = arith.mulf %296, %298 : vector<32x256xf32>
    %c192_211 = arith.constant 192 : index
    %c0_212 = arith.constant 0 : index
    %300 = vector.load %arg12[%c192_211, %c0_212] : memref<800x256xf32, #tpu.memory_space<vmem>>, vector<32x256xf32>
    tpu.vector_store %arg12[%c192_211, %c0_212], %299 {strides = array<i32>} : memref<800x256xf32, #tpu.memory_space<vmem>>, vector<32x256xf32>,
    %c16_i32_213 = arith.constant 16 : i32
    %301 = tpu.dynamic_rotate %265 by %c16_i32_213 dim 1 : vector<32x256xf32>, i32 -> vector<32x256xf32>
    %c7_214 = arith.constant 7 : index
    %c0_215 = arith.constant 0 : index
    %302 = vector.load %arg2[%c7_214, %c0_215] : memref<25x256xf32, #tpu.memory_space<vmem>>, vector<1x256xf32>
    %303 = vector.broadcast %302 : vector<1x256xf32> to vector<32x256xf32>
    %304 = arith.mulf %301, %303 : vector<32x256xf32>
    %c224_216 = arith.constant 224 : index
    %c0_217 = arith.constant 0 : index
    %305 = vector.load %arg12[%c224_216, %c0_217] : memref<800x256xf32, #tpu.memory_space<vmem>>, vector<32x256xf32>
    tpu.vector_store %arg12[%c224_216, %c0_217], %304 {strides = array<i32>} : memref<800x256xf32, #tpu.memory_space<vmem>>, vector<32x256xf32>,
    %c15_i32_218 = arith.constant 15 : i32
    %306 = tpu.dynamic_rotate %265 by %c15_i32_218 dim 1 : vector<32x256xf32>, i32 -> vector<32x256xf32>
    %c8_219 = arith.constant 8 : index
    %c0_220 = arith.constant 0 : index
    %307 = vector.load %arg2[%c8_219, %c0_220] : memref<25x256xf32, #tpu.memory_space<vmem>>, vector<1x256xf32>
    %308 = vector.broadcast %307 : vector<1x256xf32> to vector<32x256xf32>
    %309 = arith.mulf %306, %308 : vector<32x256xf32>
    %c256_221 = arith.constant 256 : index
    %c0_222 = arith.constant 0 : index
    %310 = vector.load %arg12[%c256_221, %c0_222] : memref<800x256xf32, #tpu.memory_space<vmem>>, vector<32x256xf32>
    tpu.vector_store %arg12[%c256_221, %c0_222], %309 {strides = array<i32>} : memref<800x256xf32, #tpu.memory_space<vmem>>, vector<32x256xf32>,
    %c14_i32_223 = arith.constant 14 : i32
    %311 = tpu.dynamic_rotate %265 by %c14_i32_223 dim 1 : vector<32x256xf32>, i32 -> vector<32x256xf32>
    %c9_224 = arith.constant 9 : index
    %c0_225 = arith.constant 0 : index
    %312 = vector.load %arg2[%c9_224, %c0_225] : memref<25x256xf32, #tpu.memory_space<vmem>>, vector<1x256xf32>
    %313 = vector.broadcast %312 : vector<1x256xf32> to vector<32x256xf32>
    %314 = arith.mulf %311, %313 : vector<32x256xf32>
    %c288_226 = arith.constant 288 : index
    %c0_227 = arith.constant 0 : index
    %315 = vector.load %arg12[%c288_226, %c0_227] : memref<800x256xf32, #tpu.memory_space<vmem>>, vector<32x256xf32>
    tpu.vector_store %arg12[%c288_226, %c0_227], %314 {strides = array<i32>} : memref<800x256xf32, #tpu.memory_space<vmem>>, vector<32x256xf32>,
    %c2_i32_228 = arith.constant 2 : i32
    %316 = tpu.dynamic_rotate %265 by %c2_i32_228 dim 1 : vector<32x256xf32>, i32 -> vector<32x256xf32>
    %c10_229 = arith.constant 10 : index
    %c0_230 = arith.constant 0 : index
    %317 = vector.load %arg2[%c10_229, %c0_230] : memref<25x256xf32, #tpu.memory_space<vmem>>, vector<1x256xf32>
    %318 = vector.broadcast %317 : vector<1x256xf32> to vector<32x256xf32>
    %319 = arith.mulf %316, %318 : vector<32x256xf32>
    %c320_231 = arith.constant 320 : index
    %c0_232 = arith.constant 0 : index
    %320 = vector.load %arg12[%c320_231, %c0_232] : memref<800x256xf32, #tpu.memory_space<vmem>>, vector<32x256xf32>
    tpu.vector_store %arg12[%c320_231, %c0_232], %319 {strides = array<i32>} : memref<800x256xf32, #tpu.memory_space<vmem>>, vector<32x256xf32>,
    %c1_i32_233 = arith.constant 1 : i32
    %321 = tpu.dynamic_rotate %265 by %c1_i32_233 dim 1 : vector<32x256xf32>, i32 -> vector<32x256xf32>
    %c11_234 = arith.constant 11 : index
    %c0_235 = arith.constant 0 : index
    %322 = vector.load %arg2[%c11_234, %c0_235] : memref<25x256xf32, #tpu.memory_space<vmem>>, vector<1x256xf32>
    %323 = vector.broadcast %322 : vector<1x256xf32> to vector<32x256xf32>
    %324 = arith.mulf %321, %323 : vector<32x256xf32>
    %c352_236 = arith.constant 352 : index
    %c0_237 = arith.constant 0 : index
    %325 = vector.load %arg12[%c352_236, %c0_237] : memref<800x256xf32, #tpu.memory_space<vmem>>, vector<32x256xf32>
    tpu.vector_store %arg12[%c352_236, %c0_237], %324 {strides = array<i32>} : memref<800x256xf32, #tpu.memory_space<vmem>>, vector<32x256xf32>,
    %c12_238 = arith.constant 12 : index
    %c0_239 = arith.constant 0 : index
    %326 = vector.load %arg2[%c12_238, %c0_239] : memref<25x256xf32, #tpu.memory_space<vmem>>, vector<1x256xf32>
    %327 = vector.broadcast %326 : vector<1x256xf32> to vector<32x256xf32>
    %328 = arith.mulf %265, %327 : vector<32x256xf32>
    %c384_240 = arith.constant 384 : index
    %c0_241 = arith.constant 0 : index
    %329 = vector.load %arg12[%c384_240, %c0_241] : memref<800x256xf32, #tpu.memory_space<vmem>>, vector<32x256xf32>
    tpu.vector_store %arg12[%c384_240, %c0_241], %328 {strides = array<i32>} : memref<800x256xf32, #tpu.memory_space<vmem>>, vector<32x256xf32>,
    %c255_i32_242 = arith.constant 255 : i32
    %330 = tpu.dynamic_rotate %265 by %c255_i32_242 dim 1 : vector<32x256xf32>, i32 -> vector<32x256xf32>
    %c13_243 = arith.constant 13 : index
    %c0_244 = arith.constant 0 : index
    %331 = vector.load %arg2[%c13_243, %c0_244] : memref<25x256xf32, #tpu.memory_space<vmem>>, vector<1x256xf32>
    %332 = vector.broadcast %331 : vector<1x256xf32> to vector<32x256xf32>
    %333 = arith.mulf %330, %332 : vector<32x256xf32>
    %c416_245 = arith.constant 416 : index
    %c0_246 = arith.constant 0 : index
    %334 = vector.load %arg12[%c416_245, %c0_246] : memref<800x256xf32, #tpu.memory_space<vmem>>, vector<32x256xf32>
    tpu.vector_store %arg12[%c416_245, %c0_246], %333 {strides = array<i32>} : memref<800x256xf32, #tpu.memory_space<vmem>>, vector<32x256xf32>,
    %c254_i32_247 = arith.constant 254 : i32
    %335 = tpu.dynamic_rotate %265 by %c254_i32_247 dim 1 : vector<32x256xf32>, i32 -> vector<32x256xf32>
    %c14_248 = arith.constant 14 : index
    %c0_249 = arith.constant 0 : index
    %336 = vector.load %arg2[%c14_248, %c0_249] : memref<25x256xf32, #tpu.memory_space<vmem>>, vector<1x256xf32>
    %337 = vector.broadcast %336 : vector<1x256xf32> to vector<32x256xf32>
    %338 = arith.mulf %335, %337 : vector<32x256xf32>
    %c448_250 = arith.constant 448 : index
    %c0_251 = arith.constant 0 : index
    %339 = vector.load %arg12[%c448_250, %c0_251] : memref<800x256xf32, #tpu.memory_space<vmem>>, vector<32x256xf32>
    tpu.vector_store %arg12[%c448_250, %c0_251], %338 {strides = array<i32>} : memref<800x256xf32, #tpu.memory_space<vmem>>, vector<32x256xf32>,
    %c242_i32_252 = arith.constant 242 : i32
    %340 = tpu.dynamic_rotate %265 by %c242_i32_252 dim 1 : vector<32x256xf32>, i32 -> vector<32x256xf32>
    %c15_253 = arith.constant 15 : index
    %c0_254 = arith.constant 0 : index
    %341 = vector.load %arg2[%c15_253, %c0_254] : memref<25x256xf32, #tpu.memory_space<vmem>>, vector<1x256xf32>
    %342 = vector.broadcast %341 : vector<1x256xf32> to vector<32x256xf32>
    %343 = arith.mulf %340, %342 : vector<32x256xf32>
    %c480_255 = arith.constant 480 : index
    %c0_256 = arith.constant 0 : index
    %344 = vector.load %arg12[%c480_255, %c0_256] : memref<800x256xf32, #tpu.memory_space<vmem>>, vector<32x256xf32>
    tpu.vector_store %arg12[%c480_255, %c0_256], %343 {strides = array<i32>} : memref<800x256xf32, #tpu.memory_space<vmem>>, vector<32x256xf32>,
    %c241_i32_257 = arith.constant 241 : i32
    %345 = tpu.dynamic_rotate %265 by %c241_i32_257 dim 1 : vector<32x256xf32>, i32 -> vector<32x256xf32>
    %c16_258 = arith.constant 16 : index
    %c0_259 = arith.constant 0 : index
    %346 = vector.load %arg2[%c16_258, %c0_259] : memref<25x256xf32, #tpu.memory_space<vmem>>, vector<1x256xf32>
    %347 = vector.broadcast %346 : vector<1x256xf32> to vector<32x256xf32>
    %348 = arith.mulf %345, %347 : vector<32x256xf32>
    %c512_260 = arith.constant 512 : index
    %c0_261 = arith.constant 0 : index
    %349 = vector.load %arg12[%c512_260, %c0_261] : memref<800x256xf32, #tpu.memory_space<vmem>>, vector<32x256xf32>
    tpu.vector_store %arg12[%c512_260, %c0_261], %348 {strides = array<i32>} : memref<800x256xf32, #tpu.memory_space<vmem>>, vector<32x256xf32>,
    %c240_i32_262 = arith.constant 240 : i32
    %350 = tpu.dynamic_rotate %265 by %c240_i32_262 dim 1 : vector<32x256xf32>, i32 -> vector<32x256xf32>
    %c17_263 = arith.constant 17 : index
    %c0_264 = arith.constant 0 : index
    %351 = vector.load %arg2[%c17_263, %c0_264] : memref<25x256xf32, #tpu.memory_space<vmem>>, vector<1x256xf32>
    %352 = vector.broadcast %351 : vector<1x256xf32> to vector<32x256xf32>
    %353 = arith.mulf %350, %352 : vector<32x256xf32>
    %c544_265 = arith.constant 544 : index
    %c0_266 = arith.constant 0 : index
    %354 = vector.load %arg12[%c544_265, %c0_266] : memref<800x256xf32, #tpu.memory_space<vmem>>, vector<32x256xf32>
    tpu.vector_store %arg12[%c544_265, %c0_266], %353 {strides = array<i32>} : memref<800x256xf32, #tpu.memory_space<vmem>>, vector<32x256xf32>,
    %c239_i32_267 = arith.constant 239 : i32
    %355 = tpu.dynamic_rotate %265 by %c239_i32_267 dim 1 : vector<32x256xf32>, i32 -> vector<32x256xf32>
    %c18_268 = arith.constant 18 : index
    %c0_269 = arith.constant 0 : index
    %356 = vector.load %arg2[%c18_268, %c0_269] : memref<25x256xf32, #tpu.memory_space<vmem>>, vector<1x256xf32>
    %357 = vector.broadcast %356 : vector<1x256xf32> to vector<32x256xf32>
    %358 = arith.mulf %355, %357 : vector<32x256xf32>
    %c576_270 = arith.constant 576 : index
    %c0_271 = arith.constant 0 : index
    %359 = vector.load %arg12[%c576_270, %c0_271] : memref<800x256xf32, #tpu.memory_space<vmem>>, vector<32x256xf32>
    tpu.vector_store %arg12[%c576_270, %c0_271], %358 {strides = array<i32>} : memref<800x256xf32, #tpu.memory_space<vmem>>, vector<32x256xf32>,
    %c238_i32_272 = arith.constant 238 : i32
    %360 = tpu.dynamic_rotate %265 by %c238_i32_272 dim 1 : vector<32x256xf32>, i32 -> vector<32x256xf32>
    %c19_273 = arith.constant 19 : index
    %c0_274 = arith.constant 0 : index
    %361 = vector.load %arg2[%c19_273, %c0_274] : memref<25x256xf32, #tpu.memory_space<vmem>>, vector<1x256xf32>
    %362 = vector.broadcast %361 : vector<1x256xf32> to vector<32x256xf32>
    %363 = arith.mulf %360, %362 : vector<32x256xf32>
    %c608_275 = arith.constant 608 : index
    %c0_276 = arith.constant 0 : index
    %364 = vector.load %arg12[%c608_275, %c0_276] : memref<800x256xf32, #tpu.memory_space<vmem>>, vector<32x256xf32>
    tpu.vector_store %arg12[%c608_275, %c0_276], %363 {strides = array<i32>} : memref<800x256xf32, #tpu.memory_space<vmem>>, vector<32x256xf32>,
    %c226_i32_277 = arith.constant 226 : i32
    %365 = tpu.dynamic_rotate %265 by %c226_i32_277 dim 1 : vector<32x256xf32>, i32 -> vector<32x256xf32>
    %c20_278 = arith.constant 20 : index
    %c0_279 = arith.constant 0 : index
    %366 = vector.load %arg2[%c20_278, %c0_279] : memref<25x256xf32, #tpu.memory_space<vmem>>, vector<1x256xf32>
    %367 = vector.broadcast %366 : vector<1x256xf32> to vector<32x256xf32>
    %368 = arith.mulf %365, %367 : vector<32x256xf32>
    %c640_280 = arith.constant 640 : index
    %c0_281 = arith.constant 0 : index
    %369 = vector.load %arg12[%c640_280, %c0_281] : memref<800x256xf32, #tpu.memory_space<vmem>>, vector<32x256xf32>
    tpu.vector_store %arg12[%c640_280, %c0_281], %368 {strides = array<i32>} : memref<800x256xf32, #tpu.memory_space<vmem>>, vector<32x256xf32>,
    %c225_i32_282 = arith.constant 225 : i32
    %370 = tpu.dynamic_rotate %265 by %c225_i32_282 dim 1 : vector<32x256xf32>, i32 -> vector<32x256xf32>
    %c21_283 = arith.constant 21 : index
    %c0_284 = arith.constant 0 : index
    %371 = vector.load %arg2[%c21_283, %c0_284] : memref<25x256xf32, #tpu.memory_space<vmem>>, vector<1x256xf32>
    %372 = vector.broadcast %371 : vector<1x256xf32> to vector<32x256xf32>
    %373 = arith.mulf %370, %372 : vector<32x256xf32>
    %c672_285 = arith.constant 672 : index
    %c0_286 = arith.constant 0 : index
    %374 = vector.load %arg12[%c672_285, %c0_286] : memref<800x256xf32, #tpu.memory_space<vmem>>, vector<32x256xf32>
    tpu.vector_store %arg12[%c672_285, %c0_286], %373 {strides = array<i32>} : memref<800x256xf32, #tpu.memory_space<vmem>>, vector<32x256xf32>,
    %c224_i32_287 = arith.constant 224 : i32
    %375 = tpu.dynamic_rotate %265 by %c224_i32_287 dim 1 : vector<32x256xf32>, i32 -> vector<32x256xf32>
    %c22_288 = arith.constant 22 : index
    %c0_289 = arith.constant 0 : index
    %376 = vector.load %arg2[%c22_288, %c0_289] : memref<25x256xf32, #tpu.memory_space<vmem>>, vector<1x256xf32>
    %377 = vector.broadcast %376 : vector<1x256xf32> to vector<32x256xf32>
    %378 = arith.mulf %375, %377 : vector<32x256xf32>
    %c704_290 = arith.constant 704 : index
    %c0_291 = arith.constant 0 : index
    %379 = vector.load %arg12[%c704_290, %c0_291] : memref<800x256xf32, #tpu.memory_space<vmem>>, vector<32x256xf32>
    tpu.vector_store %arg12[%c704_290, %c0_291], %378 {strides = array<i32>} : memref<800x256xf32, #tpu.memory_space<vmem>>, vector<32x256xf32>,
    %c223_i32_292 = arith.constant 223 : i32
    %380 = tpu.dynamic_rotate %265 by %c223_i32_292 dim 1 : vector<32x256xf32>, i32 -> vector<32x256xf32>
    %c23_293 = arith.constant 23 : index
    %c0_294 = arith.constant 0 : index
    %381 = vector.load %arg2[%c23_293, %c0_294] : memref<25x256xf32, #tpu.memory_space<vmem>>, vector<1x256xf32>
    %382 = vector.broadcast %381 : vector<1x256xf32> to vector<32x256xf32>
    %383 = arith.mulf %380, %382 : vector<32x256xf32>
    %c736_295 = arith.constant 736 : index
    %c0_296 = arith.constant 0 : index
    %384 = vector.load %arg12[%c736_295, %c0_296] : memref<800x256xf32, #tpu.memory_space<vmem>>, vector<32x256xf32>
    tpu.vector_store %arg12[%c736_295, %c0_296], %383 {strides = array<i32>} : memref<800x256xf32, #tpu.memory_space<vmem>>, vector<32x256xf32>,
    %c222_i32_297 = arith.constant 222 : i32
    %385 = tpu.dynamic_rotate %265 by %c222_i32_297 dim 1 : vector<32x256xf32>, i32 -> vector<32x256xf32>
    %c24_298 = arith.constant 24 : index
    %c0_299 = arith.constant 0 : index
    %386 = vector.load %arg2[%c24_298, %c0_299] : memref<25x256xf32, #tpu.memory_space<vmem>>, vector<1x256xf32>
    %387 = vector.broadcast %386 : vector<1x256xf32> to vector<32x256xf32>
    %388 = arith.mulf %385, %387 : vector<32x256xf32>
    %c768_300 = arith.constant 768 : index
    %c0_301 = arith.constant 0 : index
    %389 = vector.load %arg12[%c768_300, %c0_301] : memref<800x256xf32, #tpu.memory_space<vmem>>, vector<32x256xf32>
    tpu.vector_store %arg12[%c768_300, %c0_301], %388 {strides = array<i32>} : memref<800x256xf32, #tpu.memory_space<vmem>>, vector<32x256xf32>,
    %c0_302 = arith.constant 0 : index
    %c0_303 = arith.constant 0 : index
    %390 = vector.load %arg7[%c0_302, %c0_303] : memref<32x800xf32, #tpu.memory_space<vmem>>, vector<32x800xf32>
    %c0_304 = arith.constant 0 : index
    %c0_305 = arith.constant 0 : index
    %391 = vector.load %arg12[%c0_304, %c0_305] : memref<800x256xf32, #tpu.memory_space<vmem>>, vector<800x256xf32>
    %cst_306 = arith.constant dense<0.000000e+00> : vector<32x256xf32>
    %392 = tpu.matmul %390, %391, %cst_306 {dimension_numbers = #tpu.dot_dimension_numbers<[1], [0], [0], [1], [0, 0, 1, 1], [], []>} : vector<32x800xf32>, vector<800x256xf32>, vector<32x256xf32> -> vector<32x256xf32>
    %c0_307 = arith.constant 0 : index
    %c0_308 = arith.constant 0 : index
    %393 = vector.load %arg8[%c0_307, %c0_308] : memref<32x1xf32, #tpu.memory_space<vmem>>, vector<32x1xf32>
    %394 = vector.broadcast %393 : vector<32x1xf32> to vector<32x256xf32>
    %395 = arith.addf %392, %394 : vector<32x256xf32>
    %cst_309 = arith.constant 0.000000e+00 : f32
    %396 = vector.broadcast %cst_309 : f32 to vector<32x256xf32>
    %397 = arith.maximumf %395, %396 : vector<32x256xf32>
    %c34_i32_310 = arith.constant 34 : i32
    %398 = tpu.dynamic_rotate %397 by %c34_i32_310 dim 1 : vector<32x256xf32>, i32 -> vector<32x256xf32>
    %c0_311 = arith.constant 0 : index
    %c0_312 = arith.constant 0 : index
    %399 = vector.load %arg2[%c0_311, %c0_312] : memref<25x256xf32, #tpu.memory_space<vmem>>, vector<1x256xf32>
    %400 = vector.broadcast %399 : vector<1x256xf32> to vector<32x256xf32>
    %401 = arith.mulf %398, %400 : vector<32x256xf32>
    %c0_313 = arith.constant 0 : index
    %c0_314 = arith.constant 0 : index
    %402 = vector.load %arg12[%c0_313, %c0_314] : memref<800x256xf32, #tpu.memory_space<vmem>>, vector<32x256xf32>
    tpu.vector_store %arg12[%c0_313, %c0_314], %401 {strides = array<i32>} : memref<800x256xf32, #tpu.memory_space<vmem>>, vector<32x256xf32>,
    %c33_i32_315 = arith.constant 33 : i32
    %403 = tpu.dynamic_rotate %397 by %c33_i32_315 dim 1 : vector<32x256xf32>, i32 -> vector<32x256xf32>
    %c1_316 = arith.constant 1 : index
    %c0_317 = arith.constant 0 : index
    %404 = vector.load %arg2[%c1_316, %c0_317] : memref<25x256xf32, #tpu.memory_space<vmem>>, vector<1x256xf32>
    %405 = vector.broadcast %404 : vector<1x256xf32> to vector<32x256xf32>
    %406 = arith.mulf %403, %405 : vector<32x256xf32>
    %c32_318 = arith.constant 32 : index
    %c0_319 = arith.constant 0 : index
    %407 = vector.load %arg12[%c32_318, %c0_319] : memref<800x256xf32, #tpu.memory_space<vmem>>, vector<32x256xf32>
    tpu.vector_store %arg12[%c32_318, %c0_319], %406 {strides = array<i32>} : memref<800x256xf32, #tpu.memory_space<vmem>>, vector<32x256xf32>,
    %c32_i32_320 = arith.constant 32 : i32
    %408 = tpu.dynamic_rotate %397 by %c32_i32_320 dim 1 : vector<32x256xf32>, i32 -> vector<32x256xf32>
    %c2_321 = arith.constant 2 : index
    %c0_322 = arith.constant 0 : index
    %409 = vector.load %arg2[%c2_321, %c0_322] : memref<25x256xf32, #tpu.memory_space<vmem>>, vector<1x256xf32>
    %410 = vector.broadcast %409 : vector<1x256xf32> to vector<32x256xf32>
    %411 = arith.mulf %408, %410 : vector<32x256xf32>
    %c64_323 = arith.constant 64 : index
    %c0_324 = arith.constant 0 : index
    %412 = vector.load %arg12[%c64_323, %c0_324] : memref<800x256xf32, #tpu.memory_space<vmem>>, vector<32x256xf32>
    tpu.vector_store %arg12[%c64_323, %c0_324], %411 {strides = array<i32>} : memref<800x256xf32, #tpu.memory_space<vmem>>, vector<32x256xf32>,
    %c31_i32_325 = arith.constant 31 : i32
    %413 = tpu.dynamic_rotate %397 by %c31_i32_325 dim 1 : vector<32x256xf32>, i32 -> vector<32x256xf32>
    %c3_326 = arith.constant 3 : index
    %c0_327 = arith.constant 0 : index
    %414 = vector.load %arg2[%c3_326, %c0_327] : memref<25x256xf32, #tpu.memory_space<vmem>>, vector<1x256xf32>
    %415 = vector.broadcast %414 : vector<1x256xf32> to vector<32x256xf32>
    %416 = arith.mulf %413, %415 : vector<32x256xf32>
    %c96_328 = arith.constant 96 : index
    %c0_329 = arith.constant 0 : index
    %417 = vector.load %arg12[%c96_328, %c0_329] : memref<800x256xf32, #tpu.memory_space<vmem>>, vector<32x256xf32>
    tpu.vector_store %arg12[%c96_328, %c0_329], %416 {strides = array<i32>} : memref<800x256xf32, #tpu.memory_space<vmem>>, vector<32x256xf32>,
    %c30_i32_330 = arith.constant 30 : i32
    %418 = tpu.dynamic_rotate %397 by %c30_i32_330 dim 1 : vector<32x256xf32>, i32 -> vector<32x256xf32>
    %c4_331 = arith.constant 4 : index
    %c0_332 = arith.constant 0 : index
    %419 = vector.load %arg2[%c4_331, %c0_332] : memref<25x256xf32, #tpu.memory_space<vmem>>, vector<1x256xf32>
    %420 = vector.broadcast %419 : vector<1x256xf32> to vector<32x256xf32>
    %421 = arith.mulf %418, %420 : vector<32x256xf32>
    %c128_333 = arith.constant 128 : index
    %c0_334 = arith.constant 0 : index
    %422 = vector.load %arg12[%c128_333, %c0_334] : memref<800x256xf32, #tpu.memory_space<vmem>>, vector<32x256xf32>
    tpu.vector_store %arg12[%c128_333, %c0_334], %421 {strides = array<i32>} : memref<800x256xf32, #tpu.memory_space<vmem>>, vector<32x256xf32>,
    %c18_i32_335 = arith.constant 18 : i32
    %423 = tpu.dynamic_rotate %397 by %c18_i32_335 dim 1 : vector<32x256xf32>, i32 -> vector<32x256xf32>
    %c5_336 = arith.constant 5 : index
    %c0_337 = arith.constant 0 : index
    %424 = vector.load %arg2[%c5_336, %c0_337] : memref<25x256xf32, #tpu.memory_space<vmem>>, vector<1x256xf32>
    %425 = vector.broadcast %424 : vector<1x256xf32> to vector<32x256xf32>
    %426 = arith.mulf %423, %425 : vector<32x256xf32>
    %c160_338 = arith.constant 160 : index
    %c0_339 = arith.constant 0 : index
    %427 = vector.load %arg12[%c160_338, %c0_339] : memref<800x256xf32, #tpu.memory_space<vmem>>, vector<32x256xf32>
    tpu.vector_store %arg12[%c160_338, %c0_339], %426 {strides = array<i32>} : memref<800x256xf32, #tpu.memory_space<vmem>>, vector<32x256xf32>,
    %c17_i32_340 = arith.constant 17 : i32
    %428 = tpu.dynamic_rotate %397 by %c17_i32_340 dim 1 : vector<32x256xf32>, i32 -> vector<32x256xf32>
    %c6_341 = arith.constant 6 : index
    %c0_342 = arith.constant 0 : index
    %429 = vector.load %arg2[%c6_341, %c0_342] : memref<25x256xf32, #tpu.memory_space<vmem>>, vector<1x256xf32>
    %430 = vector.broadcast %429 : vector<1x256xf32> to vector<32x256xf32>
    %431 = arith.mulf %428, %430 : vector<32x256xf32>
    %c192_343 = arith.constant 192 : index
    %c0_344 = arith.constant 0 : index
    %432 = vector.load %arg12[%c192_343, %c0_344] : memref<800x256xf32, #tpu.memory_space<vmem>>, vector<32x256xf32>
    tpu.vector_store %arg12[%c192_343, %c0_344], %431 {strides = array<i32>} : memref<800x256xf32, #tpu.memory_space<vmem>>, vector<32x256xf32>,
    %c16_i32_345 = arith.constant 16 : i32
    %433 = tpu.dynamic_rotate %397 by %c16_i32_345 dim 1 : vector<32x256xf32>, i32 -> vector<32x256xf32>
    %c7_346 = arith.constant 7 : index
    %c0_347 = arith.constant 0 : index
    %434 = vector.load %arg2[%c7_346, %c0_347] : memref<25x256xf32, #tpu.memory_space<vmem>>, vector<1x256xf32>
    %435 = vector.broadcast %434 : vector<1x256xf32> to vector<32x256xf32>
    %436 = arith.mulf %433, %435 : vector<32x256xf32>
    %c224_348 = arith.constant 224 : index
    %c0_349 = arith.constant 0 : index
    %437 = vector.load %arg12[%c224_348, %c0_349] : memref<800x256xf32, #tpu.memory_space<vmem>>, vector<32x256xf32>
    tpu.vector_store %arg12[%c224_348, %c0_349], %436 {strides = array<i32>} : memref<800x256xf32, #tpu.memory_space<vmem>>, vector<32x256xf32>,
    %c15_i32_350 = arith.constant 15 : i32
    %438 = tpu.dynamic_rotate %397 by %c15_i32_350 dim 1 : vector<32x256xf32>, i32 -> vector<32x256xf32>
    %c8_351 = arith.constant 8 : index
    %c0_352 = arith.constant 0 : index
    %439 = vector.load %arg2[%c8_351, %c0_352] : memref<25x256xf32, #tpu.memory_space<vmem>>, vector<1x256xf32>
    %440 = vector.broadcast %439 : vector<1x256xf32> to vector<32x256xf32>
    %441 = arith.mulf %438, %440 : vector<32x256xf32>
    %c256_353 = arith.constant 256 : index
    %c0_354 = arith.constant 0 : index
    %442 = vector.load %arg12[%c256_353, %c0_354] : memref<800x256xf32, #tpu.memory_space<vmem>>, vector<32x256xf32>
    tpu.vector_store %arg12[%c256_353, %c0_354], %441 {strides = array<i32>} : memref<800x256xf32, #tpu.memory_space<vmem>>, vector<32x256xf32>,
    %c14_i32_355 = arith.constant 14 : i32
    %443 = tpu.dynamic_rotate %397 by %c14_i32_355 dim 1 : vector<32x256xf32>, i32 -> vector<32x256xf32>
    %c9_356 = arith.constant 9 : index
    %c0_357 = arith.constant 0 : index
    %444 = vector.load %arg2[%c9_356, %c0_357] : memref<25x256xf32, #tpu.memory_space<vmem>>, vector<1x256xf32>
    %445 = vector.broadcast %444 : vector<1x256xf32> to vector<32x256xf32>
    %446 = arith.mulf %443, %445 : vector<32x256xf32>
    %c288_358 = arith.constant 288 : index
    %c0_359 = arith.constant 0 : index
    %447 = vector.load %arg12[%c288_358, %c0_359] : memref<800x256xf32, #tpu.memory_space<vmem>>, vector<32x256xf32>
    tpu.vector_store %arg12[%c288_358, %c0_359], %446 {strides = array<i32>} : memref<800x256xf32, #tpu.memory_space<vmem>>, vector<32x256xf32>,
    %c2_i32_360 = arith.constant 2 : i32
    %448 = tpu.dynamic_rotate %397 by %c2_i32_360 dim 1 : vector<32x256xf32>, i32 -> vector<32x256xf32>
    %c10_361 = arith.constant 10 : index
    %c0_362 = arith.constant 0 : index
    %449 = vector.load %arg2[%c10_361, %c0_362] : memref<25x256xf32, #tpu.memory_space<vmem>>, vector<1x256xf32>
    %450 = vector.broadcast %449 : vector<1x256xf32> to vector<32x256xf32>
    %451 = arith.mulf %448, %450 : vector<32x256xf32>
    %c320_363 = arith.constant 320 : index
    %c0_364 = arith.constant 0 : index
    %452 = vector.load %arg12[%c320_363, %c0_364] : memref<800x256xf32, #tpu.memory_space<vmem>>, vector<32x256xf32>
    tpu.vector_store %arg12[%c320_363, %c0_364], %451 {strides = array<i32>} : memref<800x256xf32, #tpu.memory_space<vmem>>, vector<32x256xf32>,
    %c1_i32_365 = arith.constant 1 : i32
    %453 = tpu.dynamic_rotate %397 by %c1_i32_365 dim 1 : vector<32x256xf32>, i32 -> vector<32x256xf32>
    %c11_366 = arith.constant 11 : index
    %c0_367 = arith.constant 0 : index
    %454 = vector.load %arg2[%c11_366, %c0_367] : memref<25x256xf32, #tpu.memory_space<vmem>>, vector<1x256xf32>
    %455 = vector.broadcast %454 : vector<1x256xf32> to vector<32x256xf32>
    %456 = arith.mulf %453, %455 : vector<32x256xf32>
    %c352_368 = arith.constant 352 : index
    %c0_369 = arith.constant 0 : index
    %457 = vector.load %arg12[%c352_368, %c0_369] : memref<800x256xf32, #tpu.memory_space<vmem>>, vector<32x256xf32>
    tpu.vector_store %arg12[%c352_368, %c0_369], %456 {strides = array<i32>} : memref<800x256xf32, #tpu.memory_space<vmem>>, vector<32x256xf32>,
    %c12_370 = arith.constant 12 : index
    %c0_371 = arith.constant 0 : index
    %458 = vector.load %arg2[%c12_370, %c0_371] : memref<25x256xf32, #tpu.memory_space<vmem>>, vector<1x256xf32>
    %459 = vector.broadcast %458 : vector<1x256xf32> to vector<32x256xf32>
    %460 = arith.mulf %397, %459 : vector<32x256xf32>
    %c384_372 = arith.constant 384 : index
    %c0_373 = arith.constant 0 : index
    %461 = vector.load %arg12[%c384_372, %c0_373] : memref<800x256xf32, #tpu.memory_space<vmem>>, vector<32x256xf32>
    tpu.vector_store %arg12[%c384_372, %c0_373], %460 {strides = array<i32>} : memref<800x256xf32, #tpu.memory_space<vmem>>, vector<32x256xf32>,
    %c255_i32_374 = arith.constant 255 : i32
    %462 = tpu.dynamic_rotate %397 by %c255_i32_374 dim 1 : vector<32x256xf32>, i32 -> vector<32x256xf32>
    %c13_375 = arith.constant 13 : index
    %c0_376 = arith.constant 0 : index
    %463 = vector.load %arg2[%c13_375, %c0_376] : memref<25x256xf32, #tpu.memory_space<vmem>>, vector<1x256xf32>
    %464 = vector.broadcast %463 : vector<1x256xf32> to vector<32x256xf32>
    %465 = arith.mulf %462, %464 : vector<32x256xf32>
    %c416_377 = arith.constant 416 : index
    %c0_378 = arith.constant 0 : index
    %466 = vector.load %arg12[%c416_377, %c0_378] : memref<800x256xf32, #tpu.memory_space<vmem>>, vector<32x256xf32>
    tpu.vector_store %arg12[%c416_377, %c0_378], %465 {strides = array<i32>} : memref<800x256xf32, #tpu.memory_space<vmem>>, vector<32x256xf32>,
    %c254_i32_379 = arith.constant 254 : i32
    %467 = tpu.dynamic_rotate %397 by %c254_i32_379 dim 1 : vector<32x256xf32>, i32 -> vector<32x256xf32>
    %c14_380 = arith.constant 14 : index
    %c0_381 = arith.constant 0 : index
    %468 = vector.load %arg2[%c14_380, %c0_381] : memref<25x256xf32, #tpu.memory_space<vmem>>, vector<1x256xf32>
    %469 = vector.broadcast %468 : vector<1x256xf32> to vector<32x256xf32>
    %470 = arith.mulf %467, %469 : vector<32x256xf32>
    %c448_382 = arith.constant 448 : index
    %c0_383 = arith.constant 0 : index
    %471 = vector.load %arg12[%c448_382, %c0_383] : memref<800x256xf32, #tpu.memory_space<vmem>>, vector<32x256xf32>
    tpu.vector_store %arg12[%c448_382, %c0_383], %470 {strides = array<i32>} : memref<800x256xf32, #tpu.memory_space<vmem>>, vector<32x256xf32>,
    %c242_i32_384 = arith.constant 242 : i32
    %472 = tpu.dynamic_rotate %397 by %c242_i32_384 dim 1 : vector<32x256xf32>, i32 -> vector<32x256xf32>
    %c15_385 = arith.constant 15 : index
    %c0_386 = arith.constant 0 : index
    %473 = vector.load %arg2[%c15_385, %c0_386] : memref<25x256xf32, #tpu.memory_space<vmem>>, vector<1x256xf32>
    %474 = vector.broadcast %473 : vector<1x256xf32> to vector<32x256xf32>
    %475 = arith.mulf %472, %474 : vector<32x256xf32>
    %c480_387 = arith.constant 480 : index
    %c0_388 = arith.constant 0 : index
    %476 = vector.load %arg12[%c480_387, %c0_388] : memref<800x256xf32, #tpu.memory_space<vmem>>, vector<32x256xf32>
    tpu.vector_store %arg12[%c480_387, %c0_388], %475 {strides = array<i32>} : memref<800x256xf32, #tpu.memory_space<vmem>>, vector<32x256xf32>,
    %c241_i32_389 = arith.constant 241 : i32
    %477 = tpu.dynamic_rotate %397 by %c241_i32_389 dim 1 : vector<32x256xf32>, i32 -> vector<32x256xf32>
    %c16_390 = arith.constant 16 : index
    %c0_391 = arith.constant 0 : index
    %478 = vector.load %arg2[%c16_390, %c0_391] : memref<25x256xf32, #tpu.memory_space<vmem>>, vector<1x256xf32>
    %479 = vector.broadcast %478 : vector<1x256xf32> to vector<32x256xf32>
    %480 = arith.mulf %477, %479 : vector<32x256xf32>
    %c512_392 = arith.constant 512 : index
    %c0_393 = arith.constant 0 : index
    %481 = vector.load %arg12[%c512_392, %c0_393] : memref<800x256xf32, #tpu.memory_space<vmem>>, vector<32x256xf32>
    tpu.vector_store %arg12[%c512_392, %c0_393], %480 {strides = array<i32>} : memref<800x256xf32, #tpu.memory_space<vmem>>, vector<32x256xf32>,
    %c240_i32_394 = arith.constant 240 : i32
    %482 = tpu.dynamic_rotate %397 by %c240_i32_394 dim 1 : vector<32x256xf32>, i32 -> vector<32x256xf32>
    %c17_395 = arith.constant 17 : index
    %c0_396 = arith.constant 0 : index
    %483 = vector.load %arg2[%c17_395, %c0_396] : memref<25x256xf32, #tpu.memory_space<vmem>>, vector<1x256xf32>
    %484 = vector.broadcast %483 : vector<1x256xf32> to vector<32x256xf32>
    %485 = arith.mulf %482, %484 : vector<32x256xf32>
    %c544_397 = arith.constant 544 : index
    %c0_398 = arith.constant 0 : index
    %486 = vector.load %arg12[%c544_397, %c0_398] : memref<800x256xf32, #tpu.memory_space<vmem>>, vector<32x256xf32>
    tpu.vector_store %arg12[%c544_397, %c0_398], %485 {strides = array<i32>} : memref<800x256xf32, #tpu.memory_space<vmem>>, vector<32x256xf32>,
    %c239_i32_399 = arith.constant 239 : i32
    %487 = tpu.dynamic_rotate %397 by %c239_i32_399 dim 1 : vector<32x256xf32>, i32 -> vector<32x256xf32>
    %c18_400 = arith.constant 18 : index
    %c0_401 = arith.constant 0 : index
    %488 = vector.load %arg2[%c18_400, %c0_401] : memref<25x256xf32, #tpu.memory_space<vmem>>, vector<1x256xf32>
    %489 = vector.broadcast %488 : vector<1x256xf32> to vector<32x256xf32>
    %490 = arith.mulf %487, %489 : vector<32x256xf32>
    %c576_402 = arith.constant 576 : index
    %c0_403 = arith.constant 0 : index
    %491 = vector.load %arg12[%c576_402, %c0_403] : memref<800x256xf32, #tpu.memory_space<vmem>>, vector<32x256xf32>
    tpu.vector_store %arg12[%c576_402, %c0_403], %490 {strides = array<i32>} : memref<800x256xf32, #tpu.memory_space<vmem>>, vector<32x256xf32>,
    %c238_i32_404 = arith.constant 238 : i32
    %492 = tpu.dynamic_rotate %397 by %c238_i32_404 dim 1 : vector<32x256xf32>, i32 -> vector<32x256xf32>
    %c19_405 = arith.constant 19 : index
    %c0_406 = arith.constant 0 : index
    %493 = vector.load %arg2[%c19_405, %c0_406] : memref<25x256xf32, #tpu.memory_space<vmem>>, vector<1x256xf32>
    %494 = vector.broadcast %493 : vector<1x256xf32> to vector<32x256xf32>
    %495 = arith.mulf %492, %494 : vector<32x256xf32>
    %c608_407 = arith.constant 608 : index
    %c0_408 = arith.constant 0 : index
    %496 = vector.load %arg12[%c608_407, %c0_408] : memref<800x256xf32, #tpu.memory_space<vmem>>, vector<32x256xf32>
    tpu.vector_store %arg12[%c608_407, %c0_408], %495 {strides = array<i32>} : memref<800x256xf32, #tpu.memory_space<vmem>>, vector<32x256xf32>,
    %c226_i32_409 = arith.constant 226 : i32
    %497 = tpu.dynamic_rotate %397 by %c226_i32_409 dim 1 : vector<32x256xf32>, i32 -> vector<32x256xf32>
    %c20_410 = arith.constant 20 : index
    %c0_411 = arith.constant 0 : index
    %498 = vector.load %arg2[%c20_410, %c0_411] : memref<25x256xf32, #tpu.memory_space<vmem>>, vector<1x256xf32>
    %499 = vector.broadcast %498 : vector<1x256xf32> to vector<32x256xf32>
    %500 = arith.mulf %497, %499 : vector<32x256xf32>
    %c640_412 = arith.constant 640 : index
    %c0_413 = arith.constant 0 : index
    %501 = vector.load %arg12[%c640_412, %c0_413] : memref<800x256xf32, #tpu.memory_space<vmem>>, vector<32x256xf32>
    tpu.vector_store %arg12[%c640_412, %c0_413], %500 {strides = array<i32>} : memref<800x256xf32, #tpu.memory_space<vmem>>, vector<32x256xf32>,
    %c225_i32_414 = arith.constant 225 : i32
    %502 = tpu.dynamic_rotate %397 by %c225_i32_414 dim 1 : vector<32x256xf32>, i32 -> vector<32x256xf32>
    %c21_415 = arith.constant 21 : index
    %c0_416 = arith.constant 0 : index
    %503 = vector.load %arg2[%c21_415, %c0_416] : memref<25x256xf32, #tpu.memory_space<vmem>>, vector<1x256xf32>
    %504 = vector.broadcast %503 : vector<1x256xf32> to vector<32x256xf32>
    %505 = arith.mulf %502, %504 : vector<32x256xf32>
    %c672_417 = arith.constant 672 : index
    %c0_418 = arith.constant 0 : index
    %506 = vector.load %arg12[%c672_417, %c0_418] : memref<800x256xf32, #tpu.memory_space<vmem>>, vector<32x256xf32>
    tpu.vector_store %arg12[%c672_417, %c0_418], %505 {strides = array<i32>} : memref<800x256xf32, #tpu.memory_space<vmem>>, vector<32x256xf32>,
    %c224_i32_419 = arith.constant 224 : i32
    %507 = tpu.dynamic_rotate %397 by %c224_i32_419 dim 1 : vector<32x256xf32>, i32 -> vector<32x256xf32>
    %c22_420 = arith.constant 22 : index
    %c0_421 = arith.constant 0 : index
    %508 = vector.load %arg2[%c22_420, %c0_421] : memref<25x256xf32, #tpu.memory_space<vmem>>, vector<1x256xf32>
    %509 = vector.broadcast %508 : vector<1x256xf32> to vector<32x256xf32>
    %510 = arith.mulf %507, %509 : vector<32x256xf32>
    %c704_422 = arith.constant 704 : index
    %c0_423 = arith.constant 0 : index
    %511 = vector.load %arg12[%c704_422, %c0_423] : memref<800x256xf32, #tpu.memory_space<vmem>>, vector<32x256xf32>
    tpu.vector_store %arg12[%c704_422, %c0_423], %510 {strides = array<i32>} : memref<800x256xf32, #tpu.memory_space<vmem>>, vector<32x256xf32>,
    %c223_i32_424 = arith.constant 223 : i32
    %512 = tpu.dynamic_rotate %397 by %c223_i32_424 dim 1 : vector<32x256xf32>, i32 -> vector<32x256xf32>
    %c23_425 = arith.constant 23 : index
    %c0_426 = arith.constant 0 : index
    %513 = vector.load %arg2[%c23_425, %c0_426] : memref<25x256xf32, #tpu.memory_space<vmem>>, vector<1x256xf32>
    %514 = vector.broadcast %513 : vector<1x256xf32> to vector<32x256xf32>
    %515 = arith.mulf %512, %514 : vector<32x256xf32>
    %c736_427 = arith.constant 736 : index
    %c0_428 = arith.constant 0 : index
    %516 = vector.load %arg12[%c736_427, %c0_428] : memref<800x256xf32, #tpu.memory_space<vmem>>, vector<32x256xf32>
    tpu.vector_store %arg12[%c736_427, %c0_428], %515 {strides = array<i32>} : memref<800x256xf32, #tpu.memory_space<vmem>>, vector<32x256xf32>,
    %c222_i32_429 = arith.constant 222 : i32
    %517 = tpu.dynamic_rotate %397 by %c222_i32_429 dim 1 : vector<32x256xf32>, i32 -> vector<32x256xf32>
    %c24_430 = arith.constant 24 : index
    %c0_431 = arith.constant 0 : index
    %518 = vector.load %arg2[%c24_430, %c0_431] : memref<25x256xf32, #tpu.memory_space<vmem>>, vector<1x256xf32>
    %519 = vector.broadcast %518 : vector<1x256xf32> to vector<32x256xf32>
    %520 = arith.mulf %517, %519 : vector<32x256xf32>
    %c768_432 = arith.constant 768 : index
    %c0_433 = arith.constant 0 : index
    %521 = vector.load %arg12[%c768_432, %c0_433] : memref<800x256xf32, #tpu.memory_space<vmem>>, vector<32x256xf32>
    tpu.vector_store %arg12[%c768_432, %c0_433], %520 {strides = array<i32>} : memref<800x256xf32, #tpu.memory_space<vmem>>, vector<32x256xf32>,
    %c0_434 = arith.constant 0 : index
    %c0_435 = arith.constant 0 : index
    %522 = vector.load %arg9[%c0_434, %c0_435] : memref<32x800xf32, #tpu.memory_space<vmem>>, vector<32x800xf32>
    %c0_436 = arith.constant 0 : index
    %c0_437 = arith.constant 0 : index
    %523 = vector.load %arg12[%c0_436, %c0_437] : memref<800x256xf32, #tpu.memory_space<vmem>>, vector<800x256xf32>
    %cst_438 = arith.constant dense<0.000000e+00> : vector<32x256xf32>
    %524 = tpu.matmul %522, %523, %cst_438 {dimension_numbers = #tpu.dot_dimension_numbers<[1], [0], [0], [1], [0, 0, 1, 1], [], []>} : vector<32x800xf32>, vector<800x256xf32>, vector<32x256xf32> -> vector<32x256xf32>
    %c0_439 = arith.constant 0 : index
    %c0_440 = arith.constant 0 : index
    %525 = vector.load %arg10[%c0_439, %c0_440] : memref<32x1xf32, #tpu.memory_space<vmem>>, vector<32x1xf32>
    %526 = vector.broadcast %525 : vector<32x1xf32> to vector<32x256xf32>
    %527 = arith.addf %524, %526 : vector<32x256xf32>
    %cst_441 = arith.constant 0.000000e+00 : f32
    %528 = vector.broadcast %cst_441 : f32 to vector<32x256xf32>
    %529 = arith.maximumf %527, %528 : vector<32x256xf32>
    %c0_442 = arith.constant 0 : index
    %c0_443 = arith.constant 0 : index
    %c0_444 = arith.constant 0 : index
    %530 = vector.load %arg11[%c0_442, %c0_443, %c0_444] : memref<1x32x256xf32, #tpu.memory_space<vmem>>, vector<1x32x256xf32>
    %531 = vector.shape_cast %530 : vector<1x32x256xf32> to vector<32x256xf32>
    %532 = vector.shape_cast %529 : vector<32x256xf32> to vector<1x32x256xf32>
    tpu.vector_store %arg11[%c0_442, %c0_443, %c0_444], %532 {strides = array<i32>} : memref<1x32x256xf32, #tpu.memory_space<vmem>>, vector<1x32x256xf32>,
    return
  }
  func.func @transform_0(%arg0: i32) -> (i32, i32, i32) {
    %c0_i32 = arith.constant 0 : i32
    %c0_i32_0 = arith.constant 0 : i32
    %c0_i32_1 = arith.constant 0 : i32
    return %arg0, %c0_i32, %c0_i32_0 : i32, i32, i32
  }
  func.func @transform_1(%arg0: i32) -> (i32, i32) {
    %c0_i32 = arith.constant 0 : i32
    %c0_i32_0 = arith.constant 0 : i32
    %c0_i32_1 = arith.constant 0 : i32
    return %c0_i32, %c0_i32_0 : i32, i32
  }
  func.func @transform_2(%arg0: i32) -> (i32, i32) {
    %c0_i32 = arith.constant 0 : i32
    %c0_i32_0 = arith.constant 0 : i32
    %c0_i32_1 = arith.constant 0 : i32
    return %c0_i32, %c0_i32_0 : i32, i32
  }
  func.func @transform_3(%arg0: i32) -> (i32, i32) {
    %c0_i32 = arith.constant 0 : i32
    %c0_i32_0 = arith.constant 0 : i32
    %c0_i32_1 = arith.constant 0 : i32
    return %c0_i32, %c0_i32_0 : i32, i32
  }
  func.func @transform_4(%arg0: i32) -> (i32, i32) {
    %c0_i32 = arith.constant 0 : i32
    %c0_i32_0 = arith.constant 0 : i32
    %c0_i32_1 = arith.constant 0 : i32
    return %c0_i32, %c0_i32_0 : i32, i32
  }
  func.func @transform_5(%arg0: i32) -> (i32, i32) {
    %c0_i32 = arith.constant 0 : i32
    %c0_i32_0 = arith.constant 0 : i32
    %c0_i32_1 = arith.constant 0 : i32
    return %c0_i32, %c0_i32_0 : i32, i32
  }
  func.func @transform_6(%arg0: i32) -> (i32, i32) {
    %c0_i32 = arith.constant 0 : i32
    %c0_i32_0 = arith.constant 0 : i32
    %c0_i32_1 = arith.constant 0 : i32
    return %c0_i32, %c0_i32_0 : i32, i32
  }
  func.func @transform_7(%arg0: i32) -> (i32, i32) {
    %c0_i32 = arith.constant 0 : i32
    %c0_i32_0 = arith.constant 0 : i32
    %c0_i32_1 = arith.constant 0 : i32
    return %c0_i32, %c0_i32_0 : i32, i32
  }
  func.func @transform_8(%arg0: i32) -> (i32, i32) {
    %c0_i32 = arith.constant 0 : i32
    %c0_i32_0 = arith.constant 0 : i32
    %c0_i32_1 = arith.constant 0 : i32
    return %c0_i32, %c0_i32_0 : i32, i32
  }
  func.func @transform_9(%arg0: i32) -> (i32, i32) {
    %c0_i32 = arith.constant 0 : i32
    %c0_i32_0 = arith.constant 0 : i32
    %c0_i32_1 = arith.constant 0 : i32
    return %c0_i32, %c0_i32_0 : i32, i32
  }
  func.func @transform_10(%arg0: i32) -> (i32, i32, i32) {
    %c0_i32 = arith.constant 0 : i32
    %c0_i32_0 = arith.constant 0 : i32
    %c0_i32_1 = arith.constant 0 : i32
    return %arg0, %c0_i32, %c0_i32_0 : i32, i32, i32
  }
}

</mosaic_0001>

<bundles_post_ra>
// kernel: encoder_forward.1
= control target key start
LH: loop header
LB: loop body
LE: loop exit
PB: predicated region body
PF: predicated region fallthrough
CT: control target
= control target key end

     0   :  { %s13812_s0 = inlined_call_operand.vmem [shape: f32[2,8,256], index: 0, kind: input, shape index: {}]   ;;  %s13813_s1 = inlined_call_operand.vmem [shape: f32[25,256], index: 1, kind: input, shape index: {}]   ;;  %s13814_s2 = inlined_call_operand.vmem [shape: f32[32,200], index: 2, kind: input, shape index: {}]   ;;  %s13815_s3 = inlined_call_operand.vmem [shape: f32[32,1], index: 3, kind: input, shape index: {}]   ;;  %s13816_s4 = inlined_call_operand.vmem [shape: f32[32,800], index: 4, kind: input, shape index: {}]   ;;  %s13817_s5 = inlined_call_operand.vmem [shape: f32[32,1], index: 5, kind: input, shape index: {}]   ;;  %s13818_s6 = inlined_call_operand.vmem [shape: f32[32,800], index: 6, kind: input, shape index: {}]   ;;  %s13819_s7 = inlined_call_operand.vmem [shape: f32[32,1], index: 7, kind: input, shape index: {}]   ;;  %s13820_s8 = inlined_call_operand.vmem [shape: f32[32,800], index: 8, kind: input, shape index: {}]   ;;  %s13821_s9 = inlined_call_operand.vmem [shape: f32[32,1], index: 9, kind: input, shape index: {}]   ;;  %s13822_s10 = inlined_call_operand.hbm [shape: f32[2,32,256], index: 10, kind: output, shape index: {}]  }
   0x1   :  { %14125 = sst [smem:[#allocation124_spill]] %s13812_s0 }
   0x2   :  { %14126 = sst [smem:[#allocation125_spill]] %s13814_s2 }
   0x3   :  { %14127 = sst [smem:[#allocation126_spill]] %s13815_s3 }
   0x4   :  { %14128 = sst [smem:[#allocation127_spill]] %s13816_s4 }
   0x5   :  { %14129 = sst [smem:[#allocation128_spill]] %s13817_s5 }
   0x6   :  { %14130 = sst [smem:[#allocation129_spill]] %s13819_s7 }
   0x7   :  { %14131 = sst [smem:[#allocation130_spill]] %s13820_s8 }
   0x8   :  { %14132 = sst [smem:[#allocation131_spill]] %s13821_s9 }
   0x9   :  { %14133 = sst [smem:[#allocation132_spill]] %s13822_s10 }
   0xa   :  { %15 = vsyncpa [#allocation4], 0 }
   0xb   :  { %17 = vsyncpa [#allocation4 + $0x1], 0  ;;  %s8028_s13 = smov 0   ;;  %s8030_s14 = smov 0  }
   0xc   :  { %s8032_s15 = smov 0   ;;  %s8034_s16 = smov 0  }
   0xd LB: > { %14134 = sst [smem:[#allocation6_spill]] %s7931_s13  ;;  %s8049_s17 = sadd.s32 4294967295, %s7943_s16   ;;  %s7943_s16 = sphi %s8034_s16, %s14880_s16   ;;  %s7939_s15 = sphi %s8032_s15, %s14883_s15   ;;  %s7935_s14 = sphi %s8030_s14, %s14882_s14   ;;  %s7931_s13 = sphi %s8028_s13, %s14881_s13  }
   0xe   : > { %14135 = sst [smem:[#allocation7_spill]] %s7935_s14  ;;  %s6943_s18 = sadd.s32 4294967294, %s7943_s16  }
   0xf   : > { %14136 = sst [smem:[#allocation8_spill]] %s7939_s15  ;;  %s8053_s19 = sadd.s32 1, %s7943_s16  }
  0x10   : > { %14137 = sst [smem:[#allocation9_spill]] %s7943_s16  ;;  %s245_s20 = sadd.s32 1, %s7939_s15 }
  0x11   : > { %14138 = sst [smem:[#allocation10_spill]] %s8049_s17  ;;  %s242_s21 = ssub.s32 %s7943_s16, %s8053_s19 }
  0x12   : > { %14139 = sst [smem:[#allocation11_spill]] %s8053_s19  ;;  %p255_p0 = scmp.ne.s32.totalorder %s7939_s15, %s7935_s14 }
  0x13   : > { %p243_p1 = scmp.eq.s32.totalorder %s242_s21, 0  ;;  %p256_p2 = scmp.eq.s32.totalorder %s8049_s17, 1 }
  0x14   : > { %p261_p3 = scmp.ne.s32.totalorder %s7935_s14, %s7931_s13  ;;  %p262_p4 = scmp.eq.s32.totalorder %s6943_s18, 1 }
  0x15   : > { %s8064_s22 = scalar_select %p243_p1, %s7939_s15, %s245_s20  }
  0x16   : > { %p8066_p5 = por %p256_p2, %p255_p0  ;;  %p8070_p6 = por %p262_p4, %p261_p3 }
  0x17   : > { %14140 = sst [smem:[#allocation12_spill]] %s8064_s22  ;;  %p6946_p7 = scmp.ge.s32.totalorder %s7943_s16, 1 }
  0x18   : > { %s14141_s23 = scalar_select %p8066_p5, 1, 0 }
  0x19   : > { %s14143_s24 = scalar_select %p8070_p6, 1, 0 }
  0x1a   : > { %14142 = sst [smem:[#allocation13_spill]] %s14141_s23  ;;  %p315_p8 = scmp.lt.s32.totalorder %s7943_s16, 3 }
  0x1b   : > { %14144 = sst [smem:[#allocation14_spill]] %s14143_s24 }
  0x1c   : > { %p316_p9 = pnand %p6946_p7, %p315_p8 }
  0x1e   : > { %319 = sbr.rel (%p316_p9) target bundleno = 2679 (0xa77), region = 60 }
  0x25   : > { %p353_p10 = scmp.lt.s32.totalorder %s8049_s17, 1  ;;  %s14145_s0 = sld [smem:[#allocation124_spill]]  ;;  %vm1036_vm0 = vcmask 588800   ;;  %v7969_v5 = vmov 0   ;;  %v364_v8 = vlaneseq }
  0x26   : > { %s13835_s30 = smov 33   ;;  %s13847_s11 = smov 34   ;;  %7880 = vset.pattern.permute.xlu1 %v7969_v5  ;;  %7879 = vset.pattern.permute.xlu0 %v7969_v5  ;;  %v369_v13 = vld [vmem:[%s13813_s1] ss:$8 sm:$0x3] }
  0x27   : > { %s354_s25 = scalar_select %p353_p10, %s8049_s17, 1  ;;  %v372_v9 = vshrl.u32 %v364_v8, 7  ;;  %v8197_v10 = vand.u32 127, %v364_v8  ;;  %v6950_v14 = vld [vmem:[%s13813_s1 + $0x1] ss:$8 sm:$0x3] }
  0x28   : > { %s13833_s12 = smov 32   ;;  %s13831_s18 = smov 31   ;;  %v6951_v31 = vld [vmem:[%s13813_s1 + $0x2] ss:$8 sm:$0x3] }
  0x29   : > { %s7067_s26 = sshll.u32 %s354_s25, 4  ;;  %s13829_s20 = smov 30   ;;  %v8199_v11 = vsub.s32 0, %v372_v9  ;;  %v8201_v12 = vsub.s32 1, %v372_v9  ;;  %vm389_vm1 = vcmp.lt.s32.totalorder %v8197_v10, 33  ;;  %vm366_vm2 = vcmp.lt.s32.totalorder %v8197_v10, 34 }
  0x2a   : > { %s13827_s21 = smov 18   ;;  %s13825_s25 = smov 17   ;;  %v6952_v32 = vld [vmem:[%s13813_s1 + $0x3] ss:$8 sm:$0x3]  ;;  %vm413_vm3 = vcmp.lt.s32.totalorder %v8197_v10, 32 }
  0x2b   : > { %s357_s29 = scalar_lea.vmem %s14145_s0, %s7067_s26  ;;  %s13823_s26 = smov 16   ;;  %14148 = vst [vmem:[#allocation15_spill] sm:$0xff] %v8199_v11  ;;  %14149 = vst [vmem:[#allocation16_spill] sm:$0xff] %v8201_v12  ;;  %v378_v17 = vrot.slane %v369_v13, %v8201_v12  ;;  %v402_v18 = vrot.slane %v6950_v14, %v8201_v12  ;;  %v374_v19 = vrot.slane %v369_v13, %v8199_v11  ;;  %vm13873_vm4 = vcmp.lt.s32.totalorder %v8197_v10, 31 }
  0x2c   : > { %v8081_v0 = vld [vmem:[%s357_s29] sm:$0xff]  ;;  %v8087_v1 = vld [vmem:[%s357_s29 + $0x8] sm:$0xff]  ;;  %s13878_s27 = smov 15   ;;  %s13876_s28 = smov 14   ;;  %v398_v20 = vrot.slane %v6950_v14, %v8199_v11  ;;  %v422_v37 = vrot.slane %v6951_v31, %v8199_v11  ;;  %v426_v38 = vrot.slane %v6951_v31, %v8201_v12  ;;  %v446_v39 = vrot.slane %v6952_v32, %v8199_v11 }
  0x2d   : > { %385 = vrot.lane.b32.xlu1 %v8081_v0, %s13835_s30  ;;  %360 = vrot.lane.b32.xlu0 %v8081_v0, %s13847_s11  ;;  %s13863_s29 = smov 2   ;;  %s14146_s2 = sld [smem:[#allocation125_spill]]  ;;  %v450_v40 = vrot.slane %v6952_v32, %v8201_v12  ;;  %v6953_v51 = vld [vmem:[%s13813_s1 + $0x4] ss:$8 sm:$0x3]  ;;  %vm13868_vm5 = vcmp.lt.s32.totalorder %v8197_v10, 30 }
  0x2e   : > { %s14147_s3 = sld [smem:[#allocation126_spill]]  ;;  %v6954_v52 = vld [vmem:[%s13813_s1 + $0x5] ss:$8 sm:$0x3]  ;;  %v470_v57 = vrot.slane %v6953_v51, %v8199_v11  ;;  %v474_v58 = vrot.slane %v6953_v51, %v8201_v12  ;;  %vm13867_vm6 = vcmp.lt.s32.totalorder %v8197_v10, 18  ;;  %vm13866_vm7 = vcmp.lt.s32.totalorder %v8197_v10, 17 }
  0x2f   : > { %v494_v59 = vrot.slane %v6954_v52, %v8199_v11  ;;  %v498_v60 = vrot.slane %v6954_v52, %v8201_v12  ;;  %v6955_v9 = vld [vmem:[%s13813_s1 + $0x6] ss:$8 sm:$0x3]  ;;  %v6956_v13 = vld [vmem:[%s13813_s1 + $0x7] ss:$8 sm:$0x3] }
  0x30   : > { %vm13865_vm8 = vcmp.lt.s32.totalorder %v8197_v10, 16  ;;  %v6957_v32 = vld [vmem:[%s13813_s1 + $0x10] ss:$8 sm:$0x3]  ;;  %vm557_vm9 = vcmp.lt.s32.totalorder %v8197_v10, 15  ;;  %vm581_vm10 = vcmp.lt.s32.totalorder %v8197_v10, 14 }
  0x31   : > { %387 = vrot.lane.b32.xlu1 %v8087_v1, %s13835_s30  ;;  %362 = vrot.lane.b32.xlu0 %v8087_v1, %s13847_s11  ;;  %s13843_s30 = smov 111   ;;  %v6959_v52 = vld [vmem:[%s13813_s1 + $0x12] ss:$8 sm:$0x3]  ;;  %vm605_vm11 = vcmp.lt.s32.totalorder %v8197_v10, 2  ;;  %vm14013_vm12 = vcmp.lt.s32.totalorder %v8197_v10, 1 }
  0x32   : > { %vm670_vm13 = vcmp.lt.s32.totalorder %v8197_v10, 127  ;;  %vm14015_vm14 = vcmp.lt.s32.totalorder %v8197_v10, 126  ;;  %vm14016_vm15 = vcmp.lt.s32.totalorder %v8197_v10, 114  ;;  %s14156_s11 = smov 33   ;;  %s14161_s0 = smov 111  }
  0x33   : > { %v955_v2 = vld [vmem:[%s14146_s2 + $0x8] sm:$0xff]  ;;  %s14164_s22 = smov 18   ;;  %s14165_s15 = smov 98  }
  0x34   : > { %6974 = vmatprep.mubr.msk.f32.mxu0 %vm1036_vm0, %v955_v2  ;;  %v1013_v3 = vld [vmem:[%s14147_s3 + $0x8] sm:$0xff]  ;;  %v1012_v4 = vld [vmem:[%s14147_s3] sm:$0xff]  ;;  %v1014_v6 = vld [vmem:[%s14147_s3 + $0x10] sm:$0xff]  ;;  %s14166_s19 = smov 17   ;;  %s14167_s24 = smov 15  }
  0x35   : > { %411 = vrot.lane.b32.xlu1 %v8087_v1, %s13833_s12  ;;  %409 = vrot.lane.b32.xlu0 %v8081_v0, %s13833_s12  ;;  %s13841_s12 = smov 112   ;;  %v1015_v7 = vld [vmem:[%s14147_s3 + $0x18] sm:$0xff]  ;;  %s14163_s3 = smov 110  }
  0x36   : > { %s14168_s13 = smov 14   ;;  %s14222_s4 = sld [smem:[#allocation127_spill]] }
  0x37   : > { %s14231_s10 = smov 97   ;;  %s14236_s16 = smov 16  }
  0x38   : > { %s14263_s17 = smov 96   ;;  %s14280_s8 = smov 95  }
  0x39   : > { %435 = vrot.lane.b32.xlu1 %v8087_v1, %s13831_s18  ;;  %433 = vrot.lane.b32.xlu0 %v8081_v0, %s13831_s18  ;;  %s13839_s18 = smov 113   ;;  %s14286_s23 = smov 94  }
  0x3a   : > { %s14338_s5 = sld [smem:[#allocation128_spill]]  ;;  %s14563_s7 = smov 95  }
  0x3b   : > { %s14597_s9 = sld [smem:[#allocation129_spill]] }
  0x3d   : > { %459 = vrot.lane.b32.xlu1 %v8087_v1, %s13829_s20  ;;  %457 = vrot.lane.b32.xlu0 %v8081_v0, %s13829_s20  ;;  %s13837_s20 = smov 114  }
  0x41   : > { %483 = vrot.lane.b32.xlu1 %v8087_v1, %s13827_s21  ;;  %481 = vrot.lane.b32.xlu0 %v8081_v0, %s13827_s21  ;;  %s13855_s21 = smov 126  }
  0x45   : > { %507 = vrot.lane.b32.xlu1 %v8087_v1, %s13825_s25  ;;  %505 = vrot.lane.b32.xlu0 %v8081_v0, %s13825_s25  ;;  %s13859_s25 = smov 127  }
  0x49   : > { %531 = vrot.lane.b32.xlu1 %v8087_v1, %s13823_s26  ;;  %529 = vrot.lane.b32.xlu0 %v8081_v0, %s13823_s26  ;;  %s13861_s26 = smov 1  }
  0x4d   : > { %555 = vrot.lane.b32.xlu1 %v8087_v1, %s13878_s27  ;;  %553 = vrot.lane.b32.xlu0 %v8081_v0, %s13878_s27 }
  0x51   : > { %579 = vrot.lane.b32.xlu1 %v8087_v1, %s13876_s28  ;;  %577 = vrot.lane.b32.xlu0 %v8081_v0, %s13876_s28 }
  0x55   : > { %603 = vrot.lane.b32.xlu1 %v8087_v1, %s13863_s29  ;;  %601 = vrot.lane.b32.xlu0 %v8081_v0, %s13863_s29  ;;  %s14155_s29 = smov 114  }
  0x59   : > { %627 = vrot.lane.b32.xlu1 %v8087_v1, %s13861_s26  ;;  %625 = vrot.lane.b32.xlu0 %v8081_v0, %s13861_s26  ;;  %s14154_s26 = smov 34  }
  0x5d   : > { %668 = vrot.lane.b32.xlu1 %v8087_v1, %s13859_s25  ;;  %666 = vrot.lane.b32.xlu0 %v8081_v0, %s13859_s25  ;;  %s14153_s25 = smov 126  }
  0x61   : > { %692 = vrot.lane.b32.xlu1 %v8087_v1, %s13855_s21  ;;  %690 = vrot.lane.b32.xlu0 %v8081_v0, %s13855_s21  ;;  %s14151_s21 = smov 1  }
  0x65   : > { %716 = vrot.lane.b32.xlu1 %v8087_v1, %s13837_s20  ;;  %714 = vrot.lane.b32.xlu0 %v8081_v0, %s13837_s20  ;;  %s13845_s20 = smov 110  }
  0x69   : > { %740 = vrot.lane.b32.xlu1 %v8087_v1, %s13839_s18  ;;  %738 = vrot.lane.b32.xlu0 %v8081_v0, %s13839_s18  ;;  %s13849_s18 = smov 98  }
  0x6d   : > { %764 = vrot.lane.b32.xlu1 %v8087_v1, %s13841_s12  ;;  %762 = vrot.lane.b32.xlu0 %v8081_v0, %s13841_s12  ;;  %s13851_s12 = smov 97  }
  0x71   : > { %788 = vrot.lane.b32.xlu1 %v8087_v1, %s13843_s30  ;;  %786 = vrot.lane.b32.xlu0 %v8081_v0, %s13843_s30  ;;  %s13853_s30 = smov 96  }
  0x75   : > { %812 = vrot.lane.b32.xlu1 %v8087_v1, %s13845_s20  ;;  %810 = vrot.lane.b32.xlu0 %v8081_v0, %s13845_s20  ;;  %s14157_s20 = smov 113  }
  0x79   : > { %836 = vrot.lane.b32.xlu1 %v8087_v1, %s13849_s18  ;;  %834 = vrot.lane.b32.xlu0 %v8081_v0, %s13849_s18  ;;  %s13857_s18 = smov 95  }
  0x7d   : > { %860 = vrot.lane.b32.xlu1 %v8087_v1, %s13851_s12  ;;  %858 = vrot.lane.b32.xlu0 %v8081_v0, %s13851_s12  ;;  %s13874_s12 = smov 94  }
  0x81   : > { %884 = vrot.lane.b32.xlu1 %v8087_v1, %s13853_s30  ;;  %882 = vrot.lane.b32.xlu0 %v8081_v0, %s13853_s30  ;;  %s14150_s30 = smov 2  }
  0x85   : > { %908 = vrot.lane.b32.xlu1 %v8087_v1, %s13857_s18  ;;  %906 = vrot.lane.b32.xlu0 %v8081_v0, %s13857_s18  ;;  %s14152_s18 = smov 127  }
  0x89   : > { %932 = vrot.lane.b32.xlu1 %v8087_v1, %s13874_s12  ;;  %930 = vrot.lane.b32.xlu0 %v8081_v0, %s13874_s12  ;;  %s14158_s12 = smov 32  }
  0x8d   : > { %1023 = vperm.xlu1 %7880, %v1013_v3   ;;  %1018 = vperm.xlu0 %7879, %v1012_v4  }
  0x91   : > { %1028 = vperm.xlu1 %7880, %v1014_v6   ;;  %1033 = vperm.xlu0 %7879, %v1015_v7  }
  0x9f   : > { %v386_v15 = vpop.permute.xlu1 %385  ;;  %v361_v16 = vpop.permute.xlu0 %360 }
  0xa3   : > { %v388_v21 = vpop.permute.xlu1 %387  ;;  %v363_v22 = vpop.permute.xlu0 %362 }
  0xa4   : > { %v391_v23 = vsel %vm389_vm1, %v388_v21, %v386_v15  ;;  %v368_v24 = vsel %vm366_vm2, %v363_v22, %v361_v16  ;;  %v367_v25 = vsel %vm366_vm2, %v361_v16, %v363_v22  ;;  %v390_v26 = vsel %vm389_vm1, %v386_v15, %v388_v21 }
  0xa5   : > { %v382_v27 = vmul.f32 %v378_v17, %v367_v25  ;;  %v406_v28 = vmul.f32 %v402_v18, %v390_v26  ;;  %v381_v29 = vmul.f32 %v374_v19, %v368_v24  ;;  %v405_v30 = vmul.f32 %v398_v20, %v391_v23 }
  0xa6   : > { %v518_v18 = vrot.slane %v6955_v9, %v8199_v11  ;;  %v522_v19 = vrot.slane %v6955_v9, %v8201_v12  ;;  %v542_v20 = vrot.slane %v6956_v13, %v8199_v11  ;;  %v546_v21 = vrot.slane %v6956_v13, %v8201_v12 }
  0xa7   : > { %v412_v33 = vpop.permute.xlu1 %411  ;;  %v410_v34 = vpop.permute.xlu0 %409  ;;  %v7069_v35 = vpack.c.bf16 %v406_v28, %v382_v27  ;;  %v7071_v36 = vpack.c.bf16 %v405_v30, %v381_v29 }
  0xa8   : > { %v414_v41 = vsel %vm413_vm3, %v410_v34, %v412_v33  ;;  %v415_v42 = vsel %vm413_vm3, %v412_v33, %v410_v34  ;;  %v6958_v33 = vld [vmem:[%s13813_s1 + $0x11] ss:$8 sm:$0x3] }
  0xa9   : > { %7070 = vmatprep.subr.bf16.mxu0 %v7069_v35  ;;  %v429_v47 = vmul.f32 %v422_v37, %v415_v42  ;;  %v430_v48 = vmul.f32 %v426_v38, %v414_v41  ;;  %v566_v38 = vrot.slane %v6957_v32, %v8199_v11  ;;  %v594_v41 = vrot.slane %v6958_v33, %v8201_v12 }
  0xaa   : > { %7072 = vmatpush1.bf16.msra.mxu0 %v7071_v36 }
  0xab   : > { %v436_v43 = vpop.permute.xlu1 %435  ;;  %v434_v44 = vpop.permute.xlu0 %433 }
  0xac   : > { %v438_v45 = vsel %vm13873_vm4, %v434_v44, %v436_v43  ;;  %v439_v46 = vsel %vm13873_vm4, %v436_v43, %v434_v44  ;;  %vm934_vm4 = vcmp.lt.s32.totalorder %v8197_v10, 94 }
  0xad   : > { %v453_v49 = vmul.f32 %v446_v39, %v439_v46  ;;  %v454_v50 = vmul.f32 %v450_v40, %v438_v45  ;;  %v570_v39 = vrot.slane %v6957_v32, %v8201_v12  ;;  %v590_v40 = vrot.slane %v6958_v33, %v8199_v11 }
  0xaf   : > { %v460_v53 = vpop.permute.xlu1 %459  ;;  %v458_v54 = vpop.permute.xlu0 %457  ;;  %v7073_v55 = vpack.c.bf16 %v454_v50, %v430_v48  ;;  %v7075_v56 = vpack.c.bf16 %v453_v49, %v429_v47 }
  0xb0   : > { %v462_v61 = vsel %vm13868_vm5, %v458_v54, %v460_v53  ;;  %v463_v62 = vsel %vm13868_vm5, %v460_v53, %v458_v54  ;;  %v6960_v53 = vld [vmem:[%s13813_s1 + $0x13] ss:$8 sm:$0x3]  ;;  %vm13870_vm5 = vcmp.lt.s32.totalorder %v8197_v10, 110 }
  0xb1   : > { %7074 = vmatprep.subr.bf16.mxu0 %v7073_v55  ;;  %v477_v5 = vmul.f32 %v470_v57, %v463_v62  ;;  %v478_v6 = vmul.f32 %v474_v58, %v462_v61  ;;  %v614_v58 = vrot.slane %v6959_v52, %v8199_v11  ;;  %v638_v61 = vrot.slane %v6960_v53, %v8199_v11 }
  0xb2   : > { %7076 = vmatpush1.bf16.msra.mxu0 %v7075_v56  ;;  %v642_v62 = vrot.slane %v6960_v53, %v8201_v12 }
  0xb3   : > { %v484_v63 = vpop.permute.xlu1 %483  ;;  %v482_v2 = vpop.permute.xlu0 %481 }
  0xb4   : > { %v486_v3 = vsel %vm13867_vm6, %v482_v2, %v484_v63  ;;  %v487_v4 = vsel %vm13867_vm6, %v484_v63, %v482_v2  ;;  %v6962_v63 = vld [vmem:[%s13813_s1 + $0x15] ss:$8 sm:$0x3]  ;;  %vm13869_vm6 = vcmp.lt.s32.totalorder %v8197_v10, 111 }
  0xb5   : > { %v501_v7 = vmul.f32 %v494_v59, %v487_v4  ;;  %v502_v8 = vmul.f32 %v498_v60, %v486_v3  ;;  %v6961_v59 = vld [vmem:[%s13813_s1 + $0x14] ss:$8 sm:$0x3]  ;;  %v618_v60 = vrot.slane %v6959_v52, %v8201_v12  ;;  %v679_v13 = vrot.slane %v6962_v63, %v8199_v11 }
  0xb7   : > { %v508_v14 = vpop.permute.xlu1 %507  ;;  %v506_v15 = vpop.permute.xlu0 %505  ;;  %v7077_v16 = vpack.c.bf16 %v502_v8, %v478_v6  ;;  %v7079_v17 = vpack.c.bf16 %v501_v7, %v477_v5  ;;  %v659_v6 = vrot.slane %v6961_v59, %v8201_v12  ;;  %v655_v7 = vrot.slane %v6961_v59, %v8199_v11 }
  0xb8   : > { %v510_v22 = vsel %vm13866_vm7, %v506_v15, %v508_v14  ;;  %v511_v23 = vsel %vm13866_vm7, %v508_v14, %v506_v15  ;;  %v683_v14 = vrot.slane %v6962_v63, %v8201_v12  ;;  %vm14017_vm7 = vcmp.lt.s32.totalorder %v8197_v10, 112 }
  0xb9   : > { %7078 = vmatprep.subr.bf16.mxu0 %v7077_v16  ;;  %v525_v28 = vmul.f32 %v518_v18, %v511_v23  ;;  %v526_v29 = vmul.f32 %v522_v19, %v510_v22  ;;  %v663_v23 = vmul.f32 %v659_v6, %v8087_v1  ;;  %v6964_v1 = vld [vmem:[%s13813_s1 + $0x17] ss:$8 sm:$0x3]  ;;  %v6968_v6 = vld [vmem:[%s13813_s1 + $0x23] ss:$8 sm:$0x3] }
  0xba   : > { %7080 = vmatpush1.bf16.msra.mxu0 %v7079_v17 }
  0xbb   : > { %v532_v24 = vpop.permute.xlu1 %531  ;;  %v530_v25 = vpop.permute.xlu0 %529 }
  0xbc   : > { %v534_v26 = vsel %vm13865_vm8, %v530_v25, %v532_v24  ;;  %v535_v27 = vsel %vm13865_vm8, %v532_v24, %v530_v25  ;;  %v662_v24 = vmul.f32 %v655_v7, %v8081_v0  ;;  %vm742_vm8 = vcmp.lt.s32.totalorder %v8197_v10, 113 }
  0xbd   : > { %v549_v30 = vmul.f32 %v542_v20, %v535_v27  ;;  %v550_v31 = vmul.f32 %v546_v21, %v534_v26 }
  0xbf   : > { %v556_v34 = vpop.permute.xlu1 %555  ;;  %v554_v35 = vpop.permute.xlu0 %553  ;;  %v7081_v36 = vpack.c.bf16 %v550_v31, %v526_v29  ;;  %v7083_v37 = vpack.c.bf16 %v549_v30, %v525_v28  ;;  %v6963_v29 = vld [vmem:[%s13813_s1 + $0x16] ss:$8 sm:$0x3] }
  0xc0   : > { %v558_v42 = vsel %vm557_vm9, %v554_v35, %v556_v34  ;;  %v559_v43 = vsel %vm557_vm9, %v556_v34, %v554_v35  ;;  %v703_v33 = vrot.slane %v6963_v29, %v8199_v11  ;;  %v707_v34 = vrot.slane %v6963_v29, %v8201_v12  ;;  %v6970_v29 = vld [vmem:[%s13813_s1 + $0x25] ss:$8 sm:$0x3] }
  0xc1   : > { %7082 = vmatprep.subr.bf16.mxu0 %v7081_v36  ;;  %v573_v48 = vmul.f32 %v566_v38, %v559_v43  ;;  %v574_v49 = vmul.f32 %v570_v39, %v558_v42  ;;  %v727_v35 = vrot.slane %v6964_v1, %v8199_v11  ;;  %v731_v36 = vrot.slane %v6964_v1, %v8201_v12 }
  0xc2   : > { %7084 = vmatpush1.bf16.msra.mxu0 %v7083_v37 }
  0xc3   : > { %v580_v44 = vpop.permute.xlu1 %579  ;;  %v578_v45 = vpop.permute.xlu0 %577 }
  0xc4   : > { %v582_v46 = vsel %vm581_vm10, %v578_v45, %v580_v44  ;;  %v583_v47 = vsel %vm581_vm10, %v580_v44, %v578_v45 }
  0xc5   : > { %v597_v50 = vmul.f32 %v590_v40, %v583_v47  ;;  %v598_v51 = vmul.f32 %v594_v41, %v582_v46  ;;  %v6965_v47 = vld [vmem:[%s13813_s1 + $0x20] ss:$8 sm:$0x3] }
  0xc6   : > { %v751_v53 = vrot.slane %v6965_v47, %v8199_v11 }
  0xc7   : > { %v604_v54 = vpop.permute.xlu1 %603  ;;  %v602_v55 = vpop.permute.xlu0 %601  ;;  %v7085_v56 = vpack.c.bf16 %v598_v51, %v574_v49  ;;  %v7087_v57 = vpack.c.bf16 %v597_v50, %v573_v48  ;;  %v6966_v48 = vld [vmem:[%s13813_s1 + $0x21] ss:$8 sm:$0x3] }
  0xc8   : > { %v606_v2 = vsel %vm605_vm11, %v602_v55, %v604_v54  ;;  %v607_v3 = vsel %vm605_vm11, %v604_v54, %v602_v55  ;;  %v755_v54 = vrot.slane %v6965_v47, %v8201_v12  ;;  %v775_v55 = vrot.slane %v6966_v48, %v8199_v11  ;;  %v6972_v47 = vld [vmem:[%s13813_s1 + $0x27] ss:$8 sm:$0x3] }
  0xc9   : > { %7086 = vmatprep.subr.bf16.mxu0 %v7085_v56  ;;  %v621_v15 = vmul.f32 %v614_v58, %v607_v3  ;;  %v622_v16 = vmul.f32 %v618_v60, %v606_v2  ;;  %v779_v56 = vrot.slane %v6966_v48, %v8201_v12 }
  0xca   : > { %7088 = vmatpush1.bf16.msra.mxu0 %v7087_v57 }
  0xcb   : > { %v628_v4 = vpop.permute.xlu1 %627  ;;  %v626_v5 = vpop.permute.xlu0 %625 }
  0xcc   : > { %v630_v8 = vsel %vm14013_vm12, %v626_v5, %v628_v4  ;;  %v631_v9 = vsel %vm14013_vm12, %v628_v4, %v626_v5  ;;  %v6967_v5 = vld [vmem:[%s13813_s1 + $0x22] ss:$8 sm:$0x3] }
  0xcd   : > { %v645_v17 = vmul.f32 %v638_v61, %v631_v9  ;;  %v646_v18 = vmul.f32 %v642_v62, %v630_v8 }
  0xcf   : > { %v669_v19 = vpop.permute.xlu1 %668  ;;  %v667_v20 = vpop.permute.xlu0 %666  ;;  %v7089_v21 = vpack.c.bf16 %v646_v18, %v622_v16  ;;  %v7091_v22 = vpack.c.bf16 %v645_v17, %v621_v15  ;;  %v803_v15 = vrot.slane %v6967_v5, %v8201_v12  ;;  %v823_v16 = vrot.slane %v6968_v6, %v8199_v11 }
  0xd0   : > { %v671_v25 = vsel %vm670_vm13, %v667_v20, %v669_v19  ;;  %v672_v26 = vsel %vm670_vm13, %v669_v19, %v667_v20  ;;  %v827_v17 = vrot.slane %v6968_v6, %v8201_v12 }
  0xd1   : > { %v686_v27 = vmul.f32 %v679_v13, %v671_v25  ;;  %v687_v28 = vmul.f32 %v683_v14, %v672_v26  ;;  %7090 = vmatprep.subr.bf16.mxu0 %v7089_v21  ;;  %v799_v14 = vrot.slane %v6967_v5, %v8199_v11 }
  0xd2   : > { %7092 = vmatpush1.bf16.msra.mxu0 %v7091_v22 }
  0xd3   : > { %v693_v30 = vpop.permute.xlu1 %692  ;;  %v691_v0 = vpop.permute.xlu0 %690  ;;  %v7093_v31 = vpack.c.bf16 %v687_v28, %v663_v23  ;;  %v7095_v32 = vpack.c.bf16 %v686_v27, %v662_v24  ;;  %v6969_v28 = vld [vmem:[%s13813_s1 + $0x24] ss:$8 sm:$0x3] }
  0xd4   : > { %v695_v37 = vsel %vm14015_vm14, %v691_v0, %v693_v30  ;;  %v696_v38 = vsel %vm14015_vm14, %v693_v30, %v691_v0 }
  0xd5   : > { %7094 = vmatprep.subr.bf16.mxu0 %v7093_v31  ;;  %v710_v43 = vmul.f32 %v703_v33, %v695_v37  ;;  %v711_v44 = vmul.f32 %v707_v34, %v696_v38  ;;  %v851_v33 = vrot.slane %v6969_v28, %v8201_v12  ;;  %v871_v34 = vrot.slane %v6970_v29, %v8199_v11 }
  0xd6   : > { %7096 = vmatpush1.bf16.msra.mxu0 %v7095_v32  ;;  %v847_v32 = vrot.slane %v6969_v28, %v8199_v11 }
  0xd7   : > { %v717_v39 = vpop.permute.xlu1 %716  ;;  %v715_v40 = vpop.permute.xlu0 %714 }
  0xd8   : > { %v719_v41 = vsel %vm14016_vm15, %v715_v40, %v717_v39  ;;  %v720_v42 = vsel %vm14016_vm15, %v717_v39, %v715_v40 }
  0xd9   : > { %v734_v45 = vmul.f32 %v727_v35, %v719_v41  ;;  %v735_v46 = vmul.f32 %v731_v36, %v720_v42  ;;  %v875_v35 = vrot.slane %v6970_v29, %v8201_v12 }
  0xdb   : > { %v741_v49 = vpop.permute.xlu1 %740  ;;  %v739_v50 = vpop.permute.xlu0 %738  ;;  %v7097_v51 = vpack.c.bf16 %v735_v46, %v711_v44  ;;  %v7099_v52 = vpack.c.bf16 %v734_v45, %v710_v43  ;;  %v6971_v46 = vld [vmem:[%s13813_s1 + $0x26] ss:$8 sm:$0x3] }
  0xdc   : > { %v743_v57 = vsel %vm742_vm8, %v739_v50, %v741_v49  ;;  %v744_v58 = vsel %vm742_vm8, %v741_v49, %v739_v50 }
  0xdd   : > { %7098 = vmatprep.subr.bf16.mxu0 %v7097_v51  ;;  %v758_v63 = vmul.f32 %v751_v53, %v743_v57  ;;  %v759_v2 = vmul.f32 %v755_v54, %v744_v58  ;;  %v899_v53 = vrot.slane %v6971_v46, %v8201_v12  ;;  %v919_v54 = vrot.slane %v6972_v47, %v8199_v11 }
  0xde   : > { %7100 = vmatpush1.bf16.msra.mxu0 %v7099_v52  ;;  %v895_v52 = vrot.slane %v6971_v46, %v8199_v11 }
  0xdf   : > { %v765_v59 = vpop.permute.xlu1 %764  ;;  %v763_v60 = vpop.permute.xlu0 %762 }
  0xe0   : > { %v767_v61 = vsel %vm14017_vm7, %v763_v60, %v765_v59  ;;  %v768_v62 = vsel %vm14017_vm7, %v765_v59, %v763_v60 }
  0xe1   : > { %v782_v3 = vmul.f32 %v775_v55, %v767_v61  ;;  %v783_v4 = vmul.f32 %v779_v56, %v768_v62  ;;  %v923_v55 = vrot.slane %v6972_v47, %v8201_v12  ;;  %v6973_v56 = vld [vmem:[%s13813_s1 + $0x30] ss:$8 sm:$0x3] }
  0xe2   : > { %v943_v6 = vrot.slane %v6973_v56, %v8199_v11 }
  0xe3   : > { %v789_v7 = vpop.permute.xlu1 %788  ;;  %v787_v8 = vpop.permute.xlu0 %786  ;;  %v7101_v9 = vpack.c.bf16 %v783_v4, %v759_v2  ;;  %v7103_v13 = vpack.c.bf16 %v782_v3, %v758_v63  ;;  %v947_v63 = vrot.slane %v6973_v56, %v8201_v12 }
  0xe4   : > { %v791_v18 = vsel %vm13869_vm6, %v787_v8, %v789_v7  ;;  %v792_v19 = vsel %vm13869_vm6, %v789_v7, %v787_v8  ;;  %vm13871_vm6 = vcmp.lt.s32.totalorder %v8197_v10, 98 }
  0xe5   : > { %7102 = vmatprep.subr.bf16.mxu0 %v7101_v9  ;;  %v806_v24 = vmul.f32 %v799_v14, %v791_v18  ;;  %v807_v25 = vmul.f32 %v803_v15, %v792_v19  ;;  %v954_v18 = vld [vmem:[%s14146_s2] sm:$0xff]  ;;  %v957_v19 = vld [vmem:[%s14146_s2 + $0x18] sm:$0xff] }
  0xe6   : > { %7104 = vmatpush1.bf16.msra.mxu0 %v7103_v13 }
  0xe7   : > { %v813_v20 = vpop.permute.xlu1 %812  ;;  %v811_v21 = vpop.permute.xlu0 %810 }
  0xe8   : > { %v815_v22 = vsel %vm13870_vm5, %v811_v21, %v813_v20  ;;  %v816_v23 = vsel %vm13870_vm5, %v813_v20, %v811_v21  ;;  %vm13872_vm5 = vcmp.lt.s32.totalorder %v8197_v10, 97  ;;  %v956_v20 = vld [vmem:[%s14146_s2 + $0x10] sm:$0xff]  ;;  %v959_v21 = vld [vmem:[%s14146_s2 + $0x28] sm:$0xff] }
  0xe9   : > { %v830_v26 = vmul.f32 %v823_v16, %v815_v22  ;;  %v831_v27 = vmul.f32 %v827_v17, %v816_v23  ;;  %v958_v22 = vld [vmem:[%s14146_s2 + $0x20] sm:$0xff]  ;;  %v961_v23 = vld [vmem:[%s14146_s2 + $0x38] sm:$0xff] }
  0xeb   : > { %v837_v1 = vpop.permute.xlu1 %836  ;;  %v835_v30 = vpop.permute.xlu0 %834  ;;  %v7105_v0 = vpack.c.bf16 %v831_v27, %v807_v25  ;;  %v7107_v31 = vpack.c.bf16 %v830_v26, %v806_v24  ;;  %v960_v24 = vld [vmem:[%s14146_s2 + $0x30] sm:$0xff]  ;;  %s14162_s2 = smov 30  }
  0xec   : > { %v839_v36 = vsel %vm13871_vm6, %v835_v30, %v837_v1  ;;  %v840_v37 = vsel %vm13871_vm6, %v837_v1, %v835_v30  ;;  %vm886_vm6 = vcmp.lt.s32.totalorder %v8197_v10, 96 }
  0xed   : > { %7106 = vmatprep.subr.bf16.mxu0 %v7105_v0  ;;  %v854_v42 = vmul.f32 %v847_v32, %v839_v36  ;;  %v855_v43 = vmul.f32 %v851_v33, %v840_v37 }
  0xee   : > { %7108 = vmatpush1.bf16.msra.mxu0 %v7107_v31 }
  0xef   : > { %v861_v38 = vpop.permute.xlu1 %860  ;;  %v859_v39 = vpop.permute.xlu0 %858 }
  0xf0   : > { %v863_v40 = vsel %vm13872_vm5, %v859_v39, %v861_v38  ;;  %v864_v41 = vsel %vm13872_vm5, %v861_v38, %v859_v39  ;;  %vm910_vm5 = vcmp.lt.s32.totalorder %v8197_v10, 95 }
  0xf1   : > { %v878_v44 = vmul.f32 %v871_v34, %v863_v40  ;;  %v879_v45 = vmul.f32 %v875_v35, %v864_v41 }
  0xf3   : > { %v885_v48 = vpop.permute.xlu1 %884  ;;  %v883_v49 = vpop.permute.xlu0 %882  ;;  %v7109_v50 = vpack.c.bf16 %v879_v45, %v855_v43  ;;  %v7111_v51 = vpack.c.bf16 %v878_v44, %v854_v42 }
  0xf4   : > { %v887_v57 = vsel %vm886_vm6, %v883_v49, %v885_v48  ;;  %v888_v58 = vsel %vm886_vm6, %v885_v48, %v883_v49 }
  0xf5   : > { %7110 = vmatprep.subr.bf16.mxu0 %v7109_v50  ;;  %v902_v2 = vmul.f32 %v895_v52, %v887_v57  ;;  %v903_v3 = vmul.f32 %v899_v53, %v888_v58 }
  0xf6   : > { %7112 = vmatpush1.bf16.msra.mxu0 %v7111_v51 }
  0xf7   : > { %v909_v59 = vpop.permute.xlu1 %908  ;;  %v907_v60 = vpop.permute.xlu0 %906 }
  0xf8   : > { %v911_v61 = vsel %vm910_vm5, %v907_v60, %v909_v59  ;;  %v912_v62 = vsel %vm910_vm5, %v909_v59, %v907_v60 }
  0xf9   : > { %v926_v4 = vmul.f32 %v919_v54, %v911_v61  ;;  %v927_v5 = vmul.f32 %v923_v55, %v912_v62 }
  0xfb   : > { %v933_v7 = vpop.permute.xlu1 %932  ;;  %v931_v8 = vpop.permute.xlu0 %930  ;;  %v7113_v9 = vpack.c.bf16 %v927_v5, %v903_v3  ;;  %v7115_v13 = vpack.c.bf16 %v926_v4, %v902_v2 }
  0xfc   : > { %v935_v14 = vsel %vm934_vm4, %v931_v8, %v933_v7  ;;  %v936_v15 = vsel %vm934_vm4, %v933_v7, %v931_v8 }
  0xfd   : > { %7114 = vmatprep.subr.bf16.mxu0 %v7113_v9  ;;  %v951_v16 = vmul.f32 %v947_v63, %v936_v15  ;;  %v950_v17 = vmul.f32 %v943_v6, %v935_v14 }
  0xfe   : > { %7116 = vmatpush1.bf16.msra.mxu0 %v7115_v13 }
  0xff   : > { %1097 = vmatprep.subr.mxu0 %v951_v16 }
 0x102   : > { %1098 = vmatpush1.msra.mxu0 %v950_v17 }
 0x103   : > { %1114 = vmatmul.mubr.f32.vlgmr.msra.gmra.mrb[0].mxu0 %v954_v18 }
 0x104   : > { %6975 = vmatprep.mubr.msk.f32.mxu0 %vm1036_vm0, %v957_v19 }
 0x107   : > { %1120 = vmatmul.mubr.f32.gmra.mrb[2].mxu0 %v956_v20 }
 0x108   : > { %6976 = vmatprep.mubr.msk.f32.mxu0 %vm1036_vm0, %v959_v21 }
 0x10b   : > { %1126 = vmatmul.mubr.f32.gmra.mrb[4].mxu0 %v958_v22 }
 0x10c   : > { %6977 = vmatprep.mubr.msk.f32.mxu0 %vm1036_vm0, %v961_v23  ;;  %v1019_v25 = vpop.permute.xlu0 %1018  ;;  %v1024_v1 = vpop.permute.xlu1 %1023  ;;  %vm14325_vm0 = vcmp.lt.s32.totalorder %v8197_v10, 31 }
 0x10f   : > { %1132 = vmatmul.mubr.f32.gmra.mrb[6].mxu0 %v960_v24 }
 0x110   : > { %v8600_v41 = vpop.permute.xlu1 %1028  ;;  %v8606_v42 = vpop.permute.xlu0 %1033 }
 0x1d6   : > { %v1115_v26 = vpop.f32.mrb[0].mxu0 }
 0x1d7   : > { %v1116_v27 = vadd.f32 %v1115_v26, %v1019_v25  ;;  %v1117_v28 = vpop.f32.mrb[1].mxu0 }
 0x1d8   : > { %v1118_v37 = vadd.f32 %v1117_v28, %v1019_v25  ;;  %v6985_v25 = vld [vmem:[%s13813_s1 + $0x10] ss:$8 sm:$0x3] }
 0x1d9   : > { %v8474_v29 = vmax.f32 %v1116_v27, 0.0  ;;  %v8776_v28 = vrot.slane %v6985_v25, %v8201_v12 }
 0x1da   : > { %v1121_v30 = vpop.f32.mrb[2].mxu0  ;;  %v8560_v38 = vmax.f32 %v1118_v37, 0.0 }
 0x1db   : > { %v1122_v0 = vadd.f32 %v1121_v30, %v1024_v1  ;;  %v1123_v31 = vpop.f32.mrb[3].mxu0  ;;  %1562 = vrot.lane.b32.xlu1 %v8474_v29, %s13878_s27 }
 0x1dc   : > { %v1124_v39 = vadd.f32 %v1123_v31, %v1024_v1 }
 0x1dd   : > { %v8478_v32 = vmax.f32 %v1122_v0, 0.0 }
 0x1de   : > { %v8480_v33 = vpop.f32.mrb[4].mxu0  ;;  %v8566_v40 = vmax.f32 %v1124_v39, 0.0 }
 0x1df   : > { %v8482_v34 = vpop.f32.mrb[5].mxu0  ;;  %1564 = vrot.lane.b32.xlu0 %v8478_v32, %s13878_s27  ;;  %1614 = vrot.lane.b32.xlu1 %v8474_v29, %s13876_s28  ;;  %s14160_s27 = smov 31   ;;  %v1128_v58 = vadd.f32 %v8480_v33, %v8600_v41 }
 0x1e1   : > { %v8680_v61 = vmax.f32 %v1128_v58, 0.0 }
 0x1e2   : > { %v8488_v35 = vpop.f32.mrb[6].mxu0 }
 0x1e3   : > { %v8490_v36 = vpop.f32.mrb[7].mxu0  ;;  %1616 = vrot.lane.b32.xlu0 %v8478_v32, %s13876_s28  ;;  %1666 = vrot.lane.b32.xlu1 %v8474_v29, %s14150_s30  ;;  %s14159_s28 = smov 112   ;;  %v1134_v62 = vadd.f32 %v8488_v35, %v8606_v42  ;;  %v8790_v35 = vrot.slane %v6985_v25, %v8199_v11 }
 0x1e5   : > { %v8692_v3 = vmax.f32 %v1134_v62, 0.0 }
 0x1e7   : > { %1668 = vrot.lane.b32.xlu0 %v8478_v32, %s14150_s30  ;;  %1718 = vrot.lane.b32.xlu1 %v8474_v29, %s14151_s21 }
 0x1eb   : > { %1720 = vrot.lane.b32.xlu0 %v8478_v32, %s14151_s21  ;;  %1798 = vrot.lane.b32.xlu1 %v8474_v29, %s14152_s18 }
 0x1ef   : > { %1800 = vrot.lane.b32.xlu0 %v8478_v32, %s14152_s18  ;;  %1850 = vrot.lane.b32.xlu1 %v8474_v29, %s14153_s25 }
 0x1f3   : > { %1852 = vrot.lane.b32.xlu0 %v8478_v32, %s14153_s25  ;;  %1146 = vrot.lane.b32.xlu1 %v8474_v29, %s14154_s26 }
 0x1f7   : > { %1148 = vrot.lane.b32.xlu0 %v8478_v32, %s14154_s26  ;;  %1902 = vrot.lane.b32.xlu1 %v8474_v29, %s14155_s29 }
 0x1fb   : > { %1904 = vrot.lane.b32.xlu0 %v8478_v32, %s14155_s29  ;;  %1198 = vrot.lane.b32.xlu1 %v8474_v29, %s14156_s11 }
 0x1ff   : > { %1200 = vrot.lane.b32.xlu0 %v8478_v32, %s14156_s11  ;;  %1954 = vrot.lane.b32.xlu1 %v8474_v29, %s14157_s20 }
 0x203   : > { %1956 = vrot.lane.b32.xlu0 %v8478_v32, %s14157_s20  ;;  %1250 = vrot.lane.b32.xlu1 %v8474_v29, %s14158_s12 }
 0x207   : > { %1252 = vrot.lane.b32.xlu0 %v8478_v32, %s14158_s12  ;;  %2006 = vrot.lane.b32.xlu1 %v8474_v29, %s14159_s28 }
 0x20b   : > { %2008 = vrot.lane.b32.xlu0 %v8478_v32, %s14159_s28  ;;  %1302 = vrot.lane.b32.xlu1 %v8474_v29, %s14160_s27 }
 0x20f   : > { %1304 = vrot.lane.b32.xlu0 %v8478_v32, %s14160_s27  ;;  %2058 = vrot.lane.b32.xlu1 %v8474_v29, %s14161_s0 }
 0x213   : > { %2060 = vrot.lane.b32.xlu0 %v8478_v32, %s14161_s0  ;;  %1354 = vrot.lane.b32.xlu1 %v8474_v29, %s14162_s2 }
 0x217   : > { %1356 = vrot.lane.b32.xlu0 %v8478_v32, %s14162_s2  ;;  %2110 = vrot.lane.b32.xlu1 %v8474_v29, %s14163_s3 }
 0x21b   : > { %2112 = vrot.lane.b32.xlu0 %v8478_v32, %s14163_s3  ;;  %1406 = vrot.lane.b32.xlu1 %v8474_v29, %s14164_s22 }
 0x21f   : > { %1408 = vrot.lane.b32.xlu0 %v8478_v32, %s14164_s22  ;;  %2162 = vrot.lane.b32.xlu1 %v8474_v29, %s14165_s15 }
 0x223   : > { %2164 = vrot.lane.b32.xlu0 %v8478_v32, %s14165_s15  ;;  %1458 = vrot.lane.b32.xlu1 %v8474_v29, %s14166_s19 }
 0x227   : > { %1460 = vrot.lane.b32.xlu0 %v8478_v32, %s14166_s19  ;;  %1570 = vrot.lane.b32.xlu1 %v8560_v38, %s14167_s24 }
 0x22b   : > { %1572 = vrot.lane.b32.xlu0 %v8566_v40, %s14167_s24  ;;  %1622 = vrot.lane.b32.xlu1 %v8560_v38, %s14168_s13 }
 0x22f   : > { %1624 = vrot.lane.b32.xlu0 %v8566_v40, %s14168_s13  ;;  %1674 = vrot.lane.b32.xlu1 %v8560_v38, %s14150_s30 }
 0x233   : > { %1676 = vrot.lane.b32.xlu0 %v8566_v40, %s14150_s30  ;;  %1726 = vrot.lane.b32.xlu1 %v8560_v38, %s14151_s21 }
 0x237   : > { %1728 = vrot.lane.b32.xlu0 %v8566_v40, %s14151_s21  ;;  %1806 = vrot.lane.b32.xlu1 %v8560_v38, %s14152_s18 }
 0x23b   : > { %1808 = vrot.lane.b32.xlu0 %v8566_v40, %s14152_s18  ;;  %1858 = vrot.lane.b32.xlu1 %v8560_v38, %s14153_s25 }
 0x23f   : > { %1860 = vrot.lane.b32.xlu0 %v8566_v40, %s14153_s25  ;;  %1154 = vrot.lane.b32.xlu1 %v8560_v38, %s14154_s26 }
 0x243   : > { %1156 = vrot.lane.b32.xlu0 %v8566_v40, %s14154_s26  ;;  %1910 = vrot.lane.b32.xlu1 %v8560_v38, %s14155_s29 }
 0x247   : > { %1912 = vrot.lane.b32.xlu0 %v8566_v40, %s14155_s29  ;;  %1206 = vrot.lane.b32.xlu1 %v8560_v38, %s14156_s11 }
 0x24b   : > { %1208 = vrot.lane.b32.xlu0 %v8566_v40, %s14156_s11  ;;  %1962 = vrot.lane.b32.xlu1 %v8560_v38, %s14157_s20 }
 0x24d   : > { %v8608_v43 = vpop.permute.xlu1 %1562 }
 0x24f   : > { %1964 = vrot.lane.b32.xlu0 %v8566_v40, %s14157_s20  ;;  %1258 = vrot.lane.b32.xlu1 %v8560_v38, %s14158_s12 }
 0x251   : > { %v8614_v44 = vpop.permute.xlu0 %1564  ;;  %v8616_v45 = vpop.permute.xlu1 %1614 }
 0x253   : > { %1260 = vrot.lane.b32.xlu0 %v8566_v40, %s14158_s12  ;;  %2014 = vrot.lane.b32.xlu1 %v8560_v38, %s14159_s28 }
 0x255   : > { %v8622_v46 = vpop.permute.xlu0 %1616  ;;  %v8624_v47 = vpop.permute.xlu1 %1666 }
 0x257   : > { %2016 = vrot.lane.b32.xlu0 %v8566_v40, %s14159_s28  ;;  %1310 = vrot.lane.b32.xlu1 %v8560_v38, %s14160_s27 }
 0x259   : > { %v8630_v48 = vpop.permute.xlu0 %1668  ;;  %v8632_v49 = vpop.permute.xlu1 %1718 }
 0x25b   : > { %1312 = vrot.lane.b32.xlu0 %v8566_v40, %s14160_s27  ;;  %2066 = vrot.lane.b32.xlu1 %v8560_v38, %s14161_s0 }
 0x25d   : > { %v8638_v50 = vpop.permute.xlu0 %1720  ;;  %v8640_v51 = vpop.permute.xlu1 %1798 }
 0x25f   : > { %2068 = vrot.lane.b32.xlu0 %v8566_v40, %s14161_s0  ;;  %1362 = vrot.lane.b32.xlu1 %v8560_v38, %s14162_s2 }
 0x261   : > { %v8646_v52 = vpop.permute.xlu0 %1800  ;;  %v8648_v53 = vpop.permute.xlu1 %1850 }
 0x263   : > { %1364 = vrot.lane.b32.xlu0 %v8566_v40, %s14162_s2  ;;  %2118 = vrot.lane.b32.xlu1 %v8560_v38, %s14163_s3 }
 0x265   : > { %v8654_v54 = vpop.permute.xlu0 %1852  ;;  %v8656_v55 = vpop.permute.xlu1 %1146 }
 0x267   : > { %2120 = vrot.lane.b32.xlu0 %v8566_v40, %s14163_s3  ;;  %1414 = vrot.lane.b32.xlu1 %v8560_v38, %s14164_s22 }
 0x269   : > { %v8662_v56 = vpop.permute.xlu0 %1148  ;;  %v8664_v57 = vpop.permute.xlu1 %1902 }
 0x26b   : > { %1416 = vrot.lane.b32.xlu0 %v8566_v40, %s14164_s22  ;;  %2170 = vrot.lane.b32.xlu1 %v8560_v38, %s14165_s15 }
 0x26d   : > { %v8672_v59 = vpop.permute.xlu0 %1904  ;;  %v8674_v60 = vpop.permute.xlu1 %1198 }
 0x26e   : > { %14169 = vst [vmem:[#allocation17_spill] sm:$0xff] %v8674_v60  ;;  %v6978_v60 = vld [vmem:[%s13813_s1 + $0x1] ss:$8 sm:$0x3] }
 0x26f   : > { %2172 = vrot.lane.b32.xlu0 %v8566_v40, %s14165_s15  ;;  %1466 = vrot.lane.b32.xlu1 %v8560_v38, %s14166_s19 }
 0x271   : > { %v8684_v63 = vpop.permute.xlu0 %1200  ;;  %v8686_v2 = vpop.permute.xlu1 %1954 }
 0x272   : > { %14170 = vst [vmem:[#allocation18_spill] sm:$0xff] %v8684_v63  ;;  %14171 = vst [vmem:[#allocation19_spill] sm:$0xff] %v8686_v2  ;;  %v6992_v2 = vld [vmem:[%s13813_s1 + $0x17] ss:$8 sm:$0x3] }
 0x273   : > { %1468 = vrot.lane.b32.xlu0 %v8566_v40, %s14166_s19  ;;  %1566 = vrot.lane.b32.xlu1 %v8680_v61, %s14167_s24 }
 0x275   : > { %v8694_v4 = vpop.permute.xlu0 %1956  ;;  %v8696_v5 = vpop.permute.xlu1 %1250 }
 0x276   : > { %14172 = vst [vmem:[#allocation20_spill] sm:$0xff] %v8694_v4  ;;  %14173 = vst [vmem:[#allocation21_spill] sm:$0xff] %v8696_v5  ;;  %v6988_v5 = vld [vmem:[%s13813_s1 + $0x13] ss:$8 sm:$0x3] }
 0x277   : > { %1568 = vrot.lane.b32.xlu0 %v8692_v3, %s14167_s24  ;;  %1618 = vrot.lane.b32.xlu1 %v8680_v61, %s14168_s13 }
 0x279   : > { %v8702_v6 = vpop.permute.xlu0 %1252  ;;  %v8704_v7 = vpop.permute.xlu1 %2006 }
 0x27a   : > { %14174 = vst [vmem:[#allocation22_spill] sm:$0xff] %v8702_v6  ;;  %14175 = vst [vmem:[#allocation23_spill] sm:$0xff] %v8704_v7  ;;  %v2425_v7 = vld [vmem:[%s14222_s4 + $0x18] sm:$0xff] }
 0x27b   : > { %1620 = vrot.lane.b32.xlu0 %v8692_v3, %s14168_s13  ;;  %1670 = vrot.lane.b32.xlu1 %v8680_v61, %s14150_s30 }
 0x27c   : > { %2840 = vmatprep.mubr.f32.mxu1 %v2425_v7 }
 0x27d   : > { %v8710_v8 = vpop.permute.xlu0 %2008  ;;  %v8712_v9 = vpop.permute.xlu1 %1302 }
 0x27e   : > { %14176 = vst [vmem:[#allocation24_spill] sm:$0xff] %v8710_v8  ;;  %14177 = vst [vmem:[#allocation25_spill] sm:$0xff] %v8712_v9 }
 0x27f   : > { %1672 = vrot.lane.b32.xlu0 %v8692_v3, %s14150_s30  ;;  %1722 = vrot.lane.b32.xlu1 %v8680_v61, %s14151_s21 }
 0x281   : > { %v8718_v13 = vpop.permute.xlu0 %1304  ;;  %v8720_v14 = vpop.permute.xlu1 %2058 }
 0x282   : > { %14178 = vst [vmem:[#allocation26_spill] sm:$0xff] %v8718_v13  ;;  %14179 = vst [vmem:[#allocation27_spill] sm:$0xff] %v8720_v14 }
 0x283   : > { %1724 = vrot.lane.b32.xlu0 %v8692_v3, %s14151_s21  ;;  %1802 = vrot.lane.b32.xlu1 %v8680_v61, %s14152_s18 }
 0x285   : > { %v8726_v15 = vpop.permute.xlu0 %2060  ;;  %v8728_v16 = vpop.permute.xlu1 %1354 }
 0x286   : > { %14180 = vst [vmem:[#allocation28_spill] sm:$0xff] %v8726_v15  ;;  %14181 = vst [vmem:[#allocation29_spill] sm:$0xff] %v8728_v16 }
 0x287   : > { %1804 = vrot.lane.b32.xlu0 %v8692_v3, %s14152_s18  ;;  %1854 = vrot.lane.b32.xlu1 %v8680_v61, %s14153_s25 }
 0x289   : > { %v8734_v17 = vpop.permute.xlu0 %1356  ;;  %v8736_v18 = vpop.permute.xlu1 %2110 }
 0x28a   : > { %14182 = vst [vmem:[#allocation30_spill] sm:$0xff] %v8734_v17  ;;  %14183 = vst [vmem:[#allocation31_spill] sm:$0xff] %v8736_v18 }
 0x28b   : > { %1856 = vrot.lane.b32.xlu0 %v8692_v3, %s14153_s25  ;;  %1150 = vrot.lane.b32.xlu1 %v8680_v61, %s14154_s26 }
 0x28d   : > { %v8742_v19 = vpop.permute.xlu0 %2112  ;;  %v8744_v20 = vpop.permute.xlu1 %1406 }
 0x28e   : > { %14184 = vst [vmem:[#allocation32_spill] sm:$0xff] %v8742_v19  ;;  %14185 = vst [vmem:[#allocation33_spill] sm:$0xff] %v8744_v20 }
 0x28f   : > { %1152 = vrot.lane.b32.xlu0 %v8692_v3, %s14154_s26  ;;  %1906 = vrot.lane.b32.xlu1 %v8680_v61, %s14155_s29 }
 0x291   : > { %v8750_v21 = vpop.permute.xlu0 %1408  ;;  %v8752_v22 = vpop.permute.xlu1 %2162 }
 0x292   : > { %14186 = vst [vmem:[#allocation34_spill] sm:$0xff] %v8750_v21  ;;  %14187 = vst [vmem:[#allocation35_spill] sm:$0xff] %v8752_v22 }
 0x293   : > { %1908 = vrot.lane.b32.xlu0 %v8692_v3, %s14155_s29  ;;  %1202 = vrot.lane.b32.xlu1 %v8680_v61, %s14156_s11 }
 0x295   : > { %v8758_v23 = vpop.permute.xlu0 %2164  ;;  %v8760_v24 = vpop.permute.xlu1 %1458 }
 0x296   : > { %14188 = vst [vmem:[#allocation36_spill] sm:$0xff] %v8758_v23  ;;  %14189 = vst [vmem:[#allocation37_spill] sm:$0xff] %v8760_v24 }
 0x297   : > { %1204 = vrot.lane.b32.xlu0 %v8692_v3, %s14156_s11  ;;  %1958 = vrot.lane.b32.xlu1 %v8680_v61, %s14157_s20 }
 0x299   : > { %v8769_v26 = vpop.permute.xlu0 %1460  ;;  %v1571_v27 = vpop.permute.xlu1 %1570 }
 0x29a   : > { %14190 = vst [vmem:[#allocation38_spill] sm:$0xff] %v8769_v26  ;;  %v1578_v1 = vsel %vm557_vm9, %v8608_v43, %v1571_v27  ;;  %v1582_v37 = vsel %vm557_vm9, %v1571_v27, %v8608_v43 }
 0x29b   : > { %1960 = vrot.lane.b32.xlu0 %v8692_v3, %s14157_s20  ;;  %1254 = vrot.lane.b32.xlu1 %v8680_v61, %s14158_s12  ;;  %v1599_v39 = vmul.f32 %v8776_v28, %v1578_v1  ;;  %v1598_v23 = vmul.f32 %v8790_v35, %v1582_v37 }
 0x29d   : > { %v1573_v30 = vpop.permute.xlu0 %1572  ;;  %v8781_v0 = vpop.permute.xlu1 %1622 }
 0x29e   : > { %v1583_v31 = vsel %vm557_vm9, %v1573_v30, %v8614_v44  ;;  %v1579_v33 = vsel %vm557_vm9, %v8614_v44, %v1573_v30 }
 0x29f   : > { %1256 = vrot.lane.b32.xlu0 %v8692_v3, %s14158_s12  ;;  %2010 = vrot.lane.b32.xlu1 %v8680_v61, %s14159_s28  ;;  %v1601_v58 = vmul.f32 %v8776_v28, %v1579_v33  ;;  %v1600_v62 = vmul.f32 %v8790_v35, %v1583_v31 }
 0x2a1   : > { %v8802_v44 = vpop.permute.xlu0 %1624  ;;  %v8804_v25 = vpop.permute.xlu1 %1674  ;;  %v7181_v30 = vpack.c.bf16 %v1601_v58, %v1599_v39  ;;  %v7183_v43 = vpack.c.bf16 %v1600_v62, %v1598_v23  ;;  %v1170_v39 = vld [vmem:[%s13813_s1] ss:$8 sm:$0x3] }
 0x2a3   : > { %2012 = vrot.lane.b32.xlu0 %v8692_v3, %s14159_s28  ;;  %1306 = vrot.lane.b32.xlu1 %v8680_v61, %s14160_s27 }
 0x2a4   : > { %7182 = vmatprep.subr.bf16.mxu1 %v7181_v30  ;;  %v8841_v30 = vrot.slane %v1170_v39, %v8199_v11 }
 0x2a5   : > { %v8811_v27 = vpop.permute.xlu0 %1676  ;;  %v8813_v1 = vpop.permute.xlu1 %1726  ;;  %7184 = vmatpush1.bf16.msra.mxu1 %v7183_v43  ;;  %v8844_v43 = vrot.slane %v1170_v39, %v8201_v12 }
 0x2a6   : > { %14191 = vst [vmem:[#allocation39_spill] sm:$0xff] %v8841_v30 }
 0x2a7   : > { %1308 = vrot.lane.b32.xlu0 %v8692_v3, %s14160_s27  ;;  %2062 = vrot.lane.b32.xlu1 %v8680_v61, %s14161_s0  ;;  %14192 = vst [vmem:[#allocation40_spill] sm:$0xff] %v8844_v43 }
 0x2a9   : > { %v8819_v31 = vpop.permute.xlu0 %1728  ;;  %v8821_v33 = vpop.permute.xlu1 %1806 }
 0x2ab   : > { %2064 = vrot.lane.b32.xlu0 %v8692_v3, %s14161_s0  ;;  %1358 = vrot.lane.b32.xlu1 %v8680_v61, %s14162_s2 }
 0x2ad   : > { %v8827_v23 = vpop.permute.xlu0 %1808  ;;  %v8829_v37 = vpop.permute.xlu1 %1858 }
 0x2af   : > { %1360 = vrot.lane.b32.xlu0 %v8692_v3, %s14162_s2  ;;  %2114 = vrot.lane.b32.xlu1 %v8680_v61, %s14163_s3 }
 0x2b1   : > { %v8838_v58 = vpop.permute.xlu0 %1860  ;;  %v1155_v62 = vpop.permute.xlu1 %1154 }
 0x2b2   : > { %v1162_v22 = vsel %vm366_vm2, %v8656_v55, %v1155_v62  ;;  %v1166_v18 = vsel %vm366_vm2, %v1155_v62, %v8656_v55 }
 0x2b3   : > { %2116 = vrot.lane.b32.xlu0 %v8692_v3, %s14163_s3  ;;  %1410 = vrot.lane.b32.xlu1 %v8680_v61, %s14164_s22  ;;  %v1182_v26 = vmul.f32 %v8841_v30, %v1166_v18  ;;  %v1183_v24 = vmul.f32 %v8844_v43, %v1162_v22  ;;  %v1130_v18 = vadd.f32 %v8482_v34, %v8600_v41 }
 0x2b5   : > { %v1157_v19 = vpop.permute.xlu0 %1156  ;;  %v8856_v15 = vpop.permute.xlu1 %1910 }
 0x2b6   : > { %14193 = vst [vmem:[#allocation41_spill] sm:$0xff] %v8856_v15  ;;  %v1163_v39 = vsel %vm366_vm2, %v8662_v56, %v1157_v19  ;;  %v1167_v14 = vsel %vm366_vm2, %v1157_v19, %v8662_v56 }
 0x2b7   : > { %v1184_v55 = vmul.f32 %v8841_v30, %v1167_v14  ;;  %v1185_v62 = vmul.f32 %v8844_v43, %v1163_v39  ;;  %1412 = vrot.lane.b32.xlu0 %v8692_v3, %s14164_s22  ;;  %2166 = vrot.lane.b32.xlu1 %v8680_v61, %s14165_s15  ;;  %v1136_v14 = vadd.f32 %v8490_v36, %v8606_v42 }
 0x2b9   : > { %v7119_v20 = vpack.c.bf16 %v1184_v55, %v1182_v26  ;;  %v8872_v21 = vpop.permute.xlu0 %1912  ;;  %v8874_v17 = vpop.permute.xlu1 %1206  ;;  %v7117_v56 = vpack.c.bf16 %v1185_v62, %v1183_v24  ;;  %v8888_v26 = vmax.f32 %v1130_v18, 0.0  ;;  %v8894_v34 = vmax.f32 %v1136_v14, 0.0 }
 0x2ba   : > { %14194 = vst [vmem:[#allocation42_spill] sm:$0xff] %v8874_v17  ;;  %v2423_v17 = vld [vmem:[%s14222_s4 + $0x8] sm:$0xff] }
 0x2bb   : > { %2168 = vrot.lane.b32.xlu0 %v8692_v3, %s14165_s15  ;;  %1462 = vrot.lane.b32.xlu1 %v8680_v61, %s14166_s19 }
 0x2bc   : > { %7118 = vmatprep.subr.bf16.mxu0 %v7117_v56  ;;  %2751 = vmatprep.mubr.f32.mxu0 %v2423_v17  ;;  %v6994_v17 = vld [vmem:[%s13813_s1 + $0x21] ss:$8 sm:$0x3] }
 0x2bd   : > { %7120 = vmatpush1.bf16.msra.mxu0 %v7119_v20  ;;  %v8884_v19 = vpop.permute.xlu0 %1208  ;;  %v8886_v22 = vpop.permute.xlu1 %1962 }
 0x2be   : > { %14195 = vst [vmem:[#allocation43_spill] sm:$0xff] %v8884_v19  ;;  %14196 = vst [vmem:[#allocation44_spill] sm:$0xff] %v8886_v22  ;;  %v6993_v22 = vld [vmem:[%s13813_s1 + $0x20] ss:$8 sm:$0x3] }
 0x2bf   : > { %1464 = vrot.lane.b32.xlu0 %v8692_v3, %s14166_s19  ;;  %1574 = vrot.lane.b32.xlu1 %v8888_v26, %s14167_s24 }
 0x2c1   : > { %v8896_v41 = vpop.permute.xlu0 %1964  ;;  %v8898_v24 = vpop.permute.xlu1 %1258 }
 0x2c2   : > { %14197 = vst [vmem:[#allocation45_spill] sm:$0xff] %v8896_v41  ;;  %14198 = vst [vmem:[#allocation46_spill] sm:$0xff] %v8898_v24 }
 0x2c3   : > { %1576 = vrot.lane.b32.xlu0 %v8894_v34, %s14167_s24  ;;  %1626 = vrot.lane.b32.xlu1 %v8888_v26, %s14168_s13 }
 0x2c5   : > { %v8904_v36 = vpop.permute.xlu0 %1260  ;;  %v8906_v42 = vpop.permute.xlu1 %2014 }
 0x2c6   : > { %14199 = vst [vmem:[#allocation47_spill] sm:$0xff] %v8904_v36  ;;  %14200 = vst [vmem:[#allocation48_spill] sm:$0xff] %v8906_v42 }
 0x2c7   : > { %1628 = vrot.lane.b32.xlu0 %v8894_v34, %s14168_s13  ;;  %1678 = vrot.lane.b32.xlu1 %v8888_v26, %s14150_s30 }
 0x2c9   : > { %v8912_v20 = vpop.permute.xlu0 %2016  ;;  %v8914_v39 = vpop.permute.xlu1 %1310 }
 0x2ca   : > { %14201 = vst [vmem:[#allocation49_spill] sm:$0xff] %v8912_v20  ;;  %14202 = vst [vmem:[#allocation50_spill] sm:$0xff] %v8914_v39 }
 0x2cb   : > { %1680 = vrot.lane.b32.xlu0 %v8894_v34, %s14150_s30  ;;  %1730 = vrot.lane.b32.xlu1 %v8888_v26, %s14151_s21 }
 0x2cd   : > { %v8920_v55 = vpop.permute.xlu0 %1312  ;;  %v8922_v62 = vpop.permute.xlu1 %2066 }
 0x2ce   : > { %14203 = vst [vmem:[#allocation51_spill] sm:$0xff] %v8920_v55  ;;  %14204 = vst [vmem:[#allocation52_spill] sm:$0xff] %v8922_v62 }
 0x2cf   : > { %1732 = vrot.lane.b32.xlu0 %v8894_v34, %s14151_s21  ;;  %1810 = vrot.lane.b32.xlu1 %v8888_v26, %s14152_s18 }
 0x2d1   : > { %v8928_v56 = vpop.permute.xlu0 %2068  ;;  %v8930_v18 = vpop.permute.xlu1 %1362 }
 0x2d2   : > { %14205 = vst [vmem:[#allocation53_spill] sm:$0xff] %v8928_v56  ;;  %14206 = vst [vmem:[#allocation54_spill] sm:$0xff] %v8930_v18 }
 0x2d3   : > { %1812 = vrot.lane.b32.xlu0 %v8894_v34, %s14152_s18  ;;  %1862 = vrot.lane.b32.xlu1 %v8888_v26, %s14153_s25 }
 0x2d5   : > { %v8936_v14 = vpop.permute.xlu0 %1364  ;;  %v8938_v16 = vpop.permute.xlu1 %2118 }
 0x2d6   : > { %14207 = vst [vmem:[#allocation55_spill] sm:$0xff] %v8936_v14  ;;  %14208 = vst [vmem:[#allocation56_spill] sm:$0xff] %v8938_v16 }
 0x2d7   : > { %1864 = vrot.lane.b32.xlu0 %v8894_v34, %s14153_s25  ;;  %1158 = vrot.lane.b32.xlu1 %v8888_v26, %s14154_s26 }
 0x2d9   : > { %v8944_v62 = vpop.permute.xlu0 %2120  ;;  %v8946_v56 = vpop.permute.xlu1 %1414 }
 0x2da   : > { %14209 = vst [vmem:[#allocation57_spill] sm:$0xff] %v8944_v62  ;;  %14210 = vst [vmem:[#allocation58_spill] sm:$0xff] %v8946_v56 }
 0x2db   : > { %1160 = vrot.lane.b32.xlu0 %v8894_v34, %s14154_s26  ;;  %1914 = vrot.lane.b32.xlu1 %v8888_v26, %s14155_s29 }
 0x2dd   : > { %v8952_v18 = vpop.permute.xlu0 %1416  ;;  %v8954_v14 = vpop.permute.xlu1 %2170 }
 0x2de   : > { %14211 = vst [vmem:[#allocation59_spill] sm:$0xff] %v8952_v18  ;;  %14212 = vst [vmem:[#allocation60_spill] sm:$0xff] %v8954_v14 }
 0x2df   : > { %1916 = vrot.lane.b32.xlu0 %v8894_v34, %s14155_s29  ;;  %1210 = vrot.lane.b32.xlu1 %v8888_v26, %s14156_s11 }
 0x2e1   : > { %v8960_v16 = vpop.permute.xlu0 %2172  ;;  %v8962_v62 = vpop.permute.xlu1 %1466 }
 0x2e2   : > { %14213 = vst [vmem:[#allocation61_spill] sm:$0xff] %v8960_v16  ;;  %14214 = vst [vmem:[#allocation62_spill] sm:$0xff] %v8962_v62 }
 0x2e3   : > { %1212 = vrot.lane.b32.xlu0 %v8894_v34, %s14156_s11  ;;  %1966 = vrot.lane.b32.xlu1 %v8888_v26, %s14157_s20 }
 0x2e5   : > { %v8968_v56 = vpop.permute.xlu0 %1468  ;;  %v8970_v18 = vpop.permute.xlu1 %1566 }
 0x2e6   : > { %14215 = vst [vmem:[#allocation63_spill] sm:$0xff] %v8968_v56 }
 0x2e7   : > { %1968 = vrot.lane.b32.xlu0 %v8894_v34, %s14157_s20  ;;  %1262 = vrot.lane.b32.xlu1 %v8888_v26, %s14158_s12 }
 0x2e9   : > { %v8976_v14 = vpop.permute.xlu0 %1568  ;;  %v8978_v16 = vpop.permute.xlu1 %1618 }
 0x2eb   : > { %1264 = vrot.lane.b32.xlu0 %v8894_v34, %s14158_s12  ;;  %2018 = vrot.lane.b32.xlu1 %v8888_v26, %s14159_s28 }
 0x2ed   : > { %v8984_v62 = vpop.permute.xlu0 %1620  ;;  %v8986_v56 = vpop.permute.xlu1 %1670 }
 0x2ee   : > { %14216 = vst [vmem:[#allocation64_spill] sm:$0xff] %v8986_v56 }
 0x2ef   : > { %2020 = vrot.lane.b32.xlu0 %v8894_v34, %s14159_s28  ;;  %1314 = vrot.lane.b32.xlu1 %v8888_v26, %s14160_s27 }
 0x2f1   : > { %v8992_v55 = vpop.permute.xlu0 %1672  ;;  %v8994_v13 = vpop.permute.xlu1 %1722 }
 0x2f2   : > { %14217 = vst [vmem:[#allocation65_spill] sm:$0xff] %v8994_v13 }
 0x2f3   : > { %1316 = vrot.lane.b32.xlu0 %v8894_v34, %s14160_s27  ;;  %2070 = vrot.lane.b32.xlu1 %v8888_v26, %s14161_s0 }
 0x2f5   : > { %v9000_v39 = vpop.permute.xlu0 %1724  ;;  %v9002_v9 = vpop.permute.xlu1 %1802 }
 0x2f6   : > { %14218 = vst [vmem:[#allocation66_spill] sm:$0xff] %v9000_v39  ;;  %14219 = vst [vmem:[#allocation67_spill] sm:$0xff] %v9002_v9  ;;  %v6990_v39 = vld [vmem:[%s13813_s1 + $0x15] ss:$8 sm:$0x3] }
 0x2f7   : > { %2072 = vrot.lane.b32.xlu0 %v8894_v34, %s14161_s0  ;;  %1366 = vrot.lane.b32.xlu1 %v8888_v26, %s14162_s2 }
 0x2f9   : > { %v9008_v8 = vpop.permute.xlu0 %1804  ;;  %v9010_v20 = vpop.permute.xlu1 %1854 }
 0x2fa   : > { %14220 = vst [vmem:[#allocation68_spill] sm:$0xff] %v9008_v8  ;;  %14221 = vst [vmem:[#allocation69_spill] sm:$0xff] %v9010_v20 }
 0x2fb   : > { %1368 = vrot.lane.b32.xlu0 %v8894_v34, %s14162_s2  ;;  %2122 = vrot.lane.b32.xlu1 %v8888_v26, %s14163_s3 }
 0x2fd   : > { %v9019_v9 = vpop.permute.xlu0 %1856  ;;  %v9021_v42 = vpop.permute.xlu1 %1150 }
 0x2fe   : > { %14223 = vst [vmem:[#allocation70_spill] sm:$0xff] %v9019_v9  ;;  %14224 = vst [vmem:[#allocation71_spill] sm:$0xff] %v9021_v42  ;;  %v6987_v42 = vld [vmem:[%s13813_s1 + $0x12] ss:$8 sm:$0x3] }
 0x2ff   : > { %2124 = vrot.lane.b32.xlu0 %v8894_v34, %s14163_s3  ;;  %1418 = vrot.lane.b32.xlu1 %v8888_v26, %s14164_s22 }
 0x301   : > { %v9027_v20 = vpop.permute.xlu0 %1152  ;;  %v9029_v8 = vpop.permute.xlu1 %1906 }
 0x302   : > { %14225 = vst [vmem:[#allocation72_spill] sm:$0xff] %v9027_v20  ;;  %14226 = vst [vmem:[#allocation73_spill] sm:$0xff] %v9029_v8 }
 0x303   : > { %1420 = vrot.lane.b32.xlu0 %v8894_v34, %s14164_s22  ;;  %2174 = vrot.lane.b32.xlu1 %v8888_v26, %s14165_s15 }
 0x305   : > { %v9035_v7 = vpop.permute.xlu0 %1908  ;;  %v9037_v9 = vpop.permute.xlu1 %1202 }
 0x306   : > { %14227 = vst [vmem:[#allocation74_spill] sm:$0xff] %v9035_v7  ;;  %14228 = vst [vmem:[#allocation75_spill] sm:$0xff] %v9037_v9 }
 0x307   : > { %2176 = vrot.lane.b32.xlu0 %v8894_v34, %s14165_s15  ;;  %1470 = vrot.lane.b32.xlu1 %v8888_v26, %s14166_s19 }
 0x309   : > { %v9043_v6 = vpop.permute.xlu0 %1204  ;;  %v9045_v36 = vpop.permute.xlu1 %1958 }
 0x30a   : > { %14229 = vst [vmem:[#allocation76_spill] sm:$0xff] %v9043_v6  ;;  %14230 = vst [vmem:[#allocation77_spill] sm:$0xff] %v9045_v36 }
 0x30b   : > { %1472 = vrot.lane.b32.xlu0 %v8894_v34, %s14166_s19  ;;  %2214 = vrot.lane.b32.xlu1 %v8474_v29, %s14231_s10 }
 0x30d   : > { %v9051_v8 = vpop.permute.xlu0 %1960  ;;  %v9053_v7 = vpop.permute.xlu1 %1254 }
 0x30e   : > { %14232 = vst [vmem:[#allocation78_spill] sm:$0xff] %v9051_v8  ;;  %14233 = vst [vmem:[#allocation79_spill] sm:$0xff] %v9053_v7 }
 0x30f   : > { %2216 = vrot.lane.b32.xlu0 %v8478_v32, %s14231_s10  ;;  %2222 = vrot.lane.b32.xlu1 %v8560_v38, %s14231_s10 }
 0x311   : > { %v9059_v9 = vpop.permute.xlu0 %1256  ;;  %v9061_v6 = vpop.permute.xlu1 %2010 }
 0x312   : > { %14234 = vst [vmem:[#allocation80_spill] sm:$0xff] %v9059_v9  ;;  %14235 = vst [vmem:[#allocation81_spill] sm:$0xff] %v9061_v6 }
 0x313   : > { %2224 = vrot.lane.b32.xlu0 %v8566_v40, %s14231_s10  ;;  %1510 = vrot.lane.b32.xlu1 %v8474_v29, %s14236_s16 }
 0x315   : > { %v9067_v36 = vpop.permute.xlu0 %2012  ;;  %v9069_v8 = vpop.permute.xlu1 %1306 }
 0x316   : > { %14237 = vst [vmem:[#allocation82_spill] sm:$0xff] %v9067_v36  ;;  %14238 = vst [vmem:[#allocation83_spill] sm:$0xff] %v9069_v8  ;;  %v6989_v8 = vld [vmem:[%s13813_s1 + $0x14] ss:$8 sm:$0x3] }
 0x317   : > { %1512 = vrot.lane.b32.xlu0 %v8478_v32, %s14236_s16  ;;  %1518 = vrot.lane.b32.xlu1 %v8560_v38, %s14236_s16  ;;  %v1779_v43 = vrot.slane %v6989_v8, %v8201_v12 }
 0x319   : > { %v9075_v7 = vpop.permute.xlu0 %1308  ;;  %v9077_v9 = vpop.permute.xlu1 %2062  ;;  %v9130_v13 = vmul.f32 %v1779_v43, %v8560_v38  ;;  %v9136_v41 = vmul.f32 %v1779_v43, %v8888_v26 }
 0x31a   : > { %14239 = vst [vmem:[#allocation84_spill] sm:$0xff] %v9075_v7  ;;  %14240 = vst [vmem:[#allocation85_spill] sm:$0xff] %v9077_v9 }
 0x31b   : > { %1520 = vrot.lane.b32.xlu0 %v8566_v40, %s14236_s16  ;;  %2218 = vrot.lane.b32.xlu1 %v8680_v61, %s14231_s10  ;;  %14251 = vst [vmem:[#allocation96_spill] sm:$0xff] %v9130_v13  ;;  %14253 = vst [vmem:[#allocation98_spill] sm:$0xff] %v9136_v41  ;;  %v9195_v41 = vrot.slane %v6990_v39, %v8201_v12  ;;  %v6980_v13 = vld [vmem:[%s13813_s1 + $0x3] ss:$8 sm:$0x3] }
 0x31d   : > { %v9083_v6 = vpop.permute.xlu0 %2064  ;;  %v9085_v36 = vpop.permute.xlu1 %1358 }
 0x31e   : > { %14241 = vst [vmem:[#allocation86_spill] sm:$0xff] %v9083_v6  ;;  %14242 = vst [vmem:[#allocation87_spill] sm:$0xff] %v9085_v36  ;;  %v1775_v6 = vrot.slane %v6989_v8, %v8199_v11  ;;  %v9105_v36 = vmul.f32 %v1779_v43, %v8566_v40  ;;  %v6986_v8 = vld [vmem:[%s13813_s1 + $0x11] ss:$8 sm:$0x3] }
 0x31f   : > { %2220 = vrot.lane.b32.xlu0 %v8692_v3, %s14231_s10  ;;  %2226 = vrot.lane.b32.xlu1 %v8888_v26, %s14231_s10  ;;  %v9166_v56 = vrot.slane %v6986_v8, %v8199_v11  ;;  %v9169_v19 = vrot.slane %v6986_v8, %v8201_v12  ;;  %v9186_v8 = vrot.slane %v6988_v5, %v8199_v11 }
 0x320   : > { %14245 = vst [vmem:[#allocation90_spill] sm:$0xff] %v9105_v36  ;;  %v9108_v30 = vmul.f32 %v1775_v6, %v8478_v32  ;;  %v9133_v4 = vmul.f32 %v1775_v6, %v8474_v29  ;;  %v9226_v36 = vrot.slane %v6978_v60, %v8201_v12 }
 0x321   : > { %v9094_v9 = vpop.permute.xlu0 %1360  ;;  %v9096_v7 = vpop.permute.xlu1 %2114 }
 0x322   : > { %14243 = vst [vmem:[#allocation88_spill] sm:$0xff] %v9094_v9  ;;  %14244 = vst [vmem:[#allocation89_spill] sm:$0xff] %v9096_v7  ;;  %v9111_v9 = vmul.f32 %v1779_v43, %v8894_v34  ;;  %v9114_v7 = vmul.f32 %v1775_v6, %v8692_v3  ;;  %v9175_v43 = vrot.slane %v6987_v42, %v8201_v12 }
 0x323   : > { %2228 = vrot.lane.b32.xlu0 %v8894_v34, %s14231_s10  ;;  %1514 = vrot.lane.b32.xlu1 %v8680_v61, %s14236_s16  ;;  %14246 = vst [vmem:[#allocation91_spill] sm:$0xff] %v9108_v30  ;;  %14252 = vst [vmem:[#allocation97_spill] sm:$0xff] %v9133_v4  ;;  %v9212_v30 = vrot.slane %v6992_v2, %v8199_v11  ;;  %s14580_s10 = smov 94  }
 0x324   : > { %14247 = vst [vmem:[#allocation92_spill] sm:$0xff] %v9111_v9  ;;  %14248 = vst [vmem:[#allocation93_spill] sm:$0xff] %v9114_v7  ;;  %v9189_v7 = vrot.slane %v6988_v5, %v8201_v12  ;;  %v6979_v9 = vld [vmem:[%s13813_s1 + $0x2] ss:$8 sm:$0x3] }
 0x325   : > { %v9119_v20 = vpop.permute.xlu0 %2116  ;;  %v9127_v24 = vpop.permute.xlu1 %1410  ;;  %14257 = vst [vmem:[#allocation102_spill] sm:$0xff] %v9212_v30  ;;  %14260 = vst [vmem:[#allocation105_spill] sm:$0xff] %v9226_v36  ;;  %v9232_v30 = vrot.slane %v6993_v22, %v8201_v12  ;;  %v9246_v36 = vrot.slane %v6979_v9, %v8201_v12 }
 0x326   : > { %14249 = vst [vmem:[#allocation94_spill] sm:$0xff] %v9119_v20  ;;  %14250 = vst [vmem:[#allocation95_spill] sm:$0xff] %v9127_v24  ;;  %v9139_v20 = vmul.f32 %v1775_v6, %v8680_v61  ;;  %v6991_v24 = vld [vmem:[%s13813_s1 + $0x16] ss:$8 sm:$0x3]  ;;  %v9172_v6 = vrot.slane %v6987_v42, %v8199_v11  ;;  %v9192_v42 = vrot.slane %v6990_v39, %v8199_v11 }
 0x327   : > { %1516 = vrot.lane.b32.xlu0 %v8692_v3, %s14236_s16  ;;  %1522 = vrot.lane.b32.xlu1 %v8888_v26, %s14236_s16  ;;  %v9206_v4 = vrot.slane %v6991_v24, %v8199_v11  ;;  %v9209_v5 = vrot.slane %v6991_v24, %v8201_v12  ;;  %v9215_v39 = vrot.slane %v6992_v2, %v8201_v12  ;;  %v6995_v2 = vld [vmem:[%s13813_s1 + $0x22] ss:$8 sm:$0x3] }
 0x328   : > { %14254 = vst [vmem:[#allocation99_spill] sm:$0xff] %v9139_v20  ;;  %v9229_v24 = vrot.slane %v6993_v22, %v8199_v11  ;;  %14262 = vst [vmem:[#allocation107_spill] sm:$0xff] %v9232_v30  ;;  %v9249_v22 = vrot.slane %v6994_v17, %v8199_v11  ;;  %v9252_v30 = vrot.slane %v6994_v17, %v8201_v12 }
 0x329   : > { %v9183_v20 = vpop.permute.xlu0 %1412  ;;  %14258 = vst [vmem:[#allocation103_spill] sm:$0xff] %v9215_v39  ;;  %v6981_v39 = vld [vmem:[%s13813_s1 + $0x4] ss:$8 sm:$0x3]  ;;  %14265 = vst [vmem:[#allocation109_spill] sm:$0xff] %v9246_v36  ;;  %v9271_v17 = vrot.slane %v6980_v13, %v8201_v12  ;;  %v9279_v36 = vrot.slane %v6995_v2, %v8201_v12 }
 0x32a   : > { %14255 = vst [vmem:[#allocation100_spill] sm:$0xff] %v9183_v20  ;;  %v9203_v20 = vpop.permute.xlu1 %2166  ;;  %14261 = vst [vmem:[#allocation106_spill] sm:$0xff] %v9229_v24  ;;  %v6982_v24 = vld [vmem:[%s13813_s1 + $0x5] ss:$8 sm:$0x3]  ;;  %v9282_v63 = vrot.slane %v6981_v39, %v8199_v11  ;;  %v9285_v15 = vrot.slane %v6981_v39, %v8201_v12  ;;  %v1686_v39 = vsel %vm605_vm11, %v8804_v25, %v8624_v47 }
 0x32b   : > { %14256 = vst [vmem:[#allocation101_spill] sm:$0xff] %v9203_v20  ;;  %1524 = vrot.lane.b32.xlu0 %v8894_v34, %s14236_s16  ;;  %v9223_v20 = vrot.slane %v6978_v60, %v8199_v11  ;;  %2266 = vrot.lane.b32.xlu1 %v8474_v29, %s14263_s17  ;;  %v9243_v60 = vrot.slane %v6979_v9, %v8199_v11  ;;  %14266 = vst [vmem:[#allocation110_spill] sm:$0xff] %v9249_v22 }
 0x32c   : > { %14267 = vst [vmem:[#allocation111_spill] sm:$0xff] %v9252_v30  ;;  %v1635_v9 = vsel %vm581_vm10, %v8802_v44, %v8622_v46  ;;  %v9268_v22 = vrot.slane %v6980_v13, %v8199_v11  ;;  %14269 = vst [vmem:[#allocation113_spill] sm:$0xff] %v9271_v17  ;;  %v1630_v13 = vsel %vm581_vm10, %v8616_v45, %v8781_v0 }
 0x32d   : > { %14259 = vst [vmem:[#allocation104_spill] sm:$0xff] %v9223_v20  ;;  %14264 = vst [vmem:[#allocation108_spill] sm:$0xff] %v9243_v60  ;;  %v9257_v20 = vpop.permute.xlu0 %2168  ;;  %v1631_v60 = vsel %vm581_vm10, %v8622_v46, %v8802_v44  ;;  %v6983_v46 = vld [vmem:[%s13813_s1 + $0x6] ss:$8 sm:$0x3]  ;;  %v1634_v44 = vsel %vm581_vm10, %v8781_v0, %v8616_v45  ;;  %v1683_v45 = vsel %vm605_vm11, %v8630_v48, %v8811_v27 }
 0x32e   : > { %14268 = vst [vmem:[#allocation112_spill] sm:$0xff] %v9257_v20  ;;  %v9273_v30 = vpop.permute.xlu1 %1462  ;;  %v9276_v20 = vrot.slane %v6995_v2, %v8199_v11  ;;  %14272 = vst [vmem:[#allocation116_spill] sm:$0xff] %v9279_v36  ;;  %v9305_v2 = vrot.slane %v6982_v24, %v8199_v11  ;;  %v9313_v36 = vmul.f32 %v9169_v19, %v1631_v60 }
 0x32f   : > { %14270 = vst [vmem:[#allocation114_spill] sm:$0xff] %v9273_v30  ;;  %14273 = vst [vmem:[#allocation117_spill] sm:$0xff] %v9282_v63  ;;  %2268 = vrot.lane.b32.xlu0 %v8478_v32, %s14263_s17  ;;  %2274 = vrot.lane.b32.xlu1 %v8560_v38, %s14263_s17  ;;  %v1687_v0 = vsel %vm605_vm11, %v8811_v27, %v8630_v48  ;;  %v9330_v60 = vrot.slane %v6982_v24, %v8201_v12 }
 0x330   : > { %14271 = vst [vmem:[#allocation115_spill] sm:$0xff] %v9276_v20  ;;  %14274 = vst [vmem:[#allocation118_spill] sm:$0xff] %v9285_v15  ;;  %v9310_v20 = vmul.f32 %v9166_v56, %v1635_v9  ;;  %v1682_v9 = vsel %vm605_vm11, %v8624_v47, %v8804_v25  ;;  %v9336_v15 = vrot.slane %v6983_v46, %v8201_v12 }
 0x331   : > { %14275 = vst [vmem:[#allocation119_spill] sm:$0xff] %v9305_v2  ;;  %v9323_v30 = vpop.permute.xlu0 %1464  ;;  %14277 = vst [vmem:[#allocation121_spill] sm:$0xff] %v9330_v60  ;;  %v9333_v2 = vrot.slane %v6983_v46, %v8199_v11  ;;  %v9339_v17 = vmul.f32 %v9166_v56, %v1634_v44  ;;  %v1651_v48 = vmul.f32 %v9169_v19, %v1630_v13 }
 0x332   : > { %14276 = vst [vmem:[#allocation120_spill] sm:$0xff] %v9323_v30  ;;  %14279 = vst [vmem:[#allocation123_spill] sm:$0xff] %v9336_v15  ;;  %v1575_v63 = vpop.permute.xlu1 %1574  ;;  %v9343_v27 = vmul.f32 %v9172_v6, %v1686_v39  ;;  %v1738_v47 = vsel %vm14013_vm12, %v8813_v1, %v8632_v49  ;;  %v9352_v25 = vmul.f32 %v9172_v6, %v1687_v0 }
 0x333   : > { %14278 = vst [vmem:[#allocation122_spill] sm:$0xff] %v9333_v2  ;;  %2276 = vrot.lane.b32.xlu0 %v8566_v40, %s14263_s17  ;;  %v9355_v24 = vmul.f32 %v9175_v43, %v1683_v45  ;;  %v1580_v46 = vsel %vm557_vm9, %v8970_v18, %v1575_v63  ;;  %v1584_v13 = vsel %vm557_vm9, %v1575_v63, %v8970_v18 }
 0x334   : > { %2270 = vrot.lane.b32.xlu1 %v8680_v61, %s14263_s17  ;;  %v9366_v44 = vmul.f32 %v9175_v43, %v1682_v9  ;;  %v1734_v39 = vsel %vm14013_vm12, %v8632_v49, %v8813_v1  ;;  %v7189_v0 = vpack.c.bf16 %v9313_v36, %v1651_v48  ;;  %v7191_v12 = vpack.c.bf16 %v9310_v20, %v9339_v17 }
 0x335   : > { %v1577_v45 = vpop.permute.xlu0 %1576  ;;  %v9376_v11 = vmul.f32 %v9186_v8, %v1738_v47  ;;  %v1739_v63 = vsel %vm14013_vm12, %v8819_v31, %v8638_v50  ;;  %v1602_v36 = vmul.f32 %v8790_v35, %v1584_v13  ;;  %v1603_v20 = vmul.f32 %v8776_v28, %v1580_v46  ;;  %v14289_v47 = vld [vmem:[#allocation17_spill] sm:$0xff] }
 0x336   : > { %v1581_v18 = vsel %vm557_vm9, %v8976_v14, %v1577_v45  ;;  %v1585_v49 = vsel %vm557_vm9, %v1577_v45, %v8976_v14  ;;  %v1627_v1 = vpop.permute.xlu1 %1626  ;;  %v9395_v48 = vmul.f32 %v9189_v7, %v1734_v39  ;;  %v1735_v14 = vsel %vm14013_vm12, %v8638_v50, %v8819_v31 }
 0x337   : > { %v1604_v17 = vmul.f32 %v8790_v35, %v1585_v49  ;;  %v1605_v9 = vmul.f32 %v8776_v28, %v1581_v18  ;;  %2272 = vrot.lane.b32.xlu0 %v8692_v3, %s14263_s17  ;;  %v1814_v35 = vsel %vm670_vm13, %v8640_v51, %v8821_v33  ;;  %v1819_v46 = vsel %vm670_vm13, %v8827_v23, %v8646_v52 }
 0x338   : > { %2278 = vrot.lane.b32.xlu1 %v8888_v26, %s14263_s17  ;;  %v9416_v39 = vmul.f32 %v9186_v8, %v1739_v63  ;;  %v1818_v45 = vsel %vm670_vm13, %v8821_v33, %v8640_v51  ;;  %v1815_v18 = vsel %vm670_vm13, %v8646_v52, %v8827_v23  ;;  %v1867_v63 = vsel %vm14015_vm14, %v8654_v54, %v8838_v58 }
 0x339   : > { %v1629_v50 = vpop.permute.xlu0 %1628  ;;  %v7185_v31 = vpack.c.bf16 %v1605_v9, %v1603_v20  ;;  %v7187_v13 = vpack.c.bf16 %v1604_v17, %v1602_v36  ;;  %v9432_v36 = vmul.f32 %v9189_v7, %v1735_v14  ;;  %v1871_v51 = vsel %vm14015_vm14, %v8838_v58, %v8654_v54 }
 0x33a   : > { %v1633_v49 = vsel %vm581_vm10, %v8984_v62, %v1629_v50  ;;  %v9429_v28 = vpop.permute.xlu1 %1678  ;;  %v1632_v52 = vsel %vm581_vm10, %v8978_v16, %v1627_v1  ;;  %v9448_v33 = vmul.f32 %v9195_v41, %v1819_v46  ;;  %v1637_v23 = vsel %vm581_vm10, %v1629_v50, %v8984_v62 }
 0x33b   : > { %2280 = vrot.lane.b32.xlu0 %v8894_v34, %s14263_s17  ;;  %v1657_v20 = vmul.f32 %v9169_v19, %v1633_v49  ;;  %7186 = vmatprep.subr.bf16.mxu1 %v7185_v31  ;;  %v9457_v54 = vmul.f32 %v9195_v41, %v1818_v45  ;;  %v9460_v58 = vmul.f32 %v9192_v42, %v1815_v18  ;;  %s14540_s17 = smov 96  }
 0x33c   : > { %2318 = vrot.lane.b32.xlu1 %v8474_v29, %s14280_s8  ;;  %v1866_v17 = vsel %vm14015_vm14, %v8648_v53, %v8829_v37  ;;  %v1870_v62 = vsel %vm14015_vm14, %v8829_v37, %v8648_v53  ;;  %7188 = vmatpush1.bf16.msra.mxu1 %v7187_v13  ;;  %v9471_v14 = vmul.f32 %v9206_v4, %v1867_v63 }
 0x33d   : > { %v1681_v9 = vpop.permute.xlu0 %1680  ;;  %v9474_v46 = vmul.f32 %v9209_v5, %v1871_v51  ;;  %v1636_v50 = vsel %vm581_vm10, %v1627_v1, %v8978_v16  ;;  %v1655_v31 = vmul.f32 %v9169_v19, %v1632_v52  ;;  %7190 = vmatprep.subr.bf16.mxu1 %v7189_v0  ;;  %v9483_v18 = vmul.f32 %v9192_v42, %v1814_v35  ;;  %v14283_v52 = vld [vmem:[#allocation43_spill] sm:$0xff] }
 0x33e   : > { %v9480_v45 = vpop.permute.xlu1 %1730  ;;  %v1656_v53 = vmul.f32 %v9166_v56, %v1637_v23  ;;  %v9493_v16 = vmul.f32 %v9206_v4, %v1866_v17  ;;  %v9496_v19 = vmul.f32 %v9209_v5, %v1870_v62  ;;  %v1923_v35 = vsel %vm14016_vm15, %v8872_v21, %v8672_v59  ;;  %v14281_v23 = vld [vmem:[#allocation41_spill] sm:$0xff]  ;;  %v14285_v62 = vld [vmem:[#allocation103_spill] sm:$0xff] }
 0x33f   : > { %2320 = vrot.lane.b32.xlu0 %v8478_v32, %s14280_s8  ;;  %v7193_v0 = vpack.c.bf16 %v1657_v20, %v1655_v31  ;;  %v1654_v49 = vmul.f32 %v9166_v56, %v1636_v50  ;;  %v1685_v63 = vsel %vm605_vm11, %v8992_v55, %v1681_v9  ;;  %v1922_v20 = vsel %vm14016_vm15, %v14281_v23, %v8664_v57  ;;  %v14282_v31 = vld [vmem:[#allocation18_spill] sm:$0xff] }
 0x340   : > { %2326 = vrot.lane.b32.xlu1 %v8560_v38, %s14280_s8  ;;  %7192 = vmatpush1.bf16.msra.mxu1 %v7191_v12  ;;  %v1919_v17 = vsel %vm14016_vm15, %v8672_v59, %v8872_v21  ;;  %v1918_v50 = vsel %vm14016_vm15, %v8664_v57, %v14281_v23  ;;  %v1219_v1 = vsel %vm389_vm1, %v14283_v52, %v14282_v31  ;;  %v14284_v59 = vld [vmem:[#allocation64_spill] sm:$0xff] }
 0x341   : > { %v1733_v51 = vpop.permute.xlu0 %1732  ;;  %7194 = vmatprep.subr.bf16.mxu1 %v7193_v0  ;;  %v1684_v21 = vsel %vm605_vm11, %v14284_v59, %v9429_v28  ;;  %v7195_v0 = vpack.c.bf16 %v1656_v53, %v1654_v49  ;;  %v9541_v12 = vmul.f32 %v14285_v62, %v1923_v35  ;;  %v1215_v57 = vsel %vm389_vm1, %v14282_v31, %v14283_v52  ;;  %v14287_v53 = vld [vmem:[#allocation102_spill] sm:$0xff]  ;;  %v14292_v31 = vld [vmem:[#allocation19_spill] sm:$0xff] }
 0x342   : > { %v9520_v56 = vpop.permute.xlu1 %1810  ;;  %v1689_v23 = vsel %vm605_vm11, %v1681_v9, %v8992_v55  ;;  %v1709_v13 = vmul.f32 %v9175_v43, %v1685_v63  ;;  %v9554_v37 = vmul.f32 %v14285_v62, %v1922_v20  ;;  %v9557_v35 = vmul.f32 %v14287_v53, %v1919_v17  ;;  %v14288_v49 = vld [vmem:[#allocation42_spill] sm:$0xff]  ;;  %v14291_v20 = vld [vmem:[#allocation44_spill] sm:$0xff] }
 0x343   : > { %2328 = vrot.lane.b32.xlu0 %v8566_v40, %s14280_s8  ;;  %v1214_v52 = vsel %vm389_vm1, %v14289_v47, %v14288_v49  ;;  %v1218_v55 = vsel %vm389_vm1, %v14288_v49, %v14289_v47  ;;  %v1970_v17 = vsel %vm742_vm8, %v14292_v31, %v14291_v20  ;;  %v1688_v30 = vsel %vm605_vm11, %v9429_v28, %v14284_v59  ;;  %v14295_v49 = vld [vmem:[#allocation105_spill] sm:$0xff]  ;;  %v14296_v59 = vld [vmem:[#allocation106_spill] sm:$0xff] }
 0x344   : > { %2370 = vrot.lane.b32.xlu1 %v8474_v29, %s14286_s23  ;;  %7196 = vmatpush1.bf16.msra.mxu1 %v7195_v0  ;;  %v14290_v29 = vld [vmem:[#allocation104_spill] sm:$0xff]  ;;  %v1707_v15 = vmul.f32 %v9175_v43, %v1684_v21  ;;  %v14293_v47 = vpack.c.bf16 %v9355_v24, %v9366_v44  ;;  %v9590_v2 = vmul.f32 %v14295_v49, %v1215_v57 }
 0x345   : > { %v9567_v9 = vpop.permute.xlu0 %1812  ;;  %v9570_v63 = vmul.f32 %v14290_v29, %v1219_v1  ;;  %v9587_v1 = vmul.f32 %v14287_v53, %v1918_v50  ;;  %v1974_v60 = vsel %vm742_vm8, %v14291_v20, %v14292_v31  ;;  %v1708_v28 = vmul.f32 %v9172_v6, %v1689_v23  ;;  %v14298_v23 = vld [vmem:[#allocation66_spill] sm:$0xff] }
 0x346   : > { %7198 = vmatprep.subr.bf16.mxu1 %v14293_v47  ;;  %v9584_v0 = vpop.permute.xlu1 %1862  ;;  %v9600_v43 = vmul.f32 %v14290_v29, %v1218_v55  ;;  %v9603_v24 = vmul.f32 %v14295_v49, %v1214_v52  ;;  %v7201_v44 = vpack.c.bf16 %v1709_v13, %v1707_v15  ;;  %v9610_v21 = vmul.f32 %v14296_v59, %v1970_v17  ;;  %v14300_v13 = vld [vmem:[#allocation107_spill] sm:$0xff]  ;;  %v14303_v17 = vld [vmem:[#allocation65_spill] sm:$0xff]  ;;  %v14304_v50 = vld [vmem:[#allocation46_spill] sm:$0xff] }
 0x347   : > { %14294 = vst [vmem:[#allocation41_spill] sm:$0xff] %v9587_v1  ;;  %2372 = vrot.lane.b32.xlu0 %v8478_v32, %s14286_s23  ;;  %v1706_v57 = vmul.f32 %v9172_v6, %v1688_v30  ;;  %v1737_v32 = vsel %vm14013_vm12, %v14298_v23, %v1733_v51  ;;  %v14299_v52 = vpack.c.bf16 %v9352_v25, %v9343_v27  ;;  %v14301_v30 = vld [vmem:[#allocation45_spill] sm:$0xff]  ;;  %v14302_v6 = vld [vmem:[#allocation20_spill] sm:$0xff]  ;;  %v14306_v15 = vld [vmem:[#allocation71_spill] sm:$0xff] }
 0x348   : > { %2378 = vrot.lane.b32.xlu1 %v8560_v38, %s14286_s23  ;;  %14297 = vst [vmem:[#allocation18_spill] sm:$0xff] %v9610_v21  ;;  %v9626_v20 = vmul.f32 %v14300_v13, %v1974_v60  ;;  %v1971_v31 = vsel %vm742_vm8, %v14302_v6, %v14301_v30  ;;  %v1975_v27 = vsel %vm742_vm8, %v14301_v30, %v14302_v6  ;;  %v14305_v30 = vld [vmem:[#allocation21_spill] sm:$0xff] }
 0x349   : > { %7200 = vmatpush1.bf16.msra.mxu1 %v14299_v52  ;;  %v9619_v55 = vpop.permute.xlu0 %1864  ;;  %v1736_v47 = vsel %vm14013_vm12, %v14303_v17, %v9480_v45  ;;  %v1741_v60 = vsel %vm14013_vm12, %v1733_v51, %v14298_v23  ;;  %v7203_v52 = vpack.c.bf16 %v1708_v28, %v1706_v57  ;;  %v7125_v38 = vpack.c.bf16 %v9590_v2, %v9603_v24 }
 0x34a   : > { %7202 = vmatprep.subr.bf16.mxu1 %v7201_v44  ;;  %v1159_v25 = vpop.permute.xlu1 %1158  ;;  %v1266_v44 = vsel %vm413_vm3, %v14305_v30, %v14304_v50  ;;  %v1761_v6 = vmul.f32 %v9189_v7, %v1737_v32  ;;  %v9664_v2 = vmul.f32 %v14300_v13, %v1975_v27  ;;  %v1270_v28 = vsel %vm413_vm3, %v14304_v50, %v14305_v30  ;;  %v14311_v30 = vld [vmem:[#allocation108_spill] sm:$0xff] }
 0x34b   : > { %2380 = vrot.lane.b32.xlu0 %v8566_v40, %s14286_s23  ;;  %v1164_v1 = vsel %vm366_vm2, %v14306_v15, %v1159_v25  ;;  %v1168_v51 = vsel %vm366_vm2, %v1159_v25, %v14306_v15  ;;  %v9661_v40 = vmul.f32 %v14296_v59, %v1971_v31  ;;  %v1740_v24 = vsel %vm14013_vm12, %v9480_v45, %v14303_v17  ;;  %v14307_v15 = vld [vmem:[#allocation72_spill] sm:$0xff]  ;;  %v14309_v45 = vld [vmem:[#allocation39_spill] sm:$0xff]  ;;  %vm14332_vm12 = vmmov %vm14325_vm0 }
 0x34c   : > { %2322 = vrot.lane.b32.xlu1 %v8680_v61, %s14280_s8  ;;  %v1759_v23 = vmul.f32 %v9189_v7, %v1736_v47  ;;  %v1760_v32 = vmul.f32 %v9186_v8, %v1741_v60  ;;  %v14308_v50 = vpack.c.bf16 %v9432_v36, %v9395_v48  ;;  %v1186_v17 = vmul.f32 %v14309_v45, %v1168_v51  ;;  %v14314_v51 = vld [vmem:[#allocation48_spill] sm:$0xff] }
 0x34d   : > { %7204 = vmatpush1.bf16.msra.mxu1 %v7203_v52  ;;  %v1161_v57 = vpop.permute.xlu0 %1160  ;;  %v14310_v52 = vld [vmem:[#allocation40_spill] sm:$0xff]  ;;  %v9694_v59 = vmul.f32 %v14311_v30, %v1270_v28 }
 0x34e   : > { %v1165_v31 = vsel %vm366_vm2, %v14307_v15, %v1161_v57  ;;  %v1169_v27 = vsel %vm366_vm2, %v1161_v57, %v14307_v15  ;;  %7206 = vmatprep.subr.bf16.mxu1 %v14308_v50  ;;  %v9685_v25 = vpop.permute.xlu1 %1914  ;;  %v1187_v7 = vmul.f32 %v14310_v52, %v1164_v1  ;;  %v14312_v57 = vld [vmem:[#allocation47_spill] sm:$0xff]  ;;  %v14313_v15 = vld [vmem:[#allocation22_spill] sm:$0xff]  ;;  %v7209_v1 = vpack.c.bf16 %v1761_v6, %v1759_v23 }
 0x34f   : > { %v1188_v47 = vmul.f32 %v14309_v45, %v1169_v27  ;;  %v1189_v60 = vmul.f32 %v14310_v52, %v1165_v31  ;;  %2324 = vrot.lane.b32.xlu0 %v8692_v3, %s14280_s8  ;;  %v1267_v48 = vsel %vm413_vm3, %v14313_v15, %v14312_v57  ;;  %v1271_v36 = vsel %vm413_vm3, %v14312_v57, %v14313_v15  ;;  %v14315_v31 = vld [vmem:[#allocation23_spill] sm:$0xff]  ;;  %v14317_v15 = vld [vmem:[#allocation109_spill] sm:$0xff] }
 0x350   : > { %2330 = vrot.lane.b32.xlu1 %v8888_v26, %s14280_s8  ;;  %v2022_v28 = vsel %vm14017_vm7, %v14315_v31, %v14314_v51  ;;  %v1758_v27 = vmul.f32 %v9186_v8, %v1740_v24  ;;  %v14316_v45 = vpack.c.bf16 %v9416_v39, %v9376_v11  ;;  %v9719_v6 = vmul.f32 %v14317_v15, %v1266_v44 }
 0x351   : > { %v7123_v50 = vpack.c.bf16 %v1188_v47, %v1186_v17  ;;  %v9714_v52 = vpop.permute.xlu0 %1916  ;;  %v7121_v13 = vpack.c.bf16 %v1189_v60, %v1187_v7  ;;  %v2026_v23 = vsel %vm14017_vm7, %v14314_v51, %v14315_v31  ;;  %v9728_v39 = vmul.f32 %v14311_v30, %v1271_v36  ;;  %v14318_v17 = vld [vmem:[#allocation49_spill] sm:$0xff]  ;;  %v14319_v7 = vld [vmem:[#allocation24_spill] sm:$0xff]  ;;  %v14320_v60 = vld [vmem:[#allocation110_spill] sm:$0xff] }
 0x352   : > { %7208 = vmatpush1.bf16.msra.mxu1 %v14316_v45  ;;  %v1211_v8 = vpop.permute.xlu1 %1210  ;;  %v9731_v24 = vmul.f32 %v14317_v15, %v1267_v48  ;;  %v2023_v44 = vsel %vm14017_vm7, %v14319_v7, %v14318_v17  ;;  %v7211_v47 = vpack.c.bf16 %v1760_v32, %v1758_v27  ;;  %v14321_v51 = vld [vmem:[#allocation75_spill] sm:$0xff]  ;;  %v2027_v32 = vsel %vm14017_vm7, %v14318_v17, %v14319_v7  ;;  %v14324_v27 = vld [vmem:[#allocation50_spill] sm:$0xff]  ;;  %v14328_v7 = vld [vmem:[#allocation96_spill] sm:$0xff] }
 0x353   : > { %7210 = vmatprep.subr.bf16.mxu1 %v7209_v1  ;;  %2332 = vrot.lane.b32.xlu0 %v8894_v34, %s14280_s8  ;;  %v9740_v1 = vmul.f32 %v14320_v60, %v2022_v28  ;;  %v1216_v36 = vsel %vm389_vm1, %v14321_v51, %v1211_v8  ;;  %v1220_v48 = vsel %vm389_vm1, %v1211_v8, %v14321_v51  ;;  %v14322_v31 = vld [vmem:[#allocation111_spill] sm:$0xff]  ;;  %v14323_v28 = vld [vmem:[#allocation25_spill] sm:$0xff]  ;;  %v14327_v17 = vld [vmem:[#allocation90_spill] sm:$0xff]  ;;  %s14530_s8 = smov 97  }
 0x354   : > { %2374 = vrot.lane.b32.xlu1 %v8680_v61, %s14286_s23  ;;  %7122 = vmatprep.subr.bf16.mxu0 %v7121_v13  ;;  %v9751_v45 = vmul.f32 %v14322_v31, %v2026_v23  ;;  %v1322_v57 = vsel %vm14325_vm0, %v14324_v27, %v14323_v28  ;;  %v9762_v51 = vmul.f32 %v14320_v60, %v2023_v44  ;;  %v14326_v61 = vld [vmem:[#allocation76_spill] sm:$0xff] }
 0x355   : > { %7124 = vmatpush1.bf16.msra.mxu0 %v7123_v50  ;;  %v1213_v8 = vpop.permute.xlu0 %1212  ;;  %v14329_v11 = vpack.c.bf16 %v14327_v17, %v14328_v7  ;;  %v1238_v50 = vmul.f32 %v14290_v29, %v1220_v48  ;;  %v1239_v44 = vmul.f32 %v14295_v49, %v1216_v36  ;;  %v14335_v48 = vld [vmem:[#allocation91_spill] sm:$0xff] }
 0x356   : > { %7212 = vmatpush1.bf16.msra.mxu1 %v7211_v47  ;;  %v1217_v13 = vsel %vm389_vm1, %v14326_v61, %v1213_v8  ;;  %v1221_v23 = vsel %vm389_vm1, %v1213_v8, %v14326_v61  ;;  %7126 = vmatprep.subr.bf16.mxu0 %v7125_v38  ;;  %v9773_v21 = vpop.permute.xlu1 %1966  ;;  %v7135_v38 = vpack.c.bf16 %v9728_v39, %v9694_v59  ;;  %v14330_v8 = vld [vmem:[#allocation26_spill] sm:$0xff]  ;;  %v14331_v61 = vld [vmem:[#allocation51_spill] sm:$0xff] }
 0x357   : > { %7214 = vmatprep.subr.bf16.mxu1 %v14329_v11  ;;  %v1240_v47 = vmul.f32 %v14290_v29, %v1221_v23  ;;  %v1241_v60 = vmul.f32 %v14295_v49, %v1217_v13  ;;  %2376 = vrot.lane.b32.xlu0 %v8692_v3, %s14286_s23  ;;  %v1318_v11 = vsel %vm14325_vm0, %v14323_v28, %v14324_v27  ;;  %v14333_v3 = vld [vmem:[#allocation68_spill] sm:$0xff]  ;;  %v14336_v28 = vld [vmem:[#allocation97_spill] sm:$0xff] }
 0x358   : > { %v1323_v36 = vsel %vm14332_vm12, %v14331_v61, %v14330_v8  ;;  %2382 = vrot.lane.b32.xlu1 %v8888_v26, %s14286_s23  ;;  %v7133_v29 = vpack.c.bf16 %v9731_v24, %v9719_v6  ;;  %v1821_v49 = vsel %vm670_vm13, %v9567_v9, %v14333_v3  ;;  %v14334_v39 = vpack.c.bf16 %v9570_v63, %v9600_v43  ;;  %v2650_v26 = vld [vmem:[%s14338_s5] sm:$0xff]  ;;  %vm14339_vm12 = vmmov %vm14325_vm0 }
 0x359   : > { %v7131_v59 = vpack.c.bf16 %v1240_v47, %v1238_v50  ;;  %v14337_v27 = vpack.c.bf16 %v14335_v48, %v14336_v28  ;;  %v9805_v13 = vpop.permute.xlu0 %1968  ;;  %v7129_v6 = vpack.c.bf16 %v1241_v60, %v1239_v44  ;;  %v9811_v24 = vmul.f32 %v14322_v31, %v2027_v32  ;;  %v14340_v43 = vld [vmem:[#allocation67_spill] sm:$0xff]  ;;  %v14341_v50 = vld [vmem:[#allocation92_spill] sm:$0xff]  ;;  %v14342_v47 = vld [vmem:[#allocation98_spill] sm:$0xff] }
 0x35a   : > { %7128 = vmatpush1.bf16.msra.mxu0 %v14334_v39  ;;  %v9814_v23 = vmul.f32 %v9268_v22, %v1322_v57  ;;  %v1319_v63 = vsel %vm14339_vm12, %v14330_v8, %v14331_v61  ;;  %v1820_v17 = vsel %vm670_vm13, %v9520_v56, %v14340_v43  ;;  %v1263_v7 = vpop.permute.xlu1 %1262  ;;  %v14343_v60 = vpack.c.bf16 %v14341_v50, %v14342_v47  ;;  %v14344_v57 = vld [vmem:[#allocation113_spill] sm:$0xff]  ;;  %v14345_v48 = vld [vmem:[#allocation79_spill] sm:$0xff] }
 0x35b   : > { %7216 = vmatpush1.bf16.msra.mxu1 %v14337_v27  ;;  %v7255_v32 = vpack.c.bf16 %v9762_v51, %v9740_v1  ;;  %v9830_v44 = vmul.f32 %v14344_v57, %v1318_v11  ;;  %v9833_v39 = vmul.f32 %v9268_v22, %v1323_v36  ;;  %v1817_v8 = vsel %vm670_vm13, %v14333_v3, %v9567_v9  ;;  %v2651_v36 = vld [vmem:[%s14338_s5 + $0x8] sm:$0xff]  ;;  %v14347_v27 = vld [vmem:[#allocation99_spill] sm:$0xff] }
 0x35c   : > { %7218 = vmatprep.subr.bf16.mxu1 %v14343_v60  ;;  %2384 = vrot.lane.b32.xlu0 %v8894_v34, %s14286_s23  ;;  %v1841_v61 = vmul.f32 %v9195_v41, %v1821_v49  ;;  %v1268_v28 = vsel %vm413_vm3, %v14345_v48, %v1263_v7  ;;  %v1272_v11 = vsel %vm413_vm3, %v1263_v7, %v14345_v48  ;;  %v14346_v49 = vld [vmem:[#allocation93_spill] sm:$0xff]  ;;  %vm14353_vm0 = vcmp.lt.s32.totalorder %v8197_v10, 30  ;;  %v14433_v1 = vld [vmem:[#allocation115_spill] sm:$0xff] }
 0x35d   : > { %2656 = vperm.xlu1 %7880, %v2650_v26   ;;  %7130 = vmatprep.subr.bf16.mxu0 %v7129_v6  ;;  %v1341_v9 = vmul.f32 %v14344_v57, %v1319_v63  ;;  %v1816_v34 = vsel %vm670_vm13, %v14340_v43, %v9520_v56  ;;  %v1839_v3 = vmul.f32 %v9195_v41, %v1820_v17  ;;  %v1265_v26 = vpop.permute.xlu0 %1264  ;;  %v2652_v6 = vld [vmem:[%s14338_s5 + $0x10] sm:$0xff]  ;;  %v14349_v63 = vld [vmem:[#allocation80_spill] sm:$0xff]  ;;  %vm14356_vm12 = vmmov %vm14353_vm0 }
 0x35e   : > { %7132 = vmatpush1.bf16.msra.mxu0 %v7131_v59  ;;  %v14348_v50 = vpack.c.bf16 %v14346_v49, %v14347_v27  ;;  %v1840_v7 = vmul.f32 %v9192_v42, %v1817_v8  ;;  %v1269_v47 = vsel %vm413_vm3, %v14349_v63, %v1265_v26  ;;  %v1273_v41 = vsel %vm413_vm3, %v1265_v26, %v14349_v63  ;;  %v9870_v56 = vpop.permute.xlu1 %2018  ;;  %v14351_v48 = vld [vmem:[#allocation29_spill] sm:$0xff]  ;;  %v14352_v49 = vld [vmem:[#allocation54_spill] sm:$0xff] }
 0x35f   : > { %7134 = vmatprep.subr.bf16.mxu0 %v7133_v29  ;;  %v14350_v59 = vpack.c.bf16 %v9448_v33, %v9457_v54  ;;  %v1290_v43 = vmul.f32 %v14311_v30, %v1272_v11  ;;  %v1291_v17 = vmul.f32 %v14317_v15, %v1268_v28  ;;  %v1292_v60 = vmul.f32 %v14311_v30, %v1273_v41  ;;  %v14354_v27 = vld [vmem:[#allocation30_spill] sm:$0xff] }
 0x360   : > { %7220 = vmatpush1.bf16.msra.mxu1 %v14348_v50  ;;  %v1293_v8 = vmul.f32 %v14317_v15, %v1269_v47  ;;  %2661 = vperm.xlu0 %7879, %v2651_v36   ;;  %v1374_v29 = vsel %vm14353_vm0, %v14352_v49, %v14351_v48  ;;  %v14355_v50 = vld [vmem:[#allocation55_spill] sm:$0xff]  ;;  %v1838_v54 = vmul.f32 %v9192_v42, %v1816_v34  ;;  %v2653_v30 = vld [vmem:[%s14338_s5 + $0x18] sm:$0xff] }
 0x361   : > { %7222 = vmatprep.subr.bf16.mxu1 %v14350_v59  ;;  %v1375_v33 = vsel %vm14356_vm12, %v14355_v50, %v14354_v27  ;;  %2666 = vperm.xlu1 %7880, %v2652_v6   ;;  %v7225_v11 = vpack.c.bf16 %v1841_v61, %v1839_v3  ;;  %v14357_v15 = vld [vmem:[#allocation70_spill] sm:$0xff]  ;;  %v7139_v36 = vpack.c.bf16 %v1292_v60, %v1290_v43  ;;  %v9898_v63 = vpop.permute.xlu0 %2020  ;;  %v14359_v3 = vld [vmem:[#allocation69_spill] sm:$0xff]  ;;  %vm14360_vm12 = vmmov %vm14353_vm0 }
 0x362   : > { %v1873_v28 = vsel %vm14015_vm14, %v9619_v55, %v14357_v15  ;;  %7136 = vmatpush1.bf16.msra.mxu0 %v7135_v38  ;;  %v14358_v26 = vpack.c.bf16 %v9460_v58, %v9483_v18  ;;  %v7137_v42 = vpack.c.bf16 %v1293_v8, %v1291_v17  ;;  %v7143_v61 = vpack.c.bf16 %v9833_v39, %v9814_v23  ;;  %v1315_v6 = vpop.permute.xlu1 %1314  ;;  %v14361_v23 = vld [vmem:[#allocation117_spill] sm:$0xff]  ;;  %v14365_v60 = vld [vmem:[#allocation118_spill] sm:$0xff] }
 0x363   : > { %v1371_v34 = vsel %vm14353_vm0, %v14354_v27, %v14355_v50  ;;  %v1872_v38 = vsel %vm14015_vm14, %v9584_v0, %v14359_v3  ;;  %v7141_v58 = vpack.c.bf16 %v1341_v9, %v9830_v44  ;;  %v1370_v18 = vsel %vm14360_vm12, %v14351_v48, %v14352_v49  ;;  %v14362_v9 = vld [vmem:[#allocation83_spill] sm:$0xff] }
 0x364   : > { %7224 = vmatpush1.bf16.msra.mxu1 %v14358_v26  ;;  %v9916_v39 = vmul.f32 %v14361_v23, %v1374_v29  ;;  %v1869_v47 = vsel %vm14015_vm14, %v14357_v15, %v9619_v55  ;;  %2671 = vperm.xlu0 %7879, %v2653_v30   ;;  %v7227_v41 = vpack.c.bf16 %v1840_v7, %v1838_v54  ;;  %vm14363_vm0 = vcmp.lt.s32.totalorder %v8197_v10, 31  ;;  %v14366_v29 = vld [vmem:[#allocation84_spill] sm:$0xff] }
 0x365   : > { %7226 = vmatprep.subr.bf16.mxu1 %v7225_v11  ;;  %v9923_v59 = vmul.f32 %v14361_v23, %v1375_v33  ;;  %v1893_v44 = vmul.f32 %v9209_v5, %v1873_v28  ;;  %v1320_v43 = vsel %vm14363_vm0, %v14362_v9, %v1315_v6  ;;  %vm14364_vm12 = vmmov %vm14363_vm0  ;;  %7138 = vmatprep.subr.bf16.mxu0 %v7137_v42  ;;  %v1317_v48 = vpop.permute.xlu0 %1316  ;;  %v14369_v28 = vld [vmem:[#allocation34_spill] sm:$0xff] }
 0x366   : > { %v1324_v17 = vsel %vm14364_vm12, %v1315_v6, %v14362_v9  ;;  %v1393_v8 = vmul.f32 %v14365_v60, %v1371_v34  ;;  %v1868_v55 = vsel %vm14015_vm14, %v14359_v3, %v9584_v0  ;;  %v1891_v7 = vmul.f32 %v9209_v5, %v1872_v38  ;;  %7140 = vmatpush1.bf16.msra.mxu0 %v7139_v36  ;;  %vm14367_vm12 = vmmov %vm14363_vm0  ;;  %v9945_v33 = vpop.permute.xlu1 %2070  ;;  %v14370_v36 = vld [vmem:[#allocation59_spill] sm:$0xff] }
 0x367   : > { %v1892_v49 = vmul.f32 %v9206_v4, %v1869_v47  ;;  %v1321_v27 = vsel %vm14363_vm0, %v14366_v29, %v1317_v48  ;;  %v1325_v50 = vsel %vm14367_vm12, %v1317_v48, %v14366_v29  ;;  %7142 = vmatprep.subr.bf16.mxu0 %v7141_v58  ;;  %v14368_v0 = vpack.c.bf16 %v9474_v46, %v9496_v19  ;;  %v14372_v46 = vld [vmem:[#allocation74_spill] sm:$0xff]  ;;  %v14375_v58 = vld [vmem:[#allocation73_spill] sm:$0xff]  ;;  %v14379_v9 = vld [vmem:[#allocation119_spill] sm:$0xff] }
 0x368   : > { %7228 = vmatpush1.bf16.msra.mxu1 %v7227_v41  ;;  %v1342_v5 = vmul.f32 %v9268_v22, %v1324_v17  ;;  %v1343_v54 = vmul.f32 %v14344_v57, %v1320_v43  ;;  %v1344_v11 = vmul.f32 %v9268_v22, %v1325_v50  ;;  %v1345_v30 = vmul.f32 %v14344_v57, %v1321_v27  ;;  %v14377_v47 = vld [vmem:[#allocation33_spill] sm:$0xff] }
 0x369   : > { %7230 = vmatprep.subr.bf16.mxu1 %v14368_v0  ;;  %v1391_v15 = vmul.f32 %v14365_v60, %v1370_v18  ;;  %vm14371_vm0 = vcmp.lt.s32.totalorder %v8197_v10, 18  ;;  %v1890_v42 = vmul.f32 %v9206_v4, %v1868_v55  ;;  %v7233_v34 = vpack.c.bf16 %v1893_v44, %v1891_v7  ;;  %v9967_v57 = vpop.permute.xlu0 %2072  ;;  %v14383_v48 = vld [vmem:[#allocation121_spill] sm:$0xff]  ;;  %v14384_v0 = vld [vmem:[#allocation88_spill] sm:$0xff] }
 0x36a   : > { %v1427_v26 = vsel %vm14371_vm0, %v14370_v36, %v14369_v28  ;;  %v1925_v19 = vsel %vm14016_vm15, %v9714_v52, %v14372_v46  ;;  %v7147_v3 = vpack.c.bf16 %v1344_v11, %v1342_v5  ;;  %7144 = vmatpush1.bf16.msra.mxu0 %v7143_v61  ;;  %v14373_v22 = vpack.c.bf16 %v9471_v14, %v9493_v16  ;;  %vm14374_vm12 = vmmov %vm14371_vm0  ;;  %v1367_v18 = vpop.permute.xlu1 %1366  ;;  %v14376_v16 = vld [vmem:[#allocation58_spill] sm:$0xff] }
 0x36b   : > { %v7145_v38 = vpack.c.bf16 %v1345_v30, %v1343_v54  ;;  %v7151_v6 = vpack.c.bf16 %v9923_v59, %v9916_v39  ;;  %v1423_v4 = vsel %vm14374_vm12, %v14369_v28, %v14370_v36  ;;  %v1924_v61 = vsel %vm14016_vm15, %v9685_v25, %v14375_v58  ;;  %vm14378_vm14 = vmmov %vm14371_vm0 }
 0x36c   : > { %7232 = vmatpush1.bf16.msra.mxu1 %v14373_v22  ;;  %v7149_v14 = vpack.c.bf16 %v1393_v8, %v1391_v15  ;;  %v1422_v41 = vsel %vm14371_vm0, %v14377_v47, %v14376_v16  ;;  %v1426_v39 = vsel %vm14378_vm14, %v14376_v16, %v14377_v47  ;;  %v1921_v59 = vsel %vm14016_vm15, %v14372_v46, %v9714_v52  ;;  %v14380_v8 = vld [vmem:[#allocation87_spill] sm:$0xff]  ;;  %v14388_v46 = vld [vmem:[#allocation78_spill] sm:$0xff] }
 0x36d   : > { %7234 = vmatprep.subr.bf16.mxu1 %v7233_v34  ;;  %7146 = vmatprep.subr.bf16.mxu0 %v7145_v38  ;;  %v7235_v44 = vpack.c.bf16 %v1892_v49, %v1890_v42  ;;  %v9992_v43 = vmul.f32 %v14379_v9, %v1427_v26  ;;  %v1945_v17 = vmul.f32 %v14285_v62, %v1925_v19  ;;  %vm14381_vm12 = vcmp.lt.s32.totalorder %v8197_v10, 30  ;;  %v1369_v27 = vpop.permute.xlu0 %1368  ;;  %v14389_v19 = vld [vmem:[#allocation41_spill] sm:$0xff] }
 0x36e   : > { %v1372_v55 = vsel %vm14381_vm12, %v14380_v8, %v1367_v18  ;;  %vm14382_vm0 = vmmov %vm14381_vm12  ;;  %v1445_v29 = vmul.f32 %v14383_v48, %v1423_v4  ;;  %v1920_v52 = vsel %vm14016_vm15, %v14375_v58, %v9685_v25  ;;  %v1943_v49 = vmul.f32 %v14285_v62, %v1924_v61  ;;  %7148 = vmatpush1.bf16.msra.mxu0 %v7147_v3  ;;  %v10014_v11 = vpop.permute.xlu1 %2122  ;;  %v14391_v38 = vld [vmem:[#allocation77_spill] sm:$0xff]  ;;  %v14392_v61 = vld [vmem:[#allocation62_spill] sm:$0xff] }
 0x36f   : > { %v1376_v7 = vsel %vm14382_vm0, %v1367_v18, %v14380_v8  ;;  %v1944_v50 = vmul.f32 %v14287_v53, %v1921_v59  ;;  %vm14385_vm14 = vmmov %vm14382_vm0  ;;  %7150 = vmatprep.subr.bf16.mxu0 %v7149_v14  ;;  %v14387_v25 = vpack.c.bf16 %v9541_v12, %v9554_v37  ;;  %v1395_v30 = vmul.f32 %v14365_v60, %v1372_v55  ;;  %v14393_v18 = vld [vmem:[#allocation37_spill] sm:$0xff] }
 0x370   : > { %7236 = vmatpush1.bf16.msra.mxu1 %v7235_v44  ;;  %v1373_v5 = vsel %vm14385_vm14, %v14384_v0, %v1369_v27  ;;  %vm14386_vm12 = vmmov %vm14382_vm0  ;;  %v1394_v62 = vmul.f32 %v14361_v23, %v1376_v7  ;;  %v1442_v36 = vmul.f32 %v14379_v9, %v1426_v39  ;;  %v1443_v26 = vmul.f32 %v14383_v48, %v1422_v41  ;;  %v14396_v41 = vld [vmem:[#allocation63_spill] sm:$0xff]  ;;  %v14397_v39 = vld [vmem:[#allocation38_spill] sm:$0xff] }
 0x371   : > { %v1377_v54 = vsel %vm14386_vm12, %v1369_v27, %v14384_v0  ;;  %7238 = vmatprep.subr.bf16.mxu1 %v14387_v25  ;;  %v1397_v28 = vmul.f32 %v14365_v60, %v1373_v5  ;;  %v1942_v42 = vmul.f32 %v14287_v53, %v1920_v52  ;;  %v7241_v34 = vpack.c.bf16 %v1945_v17, %v1943_v49  ;;  %v14399_v44 = vld [vmem:[#allocation107_spill] sm:$0xff]  ;;  %v2424_v49 = vld [vmem:[%s14222_s4 + $0x10] sm:$0xff]  ;;  %v14404_v27 = vld [vmem:[#allocation106_spill] sm:$0xff] }
 0x372   : > { %v1396_v15 = vmul.f32 %v14361_v23, %v1377_v54  ;;  %v1977_v37 = vsel %vm742_vm8, %v9805_v13, %v14388_v46  ;;  %7152 = vmatpush1.bf16.msra.mxu0 %v7151_v6  ;;  %v14390_v3 = vpack.c.bf16 %v9557_v35, %v14389_v19  ;;  %v10033_v23 = vpop.permute.xlu0 %2124  ;;  %v7159_v22 = vpack.c.bf16 %v9992_v43, %v1442_v36  ;;  %v1419_v4 = vpop.permute.xlu1 %1418  ;;  %v14400_v17 = vld [vmem:[#allocation95_spill] sm:$0xff]  ;;  %v14405_v0 = vld [vmem:[#allocation100_spill] sm:$0xff]  ;;  %v2432_v36 = vld [vmem:[%s14222_s4 + $0x50] sm:$0xff] }
 0x373   : > { %v7153_v60 = vpack.c.bf16 %v1397_v28, %v1395_v30  ;;  %v1976_v53 = vsel %vm742_vm8, %v9773_v21, %v14391_v38  ;;  %v7157_v58 = vpack.c.bf16 %v1445_v29, %v1443_v26  ;;  %v7253_v6 = vpack.c.bf16 %v9811_v24, %v9751_v45  ;;  %v14409_v26 = vld [vmem:[#allocation122_spill] sm:$0xff]  ;;  %v14429_v45 = vld [vmem:[#allocation116_spill] sm:$0xff] }
 0x374   : > { %v7155_v12 = vpack.c.bf16 %v1396_v15, %v1394_v62  ;;  %7240 = vmatpush1.bf16.msra.mxu1 %v14390_v3  ;;  %vm14394_vm0 = vcmp.lt.s32.totalorder %v8197_v10, 17  ;;  %v1973_v16 = vsel %vm742_vm8, %v14388_v46, %v9805_v13  ;;  %v7243_v47 = vpack.c.bf16 %v1944_v50, %v1942_v42 }
 0x375   : > { %7242 = vmatprep.subr.bf16.mxu1 %v7241_v34  ;;  %v1474_v35 = vsel %vm14394_vm0, %v14393_v18, %v14392_v61  ;;  %vm14395_vm14 = vmmov %vm14394_vm0  ;;  %7154 = vmatprep.subr.bf16.mxu0 %v7153_v60  ;;  %v1997_v43 = vmul.f32 %v14399_v44, %v1977_v37  ;;  %v1972_v7 = vsel %vm742_vm8, %v14391_v38, %v9773_v21  ;;  %v14410_v34 = vld [vmem:[#allocation123_spill] sm:$0xff]  ;;  %v2431_v38 = vld [vmem:[%s14222_s4 + $0x48] sm:$0xff] }
 0x376   : > { %v1478_v14 = vsel %vm14395_vm14, %v14392_v61, %v14393_v18  ;;  %vm14398_vm12 = vmmov %vm14394_vm0  ;;  %vm14401_vm0 = vcmp.lt.s32.totalorder %v8197_v10, 18  ;;  %v1995_v29 = vmul.f32 %v14399_v44, %v1976_v53  ;;  %7156 = vmatpush1.bf16.msra.mxu0 %v7155_v12  ;;  %v1421_v52 = vpop.permute.xlu0 %1420  ;;  %v1996_v50 = vmul.f32 %v14404_v27, %v1973_v16  ;;  %v10084_v21 = vpop.permute.xlu1 %2174  ;;  %v14414_v53 = vld [vmem:[#allocation27_spill] sm:$0xff]  ;;  %v14417_v18 = vld [vmem:[#allocation81_spill] sm:$0xff] }
 0x377   : > { %v1475_v59 = vsel %vm14398_vm12, %v14397_v39, %v14396_v41  ;;  %v1424_v8 = vsel %vm14401_vm0, %v14400_v17, %v1419_v4  ;;  %vm14402_vm14 = vmmov %vm14401_vm0  ;;  %7158 = vmatprep.subr.bf16.mxu0 %v7157_v58  ;;  %v14408_v25 = vpack.c.bf16 %v9664_v2, %v9626_v20  ;;  %v1994_v37 = vmul.f32 %v14404_v27, %v1972_v7  ;;  %v14411_v2 = vld [vmem:[#allocation82_spill] sm:$0xff]  ;;  %v14418_v16 = vld [vmem:[#allocation28_spill] sm:$0xff] }
 0x378   : > { %v1428_v55 = vsel %vm14402_vm14, %v1419_v4, %v14400_v17  ;;  %vm14403_vm15 = vmmov %vm14398_vm12  ;;  %7244 = vmatpush1.bf16.msra.mxu1 %v7243_v47  ;;  %v1447_v30 = vmul.f32 %v14383_v48, %v1424_v8  ;;  %v1497_v46 = vmul.f32 %v14410_v34, %v1475_v59  ;;  %v7249_v20 = vpack.c.bf16 %v1997_v43, %v1995_v29  ;;  %v14415_v4 = vld [vmem:[#allocation52_spill] sm:$0xff]  ;;  %v14419_v47 = vld [vmem:[#allocation53_spill] sm:$0xff] }
 0x379   : > { %v1479_v13 = vsel %vm14403_vm15, %v14396_v41, %v14397_v39  ;;  %vm14406_vm12 = vmmov %vm14401_vm0  ;;  %7246 = vmatprep.subr.bf16.mxu1 %v14408_v25  ;;  %v1446_v62 = vmul.f32 %v14379_v9, %v1428_v55  ;;  %v2029_v12 = vsel %vm14017_vm7, %v9898_v63, %v14411_v2  ;;  %v1495_v61 = vmul.f32 %v14410_v34, %v1474_v35  ;;  %v14421_v43 = vld [vmem:[#allocation114_spill] sm:$0xff] }
 0x37a   : > { %v1425_v5 = vsel %vm14406_vm12, %v14405_v0, %v1421_v52  ;;  %vm14407_vm15 = vmmov %vm14401_vm0  ;;  %v1496_v42 = vmul.f32 %v14409_v26, %v1479_v13  ;;  %7160 = vmatpush1.bf16.msra.mxu0 %v7159_v22  ;;  %v10106_v3 = vpop.permute.xlu0 %2176  ;;  %vm14416_vm0 = vcmp.lt.s32.totalorder %v8197_v10, 111  ;;  %v1471_v22 = vpop.permute.xlu1 %1470  ;;  %v1494_v39 = vmul.f32 %v14409_v26, %v1478_v14  ;;  %v2439_v14 = vld [vmem:[%s14222_s4 + $0x88] sm:$0xff] }
 0x37b   : > { %v1429_v54 = vsel %vm14407_vm15, %v1421_v52, %v14405_v0  ;;  %v1449_v28 = vmul.f32 %v14383_v48, %v1425_v5  ;;  %2841 = vmatmul.mubr.f32.vlgmr.msra.gmra.mrb[0].mxu1 %v2424_v49  ;;  %v14412_v48 = vld [vmem:[#allocation18_spill] sm:$0xff]  ;;  %v2078_v58 = vsel %vm14416_vm0, %v14415_v4, %v14414_v53  ;;  %vm14420_vm14 = vmmov %vm14416_vm0  ;;  %v7251_v59 = vpack.c.bf16 %v1996_v50, %v1994_v37  ;;  %v2438_v52 = vld [vmem:[%s14222_s4 + $0x80] sm:$0xff] }
 0x37c   : > { %v1448_v15 = vmul.f32 %v14379_v9, %v1429_v54  ;;  %v14413_v19 = vpack.c.bf16 %v9661_v40, %v14412_v48  ;;  %v2028_v40 = vsel %vm14017_vm7, %v9870_v56, %v14417_v18  ;;  %2846 = vmatprep.mubr.f32.mxu1 %v2432_v36  ;;  %v2079_v41 = vsel %vm14420_vm14, %v14419_v47, %v14418_v16  ;;  %v14424_v49 = vld [vmem:[#allocation110_spill] sm:$0xff]  ;;  %v14425_v50 = vld [vmem:[#allocation120_spill] sm:$0xff]  ;;  %v14434_v48 = vld [vmem:[#allocation85_spill] sm:$0xff] }
 0x37d   : > { %v7161_v60 = vpack.c.bf16 %v1449_v28, %v1447_v30  ;;  %v2025_v35 = vsel %vm14017_vm7, %v14411_v2, %v9898_v63  ;;  %v2049_v44 = vmul.f32 %v14322_v31, %v2029_v12  ;;  %vm14422_vm12 = vcmp.lt.s32.totalorder %v8197_v10, 17  ;;  %v2446_v30 = vld [vmem:[%s14222_s4 + $0xc0] sm:$0xff] }
 0x37e   : > { %v7163_v9 = vpack.c.bf16 %v1448_v15, %v1446_v62  ;;  %7248 = vmatpush1.bf16.msra.mxu1 %v14413_v19  ;;  %v1476_v17 = vsel %vm14422_vm12, %v14421_v43, %v1471_v22  ;;  %vm14423_vm15 = vmmov %vm14422_vm12  ;;  %v7165_v55 = vpack.c.bf16 %v1497_v46, %v1495_v61  ;;  %v7167_v13 = vpack.c.bf16 %v1496_v42, %v1494_v39  ;;  %v1473_v29 = vpop.permute.xlu0 %1472  ;;  %v6996_v36 = vld [vmem:[%s13813_s1 + $0x23] ss:$8 sm:$0x3] }
 0x37f   : > { %7250 = vmatprep.subr.bf16.mxu1 %v7249_v20  ;;  %7162 = vmatprep.subr.bf16.mxu0 %v7161_v60  ;;  %v1480_v8 = vsel %vm14423_vm15, %v1471_v22, %v14421_v43  ;;  %v2024_v63 = vsel %vm14017_vm7, %v14417_v18, %v9870_v56  ;;  %v2047_v7 = vmul.f32 %v14322_v31, %v2028_v40  ;;  %vm14426_vm0 = vmmov %vm14422_vm12  ;;  %v10154_v56 = vpop.permute.xlu1 %2214  ;;  %vm14428_vm12 = vcmp.lt.s32.totalorder %v8197_v10, 111  ;;  %v2445_v20 = vld [vmem:[%s14222_s4 + $0xb8] sm:$0xff]  ;;  %v2427_v60 = vld [vmem:[%s14222_s4 + $0x28] sm:$0xff] }
 0x380   : > { %2847 = vmatmul.mubr.f32.gmra.mrb[2].mxu1 %v2431_v38  ;;  %7164 = vmatpush1.bf16.msra.mxu0 %v7163_v9  ;;  %v2048_v27 = vmul.f32 %v14424_v49, %v2025_v35  ;;  %v1477_v0 = vsel %vm14426_vm0, %v14425_v50, %v1473_v29  ;;  %vm14427_vm14 = vmmov %vm14426_vm0  ;;  %v1498_v31 = vmul.f32 %v14409_v26, %v1480_v8  ;;  %v14436_v38 = vld [vmem:[#allocation15_spill] sm:$0xff]  ;;  %v14438_v40 = vld [vmem:[#allocation16_spill] sm:$0xff]  ;;  %vm14460_vm7 = vcmp.lt.s32.totalorder %v8197_v10, 110 }
 0x381   : > { %v1481_v5 = vsel %vm14427_vm14, %v1473_v29, %v14425_v50  ;;  %7166 = vmatprep.subr.bf16.mxu0 %v7165_v55  ;;  %v1499_v54 = vmul.f32 %v14410_v34, %v1476_v17  ;;  %v1501_v62 = vmul.f32 %v14410_v34, %v1477_v0  ;;  %2852 = vmatprep.mubr.f32.mxu1 %v2439_v14  ;;  %vm14431_vm15 = vmmov %vm14428_vm12  ;;  %v14444_v17 = vld [vmem:[#allocation56_spill] sm:$0xff]  ;;  %v14445_v8 = vld [vmem:[#allocation31_spill] sm:$0xff] }
 0x382   : > { %7252 = vmatpush1.bf16.msra.mxu1 %v7251_v59  ;;  %v1500_v25 = vmul.f32 %v14409_v26, %v1481_v5  ;;  %v2075_v15 = vsel %vm14428_vm12, %v14418_v16, %v14419_v47  ;;  %v2097_v24 = vmul.f32 %v14429_v45, %v2079_v41  ;;  %v7257_v28 = vpack.c.bf16 %v2049_v44, %v2047_v7  ;;  %v14430_v26 = vld [vmem:[#allocation86_spill] sm:$0xff]  ;;  %v10182_v46 = vpop.permute.xlu0 %2216  ;;  %vm14432_vm0 = vmmov %vm14428_vm12  ;;  %v14439_v16 = vld [vmem:[#allocation32_spill] sm:$0xff] }
 0x383   : > { %7254 = vmatprep.subr.bf16.mxu1 %v7253_v6  ;;  %v2046_v6 = vmul.f32 %v14424_v49, %v2024_v63  ;;  %v2081_v42 = vsel %vm14431_vm15, %v9967_v57, %v14430_v26  ;;  %v7169_v37 = vpack.c.bf16 %v1501_v62, %v1499_v54  ;;  %v2074_v2 = vsel %vm14432_vm0, %v14414_v53, %v14415_v4  ;;  %v10192_v9 = vpop.permute.xlu1 %2222  ;;  %vm14435_vm14 = vmmov %vm14432_vm0  ;;  %v14440_v47 = vld [vmem:[#allocation57_spill] sm:$0xff]  ;;  %v6984_v63 = vld [vmem:[%s13813_s1 + $0x7] ss:$8 sm:$0x3] }
 0x384   : > { %2853 = vmatmul.mubr.f32.gmra.mrb[4].mxu1 %v2438_v52  ;;  %v7171_v34 = vpack.c.bf16 %v1500_v25, %v1498_v31  ;;  %7168 = vmatpush1.bf16.msra.mxu0 %v7167_v13  ;;  %v2095_v12 = vmul.f32 %v14429_v45, %v2078_v58  ;;  %v2096_v51 = vmul.f32 %v14433_v1, %v2075_v15  ;;  %vm14437_vm12 = vmmov %vm14432_vm0  ;;  %vm14441_vm15 = vcmp.lt.s32.totalorder %v8197_v10, 110  ;;  %v14449_v15 = vld [vmem:[#allocation89_spill] sm:$0xff] }
 0x385   : > { %2858 = vmatprep.mubr.f32.mxu1 %v2446_v30  ;;  %v2080_v19 = vsel %vm14435_vm14, %v9945_v33, %v14434_v48  ;;  %7170 = vmatprep.subr.bf16.mxu0 %v7169_v37  ;;  %v10203_v53 = vrot.slane %v6996_v36, %v14436_v38  ;;  %v2077_v4 = vsel %vm14437_vm12, %v14430_v26, %v9967_v57  ;;  %vm14442_vm0 = vmmov %vm14441_vm15  ;;  %v14454_v37 = vld [vmem:[#allocation35_spill] sm:$0xff] }
 0x386   : > { %7256 = vmatpush1.bf16.msra.mxu1 %v7255_v32  ;;  %v7259_v32 = vpack.c.bf16 %v2048_v27, %v2046_v6  ;;  %v2101_v58 = vmul.f32 %v14429_v45, %v2081_v42  ;;  %v7261_v61 = vpack.c.bf16 %v2097_v24, %v2095_v12  ;;  %v2094_v18 = vmul.f32 %v14433_v1, %v2074_v2  ;;  %v10216_v39 = vpop.permute.xlu0 %2224  ;;  %vm14443_vm14 = vmmov %vm14437_vm12  ;;  %v14448_v27 = vld [vmem:[#allocation94_spill] sm:$0xff]  ;;  %v14457_v12 = vld [vmem:[#allocation36_spill] sm:$0xff] }
 0x387   : > { %7258 = vmatprep.subr.bf16.mxu1 %v7257_v28  ;;  %v2143_v22 = vrot.slane %v6996_v36, %v14438_v40  ;;  %v2131_v41 = vsel %vm14441_vm15, %v14440_v47, %v14439_v16  ;;  %v2127_v57 = vsel %vm14442_vm0, %v14439_v16, %v14440_v47  ;;  %v2076_v59 = vsel %vm14443_vm14, %v14434_v48, %v9945_v33  ;;  %v1511_v44 = vpop.permute.xlu1 %1510  ;;  %vm14446_vm12 = vmmov %vm14442_vm0  ;;  %v6997_v33 = vld [vmem:[%s13813_s1 + $0x24] ss:$8 sm:$0x3] }
 0x388   : > { %2859 = vmatmul.mubr.f32.gmra.mrb[6].mxu1 %v2445_v20  ;;  %7172 = vmatpush1.bf16.msra.mxu0 %v7171_v34  ;;  %v2099_v35 = vmul.f32 %v14429_v45, %v2080_v19  ;;  %v7263_v43 = vpack.c.bf16 %v2096_v51, %v2094_v18  ;;  %v2126_v55 = vsel %vm14446_vm12, %v14445_v8, %v14444_v17  ;;  %vm14447_vm15 = vmmov %vm14442_vm0  ;;  %v14455_v20 = vld [vmem:[#allocation60_spill] sm:$0xff] }
 0x389   : > { %2929 = vmatprep.mubr.f32.mxu1 %v2427_v60  ;;  %v2130_v14 = vsel %vm14447_vm15, %v14444_v17, %v14445_v8  ;;  %v2100_v13 = vmul.f32 %v14433_v1, %v2077_v4  ;;  %v2149_v7 = vmul.f32 %v2143_v22, %v2131_v41  ;;  %v2148_v52 = vmul.f32 %v10203_v53, %v2127_v57  ;;  %vm14450_vm14 = vmmov %vm14442_vm0 }
 0x38a   : > { %7260 = vmatpush1.bf16.msra.mxu1 %v7259_v32  ;;  %v7265_v29 = vpack.c.bf16 %v2101_v58, %v2099_v35  ;;  %v2098_v49 = vmul.f32 %v14433_v1, %v2076_v59  ;;  %v2133_v50 = vsel %vm14442_vm0, %v10033_v23, %v14448_v27  ;;  %v1513_v0 = vpop.permute.xlu0 %1512  ;;  %v2146_v5 = vmul.f32 %v10203_v53, %v2126_v55  ;;  %vm14451_vm12 = vmmov %vm14442_vm0  ;;  %v14458_v1 = vld [vmem:[#allocation61_spill] sm:$0xff]  ;;  %v14463_v35 = vld [vmem:[#allocation112_spill] sm:$0xff] }
 0x38b   : > { %7262 = vmatprep.subr.bf16.mxu1 %v7261_v61  ;;  %v2147_v31 = vmul.f32 %v2143_v22, %v2130_v14  ;;  %v2195_v54 = vrot.slane %v6997_v33, %v14438_v40  ;;  %v10251_v25 = vrot.slane %v6984_v63, %v14436_v38  ;;  %v1519_v62 = vpop.permute.xlu1 %1518  ;;  %v2132_v45 = vsel %vm14450_vm14, %v10014_v11, %v14449_v15 }
 0x38c   : > { %v7267_v30 = vpack.c.bf16 %v2100_v13, %v2098_v49  ;;  %v2129_v24 = vsel %vm14451_vm12, %v14448_v27, %v10033_v23  ;;  %v10262_v6 = vrot.slane %v6984_v63, %v14438_v40  ;;  %v2153_v28 = vmul.f32 %v2143_v22, %v2133_v50 }
 0x38d   : > { %vm14452_vm15 = vcmp.lt.s32.totalorder %v8197_v10, 16  ;;  %v7269_v42 = vpack.c.bf16 %v2149_v7, %v2147_v31  ;;  %v7271_v34 = vpack.c.bf16 %v2148_v52, %v2146_v5  ;;  %vm14456_vm14 = vcmp.lt.s32.totalorder %v8197_v10, 98 }
 0x38e   : > { %7264 = vmatpush1.bf16.msra.mxu1 %v7263_v43  ;;  %v1526_v36 = vsel %vm14452_vm15, %v1511_v44, %v1519_v62  ;;  %vm14453_vm0 = vmmov %vm14452_vm15  ;;  %v2182_v2 = vsel %vm14456_vm14, %v14455_v20, %v14454_v37  ;;  %v2128_v51 = vsel %vm14460_vm7, %v14449_v15, %v10014_v11  ;;  %v1521_v32 = vpop.permute.xlu0 %1520  ;;  %v2151_v48 = vmul.f32 %v2143_v22, %v2132_v45 }
 0x38f   : > { %7266 = vmatprep.subr.bf16.mxu1 %v7265_v29  ;;  %v1530_v26 = vsel %vm14453_vm0, %v1519_v62, %v1511_v44  ;;  %vm14459_vm12 = vmmov %vm14456_vm14  ;;  %v2152_v19 = vmul.f32 %v10203_v53, %v2129_v24  ;;  %v1531_v4 = vsel %vm14453_vm0, %v1521_v32, %v1513_v0  ;;  %v10285_v58 = vpop.permute.xlu1 %2218  ;;  %v1547_v18 = vmul.f32 %v10262_v6, %v1526_v36  ;;  %v6998_v29 = vld [vmem:[%s13813_s1 + $0x25] ss:$8 sm:$0x3] }
 0x390   : > { %v2183_v23 = vsel %vm14459_vm12, %v14458_v1, %v14457_v12  ;;  %vm14461_vm15 = vmmov %vm14453_vm0  ;;  %v1546_v61 = vmul.f32 %v10251_v25, %v1530_v26  ;;  %v1548_v11 = vmul.f32 %v10251_v25, %v1531_v4  ;;  %v2191_v22 = vrot.slane %v6997_v33, %v14436_v38 }
 0x391   : > { %v1527_v60 = vsel %vm14461_vm15, %v1513_v0, %v1521_v32  ;;  %vm14462_vm7 = vmmov %vm14459_vm12  ;;  %v2201_v41 = vmul.f32 %v2195_v54, %v2183_v23  ;;  %v7273_v57 = vpack.c.bf16 %v2153_v28, %v2151_v48  ;;  %v2150_v59 = vmul.f32 %v10203_v53, %v2128_v51  ;;  %v14466_v53 = vld [vmem:[#allocation101_spill] sm:$0xff] }
 0x392   : > { %7268 = vmatpush1.bf16.msra.mxu1 %v7267_v30  ;;  %v1549_v16 = vmul.f32 %v10262_v6, %v1527_v60  ;;  %v2179_v47 = vsel %vm14462_vm7, %v14457_v12, %v14458_v1  ;;  %vm14464_vm14 = vmmov %vm14462_vm7  ;;  %v7175_v43 = vpack.c.bf16 %v1548_v11, %v1546_v61  ;;  %v2221_v17 = vpop.permute.xlu0 %2220  ;;  %v2199_v14 = vmul.f32 %v2195_v54, %v2182_v2 }
 0x393   : > { %7270 = vmatprep.subr.bf16.mxu1 %v7269_v42  ;;  %v2185_v44 = vsel %vm14464_vm14, %v10106_v3, %v14463_v35  ;;  %vm14465_vm12 = vmmov %vm14462_vm7  ;;  %v2227_v33 = vpop.permute.xlu1 %2226  ;;  %v2200_v13 = vmul.f32 %v2191_v22, %v2179_v47  ;;  %v7275_v63 = vpack.c.bf16 %v2152_v19, %v2150_v59  ;;  %v2247_v30 = vrot.slane %v6998_v29, %v14438_v40 }
 0x394   : > { %v7173_v8 = vpack.c.bf16 %v1549_v16, %v1547_v18  ;;  %v2178_v55 = vsel %vm14465_vm12, %v14454_v37, %v14455_v20  ;;  %vm14467_vm15 = vmmov %vm14462_vm7  ;;  %v2205_v49 = vmul.f32 %v2195_v54, %v2185_v44  ;;  %v7277_v27 = vpack.c.bf16 %v2201_v41, %v2199_v14 }
 0x395   : > { %v2184_v7 = vsel %vm14467_vm15, %v10084_v21, %v14466_v53  ;;  %vm14468_vm0 = vmmov %vm14462_vm7  ;;  %v2198_v50 = vmul.f32 %v2191_v22, %v2178_v55  ;;  %vm14469_vm7 = vcmp.lt.s32.totalorder %v8197_v10, 97  ;;  %v2243_v28 = vrot.slane %v6998_v29, %v14436_v38 }
 0x396   : > { %7272 = vmatpush1.bf16.msra.mxu1 %v7271_v34  ;;  %7174 = vmatprep.subr.bf16.mxu0 %v7173_v8  ;;  %v2181_v52 = vsel %vm14468_vm0, %v14463_v35, %v10106_v3  ;;  %v2235_v0 = vsel %vm14469_vm7, %v10216_v39, %v10182_v46  ;;  %v2229_v5 = vpop.permute.xlu0 %2228  ;;  %vm14470_vm14 = vmmov %vm14468_vm0  ;;  %v2203_v62 = vmul.f32 %v2195_v54, %v2184_v7 }
 0x397   : > { %7274 = vmatprep.subr.bf16.mxu1 %v7273_v57  ;;  %7176 = vmatpush1.bf16.msra.mxu0 %v7175_v43  ;;  %v2180_v31 = vsel %vm14470_vm14, %v14466_v53, %v10084_v21  ;;  %vm14471_vm12 = vmmov %vm14469_vm7  ;;  %v1515_v15 = vpop.permute.xlu1 %1514  ;;  %v7279_v45 = vpack.c.bf16 %v2200_v13, %v2198_v50  ;;  %v2204_v24 = vmul.f32 %v2191_v22, %v2181_v52  ;;  %v6999_v57 = vld [vmem:[%s13813_s1 + $0x26] ss:$8 sm:$0x3] }
 0x398   : > { %v2231_v3 = vsel %vm14471_vm12, %v10182_v46, %v10216_v39  ;;  %vm14472_vm15 = vmmov %vm14469_vm7  ;;  %v2253_v54 = vmul.f32 %v2247_v30, %v2235_v0  ;;  %v7281_v26 = vpack.c.bf16 %v2205_v49, %v2203_v62  ;;  %v2202_v42 = vmul.f32 %v2191_v22, %v2180_v31  ;;  %v2422_v13 = vld [vmem:[%s14222_s4] sm:$0xff] }
 0x399   : > { %v2234_v36 = vsel %vm14472_vm15, %v10192_v9, %v10154_v56  ;;  %vm14473_vm0 = vmmov %vm14469_vm7  ;;  %v2252_v46 = vmul.f32 %v2243_v28, %v2231_v3  ;;  %vm14477_vm15 = vcmp.lt.s32.totalorder %v8197_v10, 16  ;;  %v2295_v14 = vrot.slane %v6999_v57, %v14436_v38  ;;  %v2430_v53 = vld [vmem:[%s14222_s4 + $0x40] sm:$0xff]  ;;  %v2437_v3 = vld [vmem:[%s14222_s4 + $0x78] sm:$0xff] }
 0x39a   : > { %7276 = vmatpush1.bf16.msra.mxu1 %v7275_v63  ;;  %v2230_v21 = vsel %vm14473_vm0, %v10154_v56, %v10192_v9  ;;  %vm14474_vm7 = vmmov %vm14473_vm0  ;;  %v1517_v34 = vpop.permute.xlu0 %1516  ;;  %v2251_v37 = vmul.f32 %v2247_v30, %v2234_v36  ;;  %v7283_v2 = vpack.c.bf16 %v2204_v24, %v2202_v42 }
 0x39b   : > { %7278 = vmatprep.subr.bf16.mxu1 %v7277_v27  ;;  %v2237_v39 = vsel %vm14474_vm7, %v2229_v5, %v2221_v17  ;;  %v1523_v20 = vpop.permute.xlu1 %1522  ;;  %v2250_v12 = vmul.f32 %v2243_v28, %v2230_v21  ;;  %vm14475_vm14 = vmmov %vm14473_vm0  ;;  %v2232_v19 = vsel %vm14474_vm7, %v10285_v58, %v2227_v33  ;;  %v2444_v21 = vld [vmem:[%s14222_s4 + $0xb0] sm:$0xff] }
 0x39c   : > { %v2236_v1 = vsel %vm14475_vm14, %v2227_v33, %v10285_v58  ;;  %vm14476_vm12 = vmmov %vm14473_vm0  ;;  %v2257_v9 = vmul.f32 %v2247_v30, %v2237_v39  ;;  %v1528_v23 = vsel %vm14477_vm15, %v1515_v15, %v1523_v20  ;;  %v7285_v32 = vpack.c.bf16 %v2253_v54, %v2251_v37 }
 0x39d   : > { %v2233_v56 = vsel %vm14476_vm12, %v2221_v17, %v2229_v5  ;;  %vm14478_vm0 = vmmov %vm14477_vm15  ;;  %v7287_v48 = vpack.c.bf16 %v2252_v46, %v2250_v12  ;;  %v2255_v4 = vmul.f32 %v2247_v30, %v2236_v1  ;;  %v1551_v47 = vmul.f32 %v10262_v6, %v1528_v23  ;;  %v2429_v5 = vld [vmem:[%s14222_s4 + $0x38] sm:$0xff] }
 0x39e   : > { %7280 = vmatpush1.bf16.msra.mxu1 %v7279_v45  ;;  %v1532_v51 = vsel %vm14478_vm0, %v1523_v20, %v1515_v15  ;;  %v1525_v60 = vpop.permute.xlu0 %1524  ;;  %v2256_v61 = vmul.f32 %v2243_v28, %v2233_v56  ;;  %vm14479_vm14 = vmmov %vm14478_vm0  ;;  %v2254_v35 = vmul.f32 %v2243_v28, %v2232_v19  ;;  %v2299_v33 = vrot.slane %v6999_v57, %v14438_v40  ;;  %v2436_v28 = vld [vmem:[%s14222_s4 + $0x70] sm:$0xff]  ;;  %v7000_v20 = vld [vmem:[%s13813_s1 + $0x27] ss:$8 sm:$0x3] }
 0x39f   : > { %7282 = vmatprep.subr.bf16.mxu1 %v7281_v26  ;;  %v1529_v18 = vsel %vm14479_vm14, %v1517_v34, %v1525_v60  ;;  %vm14480_vm12 = vmmov %vm14478_vm0  ;;  %v2267_v16 = vpop.permute.xlu1 %2266  ;;  %v1550_v22 = vmul.f32 %v10251_v25, %v1532_v51  ;;  %v7289_v59 = vpack.c.bf16 %v2257_v9, %v2255_v4  ;;  %v2347_v23 = vrot.slane %v7000_v20, %v14436_v38 }
 0x3a0   : > { %v1533_v11 = vsel %vm14480_vm12, %v1525_v60, %v1517_v34  ;;  %v1553_v58 = vmul.f32 %v10262_v6, %v1529_v18  ;;  %v7291_v55 = vpack.c.bf16 %v2256_v61, %v2254_v35  ;;  %v2351_v51 = vrot.slane %v7000_v20, %v14438_v40 }
 0x3a1   : > { %v1552_v41 = vmul.f32 %v10251_v25, %v1533_v11  ;;  %v14021_v19 = vmov 0.0   ;;  %vm2674_vm15 = vcmask 261120   ;;  %vm14531_vm0 = vcmp.lt.s32.totalorder %v8197_v10, 31 }
 0x3a2   : > { %7284 = vmatpush1.bf16.msra.mxu1 %v7283_v2  ;;  %v2269_v43 = vpop.permute.xlu0 %2268  ;;  %v7177_v17 = vpack.c.bf16 %v1553_v58, %v1551_v47  ;;  %v2443_v2 = vld [vmem:[%s14222_s4 + $0xa8] sm:$0xff]  ;;  %vm14532_vm7 = vmmov %vm14531_vm0 }
 0x3a3   : > { %7286 = vmatprep.subr.bf16.mxu1 %v7285_v32  ;;  %v7179_v44 = vpack.c.bf16 %v1552_v41, %v1550_v22  ;;  %v2275_v8 = vpop.permute.xlu1 %2274  ;;  %v7001_v41 = vld [vmem:[%s13813_s1 + $0x30] ss:$8 sm:$0x3]  ;;  %vm14533_vm14 = vmmov %vm14531_vm0 }
 0x3a4   : > { %7178 = vmatprep.subr.bf16.mxu0 %v7177_v17  ;;  %v2282_v25 = vsel %vm886_vm6, %v2267_v16, %v2275_v8  ;;  %v2286_v6 = vsel %vm886_vm6, %v2275_v8, %v2267_v16  ;;  %vm14534_vm12 = vmmov %vm14531_vm0 }
 0x3a5   : > { %7180 = vmatpush1.bf16.msra.mxu0 %v7179_v44  ;;  %v2302_v49 = vmul.f32 %v2295_v14, %v2282_v25  ;;  %v2303_v27 = vmul.f32 %v2299_v33, %v2286_v6  ;;  %v2399_v44 = vrot.slane %v7001_v41, %v14436_v38 }
 0x3a6   : > { %7288 = vmatpush1.bf16.msra.mxu1 %v7287_v48  ;;  %v2277_v63 = vpop.permute.xlu0 %2276 }
 0x3a7   : > { %7290 = vmatprep.subr.bf16.mxu1 %v7289_v59  ;;  %v2283_v7 = vsel %vm886_vm6, %v2269_v43, %v2277_v63  ;;  %v2287_v29 = vsel %vm886_vm6, %v2277_v63, %v2269_v43  ;;  %v2271_v52 = vpop.permute.xlu1 %2270  ;;  %v2403_v43 = vrot.slane %v7001_v41, %v14438_v40 }
 0x3a8   : > { %v2304_v50 = vmul.f32 %v2295_v14, %v2283_v7  ;;  %v2305_v0 = vmul.f32 %v2299_v33, %v2287_v29  ;;  %2752 = vmatmul.mubr.f32.vlgmr.msra.gmra.mrb[8].mxu0 %v2422_v13 }
 0x3a9   : > { %2757 = vmatprep.mubr.f32.mxu0 %v2430_v53 }
 0x3aa   : > { %7292 = vmatpush1.bf16.msra.mxu1 %v7291_v55  ;;  %v7295_v31 = vpack.c.bf16 %v2304_v50, %v2302_v49  ;;  %v2273_v62 = vpop.permute.xlu0 %2272  ;;  %v7293_v30 = vpack.c.bf16 %v2305_v0, %v2303_v27 }
 0x3ab   : > { %v2279_v15 = vpop.permute.xlu1 %2278 }
 0x3ac   : > { %2758 = vmatmul.mubr.f32.gmra.mrb[10].mxu0 %v2429_v5  ;;  %7294 = vmatprep.subr.bf16.mxu1 %v7293_v30  ;;  %v2284_v45 = vsel %vm886_vm6, %v2271_v52, %v2279_v15  ;;  %v2288_v24 = vsel %vm886_vm6, %v2279_v15, %v2271_v52 }
 0x3ad   : > { %2763 = vmatprep.mubr.f32.mxu0 %v2437_v3  ;;  %v2306_v46 = vmul.f32 %v2295_v14, %v2284_v45  ;;  %v2307_v39 = vmul.f32 %v2299_v33, %v2288_v24 }
 0x3ae   : > { %7296 = vmatpush1.bf16.msra.mxu1 %v7295_v31  ;;  %v2281_v36 = vpop.permute.xlu0 %2280 }
 0x3af   : > { %v2285_v54 = vsel %vm886_vm6, %v2273_v62, %v2281_v36  ;;  %v2289_v26 = vsel %vm886_vm6, %v2281_v36, %v2273_v62  ;;  %v2319_v42 = vpop.permute.xlu1 %2318 }
 0x3b0   : > { %v2308_v34 = vmul.f32 %v2295_v14, %v2285_v54  ;;  %v2309_v37 = vmul.f32 %v2299_v33, %v2289_v26  ;;  %2764 = vmatmul.mubr.f32.gmra.mrb[12].mxu0 %v2436_v28 }
 0x3b1   : > { %2769 = vmatprep.mubr.f32.mxu0 %v2444_v21 }
 0x3b2   : > { %v7299_v12 = vpack.c.bf16 %v2308_v34, %v2306_v46  ;;  %v2321_v1 = vpop.permute.xlu0 %2320  ;;  %v7297_v56 = vpack.c.bf16 %v2309_v37, %v2307_v39  ;;  %v2434_v39 = vld [vmem:[%s14222_s4 + $0x60] sm:$0xff] }
 0x3b3   : > { %v2327_v9 = vpop.permute.xlu1 %2326 }
 0x3b4   : > { %2770 = vmatmul.mubr.f32.gmra.mrb[14].mxu0 %v2443_v2  ;;  %7298 = vmatprep.subr.bf16.mxu1 %v7297_v56  ;;  %v2334_v32 = vsel %vm910_vm5, %v2319_v42, %v2327_v9  ;;  %v2338_v48 = vsel %vm910_vm5, %v2327_v9, %v2319_v42  ;;  %v2426_v42 = vld [vmem:[%s14222_s4 + $0x20] sm:$0xff]  ;;  %v2433_v56 = vld [vmem:[%s14222_s4 + $0x58] sm:$0xff] }
 0x3b5   : > { %7300 = vmatpush1.bf16.msra.mxu1 %v7299_v12  ;;  %3018 = vmatprep.mubr.f32.mxu0 %v14021_v19  ;;  %v2354_v11 = vmul.f32 %v2347_v23, %v2334_v32  ;;  %v2355_v16 = vmul.f32 %v2351_v51, %v2338_v48  ;;  %v2440_v32 = vld [vmem:[%s14222_s4 + $0x90] sm:$0xff] }
 0x3b6   : > { %v2329_v60 = vpop.permute.xlu0 %2328  ;;  %v2428_v48 = vld [vmem:[%s14222_s4 + $0x30] sm:$0xff] }
 0x3b7   : > { %v2335_v4 = vsel %vm910_vm5, %v2321_v1, %v2329_v60  ;;  %v2339_v61 = vsel %vm910_vm5, %v2329_v60, %v2321_v1  ;;  %v2371_v18 = vpop.permute.xlu1 %2370  ;;  %v2448_v60 = vld [vmem:[%s14222_s4 + $0xd0] sm:$0xff] }
 0x3b8   : > { %v2356_v22 = vmul.f32 %v2347_v23, %v2335_v4  ;;  %v2357_v47 = vmul.f32 %v2351_v51, %v2339_v61  ;;  %v2447_v4 = vld [vmem:[%s14222_s4 + $0xc8] sm:$0xff] }
 0x3b9   : > { %v2435_v61 = vld [vmem:[%s14222_s4 + $0x68] sm:$0xff] }
 0x3ba   : > { %v7303_v58 = vpack.c.bf16 %v2356_v22, %v2354_v11  ;;  %v2373_v57 = vpop.permute.xlu0 %2372  ;;  %v7301_v59 = vpack.c.bf16 %v2357_v47, %v2355_v16  ;;  %v2449_v11 = vld [vmem:[%s14222_s4 + $0xd8] sm:$0xff] }
 0x3bb   : > { %v2379_v35 = vpop.permute.xlu1 %2378 }
 0x3bc   : > { %7302 = vmatprep.subr.bf16.mxu1 %v7301_v59  ;;  %v2386_v17 = vsel %vm934_vm4, %v2371_v18, %v2379_v35  ;;  %v2390_v8 = vsel %vm934_vm4, %v2379_v35, %v2371_v18  ;;  %v2442_v18 = vld [vmem:[%s14222_s4 + $0xa0] sm:$0xff] }
 0x3bd   : > { %7304 = vmatpush1.bf16.msra.mxu1 %v7303_v58  ;;  %v2406_v6 = vmul.f32 %v2399_v44, %v2386_v17  ;;  %v2407_v13 = vmul.f32 %v2403_v43, %v2390_v8 }
 0x3be   : > { %v2381_v55 = vpop.permute.xlu0 %2380 }
 0x3bf   : > { %v2387_v14 = vsel %vm934_vm4, %v2373_v57, %v2381_v55  ;;  %v2391_v33 = vsel %vm934_vm4, %v2381_v55, %v2373_v57  ;;  %v2323_v25 = vpop.permute.xlu1 %2322 }
 0x3c0   : > { %v2408_v63 = vmul.f32 %v2399_v44, %v2387_v14  ;;  %v2409_v53 = vmul.f32 %v2403_v43, %v2391_v33 }
 0x3c2   : > { %v7311_v7 = vpack.c.bf16 %v2408_v63, %v2406_v6  ;;  %v2325_v29 = vpop.permute.xlu0 %2324  ;;  %v7309_v52 = vpack.c.bf16 %v2409_v53, %v2407_v13 }
 0x3c3   : > { %v2331_v49 = vpop.permute.xlu1 %2330 }
 0x3c4   : > { %7310 = vmatprep.subr.bf16.mxu0 %v7309_v52  ;;  %v2336_v27 = vsel %vm910_vm5, %v2323_v25, %v2331_v49  ;;  %v2340_v50 = vsel %vm910_vm5, %v2331_v49, %v2323_v25 }
 0x3c5   : > { %7312 = vmatpush1.bf16.msra.mxu0 %v7311_v7  ;;  %v2358_v30 = vmul.f32 %v2347_v23, %v2336_v27  ;;  %v2359_v3 = vmul.f32 %v2351_v51, %v2340_v50 }
 0x3c6   : > { %v2333_v0 = vpop.permute.xlu0 %2332 }
 0x3c7   : > { %v2337_v5 = vsel %vm910_vm5, %v2325_v29, %v2333_v0  ;;  %v2341_v31 = vsel %vm910_vm5, %v2333_v0, %v2325_v29  ;;  %v2375_v62 = vpop.permute.xlu1 %2374 }
 0x3c8   : > { %v2360_v15 = vmul.f32 %v2347_v23, %v2337_v5  ;;  %v2361_v45 = vmul.f32 %v2351_v51, %v2341_v31  ;;  %v2441_v51 = vld [vmem:[%s14222_s4 + $0x98] sm:$0xff] }
 0x3ca   : > { %v7307_v24 = vpack.c.bf16 %v2360_v15, %v2358_v30  ;;  %v2377_v28 = vpop.permute.xlu0 %2376  ;;  %v7305_v36 = vpack.c.bf16 %v2361_v45, %v2359_v3 }
 0x3cb   : > { %v2383_v21 = vpop.permute.xlu1 %2382 }
 0x3cc   : > { %7306 = vmatprep.subr.bf16.mxu1 %v7305_v36  ;;  %v2388_v54 = vsel %vm934_vm4, %v2375_v62, %v2383_v21  ;;  %v2392_v26 = vsel %vm934_vm4, %v2383_v21, %v2375_v62 }
 0x3cd   : > { %7308 = vmatpush1.bf16.msra.mxu1 %v7307_v24  ;;  %v2410_v20 = vmul.f32 %v2399_v44, %v2388_v54  ;;  %v2411_v2 = vmul.f32 %v2403_v43, %v2392_v26 }
 0x3ce   : > { %v2385_v46 = vpop.permute.xlu0 %2384 }
 0x3cf   : > { %v2389_v34 = vsel %vm934_vm4, %v2377_v28, %v2385_v46  ;;  %v2393_v37 = vsel %vm934_vm4, %v2385_v46, %v2377_v28 }
 0x3d0   : > { %v2412_v12 = vmul.f32 %v2399_v44, %v2389_v34  ;;  %v2413_v1 = vmul.f32 %v2403_v43, %v2393_v37  ;;  %2930 = vmatmul.mubr.f32.vlgmr.msra.gmra.mrb[0].mxu1 %v2426_v42 }
 0x3d1   : > { %2935 = vmatprep.mubr.f32.mxu1 %v2434_v39 }
 0x3d2   : > { %v7315_v9 = vpack.c.bf16 %v2412_v12, %v2410_v20  ;;  %v7313_v23 = vpack.c.bf16 %v2413_v1, %v2411_v2 }
 0x3d4   : > { %2936 = vmatmul.mubr.f32.gmra.mrb[2].mxu1 %v2433_v56  ;;  %7314 = vmatprep.subr.bf16.mxu0 %v7313_v23 }
 0x3d5   : > { %7316 = vmatpush1.bf16.msra.mxu0 %v7315_v9  ;;  %2941 = vmatprep.mubr.f32.mxu1 %v2441_v51 }
 0x3d8   : > { %2942 = vmatmul.mubr.f32.gmra.mrb[4].mxu1 %v2440_v32  ;;  %7002 = vmatmul.mubr.msk.f32.vlgmr.msra.gmra.mrb[16].mxu0 %vm2674_vm15, %v2428_v48 }
 0x3d9   : > { %3024 = vmatprep.mubr.f32.mxu0 %v14021_v19  ;;  %2947 = vmatprep.mubr.f32.mxu1 %v2448_v60 }
 0x3dc   : > { %2948 = vmatmul.mubr.f32.gmra.mrb[6].mxu1 %v2447_v4  ;;  %7003 = vmatmul.mubr.msk.f32.gmra.mrb[18].mxu0 %vm2674_vm15, %v2435_v61  ;;  %v2657_v44 = vpop.permute.xlu1 %2656 }
 0x3dd   : > { %3030 = vmatprep.mubr.f32.mxu0 %v14021_v19 }
 0x3df   : > { %v2662_v33 = vpop.permute.xlu0 %2661 }
 0x3e0   : > { %7004 = vmatmul.mubr.msk.f32.gmra.mrb[20].mxu0 %vm2674_vm15, %v2442_v18  ;;  %v2667_v29 = vpop.permute.xlu1 %2666 }
 0x3e1   : > { %3036 = vmatprep.mubr.f32.mxu0 %v14021_v19 }
 0x3e3   : > { %v2672_v3 = vpop.permute.xlu0 %2671 }
 0x3e4   : > { %7005 = vmatmul.mubr.msk.f32.gmra.mrb[22].mxu0 %vm2674_vm15, %v2449_v11 }
 0x47b   : > { %v2753_v16 = vpop.f32.mrb[8].mxu0 }
 0x47c   : > { %v2755_v22 = vpop.f32.mrb[9].mxu0  ;;  %v2754_v43 = vadd.f32 %v2753_v16, %v2657_v44 }
 0x47d   : > { %v2756_v17 = vadd.f32 %v2755_v22, %v2657_v44 }
 0x47f   : > { %v2759_v47 = vpop.f32.mrb[10].mxu0 }
 0x480   : > { %v2761_v41 = vpop.f32.mrb[11].mxu0  ;;  %v2760_v6 = vadd.f32 %v2759_v47, %v2662_v33 }
 0x481   : > { %v2762_v13 = vadd.f32 %v2761_v41, %v2662_v33 }
 0x483   : > { %v2765_v58 = vpop.f32.mrb[12].mxu0 }
 0x484   : > { %v2767_v57 = vpop.f32.mrb[13].mxu0  ;;  %v2766_v49 = vadd.f32 %v2765_v58, %v2667_v29 }
 0x485   : > { %v2768_v27 = vadd.f32 %v2767_v57, %v2667_v29 }
 0x487   : > { %v2771_v59 = vpop.f32.mrb[14].mxu0 }
 0x488   : > { %v2773_v35 = vpop.f32.mrb[15].mxu0  ;;  %v2772_v24 = vadd.f32 %v2771_v59, %v2672_v3 }
 0x489   : > { %v2774_v36 = vadd.f32 %v2773_v35, %v2672_v3 }
 0x4a3   : > { %v2931_v8 = vpop.f32.mrb[0].mxu1 }
 0x4a4   : > { %v7718_v55 = vadd.f32 %v2931_v8, %v2754_v43  ;;  %v2933_v14 = vpop.f32.mrb[1].mxu1 }
 0x4a5   : > { %v7721_v25 = vadd.f32 %v2933_v14, %v2756_v17 }
 0x4a7   : > { %v2937_v63 = vpop.f32.mrb[2].mxu1 }
 0x4a8   : > { %v7724_v53 = vadd.f32 %v2937_v63, %v2760_v6  ;;  %v2939_v7 = vpop.f32.mrb[3].mxu1 }
 0x4a9   : > { %v7727_v52 = vadd.f32 %v2939_v7, %v2762_v13 }
 0x4ab   : > { %v2943_v50 = vpop.f32.mrb[4].mxu1  ;;  %v3020_v0 = vpop.f32.mrb[16].mxu0 }
 0x4ac   : > { %v7730_v5 = vadd.f32 %v2943_v50, %v2766_v49  ;;  %v7719_v31 = vadd.f32 %v7718_v55, %v3020_v0  ;;  %v2945_v62 = vpop.f32.mrb[5].mxu1  ;;  %v3022_v30 = vpop.f32.mrb[17].mxu0 }
 0x4ad   : > { %v7733_v15 = vadd.f32 %v2945_v62, %v2768_v27  ;;  %v7722_v45 = vadd.f32 %v7721_v25, %v3022_v30 }
 0x4ae   : > { %v10485_v28 = vmax.f32 %v7719_v31, 0.0 }
 0x4af   : > { %v2949_v21 = vpop.f32.mrb[6].mxu1  ;;  %v3026_v54 = vpop.f32.mrb[18].mxu0  ;;  %v10555_v48 = vmax.f32 %v7722_v45, 0.0 }
 0x4b0   : > { %v7736_v26 = vadd.f32 %v2949_v21, %v2772_v24  ;;  %v7725_v42 = vadd.f32 %v7724_v53, %v3026_v54  ;;  %v3028_v46 = vpop.f32.mrb[19].mxu0  ;;  %3051 = vrot.lane.b32.xlu1 %v10485_v28, %s14154_s26  ;;  %v2951_v39 = vpop.f32.mrb[7].mxu1 }
 0x4b1   : > { %v7728_v34 = vadd.f32 %v7727_v52, %v3028_v46  ;;  %v7739_v37 = vadd.f32 %v2951_v39, %v2774_v36 }
 0x4b2   : > { %v10489_v20 = vmax.f32 %v7725_v42, 0.0 }
 0x4b3   : > { %v3032_v2 = vpop.f32.mrb[20].mxu0  ;;  %v10561_v60 = vmax.f32 %v7728_v34, 0.0 }
 0x4b4   : > { %v10491_v12 = vadd.f32 %v7730_v5, %v3032_v2  ;;  %v3034_v1 = vpop.f32.mrb[21].mxu0  ;;  %3103 = vrot.lane.b32.xlu1 %v10485_v28, %s14156_s11  ;;  %3053 = vrot.lane.b32.xlu0 %v10489_v20, %s14154_s26  ;;  %v3075_v5 = vld [vmem:[%s13813_s1] ss:$8 sm:$0x3] }
 0x4b5   : > { %v10497_v56 = vadd.f32 %v7733_v15, %v3034_v1  ;;  %v10745_v30 = vrot.slane %v3075_v5, %v14436_v38  ;;  %v10748_v3 = vrot.slane %v3075_v5, %v14438_v40 }
 0x4b6   : > { %v10622_v61 = vmax.f32 %v10491_v12, 0.0 }
 0x4b7   : > { %v3038_v9 = vpop.f32.mrb[22].mxu0  ;;  %v10761_v24 = vmax.f32 %v10497_v56, 0.0 }
 0x4b8   : > { %v10499_v23 = vadd.f32 %v7736_v26, %v3038_v9  ;;  %v3040_v51 = vpop.f32.mrb[23].mxu0  ;;  %3155 = vrot.lane.b32.xlu1 %v10485_v28, %s14158_s12  ;;  %3105 = vrot.lane.b32.xlu0 %v10489_v20, %s14156_s11 }
 0x4b9   : > { %v10505_v32 = vadd.f32 %v7739_v37, %v3040_v51 }
 0x4ba   : > { %v10633_v16 = vmax.f32 %v10499_v23, 0.0 }
 0x4bb   : > { %v10784_v56 = vmax.f32 %v10505_v32, 0.0 }
 0x4bc   : > { %3207 = vrot.lane.b32.xlu1 %v10485_v28, %s14160_s27  ;;  %3157 = vrot.lane.b32.xlu0 %v10489_v20, %s14158_s12 }
 0x4c0   : > { %3259 = vrot.lane.b32.xlu1 %v10485_v28, %s14162_s2  ;;  %3209 = vrot.lane.b32.xlu0 %v10489_v20, %s14160_s27 }
 0x4c4   : > { %3311 = vrot.lane.b32.xlu1 %v10485_v28, %s14164_s22  ;;  %3261 = vrot.lane.b32.xlu0 %v10489_v20, %s14162_s2 }
 0x4c8   : > { %3363 = vrot.lane.b32.xlu1 %v10485_v28, %s14166_s19  ;;  %3313 = vrot.lane.b32.xlu0 %v10489_v20, %s14164_s22 }
 0x4cc   : > { %3415 = vrot.lane.b32.xlu1 %v10485_v28, %s14236_s16  ;;  %3365 = vrot.lane.b32.xlu0 %v10489_v20, %s14166_s19 }
 0x4d0   : > { %3467 = vrot.lane.b32.xlu1 %v10485_v28, %s14167_s24  ;;  %3417 = vrot.lane.b32.xlu0 %v10489_v20, %s14236_s16 }
 0x4d4   : > { %3519 = vrot.lane.b32.xlu1 %v10485_v28, %s14168_s13  ;;  %3469 = vrot.lane.b32.xlu0 %v10489_v20, %s14167_s24 }
 0x4d8   : > { %3571 = vrot.lane.b32.xlu1 %v10485_v28, %s14150_s30  ;;  %3521 = vrot.lane.b32.xlu0 %v10489_v20, %s14168_s13 }
 0x4dc   : > { %3623 = vrot.lane.b32.xlu1 %v10485_v28, %s14151_s21  ;;  %3573 = vrot.lane.b32.xlu0 %v10489_v20, %s14150_s30 }
 0x4e0   : > { %3703 = vrot.lane.b32.xlu1 %v10485_v28, %s14152_s18  ;;  %3625 = vrot.lane.b32.xlu0 %v10489_v20, %s14151_s21 }
 0x4e4   : > { %3755 = vrot.lane.b32.xlu1 %v10485_v28, %s14153_s25  ;;  %3705 = vrot.lane.b32.xlu0 %v10489_v20, %s14152_s18 }
 0x4e8   : > { %3807 = vrot.lane.b32.xlu1 %v10485_v28, %s14155_s29  ;;  %3757 = vrot.lane.b32.xlu0 %v10489_v20, %s14153_s25 }
 0x4ec   : > { %3059 = vrot.lane.b32.xlu1 %v10555_v48, %s14154_s26  ;;  %3809 = vrot.lane.b32.xlu0 %v10489_v20, %s14155_s29 }
 0x4f0   : > { %3111 = vrot.lane.b32.xlu1 %v10555_v48, %s14156_s11  ;;  %3061 = vrot.lane.b32.xlu0 %v10561_v60, %s14154_s26 }
 0x4f4   : > { %3163 = vrot.lane.b32.xlu1 %v10555_v48, %s14158_s12  ;;  %3113 = vrot.lane.b32.xlu0 %v10561_v60, %s14156_s11 }
 0x4f8   : > { %3215 = vrot.lane.b32.xlu1 %v10555_v48, %s14160_s27  ;;  %3165 = vrot.lane.b32.xlu0 %v10561_v60, %s14158_s12 }
 0x4fc   : > { %3267 = vrot.lane.b32.xlu1 %v10555_v48, %s14162_s2  ;;  %3217 = vrot.lane.b32.xlu0 %v10561_v60, %s14160_s27 }
 0x500   : > { %3319 = vrot.lane.b32.xlu1 %v10555_v48, %s14164_s22  ;;  %3269 = vrot.lane.b32.xlu0 %v10561_v60, %s14162_s2 }
 0x504   : > { %3371 = vrot.lane.b32.xlu1 %v10555_v48, %s14166_s19  ;;  %3321 = vrot.lane.b32.xlu0 %v10561_v60, %s14164_s22 }
 0x508   : > { %3423 = vrot.lane.b32.xlu1 %v10555_v48, %s14236_s16  ;;  %3373 = vrot.lane.b32.xlu0 %v10561_v60, %s14166_s19 }
 0x50c   : > { %3475 = vrot.lane.b32.xlu1 %v10555_v48, %s14167_s24  ;;  %3425 = vrot.lane.b32.xlu0 %v10561_v60, %s14236_s16 }
 0x510   : > { %3527 = vrot.lane.b32.xlu1 %v10555_v48, %s14168_s13  ;;  %3477 = vrot.lane.b32.xlu0 %v10561_v60, %s14167_s24 }
 0x514   : > { %3579 = vrot.lane.b32.xlu1 %v10555_v48, %s14150_s30  ;;  %3529 = vrot.lane.b32.xlu0 %v10561_v60, %s14168_s13 }
 0x518   : > { %3631 = vrot.lane.b32.xlu1 %v10555_v48, %s14151_s21  ;;  %3581 = vrot.lane.b32.xlu0 %v10561_v60, %s14150_s30 }
 0x51c   : > { %3711 = vrot.lane.b32.xlu1 %v10555_v48, %s14152_s18  ;;  %3633 = vrot.lane.b32.xlu0 %v10561_v60, %s14151_s21 }
 0x520   : > { %3763 = vrot.lane.b32.xlu1 %v10555_v48, %s14153_s25  ;;  %3713 = vrot.lane.b32.xlu0 %v10561_v60, %s14152_s18 }
 0x522   : > { %v10615_v4 = vpop.permute.xlu1 %3051 }
 0x524   : > { %3815 = vrot.lane.b32.xlu1 %v10555_v48, %s14155_s29  ;;  %3765 = vrot.lane.b32.xlu0 %v10561_v60, %s14153_s25 }
 0x526   : > { %v10624_v18 = vpop.permute.xlu1 %3103  ;;  %v10626_v11 = vpop.permute.xlu0 %3053 }
 0x528   : > { %3817 = vrot.lane.b32.xlu0 %v10561_v60, %s14155_s29  ;;  %3055 = vrot.lane.b32.xlu1 %v10622_v61, %s14154_s26 }
 0x52a   : > { %v10635_v22 = vpop.permute.xlu1 %3155  ;;  %v10637_v47 = vpop.permute.xlu0 %3105 }
 0x52c   : > { %3107 = vrot.lane.b32.xlu1 %v10622_v61, %s14156_s11  ;;  %3057 = vrot.lane.b32.xlu0 %v10633_v16, %s14154_s26 }
 0x52e   : > { %v10643_v41 = vpop.permute.xlu1 %3207  ;;  %v10645_v58 = vpop.permute.xlu0 %3157 }
 0x530   : > { %3159 = vrot.lane.b32.xlu1 %v10622_v61, %s14158_s12  ;;  %3109 = vrot.lane.b32.xlu0 %v10633_v16, %s14156_s11 }
 0x532   : > { %v10651_v57 = vpop.permute.xlu1 %3259  ;;  %v10653_v59 = vpop.permute.xlu0 %3209 }
 0x534   : > { %3211 = vrot.lane.b32.xlu1 %v10622_v61, %s14160_s27  ;;  %3161 = vrot.lane.b32.xlu0 %v10633_v16, %s14158_s12 }
 0x536   : > { %v10659_v35 = vpop.permute.xlu1 %3311  ;;  %v10661_v44 = vpop.permute.xlu0 %3261 }
 0x538   : > { %3263 = vrot.lane.b32.xlu1 %v10622_v61, %s14162_s2  ;;  %3213 = vrot.lane.b32.xlu0 %v10633_v16, %s14160_s27 }
 0x53a   : > { %v10667_v43 = vpop.permute.xlu1 %3363  ;;  %v10669_v17 = vpop.permute.xlu0 %3313 }
 0x53c   : > { %3315 = vrot.lane.b32.xlu1 %v10622_v61, %s14164_s22  ;;  %3265 = vrot.lane.b32.xlu0 %v10633_v16, %s14162_s2 }
 0x53e   : > { %v10675_v8 = vpop.permute.xlu1 %3415  ;;  %v10677_v55 = vpop.permute.xlu0 %3365 }
 0x53f   : > { %14481 = vst [vmem:[#allocation43_spill] sm:$0xff] %v10675_v8 }
 0x540   : > { %3367 = vrot.lane.b32.xlu1 %v10622_v61, %s14166_s19  ;;  %3317 = vrot.lane.b32.xlu0 %v10633_v16, %s14164_s22 }
 0x542   : > { %v10683_v14 = vpop.permute.xlu1 %3467  ;;  %v10685_v33 = vpop.permute.xlu0 %3417 }
 0x543   : > { %14482 = vst [vmem:[#allocation64_spill] sm:$0xff] %v10683_v14  ;;  %14483 = vst [vmem:[#allocation103_spill] sm:$0xff] %v10685_v33 }
 0x544   : > { %3419 = vrot.lane.b32.xlu1 %v10622_v61, %s14236_s16  ;;  %3369 = vrot.lane.b32.xlu0 %v10633_v16, %s14166_s19 }
 0x546   : > { %v10691_v25 = vpop.permute.xlu1 %3519  ;;  %v10693_v6 = vpop.permute.xlu0 %3469 }
 0x547   : > { %14484 = vst [vmem:[#allocation102_spill] sm:$0xff] %v10691_v25  ;;  %14485 = vst [vmem:[#allocation42_spill] sm:$0xff] %v10693_v6 }
 0x548   : > { %3471 = vrot.lane.b32.xlu1 %v10622_v61, %s14167_s24  ;;  %3421 = vrot.lane.b32.xlu0 %v10633_v16, %s14236_s16 }
 0x54a   : > { %v10699_v13 = vpop.permute.xlu1 %3571  ;;  %v10701_v63 = vpop.permute.xlu0 %3521 }
 0x54b   : > { %14486 = vst [vmem:[#allocation17_spill] sm:$0xff] %v10699_v13  ;;  %14487 = vst [vmem:[#allocation104_spill] sm:$0xff] %v10701_v63 }
 0x54c   : > { %3523 = vrot.lane.b32.xlu1 %v10622_v61, %s14168_s13  ;;  %3473 = vrot.lane.b32.xlu0 %v10633_v16, %s14167_s24 }
 0x54e   : > { %v10707_v53 = vpop.permute.xlu1 %3623  ;;  %v10709_v7 = vpop.permute.xlu0 %3573 }
 0x54f   : > { %14488 = vst [vmem:[#allocation44_spill] sm:$0xff] %v10707_v53  ;;  %14489 = vst [vmem:[#allocation19_spill] sm:$0xff] %v10709_v7 }
 0x550   : > { %3575 = vrot.lane.b32.xlu1 %v10622_v61, %s14150_s30  ;;  %3525 = vrot.lane.b32.xlu0 %v10633_v16, %s14168_s13 }
 0x552   : > { %v10715_v29 = vpop.permute.xlu1 %3703  ;;  %v10717_v52 = vpop.permute.xlu0 %3625 }
 0x553   : > { %14490 = vst [vmem:[#allocation105_spill] sm:$0xff] %v10715_v29  ;;  %14491 = vst [vmem:[#allocation66_spill] sm:$0xff] %v10717_v52 }
 0x554   : > { %3627 = vrot.lane.b32.xlu1 %v10622_v61, %s14151_s21  ;;  %3577 = vrot.lane.b32.xlu0 %v10633_v16, %s14150_s30 }
 0x556   : > { %v10723_v49 = vpop.permute.xlu1 %3755  ;;  %v10725_v27 = vpop.permute.xlu0 %3705 }
 0x557   : > { %14492 = vst [vmem:[#allocation45_spill] sm:$0xff] %v10723_v49  ;;  %14493 = vst [vmem:[#allocation20_spill] sm:$0xff] %v10725_v27 }
 0x558   : > { %3707 = vrot.lane.b32.xlu1 %v10622_v61, %s14152_s18  ;;  %3629 = vrot.lane.b32.xlu0 %v10633_v16, %s14151_s21 }
 0x55a   : > { %v10731_v50 = vpop.permute.xlu1 %3807  ;;  %v10733_v0 = vpop.permute.xlu0 %3757 }
 0x55b   : > { %14494 = vst [vmem:[#allocation65_spill] sm:$0xff] %v10731_v50  ;;  %14495 = vst [vmem:[#allocation46_spill] sm:$0xff] %v10733_v0 }
 0x55c   : > { %3759 = vrot.lane.b32.xlu1 %v10622_v61, %s14153_s25  ;;  %3709 = vrot.lane.b32.xlu0 %v10633_v16, %s14152_s18 }
 0x55e   : > { %v3060_v31 = vpop.permute.xlu1 %3059  ;;  %v10742_v62 = vpop.permute.xlu0 %3809 }
 0x55f   : > { %14496 = vst [vmem:[#allocation21_spill] sm:$0xff] %v10742_v62  ;;  %v3067_v15 = vsel %vm366_vm2, %v10615_v4, %v3060_v31  ;;  %v3071_v45 = vsel %vm366_vm2, %v3060_v31, %v10615_v4 }
 0x560   : > { %3811 = vrot.lane.b32.xlu1 %v10622_v61, %s14155_s29  ;;  %3761 = vrot.lane.b32.xlu0 %v10633_v16, %s14153_s25  ;;  %v3087_v42 = vmul.f32 %v10745_v30, %v3071_v45  ;;  %v3088_v46 = vmul.f32 %v10748_v3, %v3067_v15 }
 0x562   : > { %v10763_v36 = vpop.permute.xlu1 %3111  ;;  %v3062_v21 = vpop.permute.xlu0 %3061 }
 0x563   : > { %v3068_v54 = vsel %vm366_vm2, %v10626_v11, %v3062_v21  ;;  %v3072_v26 = vsel %vm366_vm2, %v3062_v21, %v10626_v11 }
 0x564   : > { %v3089_v39 = vmul.f32 %v10745_v30, %v3072_v26  ;;  %v3090_v34 = vmul.f32 %v10748_v3, %v3068_v54  ;;  %3063 = vrot.lane.b32.xlu1 %v10761_v24, %s14154_s26  ;;  %3813 = vrot.lane.b32.xlu0 %v10633_v16, %s14155_s29 }
 0x566   : > { %v7319_v37 = vpack.c.bf16 %v3089_v39, %v3087_v42  ;;  %v10779_v2 = vpop.permute.xlu1 %3163  ;;  %v10781_v12 = vpop.permute.xlu0 %3113  ;;  %v7317_v1 = vpack.c.bf16 %v3090_v34, %v3088_v46 }
 0x567   : > { %v3120_v14 = vsel %vm389_vm1, %v10637_v47, %v10781_v12 }
 0x568   : > { %7318 = vmatprep.subr.bf16.mxu0 %v7317_v1  ;;  %3859 = vrot.lane.b32.xlu1 %v10485_v28, %s14157_s20 }
 0x569   : > { %3065 = vrot.lane.b32.xlu0 %v10784_v56, %s14154_s26  ;;  %7320 = vmatpush1.bf16.msra.mxu0 %v7319_v37 }
 0x56a   : > { %v10790_v9 = vpop.permute.xlu1 %3215  ;;  %v10792_v23 = vpop.permute.xlu0 %3165 }
 0x56c   : > { %3115 = vrot.lane.b32.xlu1 %v10761_v24, %s14156_s11 }
 0x56d   : > { %3861 = vrot.lane.b32.xlu0 %v10489_v20, %s14157_s20 }
 0x56e   : > { %v10798_v51 = vpop.permute.xlu1 %3267  ;;  %v10800_v32 = vpop.permute.xlu0 %3217 }
 0x570   : > { %3167 = vrot.lane.b32.xlu1 %v10761_v24, %s14158_s12 }
 0x571   : > { %3117 = vrot.lane.b32.xlu0 %v10784_v56, %s14156_s11 }
 0x572   : > { %v10806_v4 = vpop.permute.xlu1 %3319  ;;  %v10808_v11 = vpop.permute.xlu0 %3269 }
 0x574   : > { %3219 = vrot.lane.b32.xlu1 %v10761_v24, %s14160_s27 }
 0x575   : > { %3869 = vrot.lane.b32.xlu0 %v10561_v60, %s14157_s20 }
 0x576   : > { %v10814_v5 = vpop.permute.xlu1 %3371  ;;  %v10816_v31 = vpop.permute.xlu0 %3321 }
 0x578   : > { %3271 = vrot.lane.b32.xlu1 %v10761_v24, %s14162_s2 }
 0x579   : > { %3169 = vrot.lane.b32.xlu0 %v10784_v56, %s14158_s12 }
 0x57a   : > { %v10822_v15 = vpop.permute.xlu1 %3423  ;;  %v10824_v45 = vpop.permute.xlu0 %3373 }
 0x57c   : > { %3323 = vrot.lane.b32.xlu1 %v10761_v24, %s14164_s22 }
 0x57d   : > { %3865 = vrot.lane.b32.xlu0 %v10633_v16, %s14157_s20 }
 0x57e   : > { %v10830_v21 = vpop.permute.xlu1 %3475  ;;  %v10832_v54 = vpop.permute.xlu0 %3425 }
 0x57f   : > { %14497 = vst [vmem:[#allocation71_spill] sm:$0xff] %v10830_v21  ;;  %14498 = vst [vmem:[#allocation72_spill] sm:$0xff] %v10832_v54 }
 0x580   : > { %3375 = vrot.lane.b32.xlu1 %v10761_v24, %s14166_s19 }
 0x581   : > { %3221 = vrot.lane.b32.xlu0 %v10784_v56, %s14160_s27 }
 0x582   : > { %v10838_v26 = vpop.permute.xlu1 %3527  ;;  %v10840_v42 = vpop.permute.xlu0 %3477 }
 0x583   : > { %14499 = vst [vmem:[#allocation39_spill] sm:$0xff] %v10838_v26  ;;  %14500 = vst [vmem:[#allocation40_spill] sm:$0xff] %v10840_v42 }
 0x584   : > { %3427 = vrot.lane.b32.xlu1 %v10761_v24, %s14236_s16 }
 0x585   : > { %3913 = vrot.lane.b32.xlu0 %v10489_v20, %s14159_s28 }
 0x586   : > { %v10846_v46 = vpop.permute.xlu1 %3579  ;;  %v10848_v39 = vpop.permute.xlu0 %3529 }
 0x587   : > { %14501 = vst [vmem:[#allocation108_spill] sm:$0xff] %v10846_v46  ;;  %14502 = vst [vmem:[#allocation47_spill] sm:$0xff] %v10848_v39 }
 0x588   : > { %3479 = vrot.lane.b32.xlu1 %v10761_v24, %s14167_s24 }
 0x589   : > { %3273 = vrot.lane.b32.xlu0 %v10784_v56, %s14162_s2 }
 0x58a   : > { %v10854_v34 = vpop.permute.xlu1 %3631  ;;  %v10856_v37 = vpop.permute.xlu0 %3581 }
 0x58b   : > { %14503 = vst [vmem:[#allocation22_spill] sm:$0xff] %v10854_v34  ;;  %14504 = vst [vmem:[#allocation48_spill] sm:$0xff] %v10856_v37 }
 0x58c   : > { %3531 = vrot.lane.b32.xlu1 %v10761_v24, %s14168_s13 }
 0x58d   : > { %3921 = vrot.lane.b32.xlu0 %v10561_v60, %s14159_s28 }
 0x58e   : > { %v10862_v1 = vpop.permute.xlu1 %3711  ;;  %v10864_v19 = vpop.permute.xlu0 %3633 }
 0x58f   : > { %14505 = vst [vmem:[#allocation23_spill] sm:$0xff] %v10862_v1  ;;  %14506 = vst [vmem:[#allocation109_spill] sm:$0xff] %v10864_v19 }
 0x590   : > { %3583 = vrot.lane.b32.xlu1 %v10761_v24, %s14150_s30 }
 0x591   : > { %3325 = vrot.lane.b32.xlu0 %v10784_v56, %s14164_s22 }
 0x592   : > { %v10870_v62 = vpop.permute.xlu1 %3763  ;;  %v10872_v50 = vpop.permute.xlu0 %3713 }
 0x593   : > { %14507 = vst [vmem:[#allocation49_spill] sm:$0xff] %v10870_v62  ;;  %14508 = vst [vmem:[#allocation24_spill] sm:$0xff] %v10872_v50 }
 0x594   : > { %3635 = vrot.lane.b32.xlu1 %v10761_v24, %s14151_s21 }
 0x595   : > { %3917 = vrot.lane.b32.xlu0 %v10633_v16, %s14159_s28 }
 0x596   : > { %v10878_v0 = vpop.permute.xlu1 %3815  ;;  %v10880_v49 = vpop.permute.xlu0 %3765 }
 0x597   : > { %14509 = vst [vmem:[#allocation75_spill] sm:$0xff] %v10878_v0  ;;  %14510 = vst [vmem:[#allocation111_spill] sm:$0xff] %v10880_v49  ;;  %v4328_v49 = vld [vmem:[%s13818_s6 + $0x8] sm:$0xff] }
 0x598   : > { %3715 = vrot.lane.b32.xlu1 %v10761_v24, %s14152_s18  ;;  %4655 = vmatprep.mubr.f32.mxu0 %v4328_v49 }
 0x599   : > { %3377 = vrot.lane.b32.xlu0 %v10784_v56, %s14166_s19 }
 0x59a   : > { %v10886_v1 = vpop.permute.xlu0 %3817  ;;  %v10888_v62 = vpop.permute.xlu1 %3055 }
 0x59b   : > { %14511 = vst [vmem:[#allocation25_spill] sm:$0xff] %v10886_v1 }
 0x59c   : > { %3767 = vrot.lane.b32.xlu1 %v10761_v24, %s14153_s25 }
 0x59d   : > { %3965 = vrot.lane.b32.xlu0 %v10489_v20, %s14161_s0 }
 0x59e   : > { %v10894_v29 = vpop.permute.xlu1 %3107  ;;  %v10896_v0 = vpop.permute.xlu0 %3057 }
 0x5a0   : > { %3819 = vrot.lane.b32.xlu1 %v10761_v24, %s14155_s29 }
 0x5a1   : > { %3429 = vrot.lane.b32.xlu0 %v10784_v56, %s14236_s16 }
 0x5a2   : > { %v10905_v1 = vpop.permute.xlu1 %3159  ;;  %v10907_v50 = vpop.permute.xlu0 %3109 }
 0x5a4   : > { %3867 = vrot.lane.b32.xlu1 %v10555_v48, %s14157_s20 }
 0x5a5   : > { %3973 = vrot.lane.b32.xlu0 %v10561_v60, %s14161_s0 }
 0x5a6   : > { %v10913_v27 = vpop.permute.xlu1 %3211  ;;  %v10915_v52 = vpop.permute.xlu0 %3161 }
 0x5a8   : > { %3863 = vrot.lane.b32.xlu1 %v10622_v61, %s14157_s20 }
 0x5a9   : > { %3481 = vrot.lane.b32.xlu0 %v10784_v56, %s14167_s24 }
 0x5aa   : > { %v10921_v49 = vpop.permute.xlu1 %3263  ;;  %v10923_v19 = vpop.permute.xlu0 %3213 }
 0x5ac   : > { %3871 = vrot.lane.b32.xlu1 %v10761_v24, %s14157_s20 }
 0x5ad   : > { %3969 = vrot.lane.b32.xlu0 %v10633_v16, %s14161_s0 }
 0x5ae   : > { %v10929_v53 = vpop.permute.xlu1 %3315  ;;  %v10931_v34 = vpop.permute.xlu0 %3265 }
 0x5b0   : > { %3911 = vrot.lane.b32.xlu1 %v10485_v28, %s14159_s28 }
 0x5b1   : > { %3533 = vrot.lane.b32.xlu0 %v10784_v56, %s14168_s13 }
 0x5b2   : > { %v10937_v7 = vpop.permute.xlu1 %3367  ;;  %v10939_v37 = vpop.permute.xlu0 %3317 }
 0x5b4   : > { %3919 = vrot.lane.b32.xlu1 %v10555_v48, %s14159_s28 }
 0x5b5   : > { %4017 = vrot.lane.b32.xlu0 %v10489_v20, %s14163_s3 }
 0x5b6   : > { %v10945_v13 = vpop.permute.xlu1 %3419  ;;  %v10947_v46 = vpop.permute.xlu0 %3369 }
 0x5b7   : > { %14512 = vst [vmem:[#allocation50_spill] sm:$0xff] %v10945_v13  ;;  %14513 = vst [vmem:[#allocation76_spill] sm:$0xff] %v10947_v46 }
 0x5b8   : > { %3915 = vrot.lane.b32.xlu1 %v10622_v61, %s14159_s28 }
 0x5b9   : > { %3585 = vrot.lane.b32.xlu0 %v10784_v56, %s14150_s30 }
 0x5ba   : > { %v10953_v63 = vpop.permute.xlu1 %3471  ;;  %v10955_v39 = vpop.permute.xlu0 %3421 }
 0x5bb   : > { %14514 = vst [vmem:[#allocation90_spill] sm:$0xff] %v10953_v63  ;;  %14515 = vst [vmem:[#allocation96_spill] sm:$0xff] %v10955_v39 }
 0x5bc   : > { %3923 = vrot.lane.b32.xlu1 %v10761_v24, %s14159_s28 }
 0x5bd   : > { %4025 = vrot.lane.b32.xlu0 %v10561_v60, %s14163_s3 }
 0x5be   : > { %v10961_v25 = vpop.permute.xlu1 %3523  ;;  %v10963_v26 = vpop.permute.xlu0 %3473 }
 0x5bf   : > { %14516 = vst [vmem:[#allocation26_spill] sm:$0xff] %v10961_v25  ;;  %14517 = vst [vmem:[#allocation51_spill] sm:$0xff] %v10963_v26 }
 0x5c0   : > { %3963 = vrot.lane.b32.xlu1 %v10485_v28, %s14161_s0 }
 0x5c1   : > { %3637 = vrot.lane.b32.xlu0 %v10784_v56, %s14151_s21 }
 0x5c2   : > { %v10969_v6 = vpop.permute.xlu1 %3575  ;;  %v10971_v63 = vpop.permute.xlu0 %3525 }
 0x5c3   : > { %14518 = vst [vmem:[#allocation68_spill] sm:$0xff] %v10969_v6  ;;  %14519 = vst [vmem:[#allocation91_spill] sm:$0xff] %v10971_v63 }
 0x5c4   : > { %3971 = vrot.lane.b32.xlu1 %v10555_v48, %s14161_s0 }
 0x5c5   : > { %4021 = vrot.lane.b32.xlu0 %v10633_v16, %s14163_s3 }
 0x5c6   : > { %v10977_v39 = vpop.permute.xlu1 %3627  ;;  %v10979_v25 = vpop.permute.xlu0 %3577 }
 0x5c7   : > { %14520 = vst [vmem:[#allocation97_spill] sm:$0xff] %v10977_v39  ;;  %14521 = vst [vmem:[#allocation67_spill] sm:$0xff] %v10979_v25 }
 0x5c8   : > { %3967 = vrot.lane.b32.xlu1 %v10622_v61, %s14161_s0 }
 0x5c9   : > { %4069 = vrot.lane.b32.xlu0 %v10489_v20, %s14165_s15 }
 0x5ca   : > { %v10985_v26 = vpop.permute.xlu1 %3707  ;;  %v10987_v6 = vpop.permute.xlu0 %3629 }
 0x5cb   : > { %14522 = vst [vmem:[#allocation92_spill] sm:$0xff] %v10985_v26  ;;  %14523 = vst [vmem:[#allocation98_spill] sm:$0xff] %v10987_v6 }
 0x5cc   : > { %3975 = vrot.lane.b32.xlu1 %v10761_v24, %s14161_s0 }
 0x5cd   : > { %4077 = vrot.lane.b32.xlu0 %v10561_v60, %s14165_s15 }
 0x5ce   : > { %v10993_v63 = vpop.permute.xlu1 %3759  ;;  %v10995_v39 = vpop.permute.xlu0 %3709 }
 0x5cf   : > { %14524 = vst [vmem:[#allocation113_spill] sm:$0xff] %v10993_v63  ;;  %14525 = vst [vmem:[#allocation79_spill] sm:$0xff] %v10995_v39  ;;  %v7006_v39 = vld [vmem:[%s13813_s1 + $0x1] ss:$8 sm:$0x3] }
 0x5d0   : > { %4015 = vrot.lane.b32.xlu1 %v10485_v28, %s14163_s3 }
 0x5d1   : > { %3717 = vrot.lane.b32.xlu0 %v10784_v56, %s14152_s18 }
 0x5d2   : > { %v11001_v25 = vpop.permute.xlu1 %3811  ;;  %v11003_v26 = vpop.permute.xlu0 %3761 }
 0x5d3   : > { %14526 = vst [vmem:[#allocation93_spill] sm:$0xff] %v11001_v25  ;;  %14527 = vst [vmem:[#allocation99_spill] sm:$0xff] %v11003_v26  ;;  %v3119_v26 = vsel %vm389_vm1, %v10624_v18, %v10763_v36 }
 0x5d4   : > { %4023 = vrot.lane.b32.xlu1 %v10555_v48, %s14163_s3 }
 0x5d5   : > { %4073 = vrot.lane.b32.xlu0 %v10633_v16, %s14165_s15 }
 0x5d6   : > { %v3064_v6 = vpop.permute.xlu1 %3063  ;;  %v11009_v63 = vpop.permute.xlu0 %3813 }
 0x5d7   : > { %14528 = vst [vmem:[#allocation80_spill] sm:$0xff] %v11009_v63  ;;  %v3073_v42 = vsel %vm366_vm2, %v3064_v6, %v10888_v62  ;;  %v3069_v25 = vsel %vm366_vm2, %v10888_v62, %v3064_v6  ;;  %v3136_v63 = vrot.slane %v7006_v39, %v14438_v40  ;;  %v3124_v6 = vsel %vm389_vm1, %v10781_v12, %v10637_v47 }
 0x5d8   : > { %4019 = vrot.lane.b32.xlu1 %v10622_v61, %s14163_s3  ;;  %v3091_v62 = vmul.f32 %v10745_v30, %v3073_v42  ;;  %v3092_v54 = vmul.f32 %v10748_v3, %v3069_v25  ;;  %v3132_v47 = vrot.slane %v7006_v39, %v14436_v38  ;;  %v3172_v39 = vsel %vm413_vm3, %v10645_v58, %v10792_v23 }
 0x5d9   : > { %3769 = vrot.lane.b32.xlu0 %v10784_v56, %s14153_s25  ;;  %v3142_v12 = vmul.f32 %v3136_v63, %v3120_v14 }
 0x5da   : > { %v11033_v21 = vpop.permute.xlu1 %3859 }
 0x5db   : > { %14529 = vst [vmem:[#allocation29_spill] sm:$0xff] %v11033_v21  ;;  %v3066_v13 = vpop.permute.xlu0 %3065 }
 0x5dc   : > { %v3070_v46 = vsel %vm366_vm2, %v10896_v0, %v3066_v13  ;;  %v3074_v33 = vsel %vm366_vm2, %v3066_v13, %v10896_v0  ;;  %4027 = vrot.lane.b32.xlu1 %v10761_v24, %s14163_s3  ;;  %v3123_v13 = vsel %vm389_vm1, %v10763_v36, %v10624_v18 }
 0x5dd   : > { %v3093_v21 = vmul.f32 %v10745_v30, %v3074_v33  ;;  %v3094_v8 = vmul.f32 %v10748_v3, %v3070_v46  ;;  %4121 = vrot.lane.b32.xlu0 %v10489_v20, %s14530_s8  ;;  %v3140_v30 = vmul.f32 %v3136_v63, %v3119_v26  ;;  %v7007_v3 = vld [vmem:[%s13813_s1 + $0x2] ss:$8 sm:$0x3]  ;;  %v3141_v46 = vmul.f32 %v3132_v47, %v3124_v6 }
 0x5de   : > { %v3116_v25 = vpop.permute.xlu1 %3115  ;;  %v3139_v14 = vmul.f32 %v3132_v47, %v3123_v13  ;;  %v3171_v26 = vsel %vm413_vm3, %v10635_v22, %v10779_v2 }
 0x5df   : > { %v7323_v0 = vpack.c.bf16 %v3093_v21, %v3091_v62  ;;  %v11058_v42 = vpop.permute.xlu0 %3861  ;;  %v7321_v33 = vpack.c.bf16 %v3094_v8, %v3092_v54  ;;  %v3121_v18 = vsel %vm389_vm1, %v10894_v29, %v3116_v25  ;;  %v3125_v8 = vsel %vm389_vm1, %v3116_v25, %v10894_v29 }
 0x5e0   : > { %4067 = vrot.lane.b32.xlu1 %v10485_v28, %s14165_s15  ;;  %v7325_v36 = vpack.c.bf16 %v3142_v12, %v3140_v30  ;;  %v3184_v21 = vrot.slane %v7007_v3, %v14436_v38  ;;  %v3188_v54 = vrot.slane %v7007_v3, %v14438_v40  ;;  %v7327_v29 = vpack.c.bf16 %v3141_v46, %v3139_v14 }
 0x5e1   : > { %3821 = vrot.lane.b32.xlu0 %v10784_v56, %s14155_s29  ;;  %7322 = vmatprep.subr.bf16.mxu0 %v7321_v33  ;;  %v3176_v12 = vsel %vm413_vm3, %v10792_v23, %v10645_v58  ;;  %v3143_v33 = vmul.f32 %v3132_v47, %v3125_v8  ;;  %v3144_v30 = vmul.f32 %v3136_v63, %v3121_v18 }
 0x5e2   : > { %7324 = vmatpush1.bf16.msra.mxu0 %v7323_v0  ;;  %v3168_v6 = vpop.permute.xlu1 %3167  ;;  %v3175_v58 = vsel %vm413_vm3, %v10779_v2, %v10635_v22  ;;  %v3194_v23 = vmul.f32 %v3188_v54, %v3172_v39  ;;  %v3193_v8 = vmul.f32 %v3184_v21, %v3176_v12 }
 0x5e3   : > { %v3118_v62 = vpop.permute.xlu0 %3117  ;;  %7326 = vmatprep.subr.bf16.mxu0 %v7325_v36  ;;  %v3191_v36 = vmul.f32 %v3184_v21, %v3175_v58  ;;  %v3173_v22 = vsel %vm413_vm3, %v10905_v1, %v3168_v6  ;;  %v3177_v2 = vsel %vm413_vm3, %v3168_v6, %v10905_v1 }
 0x5e4   : > { %v3122_v13 = vsel %vm389_vm1, %v10907_v50, %v3118_v62  ;;  %v3126_v25 = vsel %vm389_vm1, %v3118_v62, %v10907_v50  ;;  %4075 = vrot.lane.b32.xlu1 %v10555_v48, %s14165_s15  ;;  %v3223_v62 = vsel %vm14531_vm0, %v10643_v41, %v10790_v9 }
 0x5e5   : > { %v3145_v0 = vmul.f32 %v3132_v47, %v3126_v25  ;;  %v3146_v3 = vmul.f32 %v3136_v63, %v3122_v13  ;;  %4129 = vrot.lane.b32.xlu0 %v10561_v60, %s14530_s8  ;;  %v3192_v47 = vmul.f32 %v3188_v54, %v3171_v26  ;;  %v7008_v63 = vld [vmem:[%s13813_s1 + $0x3] ss:$8 sm:$0x3]  ;;  %v7335_v6 = vpack.c.bf16 %v3193_v8, %v3191_v36 }
 0x5e6   : > { %7328 = vmatpush1.bf16.msra.mxu0 %v7327_v29  ;;  %v3220_v14 = vpop.permute.xlu1 %3219  ;;  %v3240_v39 = vrot.slane %v7008_v63, %v14438_v40  ;;  %v3224_v29 = vsel %vm14532_vm7, %v10653_v59, %v10800_v32  ;;  %v3228_v13 = vsel %vm14533_vm14, %v10800_v32, %v10653_v59  ;;  %v3227_v59 = vsel %vm14534_vm12, %v10790_v9, %v10643_v41  ;;  %vm14535_vm7 = vmmov %vm14531_vm0 }
 0x5e7   : > { %v7331_v46 = vpack.c.bf16 %v3145_v0, %v3143_v33  ;;  %v11101_v50 = vpop.permute.xlu0 %3869  ;;  %v7329_v18 = vpack.c.bf16 %v3146_v3, %v3144_v30  ;;  %v7333_v26 = vpack.c.bf16 %v3194_v23, %v3192_v47  ;;  %v3195_v30 = vmul.f32 %v3184_v21, %v3177_v2  ;;  %v7009_v47 = vld [vmem:[%s13813_s1 + $0x4] ss:$8 sm:$0x3] }
 0x5e8   : > { %4071 = vrot.lane.b32.xlu1 %v10622_v61, %s14165_s15  ;;  %v3196_v0 = vmul.f32 %v3188_v54, %v3173_v22  ;;  %v3236_v23 = vrot.slane %v7008_v63, %v14436_v38  ;;  %v3225_v41 = vsel %vm14531_vm0, %v10913_v27, %v3220_v14  ;;  %v3229_v9 = vsel %vm14535_vm7, %v3220_v14, %v10913_v27 }
 0x5e9   : > { %3873 = vrot.lane.b32.xlu0 %v10784_v56, %s14157_s20  ;;  %7330 = vmatprep.subr.bf16.mxu0 %v7329_v18  ;;  %v3244_v18 = vmul.f32 %v3240_v39, %v3223_v62  ;;  %v3292_v22 = vrot.slane %v7009_v47, %v14438_v40  ;;  %vm14536_vm14 = vcmp.lt.s32.totalorder %v8197_v10, 30 }
 0x5ea   : > { %7332 = vmatpush1.bf16.msra.mxu0 %v7331_v46  ;;  %v11125_v12 = vpop.permute.xlu1 %3271  ;;  %v3246_v46 = vmul.f32 %v3240_v39, %v3224_v29  ;;  %v3245_v63 = vmul.f32 %v3236_v23, %v3228_v13  ;;  %v3243_v8 = vmul.f32 %v3236_v23, %v3227_v59  ;;  %v3275_v2 = vsel %vm14536_vm14, %v10651_v57, %v10798_v51  ;;  %vm14537_vm12 = vmmov %vm14536_vm14 }
 0x5eb   : > { %v3170_v1 = vpop.permute.xlu0 %3169  ;;  %7334 = vmatprep.subr.bf16.mxu0 %v7333_v26  ;;  %v3276_v26 = vsel %vm14537_vm12, %v10661_v44, %v10808_v11  ;;  %vm14538_vm0 = vmmov %vm14537_vm12  ;;  %v3247_v13 = vmul.f32 %v3236_v23, %v3229_v9 }
 0x5ec   : > { %v3174_v25 = vsel %vm413_vm3, %v10915_v52, %v3170_v1  ;;  %v3178_v33 = vsel %vm413_vm3, %v3170_v1, %v10915_v52  ;;  %4079 = vrot.lane.b32.xlu1 %v10761_v24, %s14165_s15  ;;  %v7341_v36 = vpack.c.bf16 %v3246_v46, %v3244_v18  ;;  %v7343_v14 = vpack.c.bf16 %v3245_v63, %v3243_v8  ;;  %vm14539_vm14 = vmmov %vm14535_vm7  ;;  %v7010_v46 = vld [vmem:[%s13813_s1 + $0x5] ss:$8 sm:$0x3] }
 0x5ed   : > { %v3197_v3 = vmul.f32 %v3184_v21, %v3178_v33  ;;  %v3198_v58 = vmul.f32 %v3188_v54, %v3174_v25  ;;  %4125 = vrot.lane.b32.xlu0 %v10633_v16, %s14530_s8  ;;  %v3280_v29 = vsel %vm14538_vm0, %v10808_v11, %v10661_v44  ;;  %v3248_v25 = vmul.f32 %v3240_v39, %v3225_v41  ;;  %vm14541_vm12 = vmmov %vm14538_vm0 }
 0x5ee   : > { %7336 = vmatpush1.bf16.msra.mxu0 %v7335_v6  ;;  %v11146_v52 = vpop.permute.xlu1 %3323  ;;  %v3279_v44 = vsel %vm14541_vm12, %v10798_v51, %v10651_v57  ;;  %v3277_v57 = vsel %vm14538_vm0, %v10921_v49, %v11125_v12  ;;  %v3340_v18 = vrot.slane %v7010_v46, %v14436_v38 }
 0x5ef   : > { %v7339_v32 = vpack.c.bf16 %v3197_v3, %v3195_v30  ;;  %v11148_v21 = vpop.permute.xlu0 %3865  ;;  %v7337_v54 = vpack.c.bf16 %v3198_v58, %v3196_v0  ;;  %v3288_v0 = vrot.slane %v7009_v47, %v14436_v38  ;;  %v3298_v3 = vmul.f32 %v3292_v22, %v3276_v26 }
 0x5f0   : > { %4119 = vrot.lane.b32.xlu1 %v10485_v28, %s14530_s8  ;;  %v3344_v47 = vrot.slane %v7010_v46, %v14438_v40 }
 0x5f1   : > { %7338 = vmatprep.subr.bf16.mxu0 %v7337_v54  ;;  %3925 = vrot.lane.b32.xlu0 %v10784_v56, %s14159_s28  ;;  %v3297_v59 = vmul.f32 %v3288_v0, %v3280_v29 }
 0x5f2   : > { %7340 = vmatpush1.bf16.msra.mxu0 %v7339_v32  ;;  %v11172_v62 = vpop.permute.xlu1 %3375  ;;  %v3295_v32 = vmul.f32 %v3288_v0, %v3279_v44 }
 0x5f3   : > { %v3222_v27 = vpop.permute.xlu0 %3221  ;;  %7342 = vmatprep.subr.bf16.mxu0 %v7341_v36 }
 0x5f4   : > { %v3226_v1 = vsel %vm14535_vm7, %v10923_v19, %v3222_v27  ;;  %v3230_v6 = vsel %vm14539_vm14, %v3222_v27, %v10923_v19  ;;  %4127 = vrot.lane.b32.xlu1 %v10555_v48, %s14530_s8  ;;  %vm14542_vm7 = vmmov %vm14538_vm0  ;;  %vm14543_vm14 = vcmp.lt.s32.totalorder %v8197_v10, 18  ;;  %v7351_v41 = vpack.c.bf16 %v3297_v59, %v3295_v32 }
 0x5f5   : > { %v3249_v33 = vmul.f32 %v3236_v23, %v3230_v6  ;;  %v3250_v30 = vmul.f32 %v3240_v39, %v3226_v1  ;;  %4173 = vrot.lane.b32.xlu0 %v10489_v20, %s14540_s17  ;;  %v3296_v23 = vmul.f32 %v3292_v22, %v3275_v2  ;;  %v3281_v51 = vsel %vm14542_vm7, %v11125_v12, %v10921_v49  ;;  %vm14544_vm12 = vmmov %vm14543_vm14 }
 0x5f6   : > { %7344 = vmatpush1.bf16.msra.mxu0 %v7343_v14  ;;  %v11193_v19 = vpop.permute.xlu1 %3427  ;;  %v3327_v63 = vsel %vm14543_vm14, %v10659_v35, %v10806_v4  ;;  %v3328_v8 = vsel %vm14544_vm12, %v10669_v17, %v10816_v31  ;;  %vm14545_vm0 = vmmov %vm14544_vm12  ;;  %v3299_v26 = vmul.f32 %v3288_v0, %v3281_v51  ;;  %v3300_v27 = vmul.f32 %v3292_v22, %v3277_v57 }
 0x5f7   : > { %v7347_v11 = vpack.c.bf16 %v3249_v33, %v3247_v13  ;;  %v11195_v58 = vpop.permute.xlu0 %3913  ;;  %v7345_v39 = vpack.c.bf16 %v3250_v30, %v3248_v25  ;;  %v7349_v54 = vpack.c.bf16 %v3298_v3, %v3296_v23  ;;  %v3332_v9 = vsel %vm14545_vm0, %v10816_v31, %v10669_v17  ;;  %vm14546_vm14 = vmmov %vm14542_vm7  ;;  %v7011_v25 = vld [vmem:[%s13813_s1 + $0x6] ss:$8 sm:$0x3] }
 0x5f8   : > { %4123 = vrot.lane.b32.xlu1 %v10622_v61, %s14530_s8  ;;  %vm14547_vm12 = vmmov %vm14545_vm0  ;;  %v3350_v31 = vmul.f32 %v3344_v47, %v3328_v8  ;;  %v3349_v33 = vmul.f32 %v3340_v18, %v3332_v9  ;;  %v3396_v3 = vrot.slane %v7011_v25, %v14438_v40 }
 0x5f9   : > { %7346 = vmatprep.subr.bf16.mxu0 %v7345_v39  ;;  %3977 = vrot.lane.b32.xlu0 %v10784_v56, %s14161_s0  ;;  %v3331_v17 = vsel %vm14547_vm12, %v10806_v4, %v10659_v35  ;;  %v3329_v35 = vsel %vm14545_vm0, %v10929_v53, %v11146_v52 }
 0x5fa   : > { %7348 = vmatpush1.bf16.msra.mxu0 %v7347_v11  ;;  %v11222_v49 = vpop.permute.xlu1 %3479  ;;  %v3347_v30 = vmul.f32 %v3340_v18, %v3331_v17  ;;  %v3352_v57 = vmul.f32 %v3344_v47, %v3329_v35  ;;  %v14558_v17 = vld [vmem:[#allocation103_spill] sm:$0xff] }
 0x5fb   : > { %v3274_v12 = vpop.permute.xlu0 %3273  ;;  %7350 = vmatprep.subr.bf16.mxu0 %v7349_v54 }
 0x5fc   : > { %v3278_v36 = vsel %vm14542_vm7, %v10931_v34, %v3274_v12  ;;  %v3282_v2 = vsel %vm14546_vm14, %v3274_v12, %v10931_v34  ;;  %4131 = vrot.lane.b32.xlu1 %v10761_v24, %s14530_s8  ;;  %vm14548_vm7 = vmmov %vm14545_vm0  ;;  %vm14549_vm14 = vcmp.lt.s32.totalorder %v8197_v10, 17 }
 0x5fd   : > { %v3301_v14 = vmul.f32 %v3288_v0, %v3282_v2  ;;  %v3302_v29 = vmul.f32 %v3292_v22, %v3278_v36  ;;  %4181 = vrot.lane.b32.xlu0 %v10561_v60, %s14540_s17  ;;  %v3348_v22 = vmul.f32 %v3344_v47, %v3327_v63  ;;  %v3333_v4 = vsel %vm14548_vm7, %v11146_v52, %v10929_v53  ;;  %vm14550_vm12 = vmmov %vm14549_vm14 }
 0x5fe   : > { %7352 = vmatpush1.bf16.msra.mxu0 %v7351_v41  ;;  %v11242_v6 = vpop.permute.xlu1 %3531  ;;  %v3379_v44 = vsel %vm14549_vm14, %v10667_v43, %v10814_v5  ;;  %v3380_v11 = vsel %vm14550_vm12, %v10677_v55, %v10824_v45  ;;  %v7359_v52 = vpack.c.bf16 %v3349_v33, %v3347_v30  ;;  %vm14551_vm0 = vmmov %vm14550_vm12  ;;  %v3351_v32 = vmul.f32 %v3340_v18, %v3333_v4  ;;  %v7012_v41 = vld [vmem:[%s13813_s1 + $0x7] ss:$8 sm:$0x3] }
 0x5ff   : > { %v7355_v1 = vpack.c.bf16 %v3301_v14, %v3299_v26  ;;  %v11244_v34 = vpop.permute.xlu0 %3921  ;;  %v7353_v13 = vpack.c.bf16 %v3302_v29, %v3300_v27  ;;  %v7357_v0 = vpack.c.bf16 %v3350_v31, %v3348_v22  ;;  %v3384_v23 = vsel %vm14551_vm0, %v10824_v45, %v10677_v55  ;;  %vm14552_vm14 = vmmov %vm14548_vm7  ;;  %v14555_v27 = vld [vmem:[#allocation43_spill] sm:$0xff]  ;;  %v14557_v29 = vld [vmem:[#allocation72_spill] sm:$0xff] }
 0x600   : > { %4171 = vrot.lane.b32.xlu1 %v10485_v28, %s14540_s17  ;;  %v3392_v63 = vrot.slane %v7011_v25, %v14436_v38  ;;  %v3402_v8 = vmul.f32 %v3396_v3, %v3380_v11  ;;  %vm14553_vm12 = vmmov %vm14551_vm0  ;;  %v3400_v12 = vmul.f32 %v3396_v3, %v3379_v44  ;;  %v3448_v26 = vrot.slane %v7012_v41, %v14438_v40  ;;  %v14561_v22 = vld [vmem:[#allocation76_spill] sm:$0xff] }
 0x601   : > { %4029 = vrot.lane.b32.xlu0 %v10784_v56, %s14163_s3  ;;  %7354 = vmatprep.subr.bf16.mxu0 %v7353_v13  ;;  %v3383_v55 = vsel %vm14553_vm12, %v10814_v5, %v10667_v43  ;;  %v3381_v43 = vsel %vm14551_vm0, %v10937_v7, %v11172_v62  ;;  %v3444_v44 = vrot.slane %v7012_v41, %v14436_v38 }
 0x602   : > { %7356 = vmatpush1.bf16.msra.mxu0 %v7355_v1  ;;  %v11270_v39 = vpop.permute.xlu1 %3583  ;;  %v3401_v9 = vmul.f32 %v3392_v63, %v3384_v23  ;;  %v3399_v36 = vmul.f32 %v3392_v63, %v3383_v55  ;;  %v7365_v2 = vpack.c.bf16 %v3402_v8, %v3400_v12  ;;  %v3404_v35 = vmul.f32 %v3396_v3, %v3381_v43  ;;  %v14568_v12 = vld [vmem:[#allocation64_spill] sm:$0xff] }
 0x603   : > { %v3326_v53 = vpop.permute.xlu0 %3325  ;;  %7358 = vmatprep.subr.bf16.mxu0 %v7357_v0 }
 0x604   : > { %v3330_v46 = vsel %vm14548_vm7, %v10939_v37, %v3326_v53  ;;  %v3334_v59 = vsel %vm14552_vm14, %v3326_v53, %v10939_v37  ;;  %4179 = vrot.lane.b32.xlu1 %v10555_v48, %s14540_s17  ;;  %vm14554_vm7 = vmmov %vm14551_vm0  ;;  %vm14556_vm14 = vcmp.lt.s32.totalorder %v8197_v10, 16 }
 0x605   : > { %v3353_v51 = vmul.f32 %v3340_v18, %v3334_v59  ;;  %v3354_v54 = vmul.f32 %v3344_v47, %v3330_v46  ;;  %4177 = vrot.lane.b32.xlu0 %v10633_v16, %s14540_s17  ;;  %v3385_v5 = vsel %vm14554_vm7, %v11172_v62, %v10937_v7  ;;  %v3431_v14 = vsel %vm14556_vm14, %v14555_v27, %v10822_v15  ;;  %vm14559_vm12 = vmmov %vm14556_vm14 }
 0x606   : > { %7360 = vmatpush1.bf16.msra.mxu0 %v7359_v52  ;;  %v11291_v37 = vpop.permute.xlu1 %3635  ;;  %v3432_v31 = vsel %vm14559_vm12, %v14558_v17, %v14557_v29  ;;  %v7367_v62 = vpack.c.bf16 %v3401_v9, %v3399_v36  ;;  %vm14560_vm0 = vmmov %vm14559_vm12  ;;  %v3403_v30 = vmul.f32 %v3392_v63, %v3385_v5  ;;  %v3452_v59 = vmul.f32 %v3448_v26, %v3431_v14  ;;  %v14569_v9 = vld [vmem:[#allocation40_spill] sm:$0xff]  ;;  %v14570_v36 = vld [vmem:[#allocation42_spill] sm:$0xff] }
 0x607   : > { %v7363_v45 = vpack.c.bf16 %v3353_v51, %v3351_v32  ;;  %v11293_v18 = vpop.permute.xlu0 %3917  ;;  %v7361_v47 = vpack.c.bf16 %v3354_v54, %v3352_v57  ;;  %v3436_v13 = vsel %vm14560_vm0, %v14557_v29, %v14558_v17  ;;  %vm14562_vm14 = vmmov %vm14554_vm7  ;;  %v3454_v11 = vmul.f32 %v3448_v26, %v3432_v31  ;;  %v7013_v32 = vld [vmem:[%s13813_s1 + $0x10] ss:$8 sm:$0x3]  ;;  %v14571_v14 = vld [vmem:[#allocation96_spill] sm:$0xff] }
 0x608   : > { %4175 = vrot.lane.b32.xlu1 %v10622_v61, %s14540_s17  ;;  %vm14564_vm12 = vmmov %vm14560_vm0  ;;  %v3453_v57 = vmul.f32 %v3444_v44, %v3436_v13  ;;  %v3496_v55 = vrot.slane %v7013_v32, %v14436_v38  ;;  %v3484_v43 = vsel %vm557_vm9, %v14570_v36, %v14569_v9 }
 0x609   : > { %7362 = vmatprep.subr.bf16.mxu0 %v7361_v47  ;;  %4081 = vrot.lane.b32.xlu0 %v10784_v56, %s14165_s15  ;;  %v3435_v53 = vsel %vm14564_vm12, %v10822_v15, %v14555_v27  ;;  %v14565_v15 = vld [vmem:[#allocation50_spill] sm:$0xff]  ;;  %v7373_v8 = vpack.c.bf16 %v3454_v11, %v3452_v59  ;;  %v14567_v47 = vld [vmem:[#allocation71_spill] sm:$0xff]  ;;  %v3488_v27 = vsel %vm557_vm9, %v14569_v9, %v14570_v36  ;;  %vm14573_vm12 = vmmov %vm14560_vm0 }
 0x60a   : > { %7364 = vmatpush1.bf16.msra.mxu0 %v7363_v45  ;;  %v11319_v1 = vpop.permute.xlu1 %3715  ;;  %v3451_v51 = vmul.f32 %v3444_v44, %v3435_v53  ;;  %v3433_v54 = vsel %vm14560_vm0, %v14565_v15, %v11193_v19  ;;  %v3500_v45 = vrot.slane %v7013_v32, %v14438_v40  ;;  %v3483_v41 = vsel %vm557_vm9, %v14568_v12, %v14567_v47  ;;  %v14574_v53 = vld [vmem:[#allocation90_spill] sm:$0xff] }
 0x60b   : > { %v3378_v7 = vpop.permute.xlu0 %3377  ;;  %7366 = vmatprep.subr.bf16.mxu0 %v7365_v2 }
 0x60c   : > { %v3382_v25 = vsel %vm14554_vm7, %v14561_v22, %v3378_v7  ;;  %v3386_v33 = vsel %vm14562_vm14, %v3378_v7, %v14561_v22  ;;  %4183 = vrot.lane.b32.xlu1 %v10761_v24, %s14540_s17  ;;  %vm14566_vm7 = vmmov %vm14560_vm0  ;;  %v7375_v2 = vpack.c.bf16 %v3453_v57, %v3451_v51  ;;  %v3456_v7 = vmul.f32 %v3448_v26, %v3433_v54  ;;  %v14575_v51 = vld [vmem:[#allocation39_spill] sm:$0xff] }
 0x60d   : > { %v3405_v4 = vmul.f32 %v3392_v63, %v3386_v33  ;;  %v3406_v0 = vmul.f32 %v3396_v3, %v3382_v25  ;;  %4225 = vrot.lane.b32.xlu0 %v10489_v20, %s14563_s7  ;;  %v3437_v63 = vsel %vm14566_vm7, %v11193_v19, %v14565_v15  ;;  %vm14572_vm14 = vmmov %vm14560_vm0  ;;  %v3487_v22 = vsel %vm557_vm9, %v14567_v47, %v14568_v12  ;;  %v14576_v15 = vld [vmem:[#allocation102_spill] sm:$0xff] }
 0x60e   : > { %7368 = vmatpush1.bf16.msra.mxu0 %v7367_v62  ;;  %v11340_v23 = vpop.permute.xlu1 %3767  ;;  %v3455_v31 = vmul.f32 %v3444_v44, %v3437_v63  ;;  %v3506_v25 = vmul.f32 %v3500_v45, %v3484_v43  ;;  %v3503_v11 = vmul.f32 %v3496_v55, %v3487_v22  ;;  %v3535_v54 = vsel %vm581_vm10, %v14576_v15, %v14575_v51  ;;  %v14577_v63 = vld [vmem:[#allocation47_spill] sm:$0xff] }
 0x60f   : > { %v7371_v52 = vpack.c.bf16 %v3405_v4, %v3403_v30  ;;  %v11342_v46 = vpop.permute.xlu0 %3965  ;;  %v7369_v3 = vpack.c.bf16 %v3406_v0, %v3404_v35  ;;  %v7014_v0 = vld [vmem:[%s13813_s1 + $0x11] ss:$8 sm:$0x3]  ;;  %v14579_v43 = vld [vmem:[#allocation51_spill] sm:$0xff]  ;;  %vm14590_vm0 = vcmp.lt.s32.totalorder %v8197_v10, 1 }
 0x610   : > { %4223 = vrot.lane.b32.xlu1 %v10485_v28, %s14563_s7  ;;  %v3548_v32 = vrot.slane %v7014_v0, %v14436_v38  ;;  %v3552_v57 = vrot.slane %v7014_v0, %v14438_v40  ;;  %v4342_v0 = vld [vmem:[%s13818_s6 + $0x78] sm:$0xff]  ;;  %vm14593_vm7 = vmmov %vm14590_vm0 }
 0x611   : > { %7370 = vmatprep.subr.bf16.mxu0 %v7369_v3  ;;  %4133 = vrot.lane.b32.xlu0 %v10784_v56, %s14530_s8  ;;  %v3489_v3 = vsel %vm557_vm9, %v11222_v49, %v14574_v53 }
 0x612   : > { %7372 = vmatpush1.bf16.msra.mxu0 %v7371_v52  ;;  %v11369_v19 = vpop.permute.xlu1 %3819  ;;  %v3485_v52 = vsel %vm557_vm9, %v14574_v53, %v11222_v49  ;;  %v14581_v53 = vld [vmem:[#allocation26_spill] sm:$0xff] }
 0x613   : > { %v3430_v5 = vpop.permute.xlu0 %3429  ;;  %7374 = vmatprep.subr.bf16.mxu0 %v7373_v8  ;;  %v14578_v8 = vld [vmem:[#allocation104_spill] sm:$0xff] }
 0x614   : > { %v3434_v29 = vsel %vm14572_vm14, %v14571_v14, %v3430_v5  ;;  %v3438_v17 = vsel %vm14573_vm12, %v3430_v5, %v14571_v14  ;;  %4231 = vrot.lane.b32.xlu1 %v10555_v48, %s14563_s7  ;;  %v3536_v47 = vsel %vm581_vm10, %v14578_v8, %v14577_v63  ;;  %v3540_v36 = vsel %vm581_vm10, %v14577_v63, %v14578_v8  ;;  %v14584_v8 = vld [vmem:[#allocation48_spill] sm:$0xff]  ;;  %vm14594_vm14 = vmmov %vm14590_vm0 }
 0x615   : > { %v3457_v62 = vmul.f32 %v3444_v44, %v3438_v17  ;;  %v3458_v13 = vmul.f32 %v3448_v26, %v3434_v29  ;;  %4233 = vrot.lane.b32.xlu0 %v10561_v60, %s14563_s7  ;;  %v3504_v26 = vmul.f32 %v3500_v45, %v3483_v41  ;;  %v3505_v44 = vmul.f32 %v3496_v55, %v3488_v27  ;;  %v4327_v41 = vld [vmem:[%s13818_s6] sm:$0xff]  ;;  %vm14596_vm12 = vmmov %vm14590_vm0 }
 0x616   : > { %7376 = vmatpush1.bf16.msra.mxu0 %v7375_v2  ;;  %v11389_v30 = vpop.permute.xlu1 %3867  ;;  %v4335_v27 = vld [vmem:[%s13818_s6 + $0x40] sm:$0xff]  ;;  %v3507_v14 = vmul.f32 %v3496_v55, %v3489_v3  ;;  %v3508_v29 = vmul.f32 %v3500_v45, %v3485_v52  ;;  %v3537_v52 = vsel %vm581_vm10, %v14581_v53, %v11242_v6  ;;  %v3541_v3 = vsel %vm581_vm10, %v11242_v6, %v14581_v53 }
 0x617   : > { %v7379_v33 = vpack.c.bf16 %v3457_v62, %v3455_v31  ;;  %v11391_v35 = vpop.permute.xlu0 %3973  ;;  %v7377_v4 = vpack.c.bf16 %v3458_v13, %v3456_v7  ;;  %v7381_v59 = vpack.c.bf16 %v3506_v25, %v3504_v26  ;;  %v7383_v9 = vpack.c.bf16 %v3505_v44, %v3503_v11  ;;  %v7015_v62 = vld [vmem:[%s13813_s1 + $0x12] ss:$8 sm:$0x3] }
 0x618   : > { %4227 = vrot.lane.b32.xlu1 %v10622_v61, %s14563_s7  ;;  %v3539_v7 = vsel %vm581_vm10, %v14575_v51, %v14576_v15  ;;  %v3558_v13 = vmul.f32 %v3552_v57, %v3536_v47  ;;  %v3557_v26 = vmul.f32 %v3548_v32, %v3540_v36  ;;  %v11458_v11 = vrot.slane %v7015_v62, %v14436_v38  ;;  %v14582_v15 = vld [vmem:[#allocation108_spill] sm:$0xff]  ;;  %v14585_v47 = vld [vmem:[#allocation19_spill] sm:$0xff] }
 0x619   : > { %4185 = vrot.lane.b32.xlu0 %v10784_v56, %s14540_s17  ;;  %7378 = vmatprep.subr.bf16.mxu0 %v7377_v4  ;;  %v3556_v4 = vmul.f32 %v3552_v57, %v3535_v54  ;;  %v3555_v44 = vmul.f32 %v3548_v32, %v3539_v7  ;;  %v3604_v51 = vrot.slane %v7015_v62, %v14438_v40  ;;  %v14583_v54 = vld [vmem:[#allocation17_spill] sm:$0xff] }
 0x61a   : > { %7380 = vmatpush1.bf16.msra.mxu0 %v7379_v33  ;;  %v11418_v49 = vpop.permute.xlu1 %3863  ;;  %v4334_v33 = vld [vmem:[%s13818_s6 + $0x38] sm:$0xff]  ;;  %v3587_v63 = vsel %vm605_vm11, %v14583_v54, %v14582_v15  ;;  %v3591_v62 = vsel %vm605_vm11, %v14582_v15, %v14583_v54 }
 0x61b   : > { %v3482_v12 = vpop.permute.xlu0 %3481  ;;  %7382 = vmatprep.subr.bf16.mxu0 %v7381_v59  ;;  %v7389_v59 = vpack.c.bf16 %v3558_v13, %v3556_v4  ;;  %v7391_v36 = vpack.c.bf16 %v3557_v26, %v3555_v44  ;;  %v7016_v13 = vld [vmem:[%s13813_s1 + $0x13] ss:$8 sm:$0x3]  ;;  %v4348_v4 = vld [vmem:[%s13818_s6 + $0xa8] sm:$0xff]  ;;  %v3608_v26 = vmul.f32 %v3604_v51, %v3587_v63  ;;  %v3607_v53 = vmul.f32 %v11458_v11, %v3591_v62 }
 0x61c   : > { %v3486_v5 = vsel %vm557_vm9, %v14579_v43, %v3482_v12  ;;  %v3490_v2 = vsel %vm557_vm9, %v3482_v12, %v14579_v43  ;;  %4235 = vrot.lane.b32.xlu1 %v10761_v24, %s14563_s7  ;;  %v3588_v12 = vsel %vm605_vm11, %v14585_v47, %v14584_v8  ;;  %v3592_v43 = vsel %vm605_vm11, %v14584_v8, %v14585_v47  ;;  %v4330_v44 = vld [vmem:[%s13818_s6 + $0x18] sm:$0xff]  ;;  %v14589_v47 = vld [vmem:[#allocation44_spill] sm:$0xff] }
 0x61d   : > { %v3509_v17 = vmul.f32 %v3496_v55, %v3490_v2  ;;  %v3510_v31 = vmul.f32 %v3500_v45, %v3486_v5  ;;  %4229 = vrot.lane.b32.xlu0 %v10633_v16, %s14563_s7  ;;  %4656 = vmatmul.mubr.f32.vlgmr.msra.gmra.mrb[24].mxu0 %v4327_v41  ;;  %v14586_v5 = vld [vmem:[#allocation91_spill] sm:$0xff]  ;;  %v3656_v63 = vrot.slane %v7016_v13, %v14438_v40  ;;  %v14588_v8 = vld [vmem:[#allocation22_spill] sm:$0xff] }
 0x61e   : > { %7384 = vmatpush1.bf16.msra.mxu0 %v7383_v9  ;;  %v11447_v55 = vpop.permute.xlu1 %3871  ;;  %4661 = vmatprep.mubr.f32.mxu0 %v4335_v27  ;;  %v4341_v9 = vld [vmem:[%s13818_s6 + $0x70] sm:$0xff] }
 0x61f   : > { %v7387_v22 = vpack.c.bf16 %v3509_v17, %v3507_v14  ;;  %v11449_v45 = vpop.permute.xlu0 %3969  ;;  %v7385_v25 = vpack.c.bf16 %v3510_v31, %v3508_v29  ;;  %v4349_v14 = vld [vmem:[%s13818_s6 + $0xb0] sm:$0xff]  ;;  %v3559_v29 = vmul.f32 %v3548_v32, %v3541_v3  ;;  %v3560_v17 = vmul.f32 %v3552_v57, %v3537_v52  ;;  %v14587_v3 = vld [vmem:[#allocation68_spill] sm:$0xff] }
 0x620   : > { %4275 = vrot.lane.b32.xlu1 %v10485_v28, %s14580_s10  ;;  %v3652_v52 = vrot.slane %v7016_v13, %v14436_v38  ;;  %v3593_v15 = vsel %vm605_vm11, %v11270_v39, %v14587_v3  ;;  %v3643_v13 = vsel %vm14596_vm12, %v14588_v8, %v14589_v47  ;;  %vm14602_vm12 = vmmov %vm14590_vm0 }
 0x621   : > { %7386 = vmatprep.subr.bf16.mxu0 %v7385_v25  ;;  %4237 = vrot.lane.b32.xlu0 %v10784_v56, %s14563_s7 }
 0x622   : > { %4662 = vmatmul.mubr.f32.gmra.mrb[26].mxu0 %v4334_v33  ;;  %v11481_v41 = vpop.permute.xlu1 %3911 }
 0x623   : > { %7388 = vmatpush1.bf16.msra.mxu0 %v7387_v22  ;;  %v3534_v6 = vpop.permute.xlu0 %3533  ;;  %4667 = vmatprep.mubr.f32.mxu0 %v4342_v0  ;;  %v3610_v22 = vmul.f32 %v3604_v51, %v3588_v12  ;;  %v3609_v0 = vmul.f32 %v11458_v11, %v3592_v43  ;;  %v3639_v12 = vsel %vm14590_vm0, %v14589_v47, %v14588_v8  ;;  %v4557_v8 = vld [vmem:[%s14597_s9 + $0x10] sm:$0xff] }
 0x624   : > { %7390 = vmatprep.subr.bf16.mxu0 %v7389_v59  ;;  %v3538_v2 = vsel %vm581_vm10, %v14586_v5, %v3534_v6  ;;  %v3542_v27 = vsel %vm581_vm10, %v3534_v6, %v14586_v5  ;;  %4283 = vrot.lane.b32.xlu1 %v10555_v48, %s14580_s10  ;;  %v3589_v59 = vsel %vm605_vm11, %v14587_v3, %v11270_v39  ;;  %v14591_v6 = vld [vmem:[#allocation109_spill] sm:$0xff] }
 0x625   : > { %v3561_v31 = vmul.f32 %v3548_v32, %v3542_v27  ;;  %v3562_v7 = vmul.f32 %v3552_v57, %v3538_v2  ;;  %4277 = vrot.lane.b32.xlu0 %v10489_v20, %s14580_s10  ;;  %v7397_v54 = vpack.c.bf16 %v3610_v22, %v3608_v26  ;;  %v7399_v5 = vpack.c.bf16 %v3609_v0, %v3607_v53  ;;  %v14595_v27 = vld [vmem:[#allocation67_spill] sm:$0xff]  ;;  %v7017_v53 = vld [vmem:[%s13813_s1 + $0x14] ss:$8 sm:$0x3] }
 0x626   : > { %4668 = vmatmul.mubr.f32.gmra.mrb[28].mxu0 %v4341_v9  ;;  %v11510_v32 = vpop.permute.xlu1 %3919  ;;  %v14592_v9 = vld [vmem:[#allocation66_spill] sm:$0xff]  ;;  %v3660_v26 = vmul.f32 %v3656_v63, %v3639_v12  ;;  %v14598_v3 = vld [vmem:[#allocation97_spill] sm:$0xff] }
 0x627   : > { %v7395_v25 = vpack.c.bf16 %v3561_v31, %v3559_v29  ;;  %7392 = vmatpush1.bf16.msra.mxu0 %v7391_v36  ;;  %v11512_v57 = vpop.permute.xlu0 %4017  ;;  %v7393_v33 = vpack.c.bf16 %v3562_v7, %v3560_v17  ;;  %4673 = vmatprep.mubr.f32.mxu0 %v4349_v14  ;;  %v3640_v36 = vsel %vm14593_vm7, %v14592_v9, %v14591_v6  ;;  %vm14599_vm7 = vmmov %vm14590_vm0 }
 0x628   : > { %4279 = vrot.lane.b32.xlu1 %v10622_v61, %s14580_s10  ;;  %v3644_v2 = vsel %vm14594_vm14, %v14591_v6, %v14592_v9  ;;  %v3611_v17 = vmul.f32 %v11458_v11, %v3593_v15  ;;  %v3612_v31 = vmul.f32 %v3604_v51, %v3589_v59  ;;  %v3662_v22 = vmul.f32 %v3656_v63, %v3640_v36  ;;  %v4556_v6 = vld [vmem:[%s14597_s9 + $0x8] sm:$0xff]  ;;  %vm14601_vm14 = vmmov %vm14590_vm0 }
 0x629   : > { %7394 = vmatprep.subr.bf16.mxu0 %v7393_v33  ;;  %4285 = vrot.lane.b32.xlu0 %v10561_v60, %s14580_s10  ;;  %v3661_v0 = vmul.f32 %v3652_v52, %v3644_v2  ;;  %v3641_v59 = vsel %vm14590_vm0, %v14598_v3, %v11291_v37  ;;  %v3645_v15 = vsel %vm14599_vm7, %v11291_v37, %v14598_v3  ;;  %v14600_v37 = vld [vmem:[#allocation98_spill] sm:$0xff]  ;;  %vm14610_vm0 = vcmp.lt.s32.totalorder %v8197_v10, 126 }
 0x62a   : > { %4674 = vmatmul.mubr.f32.gmra.mrb[30].mxu0 %v4348_v4  ;;  %v11544_v43 = vpop.permute.xlu1 %3915  ;;  %v3663_v2 = vmul.f32 %v3652_v52, %v3645_v15  ;;  %v14605_v15 = vld [vmem:[#allocation105_spill] sm:$0xff]  ;;  %vm14613_vm7 = vmmov %vm14610_vm0 }
 0x62b   : > { %7396 = vmatpush1.bf16.msra.mxu0 %v7395_v25  ;;  %v3586_v39 = vpop.permute.xlu0 %3585  ;;  %4744 = vmatprep.mubr.f32.mxu0 %v4330_v44  ;;  %v4555_v25 = vld [vmem:[%s14597_s9] sm:$0xff]  ;;  %v3659_v44 = vmul.f32 %v3652_v52, %v3643_v13  ;;  %v4558_v13 = vld [vmem:[%s14597_s9 + $0x18] sm:$0xff] }
 0x62c   : > { %7398 = vmatprep.subr.bf16.mxu0 %v7397_v54  ;;  %v3590_v14 = vsel %vm605_vm11, %v14595_v27, %v3586_v39  ;;  %v3594_v29 = vsel %vm605_vm11, %v3586_v39, %v14595_v27  ;;  %4287 = vrot.lane.b32.xlu1 %v10761_v24, %s14580_s10  ;;  %v7405_v54 = vpack.c.bf16 %v3662_v22, %v3660_v26  ;;  %v14603_v26 = vld [vmem:[#allocation20_spill] sm:$0xff] }
 0x62d   : > { %v3613_v7 = vmul.f32 %v11458_v11, %v3594_v29  ;;  %v3614_v62 = vmul.f32 %v3604_v51, %v3590_v14  ;;  %4281 = vrot.lane.b32.xlu0 %v10633_v16, %s14580_s10  ;;  %v7407_v9 = vpack.c.bf16 %v3661_v0, %v3659_v44  ;;  %v3664_v27 = vmul.f32 %v3656_v63, %v3641_v59  ;;  %v14604_v0 = vld [vmem:[#allocation24_spill] sm:$0xff] }
 0x62e   : > { %v11569_v11 = vpop.permute.xlu1 %3923  ;;  %v3724_v44 = vsel %vm670_vm13, %v14604_v0, %v14603_v26 }
 0x62f   : > { %v7403_v33 = vpack.c.bf16 %v3613_v7, %v3611_v17  ;;  %7400 = vmatpush1.bf16.msra.mxu0 %v7399_v5  ;;  %v11571_v51 = vpop.permute.xlu0 %4025  ;;  %v7401_v4 = vpack.c.bf16 %v3614_v62, %v3612_v31  ;;  %v3684_v5 = vrot.slane %v7017_v53, %v14438_v40 }
 0x630   : > { %4561 = vperm.xlu1 %7880, %v4555_v25   ;;  %v3680_v25 = vrot.slane %v7017_v53, %v14436_v38 }
 0x631   : > { %4289 = vrot.lane.b32.xlu0 %v10784_v56, %s14580_s10  ;;  %7402 = vmatprep.subr.bf16.mxu0 %v7401_v4  ;;  %v3690_v17 = vmul.f32 %v3684_v5, %v10561_v60  ;;  %v3694_v4 = vmul.f32 %v3684_v5, %v10784_v56  ;;  %s7971_s10 = smov [#allocation3]  }
 0x632   : > { %v11589_v47 = vpop.permute.xlu1 %3963  ;;  %v3689_v60 = vmul.f32 %v3680_v25, %v10489_v20  ;;  %v3687_v3 = vmul.f32 %v3680_v25, %v10485_v28  ;;  %v3692_v20 = vmul.f32 %v3684_v5, %v10761_v24  ;;  %s7885_s9 = sshll.u32 %s7971_s10, 4  ;;  %s7886_s9 = int_to_ptr.vmem [resolvable:$false] %s7885_s9 }
 0x633   : > { %7404 = vmatpush1.bf16.msra.mxu0 %v7403_v33  ;;  %v3638_v12 = vpop.permute.xlu0 %3637 }
 0x634   : > { %7406 = vmatprep.subr.bf16.mxu0 %v7405_v54  ;;  %v3642_v36 = vsel %vm14601_vm14, %v14600_v37, %v3638_v12  ;;  %v3646_v39 = vsel %vm14602_vm12, %v3638_v12, %v14600_v37  ;;  %4571 = vperm.xlu1 %7880, %v4557_v8   ;;  %v14606_v54 = vld [vmem:[#allocation23_spill] sm:$0xff]  ;;  %v3720_v8 = vsel %vm670_vm13, %v14603_v26, %v14604_v0  ;;  %vm14614_vm14 = vmmov %vm14610_vm0 }
 0x635   : > { %v3665_v14 = vmul.f32 %v3652_v52, %v3646_v39  ;;  %v3666_v29 = vmul.f32 %v3656_v63, %v3642_v36  ;;  %4566 = vperm.xlu0 %7879, %v4556_v6   ;;  %v3688_v52 = vmul.f32 %v3684_v5, %v10555_v48  ;;  %v7018_v63 = vld [vmem:[%s13813_s1 + $0x15] ss:$8 sm:$0x3]  ;;  %v3723_v56 = vsel %vm670_vm13, %v14606_v54, %v14605_v15  ;;  %vm14616_vm12 = vmmov %vm14610_vm0 }
 0x636   : > { %v11602_v7 = vpop.permute.xlu1 %3971  ;;  %v3736_v59 = vrot.slane %v7018_v63, %v14438_v40  ;;  %v7415_v12 = vpack.c.bf16 %v3689_v60, %v3687_v3  ;;  %v3693_v6 = vmul.f32 %v3680_v25, %v10633_v16  ;;  %v3732_v28 = vrot.slane %v7018_v63, %v14436_v38  ;;  %v7019_v16 = vld [vmem:[%s13813_s1 + $0x16] ss:$8 sm:$0x3]  ;;  %v14615_v3 = vld [vmem:[#allocation79_spill] sm:$0xff] }
 0x637   : > { %v7411_v31 = vpack.c.bf16 %v3665_v14, %v3663_v2  ;;  %7408 = vmatpush1.bf16.msra.mxu0 %v7407_v9  ;;  %v11604_v62 = vpop.permute.xlu0 %4021  ;;  %v7409_v22 = vpack.c.bf16 %v3666_v29, %v3664_v27  ;;  %v7413_v33 = vpack.c.bf16 %v3690_v17, %v3688_v52  ;;  %v7417_v37 = vpack.c.bf16 %v3694_v4, %v3692_v20  ;;  %v14607_v17 = vld [vmem:[#allocation92_spill] sm:$0xff]  ;;  %v14609_v52 = vld [vmem:[#allocation49_spill] sm:$0xff]  ;;  %v14611_v60 = vld [vmem:[#allocation46_spill] sm:$0xff] }
 0x638   : > { %v3742_v9 = vmul.f32 %v3736_v59, %v3724_v44  ;;  %v3719_v24 = vsel %vm670_vm13, %v14605_v15, %v14606_v54  ;;  %v3691_v5 = vmul.f32 %v3680_v25, %v10622_v61  ;;  %v3740_v2 = vmul.f32 %v3736_v59, %v3723_v56  ;;  %v14608_v25 = vld [vmem:[#allocation45_spill] sm:$0xff] }
 0x639   : > { %7410 = vmatprep.subr.bf16.mxu0 %v7409_v22  ;;  %4576 = vperm.xlu0 %7879, %v4558_v13   ;;  %v3741_v27 = vmul.f32 %v3732_v28, %v3720_v8  ;;  %v3739_v29 = vmul.f32 %v3732_v28, %v3719_v24  ;;  %v3725_v13 = vsel %vm670_vm13, %v11319_v1, %v14607_v17 }
 0x63a   : > { %v11620_v53 = vpop.permute.xlu1 %3967  ;;  %v7419_v14 = vpack.c.bf16 %v3693_v6, %v3691_v5  ;;  %v7421_v61 = vpack.c.bf16 %v3742_v9, %v3740_v2  ;;  %v3788_v22 = vrot.slane %v7019_v16, %v14438_v40  ;;  %v3775_v63 = vsel %vm14610_vm0, %v14609_v52, %v14608_v25 }
 0x63b   : > { %7412 = vmatpush1.bf16.msra.mxu0 %v7411_v31  ;;  %v11622_v48 = vpop.permute.xlu0 %4069  ;;  %v3721_v31 = vsel %vm670_vm13, %v14607_v17, %v11319_v1  ;;  %v7423_v44 = vpack.c.bf16 %v3741_v27, %v3739_v29  ;;  %v3744_v56 = vmul.f32 %v3736_v59, %v3725_v13  ;;  %v3784_v6 = vrot.slane %v7019_v16, %v14436_v38  ;;  %v14617_v29 = vld [vmem:[#allocation113_spill] sm:$0xff] }
 0x63c   : > { %7414 = vmatprep.subr.bf16.mxu0 %v7413_v33  ;;  %v14612_v33 = vld [vmem:[#allocation111_spill] sm:$0xff]  ;;  %v3743_v54 = vmul.f32 %v3732_v28, %v3721_v31  ;;  %v3773_v17 = vsel %vm14610_vm0, %v14617_v29, %v11340_v23 }
 0x63d   : > { %v3776_v4 = vsel %vm14613_vm7, %v14612_v33, %v14611_v60  ;;  %v3772_v1 = vsel %vm14614_vm14, %v14611_v60, %v14612_v33  ;;  %vm14618_vm7 = vmmov %vm14610_vm0  ;;  %vm14621_vm14 = vcmp.lt.s32.totalorder %v8197_v10, 114  ;;  %v14622_v33 = vld [vmem:[#allocation21_spill] sm:$0xff] }
 0x63e   : > { %v11641_v36 = vpop.permute.xlu1 %3975  ;;  %v3794_v9 = vmul.f32 %v3788_v22, %v3776_v4  ;;  %v3777_v31 = vsel %vm14618_vm7, %v11340_v23, %v14617_v29  ;;  %v14623_v4 = vld [vmem:[#allocation25_spill] sm:$0xff] }
 0x63f   : > { %7416 = vmatpush1.bf16.msra.mxu0 %v7415_v12  ;;  %v11643_v39 = vpop.permute.xlu0 %4077 }
 0x640   : > { %7418 = vmatprep.subr.bf16.mxu0 %v7417_v37  ;;  %v3771_v37 = vsel %vm14616_vm12, %v14608_v25, %v14609_v52  ;;  %v14619_v52 = vld [vmem:[#allocation65_spill] sm:$0xff]  ;;  %vm14624_vm12 = vmmov %vm14621_vm14 }
 0x641   : > { %v3791_v16 = vmul.f32 %v3784_v6, %v3771_v37  ;;  %vm14625_vm0 = vmmov %vm14624_vm12 }
 0x642   : > { %v11666_v26 = vpop.permute.xlu1 %4015 }
 0x643   : > { %7420 = vmatpush1.bf16.msra.mxu0 %v7419_v14  ;;  %v3718_v0 = vpop.permute.xlu0 %3717  ;;  %v3792_v14 = vmul.f32 %v3788_v22, %v3775_v63  ;;  %v14620_v63 = vld [vmem:[#allocation75_spill] sm:$0xff] }
 0x644   : > { %v3722_v20 = vsel %vm670_vm13, %v14615_v3, %v3718_v0  ;;  %v3726_v15 = vsel %vm670_vm13, %v3718_v0, %v14615_v3  ;;  %7422 = vmatprep.subr.bf16.mxu0 %v7421_v61  ;;  %v3827_v60 = vsel %vm14621_vm14, %v14620_v63, %v14619_v52  ;;  %v3828_v0 = vsel %vm14624_vm12, %v14623_v4, %v14622_v33  ;;  %vm14627_vm14 = vmmov %vm14618_vm7 }
 0x645   : > { %v3745_v8 = vmul.f32 %v3732_v28, %v3722_v20  ;;  %v3746_v12 = vmul.f32 %v3736_v59, %v3726_v15  ;;  %v7020_v59 = vld [vmem:[%s13813_s1 + $0x17] ss:$8 sm:$0x3]  ;;  %v3793_v28 = vmul.f32 %v3784_v6, %v3772_v1  ;;  %v7429_v13 = vpack.c.bf16 %v3794_v9, %v3792_v14  ;;  %v14626_v20 = vld [vmem:[#allocation99_spill] sm:$0xff]  ;;  %vm14628_vm12 = vmmov %vm14625_vm0 }
 0x646   : > { %v11683_v5 = vpop.permute.xlu1 %4023  ;;  %v3836_v61 = vrot.slane %v7020_v59, %v14436_v38  ;;  %v3840_v25 = vrot.slane %v7020_v59, %v14438_v40  ;;  %v3824_v3 = vsel %vm14625_vm0, %v14622_v33, %v14623_v4  ;;  %v3823_v37 = vsel %vm14628_vm12, %v14619_v52, %v14620_v63  ;;  %v14631_v33 = vld [vmem:[#allocation29_spill] sm:$0xff]  ;;  %vm14634_vm12 = vmmov %vm14625_vm0 }
 0x647   : > { %v7427_v24 = vpack.c.bf16 %v3745_v8, %v3743_v54  ;;  %7424 = vmatpush1.bf16.msra.mxu0 %v7423_v44  ;;  %v11685_v2 = vpop.permute.xlu0 %4073  ;;  %v7425_v27 = vpack.c.bf16 %v3746_v12, %v3744_v56  ;;  %v7431_v23 = vpack.c.bf16 %v3793_v28, %v3791_v16  ;;  %v3795_v56 = vmul.f32 %v3784_v6, %v3773_v17  ;;  %v14629_v17 = vld [vmem:[#allocation93_spill] sm:$0xff] }
 0x648   : > { %v3796_v8 = vmul.f32 %v3788_v22, %v3777_v31  ;;  %v3844_v29 = vmul.f32 %v3840_v25, %v3827_v60  ;;  %v3825_v31 = vsel %vm14625_vm0, %v14629_v17, %v11369_v19  ;;  %v3879_v4 = vsel %vm742_vm8, %v11389_v30, %v14631_v33 }
 0x649   : > { %7426 = vmatprep.subr.bf16.mxu0 %v7425_v27  ;;  %v3845_v27 = vmul.f32 %v3836_v61, %v3824_v3  ;;  %v3847_v3 = vmul.f32 %v3836_v61, %v3825_v31 }
 0x64a   : > { %v11708_v44 = vpop.permute.xlu1 %4019 }
 0x64b   : > { %7428 = vmatpush1.bf16.msra.mxu0 %v7427_v24  ;;  %v3770_v1 = vpop.permute.xlu0 %3769  ;;  %v3846_v24 = vmul.f32 %v3840_v25, %v3828_v0 }
 0x64c   : > { %v3774_v15 = vsel %vm14618_vm7, %v14626_v20, %v3770_v1  ;;  %v3778_v54 = vsel %vm14627_vm14, %v3770_v1, %v14626_v20  ;;  %7430 = vmatprep.subr.bf16.mxu0 %v7429_v13  ;;  %vm14630_vm7 = vmmov %vm14625_vm0 }
 0x64d   : > { %v3797_v12 = vmul.f32 %v3784_v6, %v3774_v15  ;;  %v3798_v9 = vmul.f32 %v3788_v22, %v3778_v54  ;;  %v7021_v6 = vld [vmem:[%s13813_s1 + $0x20] ss:$8 sm:$0x3]  ;;  %v3843_v22 = vmul.f32 %v3836_v61, %v3823_v37  ;;  %v3829_v13 = vsel %vm14630_vm7, %v11369_v19, %v14629_v17  ;;  %vm14633_vm14 = vmmov %vm14625_vm0 }
 0x64e   : > { %v11724_v59 = vpop.permute.xlu1 %4027  ;;  %v7437_v52 = vpack.c.bf16 %v3846_v24, %v3844_v29  ;;  %v3892_v60 = vrot.slane %v7021_v6, %v14438_v40  ;;  %v14632_v19 = vld [vmem:[#allocation80_spill] sm:$0xff]  ;;  %v3848_v54 = vmul.f32 %v3840_v25, %v3829_v13  ;;  %v3876_v24 = vsel %vm742_vm8, %v11058_v42, %v11101_v50  ;;  %v4329_v13 = vld [vmem:[%s13818_s6 + $0x10] sm:$0xff] }
 0x64f   : > { %v7435_v14 = vpack.c.bf16 %v3797_v12, %v3795_v56  ;;  %7432 = vmatpush1.bf16.msra.mxu0 %v7431_v23  ;;  %v11726_v28 = vpop.permute.xlu0 %4121  ;;  %v7433_v16 = vpack.c.bf16 %v3798_v9, %v3796_v8  ;;  %v7439_v63 = vpack.c.bf16 %v3845_v27, %v3843_v22  ;;  %v3880_v23 = vsel %vm742_vm8, %v11101_v50, %v11058_v42 }
 0x650   : > { %v3875_v56 = vsel %vm742_vm8, %v14631_v33, %v11389_v30  ;;  %v3888_v9 = vrot.slane %v7021_v6, %v14436_v38  ;;  %v3896_v37 = vmul.f32 %v3892_v60, %v3879_v4  ;;  %v3898_v29 = vmul.f32 %v3892_v60, %v3880_v23  ;;  %v7022_v30 = vld [vmem:[%s13813_s1 + $0x21] ss:$8 sm:$0x3]  ;;  %v4337_v4 = vld [vmem:[%s13818_s6 + $0x50] sm:$0xff] }
 0x651   : > { %7434 = vmatprep.subr.bf16.mxu0 %v7433_v16  ;;  %v3877_v42 = vsel %vm742_vm8, %v11418_v49, %v11447_v55  ;;  %vm14635_vm0 = vcmp.lt.s32.totalorder %v8197_v10, 112 }
 0x652   : > { %v11744_v0 = vpop.permute.xlu1 %4067  ;;  %v3895_v22 = vmul.f32 %v3888_v9, %v3875_v56  ;;  %v7445_v50 = vpack.c.bf16 %v3898_v29, %v3896_v37  ;;  %v3931_v6 = vsel %vm14635_vm0, %v11510_v32, %v11481_v41  ;;  %vm14636_vm7 = vmmov %vm14635_vm0 }
 0x653   : > { %7436 = vmatpush1.bf16.msra.mxu0 %v7435_v14  ;;  %v3822_v1 = vpop.permute.xlu0 %3821 }
 0x654   : > { %v3826_v20 = vsel %vm14633_vm14, %v14632_v19, %v3822_v1  ;;  %v3830_v15 = vsel %vm14634_vm12, %v3822_v1, %v14632_v19  ;;  %7438 = vmatprep.subr.bf16.mxu0 %v7437_v52  ;;  %v3940_v52 = vrot.slane %v7022_v30, %v14436_v38  ;;  %v3899_v1 = vmul.f32 %v3888_v9, %v3877_v42  ;;  %vm14637_vm14 = vmmov %vm14635_vm0 }
 0x655   : > { %v3849_v8 = vmul.f32 %v3836_v61, %v3826_v20  ;;  %v3850_v12 = vmul.f32 %v3840_v25, %v3830_v15  ;;  %v3897_v61 = vmul.f32 %v3888_v9, %v3876_v24  ;;  %v3881_v25 = vsel %vm742_vm8, %v11447_v55, %v11418_v49  ;;  %vm14638_vm12 = vmmov %vm14635_vm0 }
 0x656   : > { %v11765_v14 = vpop.permute.xlu1 %4075  ;;  %v3932_v49 = vsel %vm14636_vm7, %v11244_v34, %v11195_v58  ;;  %v3927_v23 = vsel %vm14637_vm14, %v11481_v41, %v11510_v32  ;;  %v3900_v20 = vmul.f32 %v3892_v60, %v3881_v25  ;;  %v4336_v32 = vld [vmem:[%s13818_s6 + $0x48] sm:$0xff]  ;;  %vm14639_vm7 = vmmov %vm14635_vm0  ;;  %vm14640_vm14 = vcmp.lt.s32.totalorder %v8197_v10, 111 }
 0x657   : > { %v7443_v27 = vpack.c.bf16 %v3849_v8, %v3847_v3  ;;  %7440 = vmatpush1.bf16.msra.mxu0 %v7439_v63  ;;  %v7441_v16 = vpack.c.bf16 %v3850_v12, %v3848_v54  ;;  %v11767_v17 = vpop.permute.xlu0 %4129  ;;  %v3944_v63 = vrot.slane %v7022_v30, %v14438_v40  ;;  %v7447_v55 = vpack.c.bf16 %v3897_v61, %v3895_v22  ;;  %v4343_v61 = vld [vmem:[%s13818_s6 + $0x80] sm:$0xff] }
 0x658   : > { %v3928_v8 = vsel %vm14638_vm12, %v11195_v58, %v11244_v34  ;;  %v7023_v58 = vld [vmem:[%s13813_s1 + $0x22] ss:$8 sm:$0x3]  ;;  %v3933_v29 = vsel %vm14639_vm7, %v11569_v11, %v11544_v43  ;;  %v3983_v22 = vsel %vm14640_vm14, %v11602_v7, %v11589_v47  ;;  %vm14641_vm12 = vmmov %vm14640_vm14 }
 0x659   : > { %7442 = vmatprep.subr.bf16.mxu0 %v7441_v16  ;;  %v3948_v15 = vmul.f32 %v3944_v63, %v3931_v6  ;;  %v3950_v12 = vmul.f32 %v3944_v63, %v3932_v49  ;;  %v3949_v34 = vmul.f32 %v3940_v52, %v3928_v8  ;;  %v3992_v42 = vrot.slane %v7023_v58, %v14436_v38  ;;  %v4351_v6 = vld [vmem:[%s13818_s6 + $0xc0] sm:$0xff]  ;;  %vm14643_vm14 = vmmov %vm14639_vm7 }
 0x65a   : > { %v11784_v31 = vpop.permute.xlu1 %4071 }
 0x65b   : > { %7444 = vmatpush1.bf16.msra.mxu0 %v7443_v27  ;;  %v3874_v33 = vpop.permute.xlu0 %3873  ;;  %v3929_v27 = vsel %vm14635_vm0, %v11544_v43, %v11569_v11  ;;  %v7453_v16 = vpack.c.bf16 %v3950_v12, %v3948_v15  ;;  %v3984_v43 = vsel %vm14641_vm12, %v11391_v35, %v11342_v46  ;;  %vm14642_vm0 = vmmov %vm14641_vm12 }
 0x65c   : > { %7446 = vmatprep.subr.bf16.mxu0 %v7445_v50  ;;  %v3878_v3 = vsel %vm742_vm8, %v11148_v21, %v3874_v33  ;;  %v3882_v19 = vsel %vm742_vm8, %v3874_v33, %v11148_v21  ;;  %v3947_v21 = vmul.f32 %v3940_v52, %v3927_v23  ;;  %v3996_v50 = vrot.slane %v7023_v58, %v14438_v40  ;;  %vm14644_vm12 = vmmov %vm14642_vm0 }
 0x65d   : > { %v3901_v54 = vmul.f32 %v3888_v9, %v3878_v3  ;;  %v3902_v56 = vmul.f32 %v3892_v60, %v3882_v19  ;;  %v4344_v9 = vld [vmem:[%s13818_s6 + $0x88] sm:$0xff]  ;;  %v3979_v49 = vsel %vm14642_vm0, %v11589_v47, %v11602_v7  ;;  %v3980_v19 = vsel %vm14644_vm12, %v11342_v46, %v11391_v35  ;;  %v4350_v7 = vld [vmem:[%s13818_s6 + $0xb8] sm:$0xff] }
 0x65e   : > { %4745 = vmatmul.mubr.f32.vlgmr.msra.gmra.mrb[24].mxu0 %v4329_v13  ;;  %v11812_v41 = vpop.permute.xlu1 %4079  ;;  %v7455_v11 = vpack.c.bf16 %v3949_v34, %v3947_v21  ;;  %v3951_v13 = vmul.f32 %v3940_v52, %v3929_v27  ;;  %v7024_v46 = vld [vmem:[%s13813_s1 + $0x23] ss:$8 sm:$0x3]  ;;  %v4001_v35 = vmul.f32 %v3992_v42, %v3980_v19 }
 0x65f   : > { %7448 = vmatpush1.bf16.msra.mxu0 %v7447_v55  ;;  %4750 = vmatprep.mubr.f32.mxu0 %v4337_v4  ;;  %v7451_v37 = vpack.c.bf16 %v3901_v54, %v3899_v1  ;;  %v11817_v24 = vpop.permute.xlu0 %4125  ;;  %v7449_v60 = vpack.c.bf16 %v3902_v56, %v3900_v20  ;;  %v3952_v4 = vmul.f32 %v3944_v63, %v3933_v29 }
 0x660   : > { %v4000_v1 = vmul.f32 %v3996_v50, %v3983_v22  ;;  %v4002_v20 = vmul.f32 %v3996_v50, %v3984_v43  ;;  %v3981_v56 = vsel %vm14642_vm0, %v11620_v53, %v11641_v36 }
 0x661   : > { %7450 = vmatprep.subr.bf16.mxu0 %v7449_v60  ;;  %v4048_v60 = vrot.slane %v7024_v46, %v14438_v40 }
 0x662   : > { %4751 = vmatmul.mubr.f32.gmra.mrb[26].mxu0 %v4336_v32  ;;  %v11837_v30 = vpop.permute.xlu1 %4119  ;;  %v7461_v8 = vpack.c.bf16 %v4002_v20, %v4000_v1 }
 0x663   : > { %7452 = vmatpush1.bf16.msra.mxu0 %v7451_v37  ;;  %4756 = vmatprep.mubr.f32.mxu0 %v4344_v9  ;;  %v3926_v25 = vpop.permute.xlu0 %3925  ;;  %v4044_v37 = vrot.slane %v7024_v46, %v14436_v38 }
 0x664   : > { %7454 = vmatprep.subr.bf16.mxu0 %v7453_v16  ;;  %v3930_v55 = vsel %vm14639_vm7, %v11293_v18, %v3926_v25  ;;  %v3934_v33 = vsel %vm14643_vm14, %v3926_v25, %v11293_v18  ;;  %v3999_v18 = vmul.f32 %v3992_v42, %v3979_v49  ;;  %vm14645_vm7 = vmmov %vm14642_vm0  ;;  %vm14646_vm14 = vcmp.lt.s32.totalorder %v8197_v10, 110 }
 0x665   : > { %v3953_v23 = vmul.f32 %v3940_v52, %v3930_v55  ;;  %v3954_v3 = vmul.f32 %v3944_v63, %v3934_v33  ;;  %v4332_v63 = vld [vmem:[%s13818_s6 + $0x28] sm:$0xff]  ;;  %v3985_v32 = vsel %vm14645_vm7, %v11641_v36, %v11620_v53  ;;  %v4035_v12 = vsel %vm14646_vm14, %v11683_v5, %v11666_v26  ;;  %vm14647_vm12 = vmmov %vm14646_vm14 }
 0x666   : > { %4757 = vmatmul.mubr.f32.gmra.mrb[28].mxu0 %v4343_v61  ;;  %v11865_v47 = vpop.permute.xlu1 %4127  ;;  %v4036_v9 = vsel %vm14647_vm12, %v11571_v51, %v11512_v57  ;;  %v7463_v58 = vpack.c.bf16 %v4001_v35, %v3999_v18  ;;  %v4003_v36 = vmul.f32 %v3992_v42, %v3981_v56  ;;  %vm14648_vm0 = vmmov %vm14647_vm12  ;;  %v4004_v29 = vmul.f32 %v3996_v50, %v3985_v32 }
 0x667   : > { %7456 = vmatpush1.bf16.msra.mxu0 %v7455_v11  ;;  %4762 = vmatprep.mubr.f32.mxu0 %v4351_v6  ;;  %v7459_v15 = vpack.c.bf16 %v3953_v23, %v3951_v13  ;;  %v11870_v54 = vpop.permute.xlu0 %4173  ;;  %v7457_v52 = vpack.c.bf16 %v3954_v3, %v3952_v4  ;;  %v4031_v34 = vsel %vm14648_vm0, %v11666_v26, %v11683_v5  ;;  %vm14649_vm14 = vmmov %vm14645_vm7 }
 0x668   : > { %v4052_v22 = vmul.f32 %v4048_v60, %v4035_v12  ;;  %vm14650_vm12 = vmmov %vm14648_vm0  ;;  %v4054_v26 = vmul.f32 %v4048_v60, %v4036_v9  ;;  %v4051_v5 = vmul.f32 %v4044_v37, %v4031_v34 }
 0x669   : > { %7458 = vmatprep.subr.bf16.mxu0 %v7457_v52  ;;  %v4032_v11 = vsel %vm14650_vm12, %v11512_v57, %v11571_v51 }
 0x66a   : > { %4763 = vmatmul.mubr.f32.gmra.mrb[30].mxu0 %v4350_v7  ;;  %v11890_v21 = vpop.permute.xlu1 %4123  ;;  %v7469_v57 = vpack.c.bf16 %v4054_v26, %v4052_v22 }
 0x66b   : > { %7460 = vmatpush1.bf16.msra.mxu0 %v7459_v15  ;;  %4833 = vmatprep.mubr.f32.mxu0 %v4332_v63  ;;  %v3978_v53 = vpop.permute.xlu0 %3977 }
 0x66c   : > { %7462 = vmatprep.subr.bf16.mxu0 %v7461_v8  ;;  %v3982_v27 = vsel %vm14645_vm7, %v11449_v45, %v3978_v53  ;;  %v3986_v16 = vsel %vm14649_vm14, %v3978_v53, %v11449_v45  ;;  %v7025_v45 = vld [vmem:[%s13813_s1 + $0x24] ss:$8 sm:$0x3]  ;;  %vm14651_vm7 = vmmov %vm14648_vm0  ;;  %vm14652_vm14 = vcmp.lt.s32.totalorder %v8197_v10, 98 }
 0x66d   : > { %v4005_v61 = vmul.f32 %v3992_v42, %v3982_v27  ;;  %v4006_v43 = vmul.f32 %v3996_v50, %v3986_v16  ;;  %v4053_v42 = vmul.f32 %v4044_v37, %v4032_v11  ;;  %v4033_v50 = vsel %vm14648_vm0, %v11708_v44, %v11724_v59  ;;  %vm14653_vm12 = vmmov %vm14652_vm14 }
 0x66e   : > { %v11912_v25 = vpop.permute.xlu1 %4131  ;;  %v4037_v51 = vsel %vm14651_vm7, %v11724_v59, %v11708_v44  ;;  %v4087_v55 = vsel %vm14652_vm14, %v11765_v14, %v11744_v0  ;;  %v4096_v4 = vrot.slane %v7025_v45, %v14436_v38  ;;  %v4100_v1 = vrot.slane %v7025_v45, %v14438_v40  ;;  %vm14654_vm0 = vmmov %vm14653_vm12 }
 0x66f   : > { %7464 = vmatpush1.bf16.msra.mxu0 %v7463_v58  ;;  %v7467_v6 = vpack.c.bf16 %v4005_v61, %v4003_v36  ;;  %v11914_v13 = vpop.permute.xlu0 %4181  ;;  %v7465_v49 = vpack.c.bf16 %v4006_v43, %v4004_v29  ;;  %v4088_v23 = vsel %vm14653_vm12, %v11643_v39, %v11622_v48  ;;  %v7471_v3 = vpack.c.bf16 %v4053_v42, %v4051_v5  ;;  %vm14655_vm14 = vmmov %vm14651_vm7  ;;  %v7027_v42 = vld [vmem:[%s13813_s1 + $0x26] ss:$8 sm:$0x3] }
 0x670   : > { %v4055_v44 = vmul.f32 %v4044_v37, %v4033_v50  ;;  %v4083_v59 = vsel %vm14654_vm0, %v11744_v0, %v11765_v14  ;;  %v4056_v18 = vmul.f32 %v4048_v60, %v4037_v51  ;;  %v4104_v15 = vmul.f32 %v4100_v1, %v4087_v55  ;;  %vm14656_vm12 = vmmov %vm14654_vm0 }
 0x671   : > { %7466 = vmatprep.subr.bf16.mxu0 %v7465_v49  ;;  %v4084_v46 = vsel %vm14656_vm12, %v11622_v48, %v11643_v39  ;;  %v4106_v0 = vmul.f32 %v4100_v1, %v4088_v23  ;;  %v4103_v14 = vmul.f32 %v4096_v4, %v4083_v59  ;;  %v4204_v23 = vrot.slane %v7027_v42, %v14438_v40 }
 0x672   : > { %v11931_v33 = vpop.permute.xlu1 %4171  ;;  %v4105_v12 = vmul.f32 %v4096_v4, %v4084_v46 }
 0x673   : > { %7468 = vmatpush1.bf16.msra.mxu0 %v7467_v6  ;;  %v4030_v19 = vpop.permute.xlu0 %4029  ;;  %v7477_v48 = vpack.c.bf16 %v4106_v0, %v4104_v15  ;;  %v7028_v15 = vld [vmem:[%s13813_s1 + $0x27] ss:$8 sm:$0x3] }
 0x674   : > { %7470 = vmatprep.subr.bf16.mxu0 %v7469_v57  ;;  %v4034_v7 = vsel %vm14651_vm7, %v11604_v62, %v4030_v19  ;;  %v4038_v20 = vsel %vm14655_vm14, %v4030_v19, %v11604_v62  ;;  %v7026_v62 = vld [vmem:[%s13813_s1 + $0x25] ss:$8 sm:$0x3]  ;;  %vm14657_vm7 = vmmov %vm14654_vm0  ;;  %vm14658_vm14 = vcmp.lt.s32.totalorder %v8197_v10, 97  ;;  %v7479_v58 = vpack.c.bf16 %v4105_v12, %v4103_v14 }
 0x675   : > { %v4057_v52 = vmul.f32 %v4044_v37, %v4034_v7  ;;  %v4058_v63 = vmul.f32 %v4048_v60, %v4038_v20  ;;  %v4085_v37 = vsel %vm14654_vm0, %v11784_v31, %v11812_v41  ;;  %v4089_v39 = vsel %vm14657_vm7, %v11812_v41, %v11784_v31  ;;  %vm14659_vm12 = vmmov %vm14658_vm14 }
 0x676   : > { %v4180_v35 = vpop.permute.xlu1 %4179  ;;  %v4139_v60 = vsel %vm14658_vm14, %v11865_v47, %v11837_v30  ;;  %v4148_v53 = vrot.slane %v7026_v62, %v14436_v38  ;;  %v4152_v36 = vrot.slane %v7026_v62, %v14438_v40  ;;  %v4140_v34 = vsel %vm14659_vm12, %v11767_v17, %v11726_v28  ;;  %vm14660_vm0 = vmmov %vm14659_vm12 }
 0x677   : > { %7472 = vmatpush1.bf16.msra.mxu0 %v7471_v3  ;;  %v7475_v56 = vpack.c.bf16 %v4057_v52, %v4055_v44  ;;  %v11953_v8 = vpop.permute.xlu0 %4177  ;;  %v7473_v32 = vpack.c.bf16 %v4058_v63, %v4056_v18  ;;  %v4107_v31 = vmul.f32 %v4096_v4, %v4085_v37  ;;  %v4135_v41 = vsel %vm14660_vm0, %v11837_v30, %v11865_v47  ;;  %vm14661_vm14 = vmmov %vm14657_vm7 }
 0x678   : > { %v4108_v22 = vmul.f32 %v4100_v1, %v4089_v39  ;;  %v4156_v61 = vmul.f32 %v4152_v36, %v4139_v60  ;;  %vm14662_vm12 = vmmov %vm14660_vm0  ;;  %v4158_v30 = vmul.f32 %v4152_v36, %v4140_v34  ;;  %v4155_v47 = vmul.f32 %v4148_v53, %v4135_v41 }
 0x679   : > { %7474 = vmatprep.subr.bf16.mxu0 %v7473_v32  ;;  %v4136_v26 = vsel %vm14662_vm12, %v11726_v28, %v11767_v17  ;;  %v4191_v17 = vsel %vm886_vm6, %v4180_v35, %v11931_v33  ;;  %v4192_v19 = vsel %vm886_vm6, %v11914_v13, %v11870_v54  ;;  %vm14665_vm12 = vmmov %vm14660_vm0  ;;  %v4256_v32 = vrot.slane %v7028_v15, %v14438_v40 }
 0x67a   : > { %v4176_v9 = vpop.permute.xlu1 %4175  ;;  %v4157_v50 = vmul.f32 %v4148_v53, %v4136_v26  ;;  %v7485_v57 = vpack.c.bf16 %v4158_v30, %v4156_v61  ;;  %v4208_v7 = vmul.f32 %v4204_v23, %v4191_v17  ;;  %v4210_v63 = vmul.f32 %v4204_v23, %v4192_v19 }
 0x67b   : > { %7476 = vmatpush1.bf16.msra.mxu0 %v7475_v56  ;;  %v4082_v27 = vpop.permute.xlu0 %4081 }
 0x67c   : > { %7478 = vmatprep.subr.bf16.mxu0 %v7477_v48  ;;  %v4086_v16 = vsel %vm14657_vm7, %v11685_v2, %v4082_v27  ;;  %v4090_v29 = vsel %vm14661_vm14, %v4082_v27, %v11685_v2  ;;  %v4137_v2 = vsel %vm14660_vm0, %v11890_v21, %v11912_v25  ;;  %vm14663_vm7 = vmmov %vm14660_vm0  ;;  %v7487_v55 = vpack.c.bf16 %v4157_v50, %v4155_v47 }
 0x67d   : > { %v4109_v43 = vmul.f32 %v4096_v4, %v4086_v16  ;;  %v4110_v11 = vmul.f32 %v4100_v1, %v4090_v29  ;;  %v4141_v28 = vsel %vm14663_vm7, %v11912_v25, %v11890_v21  ;;  %v4159_v4 = vmul.f32 %v4148_v53, %v4137_v2  ;;  %vm14664_vm14 = vmmov %vm14660_vm0 }
 0x67e   : > { %v4184_v5 = vpop.permute.xlu1 %4183  ;;  %v4200_v1 = vrot.slane %v7027_v42, %v14436_v38  ;;  %v4187_v21 = vsel %vm886_vm6, %v11931_v33, %v4180_v35  ;;  %v4160_v59 = vmul.f32 %v4152_v36, %v4141_v28  ;;  %v4188_v33 = vsel %vm886_vm6, %v11870_v54, %v11914_v13 }
 0x67f   : > { %7480 = vmatpush1.bf16.msra.mxu0 %v7479_v58  ;;  %v7483_v6 = vpack.c.bf16 %v4109_v43, %v4107_v31  ;;  %v4226_v49 = vpop.permute.xlu0 %4225  ;;  %v7481_v45 = vpack.c.bf16 %v4110_v11, %v4108_v22  ;;  %v4189_v14 = vsel %vm886_vm6, %v4176_v9, %v4184_v5  ;;  %v4193_v56 = vsel %vm886_vm6, %v4184_v5, %v4176_v9 }
 0x680   : > { %v4207_v46 = vmul.f32 %v4200_v1, %v4187_v21  ;;  %v4209_v62 = vmul.f32 %v4200_v1, %v4188_v33  ;;  %v7493_v54 = vpack.c.bf16 %v4210_v63, %v4208_v7  ;;  %v4211_v39 = vmul.f32 %v4200_v1, %v4189_v14 }
 0x681   : > { %7482 = vmatprep.subr.bf16.mxu0 %v7481_v45  ;;  %v4212_v60 = vmul.f32 %v4204_v23, %v4193_v56  ;;  %v4252_v58 = vrot.slane %v7028_v15, %v14436_v38 }
 0x682   : > { %v4224_v51 = vpop.permute.xlu1 %4223  ;;  %v7495_v48 = vpack.c.bf16 %v4209_v62, %v4207_v46 }
 0x683   : > { %7484 = vmatpush1.bf16.msra.mxu0 %v7483_v6  ;;  %v4134_v3 = vpop.permute.xlu0 %4133 }
 0x684   : > { %7486 = vmatprep.subr.bf16.mxu0 %v7485_v57  ;;  %v4138_v25 = vsel %vm14664_vm14, %v11817_v24, %v4134_v3  ;;  %v4142_v44 = vsel %vm14665_vm12, %v4134_v3, %v11817_v24  ;;  %vm14724_vm12 = vcmp.lt.s32.totalorder %v8197_v10, 30 }
 0x685   : > { %v4161_v20 = vmul.f32 %v4148_v53, %v4138_v25  ;;  %v4162_v18 = vmul.f32 %v4152_v36, %v4142_v44 }
 0x686   : > { %v4232_v52 = vpop.permute.xlu1 %4231 }
 0x687   : > { %7488 = vmatpush1.bf16.msra.mxu0 %v7487_v55  ;;  %v7491_v35 = vpack.c.bf16 %v4161_v20, %v4159_v4  ;;  %v4234_v0 = vpop.permute.xlu0 %4233  ;;  %v7489_v24 = vpack.c.bf16 %v4162_v18, %v4160_v59  ;;  %v4243_v12 = vsel %vm910_vm5, %v4232_v52, %v4224_v51  ;;  %v4239_v9 = vsel %vm910_vm5, %v4224_v51, %v4232_v52  ;;  %v7029_v51 = vld [vmem:[%s13813_s1 + $0x30] ss:$8 sm:$0x3]  ;;  %v4331_v59 = vld [vmem:[%s13818_s6 + $0x20] sm:$0xff] }
 0x688   : > { %v4244_v13 = vsel %vm910_vm5, %v4234_v0, %v4226_v49  ;;  %v4260_v36 = vmul.f32 %v4256_v32, %v4243_v12  ;;  %v4240_v31 = vsel %vm910_vm5, %v4226_v49, %v4234_v0  ;;  %v4259_v26 = vmul.f32 %v4252_v58, %v4239_v9  ;;  %v4339_v20 = vld [vmem:[%s13818_s6 + $0x60] sm:$0xff] }
 0x689   : > { %7490 = vmatprep.subr.bf16.mxu0 %v7489_v24  ;;  %v4262_v41 = vmul.f32 %v4256_v32, %v4244_v13  ;;  %v4261_v5 = vmul.f32 %v4252_v58, %v4240_v31  ;;  %v4304_v3 = vrot.slane %v7029_v51, %v14436_v38  ;;  %v4308_v19 = vrot.slane %v7029_v51, %v14438_v40 }
 0x68a   : > { %v4228_v37 = vpop.permute.xlu1 %4227  ;;  %v14666_v31 = vmov 0.0  }
 0x68b   : > { %7492 = vmatpush1.bf16.msra.mxu0 %v7491_v35  ;;  %v4186_v53 = vpop.permute.xlu0 %4185  ;;  %v7501_v30 = vpack.c.bf16 %v4262_v41, %v4260_v36  ;;  %v7503_v45 = vpack.c.bf16 %v4261_v5, %v4259_v26  ;;  %v4338_v35 = vld [vmem:[%s13818_s6 + $0x58] sm:$0xff]  ;;  %v4352_v36 = vld [vmem:[%s13818_s6 + $0xc8] sm:$0xff]  ;;  %v4333_v41 = vld [vmem:[%s13818_s6 + $0x30] sm:$0xff] }
 0x68c   : > { %7494 = vmatprep.subr.bf16.mxu0 %v7493_v54  ;;  %v4190_v34 = vsel %vm886_vm6, %v11953_v8, %v4186_v53  ;;  %v4194_v27 = vsel %vm886_vm6, %v4186_v53, %v11953_v8  ;;  %v4345_v54 = vld [vmem:[%s13818_s6 + $0x90] sm:$0xff] }
 0x68d   : > { %v4213_v16 = vmul.f32 %v4200_v1, %v4190_v34  ;;  %v4214_v29 = vmul.f32 %v4204_v23, %v4194_v27 }
 0x68e   : > { %v4236_v22 = vpop.permute.xlu1 %4235 }
 0x68f   : > { %7496 = vmatpush1.bf16.msra.mxu0 %v7495_v48  ;;  %v7499_v61 = vpack.c.bf16 %v4213_v16, %v4211_v39  ;;  %v4230_v43 = vpop.permute.xlu0 %4229  ;;  %v7497_v11 = vpack.c.bf16 %v4214_v29, %v4212_v60  ;;  %v4241_v47 = vsel %vm910_vm5, %v4228_v37, %v4236_v22  ;;  %v4245_v8 = vsel %vm910_vm5, %v4236_v22, %v4228_v37  ;;  %v4353_v37 = vld [vmem:[%s13818_s6 + $0xd0] sm:$0xff]  ;;  %v4340_v16 = vld [vmem:[%s13818_s6 + $0x68] sm:$0xff]  ;;  %v4347_v29 = vld [vmem:[%s13818_s6 + $0xa0] sm:$0xff] }
 0x690   : > { %v4263_v50 = vmul.f32 %v4252_v58, %v4241_v47  ;;  %v4264_v57 = vmul.f32 %v4256_v32, %v4245_v8  ;;  %v4354_v22 = vld [vmem:[%s13818_s6 + $0xd8] sm:$0xff] }
 0x691   : > { %7498 = vmatprep.subr.bf16.mxu0 %v7497_v11 }
 0x692   : > { %v4276_v6 = vpop.permute.xlu1 %4275 }
 0x693   : > { %7500 = vmatpush1.bf16.msra.mxu0 %v7499_v61  ;;  %v4238_v49 = vpop.permute.xlu0 %4237 }
 0x694   : > { %7502 = vmatprep.subr.bf16.mxu0 %v7501_v30  ;;  %v4242_v2 = vsel %vm910_vm5, %v4230_v43, %v4238_v49  ;;  %v4246_v42 = vsel %vm910_vm5, %v4238_v49, %v4230_v43 }
 0x695   : > { %v4265_v28 = vmul.f32 %v4252_v58, %v4242_v2  ;;  %v4266_v17 = vmul.f32 %v4256_v32, %v4246_v42  ;;  %v4346_v32 = vld [vmem:[%s13818_s6 + $0x98] sm:$0xff] }
 0x696   : > { %v4284_v55 = vpop.permute.xlu1 %4283 }
 0x697   : > { %7504 = vmatpush1.bf16.msra.mxu0 %v7503_v45  ;;  %v7507_v4 = vpack.c.bf16 %v4265_v28, %v4263_v50  ;;  %v4278_v1 = vpop.permute.xlu0 %4277  ;;  %v7505_v23 = vpack.c.bf16 %v4266_v17, %v4264_v57  ;;  %v4291_v21 = vsel %vm934_vm4, %v4276_v6, %v4284_v55  ;;  %v4295_v25 = vsel %vm934_vm4, %v4284_v55, %v4276_v6 }
 0x698   : > { %v4311_v33 = vmul.f32 %v4304_v3, %v4291_v21  ;;  %v4312_v52 = vmul.f32 %v4308_v19, %v4295_v25 }
 0x699   : > { %7506 = vmatprep.subr.bf16.mxu0 %v7505_v23 }
 0x69a   : > { %v4280_v44 = vpop.permute.xlu1 %4279 }
 0x69b   : > { %7508 = vmatpush1.bf16.msra.mxu0 %v7507_v4  ;;  %v4286_v7 = vpop.permute.xlu0 %4285 }
 0x69c   : > { %v4292_v18 = vsel %vm934_vm4, %v4278_v1, %v4286_v7  ;;  %v4296_v15 = vsel %vm934_vm4, %v4286_v7, %v4278_v1 }
 0x69d   : > { %v4313_v63 = vmul.f32 %v4304_v3, %v4292_v18  ;;  %v4314_v46 = vmul.f32 %v4308_v19, %v4296_v15 }
 0x69e   : > { %4834 = vmatmul.mubr.f32.vlgmr.msra.gmra.mrb[24].mxu0 %v4331_v59  ;;  %v4288_v24 = vpop.permute.xlu1 %4287 }
 0x69f   : > { %4839 = vmatprep.mubr.f32.mxu0 %v4339_v20  ;;  %v7511_v0 = vpack.c.bf16 %v4313_v63, %v4311_v33  ;;  %v4282_v14 = vpop.permute.xlu0 %4281  ;;  %v7509_v56 = vpack.c.bf16 %v4314_v46, %v4312_v52  ;;  %v4293_v62 = vsel %vm934_vm4, %v4280_v44, %v4288_v24  ;;  %v4297_v12 = vsel %vm934_vm4, %v4288_v24, %v4280_v44 }
 0x6a0   : > { %v4315_v60 = vmul.f32 %v4304_v3, %v4293_v62  ;;  %v4316_v58 = vmul.f32 %v4308_v19, %v4297_v12 }
 0x6a1   : > { %7510 = vmatprep.subr.bf16.mxu0 %v7509_v56 }
 0x6a2   : > { %4840 = vmatmul.mubr.f32.gmra.mrb[26].mxu0 %v4338_v35 }
 0x6a3   : > { %7512 = vmatpush1.bf16.msra.mxu0 %v7511_v0  ;;  %4845 = vmatprep.mubr.f32.mxu0 %v4346_v32  ;;  %v4290_v13 = vpop.permute.xlu0 %4289 }
 0x6a4   : > { %v4294_v48 = vsel %vm934_vm4, %v4282_v14, %v4290_v13  ;;  %v4298_v39 = vsel %vm934_vm4, %v4290_v13, %v4282_v14 }
 0x6a5   : > { %v4317_v53 = vmul.f32 %v4304_v3, %v4294_v48  ;;  %v4318_v9 = vmul.f32 %v4308_v19, %v4298_v39 }
 0x6a6   : > { %4846 = vmatmul.mubr.f32.gmra.mrb[28].mxu0 %v4345_v54 }
 0x6a7   : > { %4851 = vmatprep.mubr.f32.mxu0 %v4353_v37  ;;  %v7515_v34 = vpack.c.bf16 %v4317_v53, %v4315_v60  ;;  %v7513_v27 = vpack.c.bf16 %v4318_v9, %v4316_v58 }
 0x6a9   : > { %7514 = vmatprep.subr.bf16.mxu0 %v7513_v27 }
 0x6aa   : > { %4852 = vmatmul.mubr.f32.gmra.mrb[30].mxu0 %v4352_v36  ;;  %v4979_v36 = vld [vmem:[%s13813_s1] ss:$8 sm:$0x3] }
 0x6ab   : > { %7516 = vmatpush1.bf16.msra.mxu0 %v7515_v34  ;;  %4922 = vmatprep.mubr.f32.mxu0 %v14666_v31 }
 0x6ae   : > { %7030 = vmatmul.mubr.msk.f32.vlgmr.msra.gmra.mrb[24].mxu0 %vm2674_vm15, %v4333_v41 }
 0x6af   : > { %4928 = vmatprep.mubr.f32.mxu0 %v14666_v31  ;;  %v4562_v61 = vpop.permute.xlu1 %4561 }
 0x6b2   : > { %7031 = vmatmul.mubr.msk.f32.gmra.mrb[26].mxu0 %vm2674_vm15, %v4340_v16  ;;  %v12384_v16 = vrot.slane %v4979_v36, %v14436_v38 }
 0x6b3   : > { %4934 = vmatprep.mubr.f32.mxu0 %v14666_v31  ;;  %v12242_v55 = vpop.permute.xlu1 %4571 }
 0x6b4   : > { %v4567_v30 = vpop.permute.xlu0 %4566 }
 0x6b6   : > { %7032 = vmatmul.mubr.msk.f32.gmra.mrb[28].mxu0 %vm2674_vm15, %v4347_v29  ;;  %v12387_v29 = vrot.slane %v4979_v36, %v14438_v40 }
 0x6b7   : > { %4940 = vmatprep.mubr.f32.mxu0 %v14666_v31 }
 0x6b8   : > { %v12248_v4 = vpop.permute.xlu0 %4576 }
 0x6ba   : > { %7033 = vmatmul.mubr.msk.f32.gmra.mrb[30].mxu0 %vm2674_vm15, %v4354_v22 }
 0x781   : > { %v4924_v43 = vpop.f32.mrb[24].mxu0 }
 0x782   : > { %v7741_v11 = vadd.f32 %v4924_v43, %v4562_v61  ;;  %v4926_v26 = vpop.f32.mrb[25].mxu0 }
 0x783   : > { %v7742_v57 = vadd.f32 %v4926_v26, %v4562_v61 }
 0x784   : > { %v12116_v5 = vmax.f32 %v7741_v11, 0.0 }
 0x785   : > { %v4930_v47 = vpop.f32.mrb[26].mxu0  ;;  %v12186_v28 = vmax.f32 %v7742_v57, 0.0 }
 0x786   : > { %v7743_v8 = vadd.f32 %v4930_v47, %v4567_v30  ;;  %v4932_v6 = vpop.f32.mrb[27].mxu0  ;;  %4955 = vrot.lane.b32.xlu1 %v12116_v5, %s14154_s26 }
 0x787   : > { %v7744_v17 = vadd.f32 %v4932_v6, %v4567_v30 }
 0x788   : > { %v12120_v49 = vmax.f32 %v7743_v8, 0.0 }
 0x789   : > { %v12122_v45 = vpop.f32.mrb[28].mxu0  ;;  %v12192_v51 = vmax.f32 %v7744_v17, 0.0 }
 0x78a   : > { %v12124_v2 = vpop.f32.mrb[29].mxu0  ;;  %4957 = vrot.lane.b32.xlu0 %v12120_v49, %s14154_s26  ;;  %5007 = vrot.lane.b32.xlu1 %v12116_v5, %s14156_s11  ;;  %v7745_v1 = vadd.f32 %v12122_v45, %v12242_v55 }
 0x78b   : > { %v7746_v41 = vadd.f32 %v12124_v2, %v12242_v55 }
 0x78c   : > { %v12258_v3 = vmax.f32 %v7745_v1, 0.0 }
 0x78d   : > { %v12130_v42 = vpop.f32.mrb[30].mxu0  ;;  %v12403_v30 = vmax.f32 %v7746_v41, 0.0 }
 0x78e   : > { %v12132_v50 = vpop.f32.mrb[31].mxu0  ;;  %5009 = vrot.lane.b32.xlu0 %v12120_v49, %s14156_s11  ;;  %5059 = vrot.lane.b32.xlu1 %v12116_v5, %s14158_s12  ;;  %v7747_v19 = vadd.f32 %v12130_v42, %v12248_v4 }
 0x78f   : > { %v7748_v43 = vadd.f32 %v12132_v50, %v12248_v4 }
 0x790   : > { %v12270_v44 = vmax.f32 %v7747_v19, 0.0 }
 0x791   : > { %v12419_v50 = vmax.f32 %v7748_v43, 0.0 }
 0x792   : > { %5061 = vrot.lane.b32.xlu0 %v12120_v49, %s14158_s12  ;;  %5111 = vrot.lane.b32.xlu1 %v12116_v5, %s14160_s27 }
 0x796   : > { %5113 = vrot.lane.b32.xlu0 %v12120_v49, %s14160_s27  ;;  %5163 = vrot.lane.b32.xlu1 %v12116_v5, %s14162_s2 }
 0x79a   : > { %5165 = vrot.lane.b32.xlu0 %v12120_v49, %s14162_s2  ;;  %5215 = vrot.lane.b32.xlu1 %v12116_v5, %s14164_s22 }
 0x79e   : > { %5217 = vrot.lane.b32.xlu0 %v12120_v49, %s14164_s22  ;;  %5267 = vrot.lane.b32.xlu1 %v12116_v5, %s14166_s19 }
 0x7a2   : > { %5269 = vrot.lane.b32.xlu0 %v12120_v49, %s14166_s19  ;;  %5319 = vrot.lane.b32.xlu1 %v12116_v5, %s14236_s16 }
 0x7a6   : > { %5321 = vrot.lane.b32.xlu0 %v12120_v49, %s14236_s16  ;;  %5371 = vrot.lane.b32.xlu1 %v12116_v5, %s14167_s24 }
 0x7aa   : > { %5373 = vrot.lane.b32.xlu0 %v12120_v49, %s14167_s24  ;;  %5423 = vrot.lane.b32.xlu1 %v12116_v5, %s14168_s13 }
 0x7ae   : > { %5425 = vrot.lane.b32.xlu0 %v12120_v49, %s14168_s13  ;;  %5475 = vrot.lane.b32.xlu1 %v12116_v5, %s14150_s30 }
 0x7b2   : > { %5477 = vrot.lane.b32.xlu0 %v12120_v49, %s14150_s30  ;;  %5527 = vrot.lane.b32.xlu1 %v12116_v5, %s14151_s21 }
 0x7b6   : > { %5529 = vrot.lane.b32.xlu0 %v12120_v49, %s14151_s21  ;;  %5607 = vrot.lane.b32.xlu1 %v12116_v5, %s14152_s18 }
 0x7ba   : > { %5609 = vrot.lane.b32.xlu0 %v12120_v49, %s14152_s18  ;;  %5659 = vrot.lane.b32.xlu1 %v12116_v5, %s14153_s25 }
 0x7be   : > { %5661 = vrot.lane.b32.xlu0 %v12120_v49, %s14153_s25  ;;  %5711 = vrot.lane.b32.xlu1 %v12116_v5, %s14155_s29 }
 0x7c2   : > { %5713 = vrot.lane.b32.xlu0 %v12120_v49, %s14155_s29  ;;  %4963 = vrot.lane.b32.xlu1 %v12186_v28, %s14154_s26 }
 0x7c6   : > { %4965 = vrot.lane.b32.xlu0 %v12192_v51, %s14154_s26  ;;  %5015 = vrot.lane.b32.xlu1 %v12186_v28, %s14156_s11 }
 0x7ca   : > { %5017 = vrot.lane.b32.xlu0 %v12192_v51, %s14156_s11  ;;  %5067 = vrot.lane.b32.xlu1 %v12186_v28, %s14158_s12 }
 0x7ce   : > { %5069 = vrot.lane.b32.xlu0 %v12192_v51, %s14158_s12  ;;  %5119 = vrot.lane.b32.xlu1 %v12186_v28, %s14160_s27 }
 0x7d2   : > { %5121 = vrot.lane.b32.xlu0 %v12192_v51, %s14160_s27  ;;  %5171 = vrot.lane.b32.xlu1 %v12186_v28, %s14162_s2 }
 0x7d6   : > { %5173 = vrot.lane.b32.xlu0 %v12192_v51, %s14162_s2  ;;  %5223 = vrot.lane.b32.xlu1 %v12186_v28, %s14164_s22 }
 0x7da   : > { %5225 = vrot.lane.b32.xlu0 %v12192_v51, %s14164_s22  ;;  %5275 = vrot.lane.b32.xlu1 %v12186_v28, %s14166_s19 }
 0x7de   : > { %5277 = vrot.lane.b32.xlu0 %v12192_v51, %s14166_s19  ;;  %5327 = vrot.lane.b32.xlu1 %v12186_v28, %s14236_s16 }
 0x7e2   : > { %5329 = vrot.lane.b32.xlu0 %v12192_v51, %s14236_s16  ;;  %5379 = vrot.lane.b32.xlu1 %v12186_v28, %s14167_s24 }
 0x7e6   : > { %5381 = vrot.lane.b32.xlu0 %v12192_v51, %s14167_s24  ;;  %5431 = vrot.lane.b32.xlu1 %v12186_v28, %s14168_s13 }
 0x7ea   : > { %5433 = vrot.lane.b32.xlu0 %v12192_v51, %s14168_s13  ;;  %5483 = vrot.lane.b32.xlu1 %v12186_v28, %s14150_s30 }
 0x7ee   : > { %5485 = vrot.lane.b32.xlu0 %v12192_v51, %s14150_s30  ;;  %5535 = vrot.lane.b32.xlu1 %v12186_v28, %s14151_s21 }
 0x7f2   : > { %5537 = vrot.lane.b32.xlu0 %v12192_v51, %s14151_s21  ;;  %5615 = vrot.lane.b32.xlu1 %v12186_v28, %s14152_s18 }
 0x7f6   : > { %5617 = vrot.lane.b32.xlu0 %v12192_v51, %s14152_s18  ;;  %5667 = vrot.lane.b32.xlu1 %v12186_v28, %s14153_s25 }
 0x7f8   : > { %v12252_v23 = vpop.permute.xlu1 %4955 }
 0x7fa   : > { %5669 = vrot.lane.b32.xlu0 %v12192_v51, %s14153_s25  ;;  %5719 = vrot.lane.b32.xlu1 %v12186_v28, %s14155_s29 }
 0x7fc   : > { %v12262_v21 = vpop.permute.xlu0 %4957  ;;  %v12264_v25 = vpop.permute.xlu1 %5007 }
 0x7fe   : > { %5721 = vrot.lane.b32.xlu0 %v12192_v51, %s14155_s29  ;;  %4959 = vrot.lane.b32.xlu1 %v12258_v3, %s14154_s26 }
 0x800   : > { %v12272_v59 = vpop.permute.xlu0 %5009  ;;  %v12274_v7 = vpop.permute.xlu1 %5059 }
 0x802   : > { %4961 = vrot.lane.b32.xlu0 %v12270_v44, %s14154_s26  ;;  %5011 = vrot.lane.b32.xlu1 %v12258_v3, %s14156_s11 }
 0x804   : > { %v12280_v20 = vpop.permute.xlu0 %5061  ;;  %v12282_v18 = vpop.permute.xlu1 %5111 }
 0x806   : > { %5013 = vrot.lane.b32.xlu0 %v12270_v44, %s14156_s11  ;;  %5063 = vrot.lane.b32.xlu1 %v12258_v3, %s14158_s12 }
 0x808   : > { %v12288_v15 = vpop.permute.xlu0 %5113  ;;  %v12290_v33 = vpop.permute.xlu1 %5163 }
 0x80a   : > { %5065 = vrot.lane.b32.xlu0 %v12270_v44, %s14158_s12  ;;  %5115 = vrot.lane.b32.xlu1 %v12258_v3, %s14160_s27 }
 0x80c   : > { %v12296_v52 = vpop.permute.xlu0 %5165  ;;  %v12298_v63 = vpop.permute.xlu1 %5215 }
 0x80e   : > { %5117 = vrot.lane.b32.xlu0 %v12270_v44, %s14160_s27  ;;  %5167 = vrot.lane.b32.xlu1 %v12258_v3, %s14162_s2 }
 0x810   : > { %v12304_v46 = vpop.permute.xlu0 %5217  ;;  %v12306_v35 = vpop.permute.xlu1 %5267 }
 0x812   : > { %5169 = vrot.lane.b32.xlu0 %v12270_v44, %s14162_s2  ;;  %5219 = vrot.lane.b32.xlu1 %v12258_v3, %s14164_s22 }
 0x814   : > { %v12312_v0 = vpop.permute.xlu0 %5269  ;;  %v12314_v24 = vpop.permute.xlu1 %5319 }
 0x815   : > { %14667 = vst [vmem:[#allocation54_spill] sm:$0xff] %v12314_v24 }
 0x816   : > { %5221 = vrot.lane.b32.xlu0 %v12270_v44, %s14164_s22  ;;  %5271 = vrot.lane.b32.xlu1 %v12258_v3, %s14166_s19 }
 0x818   : > { %v12320_v14 = vpop.permute.xlu0 %5321  ;;  %v12322_v56 = vpop.permute.xlu1 %5371 }
 0x819   : > { %14668 = vst [vmem:[#allocation30_spill] sm:$0xff] %v12320_v14  ;;  %14669 = vst [vmem:[#allocation55_spill] sm:$0xff] %v12322_v56 }
 0x81a   : > { %5273 = vrot.lane.b32.xlu0 %v12270_v44, %s14166_s19  ;;  %5323 = vrot.lane.b32.xlu1 %v12258_v3, %s14236_s16 }
 0x81c   : > { %v12328_v32 = vpop.permute.xlu0 %5373  ;;  %v12330_v62 = vpop.permute.xlu1 %5423 }
 0x81d   : > { %14670 = vst [vmem:[#allocation70_spill] sm:$0xff] %v12328_v32  ;;  %14671 = vst [vmem:[#allocation69_spill] sm:$0xff] %v12330_v62 }
 0x81e   : > { %5325 = vrot.lane.b32.xlu0 %v12270_v44, %s14236_s16  ;;  %5375 = vrot.lane.b32.xlu1 %v12258_v3, %s14167_s24 }
 0x820   : > { %v12336_v12 = vpop.permute.xlu0 %5425  ;;  %v12338_v54 = vpop.permute.xlu1 %5475 }
 0x821   : > { %14672 = vst [vmem:[#allocation117_spill] sm:$0xff] %v12336_v12  ;;  %14673 = vst [vmem:[#allocation83_spill] sm:$0xff] %v12338_v54 }
 0x822   : > { %5377 = vrot.lane.b32.xlu0 %v12270_v44, %s14167_s24  ;;  %5427 = vrot.lane.b32.xlu1 %v12258_v3, %s14168_s13 }
 0x824   : > { %v12344_v13 = vpop.permute.xlu0 %5477  ;;  %v12346_v37 = vpop.permute.xlu1 %5527 }
 0x825   : > { %14674 = vst [vmem:[#allocation118_spill] sm:$0xff] %v12344_v13  ;;  %14675 = vst [vmem:[#allocation84_spill] sm:$0xff] %v12346_v37 }
 0x826   : > { %5429 = vrot.lane.b32.xlu0 %v12270_v44, %s14168_s13  ;;  %5479 = vrot.lane.b32.xlu1 %v12258_v3, %s14150_s30 }
 0x828   : > { %v12352_v48 = vpop.permute.xlu0 %5529  ;;  %v12354_v39 = vpop.permute.xlu1 %5607 }
 0x829   : > { %14676 = vst [vmem:[#allocation34_spill] sm:$0xff] %v12352_v48  ;;  %14677 = vst [vmem:[#allocation59_spill] sm:$0xff] %v12354_v39 }
 0x82a   : > { %5481 = vrot.lane.b32.xlu0 %v12270_v44, %s14150_s30  ;;  %5531 = vrot.lane.b32.xlu1 %v12258_v3, %s14151_s21 }
 0x82c   : > { %v12360_v60 = vpop.permute.xlu0 %5609  ;;  %v12362_v58 = vpop.permute.xlu1 %5659 }
 0x82d   : > { %14678 = vst [vmem:[#allocation74_spill] sm:$0xff] %v12360_v60  ;;  %14679 = vst [vmem:[#allocation73_spill] sm:$0xff] %v12362_v58 }
 0x82e   : > { %5533 = vrot.lane.b32.xlu0 %v12270_v44, %s14151_s21  ;;  %5611 = vrot.lane.b32.xlu1 %v12258_v3, %s14152_s18 }
 0x830   : > { %v12368_v53 = vpop.permute.xlu0 %5661  ;;  %v12370_v9 = vpop.permute.xlu1 %5711 }
 0x831   : > { %14680 = vst [vmem:[#allocation58_spill] sm:$0xff] %v12368_v53  ;;  %14681 = vst [vmem:[#allocation33_spill] sm:$0xff] %v12370_v9 }
 0x832   : > { %5613 = vrot.lane.b32.xlu0 %v12270_v44, %s14152_s18  ;;  %5663 = vrot.lane.b32.xlu1 %v12258_v3, %s14153_s25 }
 0x834   : > { %v12379_v34 = vpop.permute.xlu0 %5713  ;;  %v4964_v27 = vpop.permute.xlu1 %4963 }
 0x835   : > { %14682 = vst [vmem:[#allocation119_spill] sm:$0xff] %v12379_v34  ;;  %v4971_v22 = vsel %vm366_vm2, %v12252_v23, %v4964_v27  ;;  %v4975_v61 = vsel %vm366_vm2, %v4964_v27, %v12252_v23 }
 0x836   : > { %5665 = vrot.lane.b32.xlu0 %v12270_v44, %s14153_s25  ;;  %5715 = vrot.lane.b32.xlu1 %v12258_v3, %s14155_s29  ;;  %v4991_v6 = vmul.f32 %v12384_v16, %v4975_v61  ;;  %v4992_v45 = vmul.f32 %v12387_v29, %v4971_v22 }
 0x838   : > { %v4966_v11 = vpop.permute.xlu0 %4965  ;;  %v12401_v26 = vpop.permute.xlu1 %5015 }
 0x839   : > { %v4972_v47 = vsel %vm366_vm2, %v12262_v21, %v4966_v11  ;;  %v4976_v8 = vsel %vm366_vm2, %v4966_v11, %v12262_v21 }
 0x83a   : > { %v4993_v2 = vmul.f32 %v12384_v16, %v4976_v8  ;;  %v4994_v42 = vmul.f32 %v12387_v29, %v4972_v47  ;;  %5717 = vrot.lane.b32.xlu0 %v12270_v44, %s14155_s29  ;;  %4967 = vrot.lane.b32.xlu1 %v12403_v30, %s14154_s26 }
 0x83c   : > { %v7519_v57 = vpack.c.bf16 %v4993_v2, %v4991_v6  ;;  %v12421_v17 = vpop.permute.xlu0 %5017  ;;  %v12423_v55 = vpop.permute.xlu1 %5067  ;;  %v7517_v4 = vpack.c.bf16 %v4994_v42, %v4992_v45 }
 0x83e   : > { %4969 = vrot.lane.b32.xlu0 %v12419_v50, %s14154_s26  ;;  %5763 = vrot.lane.b32.xlu1 %v12116_v5, %s14157_s20 }
 0x83f   : > { %7518 = vmatprep.subr.bf16.mxu1 %v7517_v4 }
 0x840   : > { %7520 = vmatpush1.bf16.msra.mxu1 %v7519_v57  ;;  %v12429_v1 = vpop.permute.xlu0 %5069  ;;  %v12431_v23 = vpop.permute.xlu1 %5119 }
 0x842   : > { %5765 = vrot.lane.b32.xlu0 %v12120_v49, %s14157_s20  ;;  %5019 = vrot.lane.b32.xlu1 %v12403_v30, %s14156_s11 }
 0x844   : > { %v12437_v19 = vpop.permute.xlu0 %5121  ;;  %v12439_v21 = vpop.permute.xlu1 %5171 }
 0x846   : > { %5021 = vrot.lane.b32.xlu0 %v12419_v50, %s14156_s11  ;;  %5071 = vrot.lane.b32.xlu1 %v12403_v30, %s14158_s12 }
 0x848   : > { %v12445_v36 = vpop.permute.xlu0 %5173  ;;  %v12447_v27 = vpop.permute.xlu1 %5223 }
 0x84a   : > { %5773 = vrot.lane.b32.xlu0 %v12192_v51, %s14157_s20  ;;  %5123 = vrot.lane.b32.xlu1 %v12403_v30, %s14160_s27 }
 0x84c   : > { %v12453_v41 = vpop.permute.xlu0 %5225  ;;  %v12455_v22 = vpop.permute.xlu1 %5275 }
 0x84e   : > { %5073 = vrot.lane.b32.xlu0 %v12419_v50, %s14158_s12  ;;  %5175 = vrot.lane.b32.xlu1 %v12403_v30, %s14162_s2  ;;  %s14699_s12 = sld [smem:[#allocation130_spill]] }
 0x850   : > { %v12461_v61 = vpop.permute.xlu0 %5277  ;;  %v12463_v43 = vpop.permute.xlu1 %5327 }
 0x851   : > { %14683 = vst [vmem:[#allocation87_spill] sm:$0xff] %v12463_v43 }
 0x852   : > { %5769 = vrot.lane.b32.xlu0 %v12270_v44, %s14157_s20  ;;  %5227 = vrot.lane.b32.xlu1 %v12403_v30, %s14164_s22 }
 0x854   : > { %v12469_v11 = vpop.permute.xlu0 %5329  ;;  %v12471_v47 = vpop.permute.xlu1 %5379 }
 0x855   : > { %14684 = vst [vmem:[#allocation121_spill] sm:$0xff] %v12469_v11  ;;  %14685 = vst [vmem:[#allocation88_spill] sm:$0xff] %v12471_v47 }
 0x856   : > { %5125 = vrot.lane.b32.xlu0 %v12419_v50, %s14160_s27  ;;  %5279 = vrot.lane.b32.xlu1 %v12403_v30, %s14166_s19 }
 0x858   : > { %v12477_v8 = vpop.permute.xlu0 %5381  ;;  %v12479_v6 = vpop.permute.xlu1 %5431 }
 0x859   : > { %14686 = vst [vmem:[#allocation78_spill] sm:$0xff] %v12477_v8  ;;  %14687 = vst [vmem:[#allocation41_spill] sm:$0xff] %v12479_v6 }
 0x85a   : > { %5817 = vrot.lane.b32.xlu0 %v12120_v49, %s14159_s28  ;;  %5331 = vrot.lane.b32.xlu1 %v12403_v30, %s14236_s16 }
 0x85c   : > { %v12485_v45 = vpop.permute.xlu0 %5433  ;;  %v12487_v2 = vpop.permute.xlu1 %5483 }
 0x85d   : > { %14688 = vst [vmem:[#allocation77_spill] sm:$0xff] %v12485_v45  ;;  %14689 = vst [vmem:[#allocation62_spill] sm:$0xff] %v12487_v2 }
 0x85e   : > { %5177 = vrot.lane.b32.xlu0 %v12419_v50, %s14162_s2  ;;  %5383 = vrot.lane.b32.xlu1 %v12403_v30, %s14167_s24  ;;  %s7887_s2 = scalar_lea.vmem %s7886_s9, 2048 }
 0x860   : > { %v12493_v42 = vpop.permute.xlu0 %5485  ;;  %v12495_v57 = vpop.permute.xlu1 %5535 }
 0x861   : > { %14690 = vst [vmem:[#allocation37_spill] sm:$0xff] %v12493_v42  ;;  %14691 = vst [vmem:[#allocation63_spill] sm:$0xff] %v12495_v57 }
 0x862   : > { %5825 = vrot.lane.b32.xlu0 %v12192_v51, %s14159_s28  ;;  %5435 = vrot.lane.b32.xlu1 %v12403_v30, %s14168_s13 }
 0x864   : > { %v12501_v4 = vpop.permute.xlu0 %5537  ;;  %v12503_v31 = vpop.permute.xlu1 %5615 }
 0x865   : > { %14692 = vst [vmem:[#allocation38_spill] sm:$0xff] %v12501_v4  ;;  %14693 = vst [vmem:[#allocation107_spill] sm:$0xff] %v12503_v31 }
 0x866   : > { %5229 = vrot.lane.b32.xlu0 %v12419_v50, %s14164_s22  ;;  %5487 = vrot.lane.b32.xlu1 %v12403_v30, %s14150_s30 }
 0x868   : > { %v12509_v34 = vpop.permute.xlu0 %5617  ;;  %v12511_v9 = vpop.permute.xlu1 %5667 }
 0x869   : > { %14694 = vst [vmem:[#allocation95_spill] sm:$0xff] %v12509_v34  ;;  %14695 = vst [vmem:[#allocation106_spill] sm:$0xff] %v12511_v9  ;;  %v6232_v9 = vld [vmem:[%s14699_s12 + $0x8] sm:$0xff] }
 0x86a   : > { %5821 = vrot.lane.b32.xlu0 %v12270_v44, %s14159_s28  ;;  %5539 = vrot.lane.b32.xlu1 %v12403_v30, %s14151_s21 }
 0x86b   : > { %6559 = vmatprep.mubr.f32.mxu1 %v6232_v9 }
 0x86c   : > { %v12517_v53 = vpop.permute.xlu0 %5669  ;;  %v12519_v58 = vpop.permute.xlu1 %5719 }
 0x86d   : > { %14696 = vst [vmem:[#allocation100_spill] sm:$0xff] %v12517_v53  ;;  %14697 = vst [vmem:[#allocation122_spill] sm:$0xff] %v12519_v58 }
 0x86e   : > { %5281 = vrot.lane.b32.xlu0 %v12419_v50, %s14166_s19  ;;  %5619 = vrot.lane.b32.xlu1 %v12403_v30, %s14152_s18 }
 0x870   : > { %v12525_v31 = vpop.permute.xlu0 %5721  ;;  %v12527_v39 = vpop.permute.xlu1 %4959 }
 0x871   : > { %14698 = vst [vmem:[#allocation123_spill] sm:$0xff] %v12525_v31 }
 0x872   : > { %5869 = vrot.lane.b32.xlu0 %v12120_v49, %s14161_s0  ;;  %5671 = vrot.lane.b32.xlu1 %v12403_v30, %s14153_s25 }
 0x874   : > { %v12536_v58 = vpop.permute.xlu0 %4961  ;;  %v12538_v53 = vpop.permute.xlu1 %5011 }
 0x876   : > { %5333 = vrot.lane.b32.xlu0 %v12419_v50, %s14236_s16  ;;  %5723 = vrot.lane.b32.xlu1 %v12403_v30, %s14155_s29 }
 0x878   : > { %v12544_v31 = vpop.permute.xlu0 %5013  ;;  %v12546_v34 = vpop.permute.xlu1 %5063 }
 0x87a   : > { %5877 = vrot.lane.b32.xlu0 %v12192_v51, %s14161_s0  ;;  %5771 = vrot.lane.b32.xlu1 %v12186_v28, %s14157_s20 }
 0x87c   : > { %v12552_v9 = vpop.permute.xlu0 %5065  ;;  %v12554_v60 = vpop.permute.xlu1 %5115 }
 0x87e   : > { %5385 = vrot.lane.b32.xlu0 %v12419_v50, %s14167_s24  ;;  %5767 = vrot.lane.b32.xlu1 %v12258_v3, %s14157_s20  ;;  %s14778_s24 = smov 94  }
 0x880   : > { %v12560_v48 = vpop.permute.xlu0 %5117  ;;  %v12562_v4 = vpop.permute.xlu1 %5167 }
 0x882   : > { %5873 = vrot.lane.b32.xlu0 %v12270_v44, %s14161_s0  ;;  %5775 = vrot.lane.b32.xlu1 %v12403_v30, %s14157_s20 }
 0x884   : > { %v12568_v37 = vpop.permute.xlu0 %5169  ;;  %v12570_v57 = vpop.permute.xlu1 %5219 }
 0x886   : > { %5437 = vrot.lane.b32.xlu0 %v12419_v50, %s14168_s13  ;;  %5815 = vrot.lane.b32.xlu1 %v12116_v5, %s14159_s28  ;;  %s14872_s13 = sld [smem:[#allocation7_spill]] }
 0x888   : > { %v12576_v13 = vpop.permute.xlu0 %5221  ;;  %v12578_v42 = vpop.permute.xlu1 %5271 }
 0x889   : > { %14700 = vst [vmem:[#allocation82_spill] sm:$0xff] %v12578_v42 }
 0x88a   : > { %5921 = vrot.lane.b32.xlu0 %v12120_v49, %s14163_s3  ;;  %5823 = vrot.lane.b32.xlu1 %v12186_v28, %s14159_s28 }
 0x88c   : > { %v12584_v54 = vpop.permute.xlu0 %5273  ;;  %v12586_v2 = vpop.permute.xlu1 %5323 }
 0x88d   : > { %14701 = vst [vmem:[#allocation18_spill] sm:$0xff] %v12584_v54  ;;  %14702 = vst [vmem:[#allocation27_spill] sm:$0xff] %v12586_v2  ;;  %v5028_v2 = vsel %vm389_vm1, %v12421_v17, %v12272_v59 }
 0x88e   : > { %5489 = vrot.lane.b32.xlu0 %v12419_v50, %s14150_s30  ;;  %5819 = vrot.lane.b32.xlu1 %v12258_v3, %s14159_s28 }
 0x890   : > { %v12592_v12 = vpop.permute.xlu0 %5325  ;;  %v12594_v45 = vpop.permute.xlu1 %5375 }
 0x891   : > { %14703 = vst [vmem:[#allocation52_spill] sm:$0xff] %v12592_v12  ;;  %14704 = vst [vmem:[#allocation81_spill] sm:$0xff] %v12594_v45 }
 0x892   : > { %5929 = vrot.lane.b32.xlu0 %v12192_v51, %s14163_s3  ;;  %5827 = vrot.lane.b32.xlu1 %v12403_v30, %s14159_s28 }
 0x894   : > { %v12600_v62 = vpop.permute.xlu0 %5377  ;;  %v12602_v6 = vpop.permute.xlu1 %5427 }
 0x895   : > { %14705 = vst [vmem:[#allocation28_spill] sm:$0xff] %v12600_v62  ;;  %14706 = vst [vmem:[#allocation53_spill] sm:$0xff] %v12602_v6 }
 0x896   : > { %5541 = vrot.lane.b32.xlu0 %v12419_v50, %s14151_s21  ;;  %5867 = vrot.lane.b32.xlu1 %v12116_v5, %s14161_s0 }
 0x898   : > { %v12608_v32 = vpop.permute.xlu0 %5429  ;;  %v12610_v12 = vpop.permute.xlu1 %5479 }
 0x899   : > { %14707 = vst [vmem:[#allocation114_spill] sm:$0xff] %v12608_v32  ;;  %14708 = vst [vmem:[#allocation110_spill] sm:$0xff] %v12610_v12 }
 0x89a   : > { %5925 = vrot.lane.b32.xlu0 %v12270_v44, %s14163_s3  ;;  %5875 = vrot.lane.b32.xlu1 %v12186_v28, %s14161_s0 }
 0x89c   : > { %v12616_v45 = vpop.permute.xlu0 %5481  ;;  %v12618_v62 = vpop.permute.xlu1 %5531 }
 0x89d   : > { %14709 = vst [vmem:[#allocation120_spill] sm:$0xff] %v12616_v45  ;;  %14710 = vst [vmem:[#allocation116_spill] sm:$0xff] %v12618_v62 }
 0x89e   : > { %5973 = vrot.lane.b32.xlu0 %v12120_v49, %s14165_s15  ;;  %5871 = vrot.lane.b32.xlu1 %v12258_v3, %s14161_s0 }
 0x8a0   : > { %v12624_v6 = vpop.permute.xlu0 %5533  ;;  %v12626_v32 = vpop.permute.xlu1 %5611 }
 0x8a1   : > { %14711 = vst [vmem:[#allocation86_spill] sm:$0xff] %v12624_v6  ;;  %14712 = vst [vmem:[#allocation115_spill] sm:$0xff] %v12626_v32 }
 0x8a2   : > { %5981 = vrot.lane.b32.xlu0 %v12192_v51, %s14165_s15  ;;  %5879 = vrot.lane.b32.xlu1 %v12403_v30, %s14161_s0 }
 0x8a4   : > { %v12632_v12 = vpop.permute.xlu0 %5613  ;;  %v12634_v45 = vpop.permute.xlu1 %5663 }
 0x8a5   : > { %14713 = vst [vmem:[#allocation85_spill] sm:$0xff] %v12632_v12  ;;  %14714 = vst [vmem:[#allocation15_spill] sm:$0xff] %v12634_v45  ;;  %v7034_v45 = vld [vmem:[%s13813_s1 + $0x1] ss:$8 sm:$0x3] }
 0x8a6   : > { %5621 = vrot.lane.b32.xlu0 %v12419_v50, %s14152_s18  ;;  %5919 = vrot.lane.b32.xlu1 %v12116_v5, %s14163_s3 }
 0x8a8   : > { %v12640_v62 = vpop.permute.xlu0 %5665  ;;  %v12642_v6 = vpop.permute.xlu1 %5715 }
 0x8a9   : > { %14715 = vst [vmem:[#allocation16_spill] sm:$0xff] %v12640_v62  ;;  %14716 = vst [vmem:[#allocation32_spill] sm:$0xff] %v12642_v6  ;;  %v5024_v62 = vsel %vm389_vm1, %v12272_v59, %v12421_v17  ;;  %v5040_v6 = vrot.slane %v7034_v45, %v14438_v40  ;;  %v5036_v59 = vrot.slane %v7034_v45, %v14436_v38 }
 0x8aa   : > { %5977 = vrot.lane.b32.xlu0 %v12270_v44, %s14165_s15  ;;  %5927 = vrot.lane.b32.xlu1 %v12186_v28, %s14163_s3 }
 0x8ab   : > { %v5046_v54 = vmul.f32 %v5040_v6, %v5024_v62  ;;  %v5027_v62 = vsel %vm389_vm1, %v12401_v26, %v12264_v25 }
 0x8ac   : > { %v12651_v12 = vpop.permute.xlu0 %5717  ;;  %v4968_v32 = vpop.permute.xlu1 %4967  ;;  %v5043_v45 = vmul.f32 %v5036_v59, %v5027_v62 }
 0x8ad   : > { %14717 = vst [vmem:[#allocation57_spill] sm:$0xff] %v12651_v12  ;;  %v4973_v8 = vsel %vm366_vm2, %v12527_v39, %v4968_v32  ;;  %v4977_v56 = vsel %vm366_vm2, %v4968_v32, %v12527_v39  ;;  %v5023_v12 = vsel %vm389_vm1, %v12264_v25, %v12401_v26 }
 0x8ae   : > { %5673 = vrot.lane.b32.xlu0 %v12419_v50, %s14153_s25  ;;  %5923 = vrot.lane.b32.xlu1 %v12258_v3, %s14163_s3  ;;  %v4995_v11 = vmul.f32 %v12384_v16, %v4977_v56  ;;  %v4996_v24 = vmul.f32 %v12387_v29, %v4973_v8  ;;  %v5044_v56 = vmul.f32 %v5040_v6, %v5023_v12 }
 0x8b0   : > { %v4970_v47 = vpop.permute.xlu0 %4969  ;;  %v12682_v39 = vpop.permute.xlu1 %5763  ;;  %v7525_v8 = vpack.c.bf16 %v5046_v54, %v5044_v56  ;;  %v5075_v54 = vsel %vm413_vm3, %v12274_v7, %v12423_v55 }
 0x8b1   : > { %v4974_v14 = vsel %vm366_vm2, %v12536_v58, %v4970_v47  ;;  %v4978_v32 = vsel %vm366_vm2, %v4970_v47, %v12536_v58  ;;  %v5045_v47 = vmul.f32 %v5036_v59, %v5028_v2  ;;  %v5080_v2 = vsel %vm413_vm3, %v12429_v1, %v12280_v20 }
 0x8b2   : > { %v4997_v43 = vmul.f32 %v12384_v16, %v4978_v32  ;;  %v4998_v42 = vmul.f32 %v12387_v29, %v4974_v14  ;;  %6025 = vrot.lane.b32.xlu0 %v12120_v49, %s14530_s8  ;;  %5931 = vrot.lane.b32.xlu1 %v12403_v30, %s14163_s3  ;;  %v7035_v14 = vld [vmem:[%s13813_s1 + $0x2] ss:$8 sm:$0x3] }
 0x8b3   : > { %v5088_v12 = vrot.slane %v7035_v14, %v14436_v38  ;;  %v5092_v26 = vrot.slane %v7035_v14, %v14438_v40 }
 0x8b4   : > { %v7523_v58 = vpack.c.bf16 %v4997_v43, %v4995_v11  ;;  %v12697_v17 = vpop.permute.xlu0 %5765  ;;  %v7521_v16 = vpack.c.bf16 %v4998_v42, %v4996_v24  ;;  %v5020_v29 = vpop.permute.xlu1 %5019  ;;  %v5076_v43 = vsel %vm413_vm3, %v12280_v20, %v12429_v1  ;;  %v5079_v20 = vsel %vm413_vm3, %v12423_v55, %v12274_v7 }
 0x8b5   : > { %v5025_v25 = vsel %vm389_vm1, %v12538_v53, %v5020_v29  ;;  %v5029_v24 = vsel %vm389_vm1, %v5020_v29, %v12538_v53  ;;  %v7527_v53 = vpack.c.bf16 %v5045_v47, %v5043_v45  ;;  %v5098_v1 = vmul.f32 %v5092_v26, %v5076_v43 }
 0x8b6   : > { %5725 = vrot.lane.b32.xlu0 %v12419_v50, %s14155_s29  ;;  %7522 = vmatprep.subr.bf16.mxu1 %v7521_v16  ;;  %v5047_v56 = vmul.f32 %v5036_v59, %v5029_v24  ;;  %s14874_s29 = sld [smem:[#allocation10_spill]] }
 0x8b7   : > { %5971 = vrot.lane.b32.xlu1 %v12116_v5, %s14165_s15  ;;  %7524 = vmatpush1.bf16.msra.mxu1 %v7523_v58  ;;  %v5048_v58 = vmul.f32 %v5040_v6, %v5025_v25  ;;  %v5095_v25 = vmul.f32 %v5088_v12, %v5079_v20 }
 0x8b8   : > { %v5022_v11 = vpop.permute.xlu0 %5021  ;;  %7526 = vmatprep.subr.bf16.mxu1 %v7525_v8  ;;  %v5072_v62 = vpop.permute.xlu1 %5071  ;;  %v5096_v8 = vmul.f32 %v5092_v26, %v5075_v54 }
 0x8b9   : > { %v5026_v42 = vsel %vm389_vm1, %v12544_v31, %v5022_v11  ;;  %v5030_v32 = vsel %vm389_vm1, %v5022_v11, %v12544_v31  ;;  %v5077_v7 = vsel %vm413_vm3, %v12546_v34, %v5072_v62  ;;  %v5081_v55 = vsel %vm413_vm3, %v5072_v62, %v12546_v34 }
 0x8ba   : > { %v5049_v16 = vmul.f32 %v5036_v59, %v5030_v32  ;;  %v5050_v14 = vmul.f32 %v5040_v6, %v5026_v42  ;;  %6033 = vrot.lane.b32.xlu0 %v12192_v51, %s14530_s8  ;;  %v5097_v59 = vmul.f32 %v5088_v12, %v5080_v2  ;;  %v7036_v6 = vld [vmem:[%s13813_s1 + $0x3] ss:$8 sm:$0x3]  ;;  %v7533_v24 = vpack.c.bf16 %v5098_v1, %v5096_v8 }
 0x8bb   : > { %5979 = vrot.lane.b32.xlu1 %v12186_v28, %s14165_s15  ;;  %7528 = vmatpush1.bf16.msra.mxu1 %v7527_v53  ;;  %v5144_v54 = vrot.slane %v7036_v6, %v14438_v40  ;;  %vm14718_vm1 = vcmp.lt.s32.totalorder %v8197_v10, 31  ;;  %v5140_v20 = vrot.slane %v7036_v6, %v14436_v38 }
 0x8bc   : > { %v7531_v47 = vpack.c.bf16 %v5049_v16, %v5047_v56  ;;  %v12740_v31 = vpop.permute.xlu0 %5773  ;;  %v7529_v29 = vpack.c.bf16 %v5050_v14, %v5048_v58  ;;  %v5124_v45 = vpop.permute.xlu1 %5123  ;;  %v5127_v43 = vsel %vm14718_vm1, %v12282_v18, %v12431_v23  ;;  %vm14719_vm2 = vmmov %vm14718_vm1  ;;  %v7535_v34 = vpack.c.bf16 %v5097_v59, %v5095_v25 }
 0x8bd   : > { %v5128_v11 = vsel %vm14719_vm2, %v12288_v15, %v12437_v19  ;;  %vm14720_vm0 = vmmov %vm14718_vm1  ;;  %v5099_v56 = vmul.f32 %v5088_v12, %v5081_v55  ;;  %v5100_v58 = vmul.f32 %v5092_v26, %v5077_v7  ;;  %v5179_v7 = vsel %vm14724_vm12, %v12290_v33, %v12439_v21 }
 0x8be   : > { %5777 = vrot.lane.b32.xlu0 %v12419_v50, %s14157_s20  ;;  %7530 = vmatprep.subr.bf16.mxu1 %v7529_v29  ;;  %v5132_v2 = vsel %vm14720_vm0, %v12437_v19, %v12288_v15  ;;  %v5150_v15 = vmul.f32 %v5144_v54, %v5128_v11  ;;  %vm14721_vm7 = vmmov %vm14720_vm0  ;;  %v7037_v29 = vld [vmem:[%s13813_s1 + $0x4] ss:$8 sm:$0x3] }
 0x8bf   : > { %5975 = vrot.lane.b32.xlu1 %v12258_v3, %s14165_s15  ;;  %7532 = vmatpush1.bf16.msra.mxu1 %v7531_v47  ;;  %v5131_v19 = vsel %vm14721_vm7, %v12431_v23, %v12282_v18  ;;  %v5149_v47 = vmul.f32 %v5140_v20, %v5132_v2  ;;  %vm14723_vm14 = vmmov %vm14720_vm0  ;;  %v5196_v25 = vrot.slane %v7037_v29, %v14438_v40 }
 0x8c0   : > { %v5074_v53 = vpop.permute.xlu0 %5073  ;;  %7534 = vmatprep.subr.bf16.mxu1 %v7533_v24  ;;  %v5176_v62 = vpop.permute.xlu1 %5175  ;;  %v5147_v59 = vmul.f32 %v5140_v20, %v5131_v19  ;;  %v5133_v23 = vsel %vm14723_vm14, %v5124_v45, %v12554_v60  ;;  %vm14725_vm1 = vmmov %vm14724_vm12 }
 0x8c1   : > { %v5078_v42 = vsel %vm413_vm3, %v12552_v9, %v5074_v53  ;;  %v5082_v32 = vsel %vm413_vm3, %v5074_v53, %v12552_v9  ;;  %vm14722_vm3 = vmmov %vm14720_vm0  ;;  %v5180_v55 = vsel %vm14725_vm1, %v12296_v52, %v12445_v36 }
 0x8c2   : > { %v5101_v16 = vmul.f32 %v5088_v12, %v5082_v32  ;;  %v5102_v14 = vmul.f32 %v5092_v26, %v5078_v42  ;;  %6029 = vrot.lane.b32.xlu0 %v12270_v44, %s14530_s8  ;;  %v5148_v26 = vmul.f32 %v5144_v54, %v5127_v43  ;;  %v5129_v18 = vsel %vm14722_vm3, %v12554_v60, %v5124_v45  ;;  %vm14726_vm2 = vmmov %vm14725_vm1 }
 0x8c3   : > { %5983 = vrot.lane.b32.xlu1 %v12403_v30, %s14165_s15  ;;  %7536 = vmatpush1.bf16.msra.mxu1 %v7535_v34  ;;  %v7543_v43 = vpack.c.bf16 %v5149_v47, %v5147_v59  ;;  %v5184_v60 = vsel %vm14726_vm2, %v12445_v36, %v12296_v52  ;;  %vm14727_vm7 = vmmov %vm14720_vm0  ;;  %v5151_v34 = vmul.f32 %v5140_v20, %v5133_v23 }
 0x8c4   : > { %v7539_v9 = vpack.c.bf16 %v5101_v16, %v5099_v56  ;;  %v12783_v1 = vpop.permute.xlu0 %5769  ;;  %v7537_v12 = vpack.c.bf16 %v5102_v14, %v5100_v58  ;;  %v12788_v8 = vpop.permute.xlu1 %5227  ;;  %v7541_v6 = vpack.c.bf16 %v5150_v15, %v5148_v26  ;;  %v5152_v2 = vmul.f32 %v5144_v54, %v5129_v18  ;;  %vm14728_vm3 = vmmov %vm14725_vm1 }
 0x8c5   : > { %v5192_v52 = vrot.slane %v7037_v29, %v14436_v38  ;;  %v5202_v36 = vmul.f32 %v5196_v25, %v5180_v55  ;;  %v5200_v14 = vmul.f32 %v5196_v25, %v5179_v7  ;;  %vm14729_vm14 = vmmov %vm14725_vm1 }
 0x8c6   : > { %5829 = vrot.lane.b32.xlu0 %v12419_v50, %s14159_s28  ;;  %7538 = vmatprep.subr.bf16.mxu1 %v7537_v12  ;;  %vm14730_vm12 = vmmov %vm14725_vm1  ;;  %vm14731_vm1 = vcmp.lt.s32.totalorder %v8197_v10, 18  ;;  %s350_s28 = sand.u32 1, %s14872_s13  }
 0x8c7   : > { %6023 = vrot.lane.b32.xlu1 %v12116_v5, %s14530_s8  ;;  %7540 = vmatpush1.bf16.msra.mxu1 %v7539_v9  ;;  %v7549_v9 = vpack.c.bf16 %v5202_v36, %v5200_v14  ;;  %v5231_v47 = vsel %vm14731_vm1, %v12298_v63, %v12447_v27  ;;  %vm14732_vm2 = vmmov %vm14731_vm1  ;;  %s6947_s26 = sshll.u32 %s350_s28, 6  ;;  %s13770_s4 = scalar_lea.sflag [#allocation4], %s350_s28 }
 0x8c8   : > { %v5126_v24 = vpop.permute.xlu0 %5125  ;;  %7542 = vmatprep.subr.bf16.mxu1 %v7541_v6  ;;  %v12819_v53 = vpop.permute.xlu1 %5279  ;;  %v5232_v29 = vsel %vm14732_vm2, %v12304_v46, %v12453_v41 }
 0x8c9   : > { %v5130_v45 = vsel %vm14720_vm0, %v12560_v48, %v5126_v24  ;;  %v5134_v11 = vsel %vm14727_vm7, %v5126_v24, %v12560_v48  ;;  %v5183_v48 = vsel %vm14728_vm3, %v12439_v21, %v12290_v33  ;;  %v5181_v33 = vsel %vm14729_vm14, %v12562_v4, %v5176_v62  ;;  %vm14733_vm0 = vmmov %vm14731_vm1 }
 0x8ca   : > { %v5153_v42 = vmul.f32 %v5140_v20, %v5134_v11  ;;  %v5154_v32 = vmul.f32 %v5144_v54, %v5130_v45  ;;  %6077 = vrot.lane.b32.xlu0 %v12120_v49, %s14540_s17  ;;  %v5201_v54 = vmul.f32 %v5192_v52, %v5184_v60  ;;  %v7038_v20 = vld [vmem:[%s13813_s1 + $0x5] ss:$8 sm:$0x3]  ;;  %v5199_v19 = vmul.f32 %v5192_v52, %v5183_v48  ;;  %vm14734_vm7 = vmmov %vm14728_vm3 }
 0x8cb   : > { %6031 = vrot.lane.b32.xlu1 %v12186_v28, %s14530_s8  ;;  %7544 = vmatpush1.bf16.msra.mxu1 %v7543_v43  ;;  %v5185_v21 = vsel %vm14730_vm12, %v5176_v62, %v12562_v4  ;;  %v5244_v12 = vrot.slane %v7038_v20, %v14436_v38  ;;  %v5248_v26 = vrot.slane %v7038_v20, %v14438_v40  ;;  %vm14735_vm14 = vmmov %vm14733_vm0  ;;  %vm14736_vm12 = vcmp.lt.s32.totalorder %v8197_v10, 112 }
 0x8cc   : > { %v7547_v56 = vpack.c.bf16 %v5153_v42, %v5151_v34  ;;  %v5818_v58 = vpop.permute.xlu0 %5817  ;;  %v7545_v16 = vpack.c.bf16 %v5154_v32, %v5152_v2  ;;  %v12833_v15 = vpop.permute.xlu1 %5331  ;;  %v7551_v62 = vpack.c.bf16 %v5201_v54, %v5199_v19  ;;  %v5236_v59 = vsel %vm14733_vm0, %v12453_v41, %v12304_v46  ;;  %vm14737_vm1 = vmmov %vm14736_vm12 }
 0x8cd   : > { %v5203_v7 = vmul.f32 %v5192_v52, %v5185_v21  ;;  %v5204_v55 = vmul.f32 %v5196_v25, %v5181_v33  ;;  %v5235_v46 = vsel %vm14735_vm14, %v12447_v27, %v12298_v63  ;;  %v5254_v41 = vmul.f32 %v5248_v26, %v5232_v29  ;;  %vm14738_vm2 = vmmov %vm14733_vm0 }
 0x8ce   : > { %5881 = vrot.lane.b32.xlu0 %v12419_v50, %s14161_s0  ;;  %7546 = vmatprep.subr.bf16.mxu1 %v7545_v16  ;;  %v5252_v11 = vmul.f32 %v5248_v26, %v5231_v47  ;;  %v5253_v34 = vmul.f32 %v5244_v12, %v5236_v59  ;;  %v5251_v42 = vmul.f32 %v5244_v12, %v5235_v46  ;;  %s13749_s0 = scalar_lea.vmem [#allocation3], %s6947_s26 }
 0x8cf   : > { %6027 = vrot.lane.b32.xlu1 %v12258_v3, %s14530_s8  ;;  %7548 = vmatpush1.bf16.msra.mxu1 %v7547_v56  ;;  %v5233_v32 = vsel %vm14738_vm2, %v12570_v57, %v12788_v8 }
 0x8d0   : > { %v5178_v4 = vpop.permute.xlu0 %5177  ;;  %7550 = vmatprep.subr.bf16.mxu1 %v7549_v9  ;;  %v12865_v6 = vpop.permute.xlu1 %5383  ;;  %v7557_v36 = vpack.c.bf16 %v5254_v41, %v5252_v11  ;;  %v5256_v33 = vmul.f32 %v5248_v26, %v5233_v32  ;;  %v14751_v41 = vld [vmem:[#allocation121_spill] sm:$0xff] }
 0x8d1   : > { %v5182_v18 = vsel %vm14734_vm7, %v12568_v37, %v5178_v4  ;;  %v5186_v23 = vsel %vm14728_vm3, %v5178_v4, %v12568_v37  ;;  %vm14739_vm7 = vcmp.lt.s32.totalorder %v8197_v10, 17 }
 0x8d2   : > { %v5205_v24 = vmul.f32 %v5192_v52, %v5186_v23  ;;  %v5206_v43 = vmul.f32 %v5196_v25, %v5182_v18  ;;  %6085 = vrot.lane.b32.xlu0 %v12192_v51, %s14540_s17  ;;  %v7039_v25 = vld [vmem:[%s13813_s1 + $0x6] ss:$8 sm:$0x3]  ;;  %v5237_v52 = vsel %vm14733_vm0, %v12788_v8, %v12570_v57  ;;  %v5283_v56 = vsel %vm14739_vm7, %v12306_v35, %v12455_v22  ;;  %vm14740_vm3 = vmmov %vm14739_vm7 }
 0x8d3   : > { %6035 = vrot.lane.b32.xlu1 %v12403_v30, %s14530_s8  ;;  %7552 = vmatpush1.bf16.msra.mxu1 %v7551_v62  ;;  %v5300_v48 = vrot.slane %v7039_v25, %v14438_v40  ;;  %v7559_v57 = vpack.c.bf16 %v5253_v34, %v5251_v42  ;;  %vm14741_vm14 = vmmov %vm14740_vm3  ;;  %v5255_v19 = vmul.f32 %v5244_v12, %v5237_v52  ;;  %v7040_v62 = vld [vmem:[%s13813_s1 + $0x7] ss:$8 sm:$0x3]  ;;  %v14755_v34 = vld [vmem:[#allocation18_spill] sm:$0xff] }
 0x8d4   : > { %v7555_v37 = vpack.c.bf16 %v5205_v24, %v5203_v7  ;;  %v5826_v60 = vpop.permute.xlu0 %5825  ;;  %v7553_v45 = vpack.c.bf16 %v5206_v43, %v5204_v55  ;;  %v12886_v27 = vpop.permute.xlu1 %5435  ;;  %v5288_v8 = vsel %vm14741_vm14, %v12461_v61, %v12312_v0  ;;  %vm14744_vm2 = vmmov %vm14740_vm3  ;;  %v5352_v55 = vrot.slane %v7040_v62, %v14438_v40  ;;  %v14748_v24 = vld [vmem:[#allocation87_spill] sm:$0xff]  ;;  %v14749_v43 = vld [vmem:[#allocation54_spill] sm:$0xff] }
 0x8d5   : > { %v12880_v2 = vsel %vm14736_vm12, %v5818_v58, %v5826_v60  ;;  %v12884_v63 = vsel %vm14737_vm1, %v5826_v60, %v5818_v58  ;;  %v5284_v58 = vsel %vm14740_vm3, %v12312_v0, %v12461_v61  ;;  %vm14742_vm12 = vmmov %vm14733_vm0  ;;  %v5296_v0 = vrot.slane %v7039_v25, %v14436_v38 }
 0x8d6   : > { %5933 = vrot.lane.b32.xlu0 %v12419_v50, %s14163_s3  ;;  %7554 = vmatprep.subr.bf16.mxu1 %v7553_v45  ;;  %vm14743_vm1 = vmmov %vm14733_vm0  ;;  %v5306_v61 = vmul.f32 %v5300_v48, %v5284_v58  ;;  %vm14750_vm3 = vcmp.lt.s32.totalorder %v8197_v10, 16  ;;  %s7068_s3 = sshll.u32 %s14874_s29, 10 }
 0x8d7   : > { %6075 = vrot.lane.b32.xlu1 %v12116_v5, %s14540_s17  ;;  %7556 = vmatpush1.bf16.msra.mxu1 %v7555_v37  ;;  %v5305_v4 = vmul.f32 %v5296_v0, %v5288_v8  ;;  %vm14746_vm0 = vmmov %vm14744_vm2  ;;  %v5335_v46 = vsel %vm14750_vm3, %v14749_v43, %v14748_v24  ;;  %v14752_v37 = vld [vmem:[#allocation30_spill] sm:$0xff] }
 0x8d8   : > { %v5230_v16 = vpop.permute.xlu0 %5229  ;;  %7558 = vmatprep.subr.bf16.mxu1 %v7557_v36  ;;  %v12919_v20 = vpop.permute.xlu1 %5487  ;;  %vm14747_vm7 = vmmov %vm14746_vm0 }
 0x8d9   : > { %v5234_v14 = vsel %vm14742_vm12, %v12576_v13, %v5230_v16  ;;  %v5238_v54 = vsel %vm14743_vm1, %v5230_v16, %v12576_v13  ;;  %v5287_v13 = vsel %vm14744_vm2, %v12455_v22, %v12306_v35  ;;  %v14745_v35 = vld [vmem:[#allocation82_spill] sm:$0xff]  ;;  %vm14753_vm14 = vmmov %vm14750_vm3  ;;  %v5348_v16 = vrot.slane %v7040_v62, %v14436_v38  ;;  %v14762_v62 = vld [vmem:[#allocation88_spill] sm:$0xff] }
 0x8da   : > { %v5257_v21 = vmul.f32 %v5244_v12, %v5238_v54  ;;  %v5258_v9 = vmul.f32 %v5248_v26, %v5234_v14  ;;  %6081 = vrot.lane.b32.xlu0 %v12270_v44, %s14540_s17  ;;  %v5304_v26 = vmul.f32 %v5300_v48, %v5283_v56  ;;  %v5303_v18 = vmul.f32 %v5296_v0, %v5287_v13  ;;  %vm14754_vm12 = vmmov %vm14750_vm3 }
 0x8db   : > { %6083 = vrot.lane.b32.xlu1 %v12186_v28, %s14540_s17  ;;  %7560 = vmatpush1.bf16.msra.mxu1 %v7559_v57  ;;  %v5285_v22 = vsel %vm14746_vm0, %v14745_v35, %v12819_v53  ;;  %v5289_v23 = vsel %vm14747_vm7, %v12819_v53, %v14745_v35  ;;  %v5336_v60 = vsel %vm14753_vm14, %v14752_v37, %v14751_v41  ;;  %vm14756_vm1 = vmmov %vm14746_vm0 }
 0x8dc   : > { %v7563_v47 = vpack.c.bf16 %v5257_v21, %v5255_v19  ;;  %v12930_v29 = vpop.permute.xlu0 %5821  ;;  %v7561_v12 = vpack.c.bf16 %v5258_v9, %v5256_v33  ;;  %v12935_v59 = vpop.permute.xlu1 %5539  ;;  %v7565_v7 = vpack.c.bf16 %v5306_v61, %v5304_v26  ;;  %v7567_v11 = vpack.c.bf16 %v5305_v4, %v5303_v18  ;;  %vm14757_vm2 = vmmov %vm14746_vm0  ;;  %v7041_v21 = vld [vmem:[%s13813_s1 + $0x10] ss:$8 sm:$0x3]  ;;  %v14759_v61 = vld [vmem:[#allocation27_spill] sm:$0xff] }
 0x8dd   : > { %v5340_v53 = vsel %vm14754_vm12, %v14751_v41, %v14752_v37  ;;  %v5307_v52 = vmul.f32 %v5296_v0, %v5289_v23  ;;  %v5308_v36 = vmul.f32 %v5300_v48, %v5285_v22  ;;  %v5358_v57 = vmul.f32 %v5352_v55, %v5336_v60  ;;  %vm14758_vm0 = vmmov %vm14750_vm3  ;;  %v14763_v18 = vld [vmem:[#allocation55_spill] sm:$0xff]  ;;  %v14764_v22 = vld [vmem:[#allocation78_spill] sm:$0xff] }
 0x8de   : > { %5985 = vrot.lane.b32.xlu0 %v12419_v50, %s14165_s15  ;;  %7562 = vmatprep.subr.bf16.mxu1 %v7561_v12  ;;  %v5339_v8 = vsel %vm14758_vm0, %v14748_v24, %v14749_v43  ;;  %v5356_v33 = vmul.f32 %v5352_v55, %v5335_v46  ;;  %vm14760_vm7 = vmmov %vm14758_vm0  ;;  %v5400_v26 = vrot.slane %v7041_v21, %v14436_v38  ;;  %v14765_v23 = vld [vmem:[#allocation70_spill] sm:$0xff]  ;;  %v14766_v46 = vld [vmem:[#allocation52_spill] sm:$0xff]  ;;  %s14794_s15 = sld [smem:[#allocation131_spill]] }
 0x8df   : > { %6079 = vrot.lane.b32.xlu1 %v12258_v3, %s14540_s17  ;;  %7564 = vmatpush1.bf16.msra.mxu1 %v7563_v47  ;;  %v5337_v13 = vsel %vm14760_vm7, %v14759_v61, %v12833_v15  ;;  %vm14761_vm3 = vmmov %vm14758_vm0  ;;  %v5404_v4 = vrot.slane %v7041_v21, %v14438_v40  ;;  %v5387_v35 = vsel %vm557_vm9, %v14763_v18, %v14762_v62 }
 0x8e0   : > { %v5282_v45 = vpop.permute.xlu0 %5281  ;;  %7566 = vmatprep.subr.bf16.mxu1 %v7565_v7  ;;  %v12968_v32 = vpop.permute.xlu1 %5619  ;;  %v5341_v47 = vsel %vm14761_vm3, %v12833_v15, %v14759_v61  ;;  %v7573_v12 = vpack.c.bf16 %v5358_v57, %v5356_v33  ;;  %v5388_v7 = vsel %vm557_vm9, %v14765_v23, %v14764_v22  ;;  %v5392_v43 = vsel %vm557_vm9, %v14764_v22, %v14765_v23  ;;  %vm14767_vm14 = vmmov %vm14758_vm0  ;;  %v14771_v33 = vld [vmem:[#allocation81_spill] sm:$0xff]  ;;  %v6231_v22 = vld [vmem:[%s14699_s12] sm:$0xff] }
 0x8e1   : > { %v5286_v25 = vsel %vm14756_vm1, %v14755_v34, %v5282_v45  ;;  %v5290_v42 = vsel %vm14757_vm2, %v5282_v45, %v14755_v34  ;;  %vm14768_vm12 = vmmov %vm14758_vm0  ;;  %v5359_v45 = vmul.f32 %v5348_v16, %v5341_v47  ;;  %v5409_v57 = vmul.f32 %v5400_v26, %v5392_v43  ;;  %v14773_v47 = vld [vmem:[#allocation69_spill] sm:$0xff] }
 0x8e2   : > { %v5309_v56 = vmul.f32 %v5296_v0, %v5290_v42  ;;  %v5310_v58 = vmul.f32 %v5300_v48, %v5286_v25  ;;  %6129 = vrot.lane.b32.xlu0 %v12120_v49, %s14563_s7  ;;  %v5357_v48 = vmul.f32 %v5348_v16, %v5340_v53  ;;  %v5355_v0 = vmul.f32 %v5348_v16, %v5339_v8 }
 0x8e3   : > { %6087 = vrot.lane.b32.xlu1 %v12403_v30, %s14540_s17  ;;  %7568 = vmatpush1.bf16.msra.mxu1 %v7567_v11  ;;  %v5360_v11 = vmul.f32 %v5352_v55, %v5337_v13  ;;  %v5391_v25 = vsel %vm557_vm9, %v14762_v62, %v14763_v18  ;;  %v5410_v42 = vmul.f32 %v5404_v4, %v5388_v7  ;;  %vm14769_vm1 = vcmp.lt.s32.totalorder %v8197_v10, 111  ;;  %v14772_v13 = vld [vmem:[#allocation41_spill] sm:$0xff] }
 0x8e4   : > { %v7571_v14 = vpack.c.bf16 %v5309_v56, %v5307_v52  ;;  %v5870_v54 = vpop.permute.xlu0 %5869  ;;  %v7569_v19 = vpack.c.bf16 %v5310_v58, %v5308_v36  ;;  %v12982_v9 = vpop.permute.xlu1 %5671  ;;  %v7575_v24 = vpack.c.bf16 %v5357_v48, %v5355_v0  ;;  %v5408_v58 = vmul.f32 %v5404_v4, %v5387_v35  ;;  %vm14770_vm2 = vmmov %vm14769_vm1  ;;  %v14774_v62 = vld [vmem:[#allocation77_spill] sm:$0xff]  ;;  %s14795_s20 = smov %s14794_s15 }
 0x8e5   : > { %v5389_v48 = vsel %vm557_vm9, %v14771_v33, %v12865_v6  ;;  %v5393_v21 = vsel %vm557_vm9, %v12865_v6, %v14771_v33  ;;  %v14775_v18 = vld [vmem:[#allocation117_spill] sm:$0xff] }
 0x8e6   : > { %6037 = vrot.lane.b32.xlu0 %v12419_v50, %s14530_s8  ;;  %7570 = vmatprep.subr.bf16.mxu1 %v7569_v19  ;;  %v5407_v19 = vmul.f32 %v5400_v26, %v5391_v25  ;;  %v5440_v35 = vsel %vm581_vm10, %v14775_v18, %v14774_v62  ;;  %v5444_v7 = vsel %vm581_vm10, %v14774_v62, %v14775_v18  ;;  %v14780_v62 = vld [vmem:[#allocation83_spill] sm:$0xff] }
 0x8e7   : > { %6127 = vrot.lane.b32.xlu1 %v12116_v5, %s14563_s7  ;;  %7572 = vmatpush1.bf16.msra.mxu1 %v7571_v14 }
 0x8e8   : > { %v5334_v15 = vpop.permute.xlu0 %5333  ;;  %7574 = vmatprep.subr.bf16.mxu1 %v7573_v12  ;;  %v13016_v60 = vpop.permute.xlu1 %5723  ;;  %v5439_v12 = vsel %vm581_vm10, %v14773_v47, %v14772_v13  ;;  %v7583_v23 = vpack.c.bf16 %v5409_v57, %v5407_v19 }
 0x8e9   : > { %v5338_v41 = vsel %vm14767_vm14, %v14766_v46, %v5334_v15  ;;  %v5342_v37 = vsel %vm14768_vm12, %v5334_v15, %v14766_v46  ;;  %v14776_v15 = vld [vmem:[#allocation28_spill] sm:$0xff] }
 0x8ea   : > { %v5361_v53 = vmul.f32 %v5348_v16, %v5342_v37  ;;  %v5362_v34 = vmul.f32 %v5352_v55, %v5338_v41  ;;  %6137 = vrot.lane.b32.xlu0 %v12192_v51, %s14563_s7  ;;  %v7042_v55 = vld [vmem:[%s13813_s1 + $0x11] ss:$8 sm:$0x3]  ;;  %v6239_v41 = vld [vmem:[%s14699_s12 + $0x40] sm:$0xff]  ;;  %v5411_v37 = vmul.f32 %v5400_v26, %v5393_v21 }
 0x8eb   : > { %6135 = vrot.lane.b32.xlu1 %v12186_v28, %s14563_s7  ;;  %7576 = vmatpush1.bf16.msra.mxu1 %v7575_v24  ;;  %v5452_v0 = vrot.slane %v7042_v55, %v14436_v38  ;;  %v5456_v61 = vrot.slane %v7042_v55, %v14438_v40  ;;  %v6246_v55 = vld [vmem:[%s14699_s12 + $0x78] sm:$0xff] }
 0x8ec   : > { %v7579_v52 = vpack.c.bf16 %v5361_v53, %v5359_v45  ;;  %v5878_v36 = vpop.permute.xlu0 %5877  ;;  %v7577_v56 = vpack.c.bf16 %v5362_v34, %v5360_v11  ;;  %v13037_v14 = vpop.permute.xlu1 %5771  ;;  %v5412_v45 = vmul.f32 %v5404_v4, %v5389_v48  ;;  %v5443_v34 = vsel %vm581_vm10, %v14772_v13, %v14773_v47  ;;  %v14777_v48 = vld [vmem:[#allocation53_spill] sm:$0xff] }
 0x8ed   : > { %v13031_v16 = vsel %vm14769_vm1, %v5870_v54, %v5878_v36  ;;  %v13035_v8 = vsel %vm14770_vm2, %v5878_v36, %v5870_v54  ;;  %v7581_v54 = vpack.c.bf16 %v5410_v42, %v5408_v58  ;;  %v5462_v25 = vmul.f32 %v5456_v61, %v5440_v35  ;;  %v7043_v42 = vld [vmem:[%s13813_s1 + $0x12] ss:$8 sm:$0x3] }
 0x8ee   : > { %6089 = vrot.lane.b32.xlu0 %v12419_v50, %s14540_s17  ;;  %7578 = vmatprep.subr.bf16.mxu1 %v7577_v56  ;;  %v6238_v36 = vld [vmem:[%s14699_s12 + $0x38] sm:$0xff]  ;;  %v5460_v56 = vmul.f32 %v5456_v61, %v5439_v12  ;;  %v5461_v58 = vmul.f32 %v5452_v0, %v5444_v7  ;;  %v5459_v19 = vmul.f32 %v5452_v0, %v5443_v34  ;;  %v14781_v35 = vld [vmem:[#allocation37_spill] sm:$0xff]  ;;  %vm14810_vm2 = vcmp.lt.s32.totalorder %v8197_v10, 126  ;;  %s14876_s17 = sld [smem:[#allocation132_spill]] }
 0x8ef   : > { %6131 = vrot.lane.b32.xlu1 %v12258_v3, %s14563_s7  ;;  %7580 = vmatpush1.bf16.msra.mxu1 %v7579_v52  ;;  %v13101_v33 = vrot.slane %v7043_v42, %v14436_v38  ;;  %v5441_v21 = vsel %vm581_vm10, %v14777_v48, %v12886_v27  ;;  %v5508_v47 = vrot.slane %v7043_v42, %v14438_v40  ;;  %v14779_v12 = vld [vmem:[#allocation62_spill] sm:$0xff] }
 0x8f0   : > { %v5386_v6 = vpop.permute.xlu0 %5385  ;;  %7582 = vmatprep.subr.bf16.mxu1 %v7581_v54  ;;  %v13074_v46 = vpop.permute.xlu1 %5767  ;;  %v5445_v54 = vsel %vm581_vm10, %v12886_v27, %v14777_v48  ;;  %v7589_v13 = vpack.c.bf16 %v5462_v25, %v5460_v56  ;;  %v5491_v18 = vsel %vm605_vm11, %v14780_v62, %v14779_v12  ;;  %v6245_v27 = vld [vmem:[%s14699_s12 + $0x70] sm:$0xff]  ;;  %v7591_v7 = vpack.c.bf16 %v5461_v58, %v5459_v19  ;;  %v6252_v56 = vld [vmem:[%s14699_s12 + $0xa8] sm:$0xff]  ;;  %v6234_v48 = vld [vmem:[%s14699_s12 + $0x18] sm:$0xff] }
 0x8f1   : > { %v5390_v24 = vsel %vm557_vm9, %v14776_v15, %v5386_v6  ;;  %v5394_v43 = vsel %vm557_vm9, %v5386_v6, %v14776_v15  ;;  %v14782_v6 = vld [vmem:[#allocation118_spill] sm:$0xff]  ;;  %v5495_v42 = vsel %vm605_vm11, %v14779_v12, %v14780_v62  ;;  %v5512_v58 = vmul.f32 %v5508_v47, %v5491_v18 }
 0x8f2   : > { %v5413_v11 = vmul.f32 %v5400_v26, %v5394_v43  ;;  %v5414_v53 = vmul.f32 %v5404_v4, %v5390_v24  ;;  %6133 = vrot.lane.b32.xlu0 %v12270_v44, %s14563_s7  ;;  %6560 = vmatmul.mubr.f32.vlgmr.msra.gmra.mrb[8].mxu1 %v6231_v22  ;;  %v5492_v22 = vsel %vm605_vm11, %v14782_v6, %v14781_v35  ;;  %v14783_v24 = vld [vmem:[#allocation114_spill] sm:$0xff]  ;;  %vm14787_vm9 = vcmp.lt.s32.totalorder %v8197_v10, 1 }
 0x8f3   : > { %6139 = vrot.lane.b32.xlu1 %v12403_v30, %s14563_s7  ;;  %7584 = vmatpush1.bf16.msra.mxu1 %v7583_v23  ;;  %v5496_v15 = vsel %vm605_vm11, %v14781_v35, %v14782_v6  ;;  %v14785_v6 = vld [vmem:[#allocation63_spill] sm:$0xff]  ;;  %vm14791_vm0 = vmmov %vm14787_vm9 }
 0x8f4   : > { %v7587_v52 = vpack.c.bf16 %v5413_v11, %v5411_v37  ;;  %v13090_v26 = vpop.permute.xlu0 %5873  ;;  %v7585_v4 = vpack.c.bf16 %v5414_v53, %v5412_v45  ;;  %6565 = vmatprep.mubr.f32.mxu1 %v6239_v41  ;;  %v13095_v57 = vpop.permute.xlu1 %5775  ;;  %v6253_v45 = vld [vmem:[%s14699_s12 + $0xb0] sm:$0xff]  ;;  %v5463_v11 = vmul.f32 %v5452_v0, %v5445_v54  ;;  %v5464_v53 = vmul.f32 %v5456_v61, %v5441_v21  ;;  %vm14793_vm7 = vmmov %vm14791_vm0  ;;  %s13762_s5 = scalar_lea.hbm %s14876_s17, %s7068_s3 }
 0x8f5   : > { %v5511_v21 = vmul.f32 %v13101_v33, %v5495_v42  ;;  %vm14798_vm3 = vmmov %vm14791_vm0 }
 0x8f6   : > { %6141 = vrot.lane.b32.xlu0 %v12419_v50, %s14563_s7  ;;  %7586 = vmatprep.subr.bf16.mxu1 %v7585_v4  ;;  %v7044_v4 = vld [vmem:[%s13813_s1 + $0x13] ss:$8 sm:$0x3]  ;;  %vm14799_vm14 = vmmov %vm14791_vm0 }
 0x8f7   : > { %6179 = vrot.lane.b32.xlu1 %v12116_v5, %s14778_s24  ;;  %6566 = vmatmul.mubr.f32.gmra.mrb[10].mxu1 %v6238_v36  ;;  %v5556_v54 = vrot.slane %v7044_v4, %v14436_v38  ;;  %v5560_v35 = vrot.slane %v7044_v4, %v14438_v40  ;;  %vm14801_vm12 = vmmov %vm14791_vm0 }
 0x8f8   : > { %7588 = vmatpush1.bf16.msra.mxu1 %v7587_v52  ;;  %v5438_v23 = vpop.permute.xlu0 %5437  ;;  %6571 = vmatprep.mubr.f32.mxu1 %v6246_v55  ;;  %v13137_v37 = vpop.permute.xlu1 %5815  ;;  %v5514_v52 = vmul.f32 %v5508_v47, %v5492_v22  ;;  %v5513_v55 = vmul.f32 %v13101_v33, %v5496_v15  ;;  %v14786_v22 = vld [vmem:[#allocation84_spill] sm:$0xff]  ;;  %vm14802_vm1 = vmmov %vm14791_vm0 }
 0x8f9   : > { %v5442_v43 = vsel %vm581_vm10, %v14783_v24, %v5438_v23  ;;  %v5446_v41 = vsel %vm581_vm10, %v5438_v23, %v14783_v24  ;;  %7590 = vmatprep.subr.bf16.mxu1 %v7589_v13  ;;  %v14784_v13 = vld [vmem:[#allocation110_spill] sm:$0xff]  ;;  %v5543_v23 = vsel %vm14787_vm9, %v14786_v22, %v14785_v6  ;;  %vm14790_vm10 = vmmov %vm14787_vm9  ;;  %v5547_v4 = vsel %vm14793_vm7, %v14785_v6, %v14786_v22 }
 0x8fa   : > { %v5465_v34 = vmul.f32 %v5452_v0, %v5446_v41  ;;  %v5466_v25 = vmul.f32 %v5456_v61, %v5442_v43  ;;  %6181 = vrot.lane.b32.xlu0 %v12120_v49, %s14778_s24  ;;  %v5493_v12 = vsel %vm605_vm11, %v14784_v13, %v12919_v20  ;;  %v5497_v62 = vsel %vm605_vm11, %v12919_v20, %v14784_v13  ;;  %v14792_v41 = vld [vmem:[#allocation120_spill] sm:$0xff]  ;;  %vm14813_vm9 = vmmov %vm14810_vm2 }
 0x8fb   : > { %6187 = vrot.lane.b32.xlu1 %v12186_v28, %s14778_s24  ;;  %6572 = vmatmul.mubr.f32.gmra.mrb[12].mxu1 %v6245_v27  ;;  %v7597_v18 = vpack.c.bf16 %v5514_v52, %v5512_v58  ;;  %v14788_v27 = vld [vmem:[#allocation38_spill] sm:$0xff]  ;;  %v7599_v20 = vpack.c.bf16 %v5513_v55, %v5511_v21  ;;  %v5564_v58 = vmul.f32 %v5560_v35, %v5543_v23  ;;  %v6460_v23 = vld [vmem:[%s14795_s20 + $0x8] sm:$0xff] }
 0x8fc   : > { %v7595_v36 = vpack.c.bf16 %v5465_v34, %v5463_v11  ;;  %7592 = vmatpush1.bf16.msra.mxu1 %v7591_v7  ;;  %v13153_v0 = vpop.permute.xlu0 %5921  ;;  %v7593_v61 = vpack.c.bf16 %v5466_v25, %v5464_v53  ;;  %6577 = vmatprep.mubr.f32.mxu1 %v6253_v45  ;;  %v13159_v19 = vpop.permute.xlu1 %5823  ;;  %v14789_v7 = vld [vmem:[#allocation34_spill] sm:$0xff]  ;;  %v5515_v34 = vmul.f32 %v13101_v33, %v5497_v62  ;;  %v14797_v62 = vld [vmem:[#allocation116_spill] sm:$0xff] }
 0x8fd   : > { %v5544_v15 = vsel %vm14790_vm10, %v14789_v7, %v14788_v27  ;;  %v5548_v43 = vsel %vm14791_vm0, %v14788_v27, %v14789_v7  ;;  %v5516_v25 = vmul.f32 %v5508_v47, %v5493_v12  ;;  %v5563_v13 = vmul.f32 %v5556_v54, %v5547_v4  ;;  %v7045_v12 = vld [vmem:[%s13813_s1 + $0x14] ss:$8 sm:$0x3]  ;;  %vm14814_vm10 = vmmov %vm14810_vm2 }
 0x8fe   : > { %6189 = vrot.lane.b32.xlu0 %v12192_v51, %s14778_s24  ;;  %7594 = vmatprep.subr.bf16.mxu1 %v7593_v61  ;;  %v5565_v55 = vmul.f32 %v5556_v54, %v5548_v43  ;;  %v5549_v6 = vsel %vm14799_vm14, %v12935_v59, %v14797_v62  ;;  %v6461_v7 = vld [vmem:[%s14795_s20 + $0x10] sm:$0xff]  ;;  %vm14816_vm0 = vmmov %vm14810_vm2 }
 0x8ff   : > { %6183 = vrot.lane.b32.xlu1 %v12258_v3, %s14778_s24  ;;  %6578 = vmatmul.mubr.f32.gmra.mrb[14].mxu1 %v6252_v56  ;;  %vm14819_vm7 = vmmov %vm14816_vm0 }
 0x900   : > { %7596 = vmatpush1.bf16.msra.mxu1 %v7595_v36  ;;  %v5490_v24 = vpop.permute.xlu0 %5489  ;;  %6648 = vmatprep.mubr.f32.mxu1 %v6234_v48  ;;  %v13197_v53 = vpop.permute.xlu1 %5819  ;;  %v5566_v36 = vmul.f32 %v5560_v35, %v5544_v15  ;;  %v7607_v15 = vpack.c.bf16 %v5565_v55, %v5563_v13  ;;  %v14803_v13 = vld [vmem:[#allocation74_spill] sm:$0xff] }
 0x901   : > { %v5494_v45 = vsel %vm605_vm11, %v14792_v41, %v5490_v24  ;;  %v5498_v11 = vsel %vm605_vm11, %v5490_v24, %v14792_v41  ;;  %7598 = vmatprep.subr.bf16.mxu1 %v7597_v18  ;;  %vm14796_vm11 = vcmp.lt.s32.totalorder %v8197_v10, 110  ;;  %v5545_v18 = vsel %vm14798_vm3, %v14797_v62, %v12935_v59  ;;  %v14800_v24 = vld [vmem:[#allocation86_spill] sm:$0xff]  ;;  %v14804_v62 = vld [vmem:[#allocation95_spill] sm:$0xff] }
 0x902   : > { %v5517_v42 = vmul.f32 %v13101_v33, %v5498_v11  ;;  %v5518_v52 = vmul.f32 %v5508_v47, %v5494_v45  ;;  %6185 = vrot.lane.b32.xlu0 %v12270_v44, %s14778_s24  ;;  %v6459_v33 = vld [vmem:[%s14794_s15] sm:$0xff]  ;;  %v7605_v22 = vpack.c.bf16 %v5566_v36, %v5564_v58  ;;  %v5588_v41 = vrot.slane %v7045_v12, %v14438_v40  ;;  %s6881_s15 = sshll.u32 %s13749_s0, 4  ;;  %s13764_s15 = int_to_ptr.vmem [resolvable:$true] %s6881_s15 }
 0x903   : > { %6191 = vrot.lane.b32.xlu1 %v12403_v30, %s14778_s24  ;;  %v5567_v45 = vmul.f32 %v5556_v54, %v5549_v6  ;;  %v5568_v11 = vmul.f32 %v5560_v35, %v5545_v18  ;;  %s7881_s14 = scalar_lea.vmem %s13764_s15, 1024  ;;  %p7888_p0 = scmp.lt.s32.totalorder %s13764_s15, %s7886_s9 }
 0x904   : > { %v7603_v61 = vpack.c.bf16 %v5517_v42, %v5515_v34  ;;  %7600 = vmatpush1.bf16.msra.mxu1 %v7599_v20  ;;  %v13209_v56 = vpop.permute.xlu0 %5929  ;;  %v7601_v47 = vpack.c.bf16 %v5518_v52, %v5516_v25  ;;  %v13220_v21 = vpop.permute.xlu1 %5827  ;;  %v6462_v42 = vld [vmem:[%s14795_s20 + $0x18] sm:$0xff]  ;;  %v5594_v52 = vmul.f32 %v5588_v41, %v12192_v51  ;;  %v5598_v55 = vmul.f32 %v5588_v41, %v12419_v50  ;;  %p7882_p11 = scmp.ne.s32.totalorder %s13764_s15, %s7881_s14  ;;  %p7889_p1 = scmp.lt.s32.totalorder %s7887_s2, %s7881_s14 }
 0x905   : > { %v13218_v48 = vsel %vm14796_vm11, %v13153_v0, %v13209_v56  ;;  %vm14822_vm11 = vcmp.lt.s32.totalorder %v8197_v10, 114 }
 0x906   : > { %6193 = vrot.lane.b32.xlu0 %v12419_v50, %s14778_s24  ;;  %7602 = vmatprep.subr.bf16.mxu1 %v7601_v47  ;;  %vm14825_vm3 = vmmov %vm14822_vm11  ;;  %p7883_p12 = pnand %p7882_p11, %p8066_p5  ;;  %p7890_p2 = por %p7889_p1, %p7888_p0 }
 0x907   : > { %6465 = vperm.xlu1 %7880, %v6459_v33   ;;  %v5584_v33 = vrot.slane %v7045_v12, %v14436_v38  ;;  %v5628_v12 = vsel %vm670_vm13, %v14804_v62, %v14803_v13  ;;  %vm14826_vm14 = vmmov %vm14825_vm3 }
 0x908   : > { %7604 = vmatpush1.bf16.msra.mxu1 %v7603_v61  ;;  %v5542_v27 = vpop.permute.xlu0 %5541  ;;  %v13247_v43 = vpop.permute.xlu1 %5867  ;;  %p7884_p13 = pneg %p7883_p12 }
 0x909   : > { %v5546_v20 = vsel %vm14801_vm12, %v14800_v24, %v5542_v27  ;;  %v5550_v59 = vsel %vm14802_vm1, %v5542_v27, %v14800_v24  ;;  %7606 = vmatprep.subr.bf16.mxu1 %v7605_v22  ;;  %v5593_v58 = vmul.f32 %v5584_v33, %v12120_v49  ;;  %v5596_v49 = vmul.f32 %v5588_v41, %v12403_v30  ;;  %v14806_v27 = vld [vmem:[#allocation107_spill] sm:$0xff]  ;;  %vm14828_vm12 = vmmov %vm14816_vm0 }
 0x90a   : > { %v5569_v34 = vmul.f32 %v5556_v54, %v5550_v59  ;;  %v5570_v25 = vmul.f32 %v5560_v35, %v5546_v20  ;;  %6470 = vperm.xlu0 %7879, %v6460_v23   ;;  %v5592_v54 = vmul.f32 %v5588_v41, %v12186_v28  ;;  %v7046_v35 = vld [vmem:[%s13813_s1 + $0x15] ss:$8 sm:$0x3]  ;;  %v5591_v28 = vmul.f32 %v5584_v33, %v12116_v5  ;;  %v14805_v23 = vld [vmem:[#allocation59_spill] sm:$0xff]  ;;  %vm14829_vm1 = vmmov %vm14816_vm0  ;;  %p7891_p3 = pnand %p7890_p2, %p7884_p13 }
 0x90b   : > { %6475 = vperm.xlu1 %7880, %v6461_v7   ;;  %v5640_v6 = vrot.slane %v7046_v35, %v14438_v40  ;;  %v5627_v50 = vsel %vm670_vm13, %v14806_v27, %v14805_v23  ;;  %v5624_v7 = vsel %vm670_vm13, %v14803_v13, %v14804_v62  ;;  %v5597_v5 = vmul.f32 %v5584_v33, %v12270_v44  ;;  %v7047_v44 = vld [vmem:[%s13813_s1 + $0x16] ss:$8 sm:$0x3]  ;;  %v14812_v13 = vld [vmem:[#allocation100_spill] sm:$0xff] }
 0x90c   : > { %v7611_v4 = vpack.c.bf16 %v5569_v34, %v5567_v45  ;;  %7608 = vmatpush1.bf16.msra.mxu1 %v7607_v15  ;;  %v13254_v36 = vpop.permute.xlu0 %5925  ;;  %v7609_v61 = vpack.c.bf16 %v5570_v25, %v5568_v11  ;;  %v13257_v47 = vpop.permute.xlu1 %5875  ;;  %v7613_v51 = vpack.c.bf16 %v5594_v52, %v5592_v54  ;;  %v7615_v15 = vpack.c.bf16 %v5593_v58, %v5591_v28  ;;  %v14809_v58 = vld [vmem:[#allocation106_spill] sm:$0xff] }
 0x90d   : > { %v5636_v24 = vrot.slane %v7046_v35, %v14436_v38  ;;  %v5646_v20 = vmul.f32 %v5640_v6, %v5628_v12  ;;  %v7617_v59 = vpack.c.bf16 %v5598_v55, %v5596_v49  ;;  %v5623_v30 = vsel %vm670_vm13, %v14805_v23, %v14806_v27  ;;  %v14808_v35 = vld [vmem:[#allocation73_spill] sm:$0xff]  ;;  %v14811_v55 = vld [vmem:[#allocation58_spill] sm:$0xff] }
 0x90e   : > { %6480 = vperm.xlu0 %7879, %v6462_v42   ;;  %7610 = vmatprep.subr.bf16.mxu1 %v7609_v61  ;;  %v5595_v45 = vmul.f32 %v5584_v33, %v12258_v3  ;;  %v5644_v11 = vmul.f32 %v5640_v6, %v5627_v50  ;;  %v5692_v54 = vrot.slane %v7047_v44, %v14438_v40  ;;  %v14815_v49 = vld [vmem:[#allocation85_spill] sm:$0xff] }
 0x90f   : > { %v5645_v34 = vmul.f32 %v5636_v24, %v5624_v7  ;;  %v5643_v52 = vmul.f32 %v5636_v24, %v5623_v30  ;;  %v5680_v62 = vsel %vm14813_vm9, %v14812_v13, %v14811_v55 }
 0x910   : > { %7612 = vmatpush1.bf16.msra.mxu1 %v7611_v4  ;;  %v13269_v18 = vpop.permute.xlu0 %5973  ;;  %v13273_v22 = vpop.permute.xlu1 %5871  ;;  %v7619_v42 = vpack.c.bf16 %v5597_v5, %v5595_v45  ;;  %v14807_v4 = vld [vmem:[#allocation115_spill] sm:$0xff]  ;;  %v7621_v33 = vpack.c.bf16 %v5646_v20, %v5644_v11  ;;  %v5698_v30 = vmul.f32 %v5692_v54, %v5680_v62  ;;  %v5675_v45 = vsel %vm14816_vm0, %v14808_v35, %v14809_v58 }
 0x911   : > { %7614 = vmatprep.subr.bf16.mxu1 %v7613_v51  ;;  %v5625_v61 = vsel %vm670_vm13, %v14807_v4, %v12968_v32  ;;  %v5629_v3 = vsel %vm670_vm13, %v12968_v32, %v14807_v4  ;;  %v5679_v51 = vsel %vm14810_vm2, %v14809_v58, %v14808_v35  ;;  %v7623_v28 = vpack.c.bf16 %v5645_v34, %v5643_v52  ;;  %vm14830_vm2 = vmmov %vm14825_vm3 }
 0x912   : > { %v5676_v32 = vsel %vm14814_vm10, %v14811_v55, %v14812_v13  ;;  %v5647_v7 = vmul.f32 %v5636_v24, %v5625_v61  ;;  %v5696_v52 = vmul.f32 %v5692_v54, %v5679_v51  ;;  %v14817_v61 = vld [vmem:[#allocation15_spill] sm:$0xff]  ;;  %v14820_v55 = vld [vmem:[#allocation33_spill] sm:$0xff]  ;;  %v14821_v13 = vld [vmem:[#allocation122_spill] sm:$0xff] }
 0x913   : > { %v5731_v62 = vsel %vm14822_vm11, %v14821_v13, %v14820_v55  ;;  %vm14832_vm9 = vmmov %vm14830_vm2 }
 0x914   : > { %7616 = vmatpush1.bf16.msra.mxu1 %v7615_v15  ;;  %v13290_v41 = vpop.permute.xlu0 %5981  ;;  %v13296_v25 = vpop.permute.xlu1 %5879  ;;  %v5648_v15 = vmul.f32 %v5640_v6, %v5629_v3  ;;  %v7629_v35 = vpack.c.bf16 %v5698_v30, %v5696_v52  ;;  %vm14833_vm10 = vmmov %vm14830_vm2 }
 0x915   : > { %7618 = vmatprep.subr.bf16.mxu1 %v7617_v59  ;;  %v5688_v59 = vrot.slane %v7047_v44, %v14436_v38 }
 0x917   : > { %v5697_v4 = vmul.f32 %v5688_v59, %v5676_v32  ;;  %v5695_v44 = vmul.f32 %v5688_v59, %v5675_v45 }
 0x918   : > { %7620 = vmatpush1.bf16.msra.mxu1 %v7619_v42  ;;  %v5622_v12 = vpop.permute.xlu0 %5621  ;;  %v13325_v50 = vpop.permute.xlu1 %5919 }
 0x919   : > { %v5626_v23 = vsel %vm670_vm13, %v14815_v49, %v5622_v12  ;;  %v5630_v27 = vsel %vm670_vm13, %v5622_v12, %v14815_v49  ;;  %7622 = vmatprep.subr.bf16.mxu1 %v7621_v33  ;;  %vm14818_vm13 = vmmov %vm14816_vm0  ;;  %v5681_v33 = vsel %vm14819_vm7, %v12982_v9, %v14817_v61  ;;  %v14823_v12 = vld [vmem:[#allocation119_spill] sm:$0xff]  ;;  %vm14837_vm7 = vcmp.lt.s32.totalorder %v8197_v10, 112 }
 0x91a   : > { %v5649_v5 = vmul.f32 %v5636_v24, %v5626_v23  ;;  %v5650_v20 = vmul.f32 %v5640_v6, %v5630_v27  ;;  %v7048_v24 = vld [vmem:[%s13813_s1 + $0x17] ss:$8 sm:$0x3]  ;;  %v5677_v3 = vsel %vm14818_vm13, %v14817_v61, %v12982_v9  ;;  %v7631_v23 = vpack.c.bf16 %v5697_v4, %v5695_v44  ;;  %v14827_v27 = vld [vmem:[#allocation16_spill] sm:$0xff]  ;;  %vm14835_vm0 = vmmov %vm14830_vm2 }
 0x91b   : > { %v5740_v58 = vrot.slane %v7048_v24, %v14436_v38  ;;  %v5744_v51 = vrot.slane %v7048_v24, %v14438_v40  ;;  %v5700_v30 = vmul.f32 %v5692_v54, %v5681_v33  ;;  %vm14836_vm13 = vmmov %vm14835_vm0 }
 0x91c   : > { %v7627_v11 = vpack.c.bf16 %v5649_v5, %v5647_v7  ;;  %7624 = vmatpush1.bf16.msra.mxu1 %v7623_v28  ;;  %v13332_v34 = vpop.permute.xlu0 %5977  ;;  %v7625_v42 = vpack.c.bf16 %v5650_v20, %v5648_v15  ;;  %v13337_v6 = vpop.permute.xlu1 %5927  ;;  %v14824_v28 = vld [vmem:[#allocation123_spill] sm:$0xff]  ;;  %v5699_v20 = vmul.f32 %v5688_v59, %v5677_v3  ;;  %vm14838_vm11 = vmmov %vm14837_vm7 }
 0x91d   : > { %v5732_v32 = vsel %vm14825_vm3, %v14824_v28, %v14823_v12  ;;  %v5728_v9 = vsel %vm14826_vm14, %v14823_v12, %v14824_v28  ;;  %v5748_v12 = vmul.f32 %v5744_v51, %v5731_v62  ;;  %v7049_v3 = vld [vmem:[%s13813_s1 + $0x20] ss:$8 sm:$0x3]  ;;  %vm14840_vm3 = vmmov %vm14837_vm7  ;;  %vm14841_vm14 = vcmp.lt.s32.totalorder %v8197_v10, 111 }
 0x91e   : > { %7626 = vmatprep.subr.bf16.mxu1 %v7625_v42  ;;  %v5727_v42 = vsel %vm14830_vm2, %v14820_v55, %v14821_v13  ;;  %v5750_v52 = vmul.f32 %v5744_v51, %v5732_v32  ;;  %v5749_v4 = vmul.f32 %v5740_v58, %v5728_v9  ;;  %v5796_v28 = vrot.slane %v7049_v3, %v14438_v40  ;;  %vm14844_vm2 = vmmov %vm14841_vm14 }
 0x91f   : > { %v5783_v32 = vsel %vm742_vm8, %v13037_v14, %v12682_v39 }
 0x920   : > { %7628 = vmatpush1.bf16.msra.mxu1 %v7627_v11  ;;  %v5674_v49 = vpop.permute.xlu0 %5673  ;;  %v13367_v5 = vpop.permute.xlu1 %5923  ;;  %v7637_v13 = vpack.c.bf16 %v5750_v52, %v5748_v12  ;;  %v5800_v52 = vmul.f32 %v5796_v28, %v5783_v32 }
 0x921   : > { %v5678_v7 = vsel %vm14828_vm12, %v14827_v27, %v5674_v49  ;;  %v5682_v15 = vsel %vm14829_vm1, %v5674_v49, %v14827_v27  ;;  %7630 = vmatprep.subr.bf16.mxu1 %v7629_v35  ;;  %v14834_v27 = vld [vmem:[#allocation57_spill] sm:$0xff]  ;;  %vm14842_vm12 = vmmov %vm14840_vm3 }
 0x922   : > { %v5701_v45 = vmul.f32 %v5688_v59, %v5678_v7  ;;  %v5702_v11 = vmul.f32 %v5692_v54, %v5682_v15  ;;  %v5747_v54 = vmul.f32 %v5740_v58, %v5727_v42  ;;  %v14831_v59 = vld [vmem:[#allocation32_spill] sm:$0xff]  ;;  %v5792_v42 = vrot.slane %v7049_v3, %v14436_v38  ;;  %vm14843_vm1 = vmmov %vm14840_vm3 }
 0x923   : > { %v5729_v35 = vsel %vm14832_vm9, %v14831_v59, %v13016_v60  ;;  %v5733_v55 = vsel %vm14833_vm10, %v13016_v60, %v14831_v59  ;;  %vm14845_vm9 = vmmov %vm14844_vm2 }
 0x924   : > { %v7635_v24 = vpack.c.bf16 %v5701_v45, %v5699_v20  ;;  %7632 = vmatpush1.bf16.msra.mxu1 %v7631_v23  ;;  %v13373_v44 = vpop.permute.xlu0 %6025  ;;  %v7633_v61 = vpack.c.bf16 %v5702_v11, %v5700_v30  ;;  %v13378_v33 = vpop.permute.xlu1 %5931  ;;  %v7639_v62 = vpack.c.bf16 %v5749_v4, %v5747_v54  ;;  %v5784_v23 = vsel %vm742_vm8, %v12740_v31, %v12697_v17  ;;  %vm14846_vm10 = vmmov %vm14844_vm2 }
 0x925   : > { %v5751_v9 = vmul.f32 %v5740_v58, %v5729_v35  ;;  %v5752_v20 = vmul.f32 %v5744_v51, %v5733_v55  ;;  %v5779_v30 = vsel %vm742_vm8, %v12682_v39, %v13037_v14  ;;  %v5780_v4 = vsel %vm742_vm8, %v12697_v17, %v12740_v31  ;;  %v7050_v39 = vld [vmem:[%s13813_s1 + $0x21] ss:$8 sm:$0x3] }
 0x926   : > { %7634 = vmatprep.subr.bf16.mxu1 %v7633_v61  ;;  %v5802_v54 = vmul.f32 %v5796_v28, %v5784_v23  ;;  %v5799_v14 = vmul.f32 %v5792_v42, %v5779_v30  ;;  %v5801_v17 = vmul.f32 %v5792_v42, %v5780_v4  ;;  %v5785_v31 = vsel %vm742_vm8, %v13095_v57, %v13074_v46  ;;  %v6241_v23 = vld [vmem:[%s14699_s12 + $0x50] sm:$0xff] }
 0x927   : > { %v5848_v59 = vrot.slane %v7050_v39, %v14438_v40  ;;  %v5835_v35 = vsel %vm14837_vm7, %v13159_v19, %v13137_v37 }
 0x928   : > { %7636 = vmatpush1.bf16.msra.mxu1 %v7635_v24  ;;  %v5726_v49 = vpop.permute.xlu0 %5725  ;;  %v7645_v3 = vpack.c.bf16 %v5802_v54, %v5800_v52  ;;  %v6240_v52 = vld [vmem:[%s14699_s12 + $0x48] sm:$0xff] }
 0x929   : > { %v5730_v60 = vsel %vm14835_vm0, %v14834_v27, %v5726_v49  ;;  %v5734_v7 = vsel %vm14836_vm13, %v5726_v49, %v14834_v27  ;;  %v13403_v15 = vpop.permute.xlu1 %5971  ;;  %7638 = vmatprep.subr.bf16.mxu1 %v7637_v13  ;;  %v6233_v13 = vld [vmem:[%s14699_s12 + $0x10] sm:$0xff]  ;;  %v5831_v27 = vsel %vm14838_vm11, %v13137_v37, %v13159_v19  ;;  %v5852_v30 = vmul.f32 %v5848_v59, %v5835_v35  ;;  %v7051_v37 = vld [vmem:[%s13813_s1 + $0x22] ss:$8 sm:$0x3]  ;;  %vm14850_vm11 = vmmov %vm14844_vm2 }
 0x92a   : > { %v5753_v45 = vmul.f32 %v5740_v58, %v5730_v60  ;;  %v5754_v11 = vmul.f32 %v5744_v51, %v5734_v7  ;;  %v5781_v51 = vsel %vm742_vm8, %v13074_v46, %v13095_v57  ;;  %v5854_v4 = vmul.f32 %v5848_v59, %v12884_v63  ;;  %v6255_v35 = vld [vmem:[%s14699_s12 + $0xc0] sm:$0xff] }
 0x92b   : > { %v5803_v32 = vmul.f32 %v5792_v42, %v5781_v51  ;;  %v5837_v63 = vsel %vm14840_vm3, %v13220_v21, %v13197_v53  ;;  %vm14847_vm0 = vcmp.lt.s32.totalorder %v8197_v10, 110 }
 0x92c   : > { %v7643_v24 = vpack.c.bf16 %v5753_v45, %v5751_v9  ;;  %7640 = vmatpush1.bf16.msra.mxu1 %v7639_v62  ;;  %v13414_v61 = vpop.permute.xlu0 %6033  ;;  %v7641_v12 = vpack.c.bf16 %v5754_v11, %v5752_v20  ;;  %v7647_v62 = vpack.c.bf16 %v5801_v17, %v5799_v14  ;;  %v5804_v9 = vmul.f32 %v5796_v28, %v5785_v31  ;;  %vm14848_vm13 = vmmov %vm14847_vm0 }
 0x92d   : > { %v13419_v58 = vpop.permute.xlu1 %5979  ;;  %v5844_v20 = vrot.slane %v7050_v39, %v14436_v38  ;;  %v7653_v54 = vpack.c.bf16 %v5854_v4, %v5852_v30  ;;  %v5900_v39 = vrot.slane %v7051_v37, %v14438_v40  ;;  %v5887_v14 = vsel %vm14841_vm14, %v13257_v47, %v13247_v43  ;;  %vm14852_vm3 = vmmov %vm14847_vm0 }
 0x92e   : > { %7642 = vmatprep.subr.bf16.mxu1 %v7641_v12  ;;  %v5939_v4 = vsel %vm14848_vm13, %v13337_v6, %v13325_v50  ;;  %vm14853_vm14 = vmmov %vm14847_vm0 }
 0x92f   : > { %v5851_v19 = vmul.f32 %v5844_v20, %v5831_v27  ;;  %v5853_v12 = vmul.f32 %v5844_v20, %v12880_v2  ;;  %v6247_v2 = vld [vmem:[%s14699_s12 + $0x80] sm:$0xff]  ;;  %v6254_v27 = vld [vmem:[%s14699_s12 + $0xb8] sm:$0xff] }
 0x930   : > { %7644 = vmatpush1.bf16.msra.mxu1 %v7643_v24  ;;  %v5778_v55 = vpop.permute.xlu0 %5777 }
 0x931   : > { %v5782_v46 = vsel %vm742_vm8, %v12783_v1, %v5778_v55  ;;  %v5786_v57 = vsel %vm742_vm8, %v5778_v55, %v12783_v1  ;;  %v13443_v49 = vpop.permute.xlu1 %5975  ;;  %7646 = vmatprep.subr.bf16.mxu1 %v7645_v3  ;;  %vm14839_vm8 = vmmov %vm14837_vm7  ;;  %v7655_v17 = vpack.c.bf16 %v5853_v12, %v5851_v19  ;;  %v5856_v55 = vmul.f32 %v5848_v59, %v5837_v63 }
 0x932   : > { %v5805_v60 = vmul.f32 %v5792_v42, %v5782_v46  ;;  %v5806_v7 = vmul.f32 %v5796_v28, %v5786_v57  ;;  %v6248_v42 = vld [vmem:[%s14699_s12 + $0x88] sm:$0xff]  ;;  %v5833_v24 = vsel %vm14839_vm8, %v13197_v53, %v13220_v21  ;;  %v5896_v46 = vrot.slane %v7051_v37, %v14436_v38  ;;  %vm14849_vm7 = vmmov %vm14844_vm2 }
 0x933   : > { %6649 = vmatmul.mubr.f32.vlgmr.msra.gmra.mrb[8].mxu1 %v6233_v13  ;;  %v5855_v31 = vmul.f32 %v5844_v20, %v5833_v24  ;;  %v5883_v13 = vsel %vm14844_vm2, %v13247_v43, %v13257_v47  ;;  %v5904_v57 = vmul.f32 %v5900_v39, %v5887_v14  ;;  %v7052_v43 = vld [vmem:[%s13813_s1 + $0x23] ss:$8 sm:$0x3]  ;;  %vm14851_vm8 = vmmov %vm14847_vm0 }
 0x934   : > { %v7651_v1 = vpack.c.bf16 %v5805_v60, %v5803_v32  ;;  %7648 = vmatpush1.bf16.msra.mxu1 %v7647_v62  ;;  %v13453_v45 = vpop.permute.xlu0 %6029  ;;  %v7649_v11 = vpack.c.bf16 %v5806_v7, %v5804_v9  ;;  %6654 = vmatprep.mubr.f32.mxu1 %v6241_v23  ;;  %v5906_v60 = vmul.f32 %v5900_v39, %v13035_v8  ;;  %v6236_v7 = vld [vmem:[%s14699_s12 + $0x28] sm:$0xff]  ;;  %vm14856_vm2 = vmmov %vm14847_vm0 }
 0x935   : > { %v13462_v28 = vpop.permute.xlu1 %5983  ;;  %v5903_v47 = vmul.f32 %v5896_v46, %v5883_v13  ;;  %v5905_v30 = vmul.f32 %v5896_v46, %v13031_v16  ;;  %v5889_v8 = vsel %vm14846_vm10, %v13296_v25, %v13273_v22  ;;  %v5948_v63 = vrot.slane %v7052_v43, %v14436_v38 }
 0x936   : > { %7650 = vmatprep.subr.bf16.mxu1 %v7649_v11  ;;  %v5952_v11 = vrot.slane %v7052_v43, %v14438_v40 }
 0x937   : > { %6655 = vmatmul.mubr.f32.gmra.mrb[10].mxu1 %v6240_v52  ;;  %v5940_v52 = vsel %vm14847_vm0, %v13209_v56, %v13153_v0  ;;  %v7663_v37 = vpack.c.bf16 %v5905_v30, %v5903_v47  ;;  %v5908_v0 = vmul.f32 %v5900_v39, %v5889_v8  ;;  %v5935_v56 = vsel %vm14851_vm8, %v13325_v50, %v13337_v6 }
 0x938   : > { %7652 = vmatpush1.bf16.msra.mxu1 %v7651_v1  ;;  %v5830_v51 = vpop.permute.xlu0 %5829  ;;  %6660 = vmatprep.mubr.f32.mxu1 %v6248_v42  ;;  %v7661_v1 = vpack.c.bf16 %v5906_v60, %v5904_v57  ;;  %v5937_v50 = vsel %vm14852_vm3, %v13367_v5, %v13378_v33  ;;  %v5957_v6 = vmul.f32 %v5948_v63, %v13218_v48 }
 0x939   : > { %v5834_v53 = vsel %vm14842_vm12, %v12930_v29, %v5830_v51  ;;  %v5838_v21 = vsel %vm14843_vm1, %v5830_v51, %v12930_v29  ;;  %v13490_v3 = vpop.permute.xlu1 %6023  ;;  %7654 = vmatprep.subr.bf16.mxu1 %v7653_v54  ;;  %v5956_v54 = vmul.f32 %v5952_v11, %v5939_v4  ;;  %vm14854_vm12 = vcmp.lt.s32.totalorder %v8197_v10, 98 }
 0x93a   : > { %v5857_v62 = vmul.f32 %v5844_v20, %v5834_v53  ;;  %v5858_v32 = vmul.f32 %v5848_v59, %v5838_v21  ;;  %v5885_v20 = vsel %vm14845_vm9, %v13273_v22, %v13296_v25  ;;  %vm14855_vm1 = vmmov %vm14854_vm12 }
 0x93b   : > { %6661 = vmatmul.mubr.f32.gmra.mrb[12].mxu1 %v6247_v2  ;;  %v5907_v19 = vmul.f32 %v5896_v46, %v5885_v20  ;;  %v5991_v13 = vsel %vm14855_vm1, %v13419_v58, %v13403_v15  ;;  %vm14857_vm9 = vmmov %vm14847_vm0 }
 0x93c   : > { %v7659_v29 = vpack.c.bf16 %v5857_v62, %v5855_v31  ;;  %7656 = vmatpush1.bf16.msra.mxu1 %v7655_v17  ;;  %v13500_v23 = vpop.permute.xlu0 %6077  ;;  %v7657_v9 = vpack.c.bf16 %v5858_v32, %v5856_v55  ;;  %6666 = vmatprep.mubr.f32.mxu1 %v6255_v35  ;;  %v7053_v17 = vld [vmem:[%s13813_s1 + $0x24] ss:$8 sm:$0x3]  ;;  %v5955_v31 = vmul.f32 %v5948_v63, %v5935_v56  ;;  %vm14858_vm10 = vmmov %vm14855_vm1 }
 0x93d   : > { %v13509_v59 = vpop.permute.xlu1 %6031  ;;  %v6004_v35 = vrot.slane %v7053_v17, %v14438_v40  ;;  %v5992_v55 = vsel %vm14854_vm12, %v13290_v41, %v13269_v18  ;;  %v5959_v32 = vmul.f32 %v5948_v63, %v5937_v50  ;;  %v6000_v60 = vrot.slane %v7053_v17, %v14436_v38  ;;  %vm14859_vm0 = vmmov %vm14855_vm1 }
 0x93e   : > { %7658 = vmatprep.subr.bf16.mxu1 %v7657_v9  ;;  %v7671_v62 = vpack.c.bf16 %v5957_v6, %v5955_v31  ;;  %v5988_v47 = vsel %vm14859_vm0, %v13269_v18, %v13290_v41  ;;  %vm14860_vm13 = vmmov %vm14859_vm0 }
 0x93f   : > { %6667 = vmatmul.mubr.f32.gmra.mrb[14].mxu1 %v6254_v27  ;;  %v6008_v43 = vmul.f32 %v6004_v35, %v5991_v13  ;;  %v6010_v30 = vmul.f32 %v6004_v35, %v5992_v55  ;;  %vm14866_vm12 = vmmov %vm14859_vm0 }
 0x940   : > { %7660 = vmatpush1.bf16.msra.mxu1 %v7659_v29  ;;  %v5882_v16 = vpop.permute.xlu0 %5881  ;;  %6737 = vmatprep.mubr.f32.mxu1 %v6236_v7  ;;  %v5987_v29 = vsel %vm14858_vm10, %v13403_v15, %v13419_v58  ;;  %v7054_v15 = vld [vmem:[%s13813_s1 + $0x25] ss:$8 sm:$0x3] }
 0x941   : > { %v5886_v22 = vsel %vm14849_vm7, %v13090_v26, %v5882_v16  ;;  %v5890_v25 = vsel %vm14850_vm11, %v5882_v16, %v13090_v26  ;;  %v13538_v42 = vpop.permute.xlu1 %6027  ;;  %7662 = vmatprep.subr.bf16.mxu1 %v7661_v1  ;;  %v5958_v26 = vmul.f32 %v5952_v11, %v5940_v52  ;;  %v6007_v58 = vmul.f32 %v6000_v60, %v5987_v29  ;;  %vm14861_vm7 = vmmov %vm14859_vm0 }
 0x942   : > { %v5909_v24 = vmul.f32 %v5896_v46, %v5886_v22  ;;  %v5910_v12 = vmul.f32 %v5900_v39, %v5890_v25  ;;  %v5941_v39 = vsel %vm14853_vm14, %v13378_v33, %v13367_v5  ;;  %v6009_v1 = vmul.f32 %v6000_v60, %v5988_v47  ;;  %vm14865_vm14 = vmmov %vm14859_vm0 }
 0x943   : > { %v7669_v21 = vpack.c.bf16 %v5958_v26, %v5956_v54  ;;  %v5960_v57 = vmul.f32 %v5952_v11, %v5941_v39  ;;  %v5993_v18 = vsel %vm14861_vm7, %v13462_v28, %v13443_v49  ;;  %v7677_v41 = vpack.c.bf16 %v6010_v30, %v6008_v43  ;;  %v7056_v43 = vld [vmem:[%s13813_s1 + $0x27] ss:$8 sm:$0x3] }
 0x944   : > { %v7667_v14 = vpack.c.bf16 %v5909_v24, %v5907_v19  ;;  %7664 = vmatpush1.bf16.msra.mxu1 %v7663_v37  ;;  %v13545_v51 = vpop.permute.xlu0 %6085  ;;  %v7665_v2 = vpack.c.bf16 %v5910_v12, %v5908_v0  ;;  %v6052_v52 = vrot.slane %v7054_v15, %v14436_v38  ;;  %v6056_v4 = vrot.slane %v7054_v15, %v14438_v40 }
 0x945   : > { %v13550_v53 = vpop.permute.xlu1 %6035  ;;  %vm14862_vm11 = vcmp.lt.s32.totalorder %v8197_v10, 97  ;;  %v7679_v22 = vpack.c.bf16 %v6009_v1, %v6007_v58  ;;  %v6012_v24 = vmul.f32 %v6004_v35, %v5993_v18  ;;  %v6156_v1 = vrot.slane %v7056_v43, %v14436_v38 }
 0x946   : > { %7666 = vmatprep.subr.bf16.mxu1 %v7665_v2  ;;  %v6044_v16 = vsel %vm14862_vm11, %v13414_v61, %v13373_v44  ;;  %vm14863_vm8 = vmmov %vm14862_vm11  ;;  %v14873_v10 = vmov 0.0  }
 0x947   : > { %v6043_v37 = vsel %vm14863_vm8, %v13509_v59, %v13490_v3  ;;  %vm14864_vm3 = vmmov %vm14863_vm8  ;;  %v6062_v17 = vmul.f32 %v6056_v4, %v6044_v16 }
 0x948   : > { %7668 = vmatpush1.bf16.msra.mxu1 %v7667_v14  ;;  %v5934_v48 = vpop.permute.xlu0 %5933  ;;  %vm14867_vm1 = vmmov %vm14864_vm3 }
 0x949   : > { %v5938_v5 = vsel %vm14856_vm2, %v13254_v36, %v5934_v48  ;;  %v5942_v33 = vsel %vm14857_vm9, %v5934_v48, %v13254_v36  ;;  %v6076_v46 = vpop.permute.xlu1 %6075  ;;  %7670 = vmatprep.subr.bf16.mxu1 %v7669_v21  ;;  %v6040_v54 = vsel %vm14867_vm1, %v13373_v44, %v13414_v61  ;;  %vm14868_vm2 = vmmov %vm14867_vm1  ;;  %v6096_v48 = vsel %vm886_vm6, %v13545_v51, %v13500_v23 }
 0x94a   : > { %v5961_v9 = vmul.f32 %v5948_v63, %v5938_v5  ;;  %v5962_v27 = vmul.f32 %v5952_v11, %v5942_v33  ;;  %v5989_v11 = vsel %vm14860_vm13, %v13443_v49, %v13462_v28  ;;  %v6039_v49 = vsel %vm14864_vm3, %v13490_v3, %v13509_v59  ;;  %vm14869_vm9 = vmmov %vm14867_vm1 }
 0x94b   : > { %v6011_v56 = vmul.f32 %v6000_v60, %v5989_v11  ;;  %v6060_v3 = vmul.f32 %v6056_v4, %v6043_v37  ;;  %v6059_v59 = vmul.f32 %v6052_v52, %v6039_v49  ;;  %v6061_v50 = vmul.f32 %v6052_v52, %v6040_v54  ;;  %vm14870_vm10 = vmmov %vm14867_vm1 }
 0x94c   : > { %v7675_v7 = vpack.c.bf16 %v5961_v9, %v5959_v32  ;;  %7672 = vmatpush1.bf16.msra.mxu1 %v7671_v62  ;;  %v13585_v36 = vpop.permute.xlu0 %6081  ;;  %v7673_v20 = vpack.c.bf16 %v5962_v27, %v5960_v57  ;;  %v6041_v6 = vsel %vm14868_vm2, %v13538_v42, %v13550_v53  ;;  %v6045_v44 = vsel %vm14869_vm9, %v13550_v53, %v13538_v42  ;;  %vm14871_vm0 = vmmov %vm14867_vm1 }
 0x94d   : > { %v6084_v8 = vpop.permute.xlu1 %6083  ;;  %v7685_v61 = vpack.c.bf16 %v6062_v17, %v6060_v3  ;;  %v7687_v39 = vpack.c.bf16 %v6061_v50, %v6059_v59  ;;  %v6063_v5 = vmul.f32 %v6052_v52, %v6041_v6  ;;  %v6064_v33 = vmul.f32 %v6056_v4, %v6045_v44 }
 0x94e   : > { %7674 = vmatprep.subr.bf16.mxu1 %v7673_v20  ;;  %v6095_v55 = vsel %vm886_vm6, %v6084_v8, %v6076_v46  ;;  %v6091_v62 = vsel %vm886_vm6, %v6076_v46, %v6084_v8  ;;  %v6092_v9 = vsel %vm886_vm6, %v13500_v23, %v13545_v51  ;;  %v6160_v23 = vrot.slane %v7056_v43, %v14438_v40 }
 0x950   : > { %7676 = vmatpush1.bf16.msra.mxu1 %v7675_v7  ;;  %v5986_v19 = vpop.permute.xlu0 %5985 }
 0x951   : > { %v5990_v28 = vsel %vm14865_vm14, %v13332_v34, %v5986_v19  ;;  %v5994_v25 = vsel %vm14866_vm12, %v5986_v19, %v13332_v34  ;;  %v6080_v0 = vpop.permute.xlu1 %6079  ;;  %7678 = vmatprep.subr.bf16.mxu1 %v7677_v41  ;;  %v7055_v34 = vld [vmem:[%s13813_s1 + $0x26] ss:$8 sm:$0x3] }
 0x952   : > { %v6013_v12 = vmul.f32 %v6000_v60, %v5990_v28  ;;  %v6014_v63 = vmul.f32 %v6004_v35, %v5994_v25  ;;  %v6104_v21 = vrot.slane %v7055_v34, %v14436_v38  ;;  %v6108_v35 = vrot.slane %v7055_v34, %v14438_v40 }
 0x954   : > { %v7683_v14 = vpack.c.bf16 %v6013_v12, %v6011_v56  ;;  %7680 = vmatpush1.bf16.msra.mxu1 %v7679_v22  ;;  %v6130_v2 = vpop.permute.xlu0 %6129  ;;  %v7681_v26 = vpack.c.bf16 %v6014_v63, %v6012_v24  ;;  %v6112_v46 = vmul.f32 %v6108_v35, %v6095_v55  ;;  %v6111_v27 = vmul.f32 %v6104_v21, %v6091_v62 }
 0x955   : > { %v6088_v31 = vpop.permute.xlu1 %6087  ;;  %v6114_v7 = vmul.f32 %v6108_v35, %v6096_v48  ;;  %v6113_v30 = vmul.f32 %v6104_v21, %v6092_v9 }
 0x956   : > { %7682 = vmatprep.subr.bf16.mxu1 %v7681_v26  ;;  %v6093_v15 = vsel %vm886_vm6, %v6080_v0, %v6088_v31  ;;  %v6097_v58 = vsel %vm886_vm6, %v6088_v31, %v6080_v0 }
 0x957   : > { %v7693_v51 = vpack.c.bf16 %v6114_v7, %v6112_v46  ;;  %v7695_v8 = vpack.c.bf16 %v6113_v30, %v6111_v27  ;;  %v6250_v30 = vld [vmem:[%s14699_s12 + $0x98] sm:$0xff] }
 0x958   : > { %7684 = vmatpush1.bf16.msra.mxu1 %v7683_v14  ;;  %v6038_v13 = vpop.permute.xlu0 %6037 }
 0x959   : > { %v6042_v42 = vsel %vm14870_vm10, %v13453_v45, %v6038_v13  ;;  %v6046_v53 = vsel %vm14871_vm0, %v6038_v13, %v13453_v45  ;;  %v6128_v32 = vpop.permute.xlu1 %6127  ;;  %7686 = vmatprep.subr.bf16.mxu1 %v7685_v61 }
 0x95a   : > { %v6065_v57 = vmul.f32 %v6052_v52, %v6042_v42  ;;  %v6066_v29 = vmul.f32 %v6056_v4, %v6046_v53  ;;  %v6115_v52 = vmul.f32 %v6104_v21, %v6093_v15  ;;  %v6116_v4 = vmul.f32 %v6108_v35, %v6097_v58 }
 0x95c   : > { %v7691_v60 = vpack.c.bf16 %v6065_v57, %v6063_v5  ;;  %7688 = vmatpush1.bf16.msra.mxu1 %v7687_v39  ;;  %v6138_v45 = vpop.permute.xlu0 %6137  ;;  %v7689_v47 = vpack.c.bf16 %v6066_v29, %v6064_v33  ;;  %v6235_v33 = vld [vmem:[%s14699_s12 + $0x20] sm:$0xff] }
 0x95d   : > { %v6136_v20 = vpop.permute.xlu1 %6135  ;;  %v6148_v11 = vsel %vm910_vm5, %v6138_v45, %v6130_v2  ;;  %v6144_v22 = vsel %vm910_vm5, %v6130_v2, %v6138_v45  ;;  %v6243_v29 = vld [vmem:[%s14699_s12 + $0x60] sm:$0xff] }
 0x95e   : > { %7690 = vmatprep.subr.bf16.mxu1 %v7689_v47  ;;  %v6147_v18 = vsel %vm910_vm5, %v6136_v20, %v6128_v32  ;;  %v6143_v49 = vsel %vm910_vm5, %v6128_v32, %v6136_v20  ;;  %v6166_v0 = vmul.f32 %v6160_v23, %v6148_v11  ;;  %v6165_v54 = vmul.f32 %v6156_v1, %v6144_v22  ;;  %v6242_v47 = vld [vmem:[%s14699_s12 + $0x58] sm:$0xff]  ;;  %v6257_v11 = vld [vmem:[%s14699_s12 + $0xd0] sm:$0xff] }
 0x95f   : > { %v6164_v56 = vmul.f32 %v6160_v23, %v6147_v18  ;;  %v6163_v3 = vmul.f32 %v6156_v1, %v6143_v49  ;;  %v6237_v22 = vld [vmem:[%s14699_s12 + $0x30] sm:$0xff]  ;;  %v6244_v49 = vld [vmem:[%s14699_s12 + $0x68] sm:$0xff] }
 0x960   : > { %7692 = vmatpush1.bf16.msra.mxu1 %v7691_v60  ;;  %v6090_v41 = vpop.permute.xlu0 %6089 }
 0x961   : > { %v6094_v16 = vsel %vm886_vm6, %v13585_v36, %v6090_v41  ;;  %v6098_v37 = vsel %vm886_vm6, %v6090_v41, %v13585_v36  ;;  %v6132_v19 = vpop.permute.xlu1 %6131  ;;  %7694 = vmatprep.subr.bf16.mxu1 %v7693_v51  ;;  %v7701_v2 = vpack.c.bf16 %v6166_v0, %v6164_v56  ;;  %v7703_v17 = vpack.c.bf16 %v6165_v54, %v6163_v3  ;;  %v6249_v51 = vld [vmem:[%s14699_s12 + $0x90] sm:$0xff] }
 0x962   : > { %v6117_v28 = vmul.f32 %v6104_v21, %v6094_v16  ;;  %v6118_v25 = vmul.f32 %v6108_v35, %v6098_v37  ;;  %v7057_v21 = vld [vmem:[%s13813_s1 + $0x30] ss:$8 sm:$0x3]  ;;  %v6256_v37 = vld [vmem:[%s14699_s12 + $0xc8] sm:$0xff] }
 0x963   : > { %v6208_v62 = vrot.slane %v7057_v21, %v14436_v38  ;;  %v6212_v42 = vrot.slane %v7057_v21, %v14438_v40 }
 0x964   : > { %v7699_v24 = vpack.c.bf16 %v6117_v28, %v6115_v52  ;;  %7696 = vmatpush1.bf16.msra.mxu1 %v7695_v8  ;;  %v6134_v12 = vpop.permute.xlu0 %6133  ;;  %v7697_v63 = vpack.c.bf16 %v6118_v25, %v6116_v4  ;;  %v6251_v28 = vld [vmem:[%s14699_s12 + $0xa0] sm:$0xff]  ;;  %v6258_v25 = vld [vmem:[%s14699_s12 + $0xd8] sm:$0xff] }
 0x965   : > { %v6140_v59 = vpop.permute.xlu1 %6139 }
 0x966   : > { %7698 = vmatprep.subr.bf16.mxu1 %v7697_v63  ;;  %v6145_v36 = vsel %vm910_vm5, %v6132_v19, %v6140_v59  ;;  %v6149_v14 = vsel %vm910_vm5, %v6140_v59, %v6132_v19 }
 0x967   : > { %v6167_v6 = vmul.f32 %v6156_v1, %v6145_v36  ;;  %v6168_v44 = vmul.f32 %v6160_v23, %v6149_v14 }
 0x968   : > { %7700 = vmatpush1.bf16.msra.mxu1 %v7699_v24  ;;  %v6142_v26 = vpop.permute.xlu0 %6141 }
 0x969   : > { %v6146_v34 = vsel %vm910_vm5, %v6134_v12, %v6142_v26  ;;  %v6150_v31 = vsel %vm910_vm5, %v6142_v26, %v6134_v12  ;;  %v6180_v50 = vpop.permute.xlu1 %6179  ;;  %7702 = vmatprep.subr.bf16.mxu1 %v7701_v2 }
 0x96a   : > { %v6169_v61 = vmul.f32 %v6156_v1, %v6146_v34  ;;  %v6170_v39 = vmul.f32 %v6160_v23, %v6150_v31 }
 0x96c   : > { %v7707_v35 = vpack.c.bf16 %v6169_v61, %v6167_v6  ;;  %7704 = vmatpush1.bf16.msra.mxu1 %v7703_v17  ;;  %v6182_v55 = vpop.permute.xlu0 %6181  ;;  %v7705_v13 = vpack.c.bf16 %v6170_v39, %v6168_v44 }
 0x96d   : > { %v6188_v48 = vpop.permute.xlu1 %6187 }
 0x96e   : > { %7706 = vmatprep.subr.bf16.mxu1 %v7705_v13  ;;  %v6195_v53 = vsel %vm934_vm4, %v6180_v50, %v6188_v48  ;;  %v6199_v32 = vsel %vm934_vm4, %v6188_v48, %v6180_v50 }
 0x96f   : > { %v6215_v9 = vmul.f32 %v6208_v62, %v6195_v53  ;;  %v6216_v46 = vmul.f32 %v6212_v42, %v6199_v32 }
 0x970   : > { %7708 = vmatpush1.bf16.msra.mxu1 %v7707_v35  ;;  %v6190_v5 = vpop.permute.xlu0 %6189 }
 0x971   : > { %v6196_v57 = vsel %vm934_vm4, %v6182_v55, %v6190_v5  ;;  %v6200_v38 = vsel %vm934_vm4, %v6190_v5, %v6182_v55  ;;  %v6184_v40 = vpop.permute.xlu1 %6183 }
 0x972   : > { %v6217_v27 = vmul.f32 %v6208_v62, %v6196_v57  ;;  %v6218_v60 = vmul.f32 %v6212_v42, %v6200_v38 }
 0x973   : > { %6738 = vmatmul.mubr.f32.vlgmr.msra.gmra.mrb[8].mxu1 %v6235_v33 }
 0x974   : > { %v7711_v43 = vpack.c.bf16 %v6217_v27, %v6215_v9  ;;  %v6186_v45 = vpop.permute.xlu0 %6185  ;;  %6743 = vmatprep.mubr.f32.mxu1 %v6243_v29  ;;  %v7709_v7 = vpack.c.bf16 %v6218_v60, %v6216_v46 }
 0x975   : > { %v6192_v20 = vpop.permute.xlu1 %6191 }
 0x976   : > { %7710 = vmatprep.subr.bf16.mxu1 %v7709_v7  ;;  %v6197_v15 = vsel %vm934_vm4, %v6184_v40, %v6192_v20  ;;  %v6201_v58 = vsel %vm934_vm4, %v6192_v20, %v6184_v40 }
 0x977   : > { %6744 = vmatmul.mubr.f32.gmra.mrb[10].mxu1 %v6242_v47  ;;  %v6219_v18 = vmul.f32 %v6208_v62, %v6197_v15  ;;  %v6220_v41 = vmul.f32 %v6212_v42, %v6201_v58 }
 0x978   : > { %7712 = vmatpush1.bf16.msra.mxu1 %v7711_v43  ;;  %v6194_v23 = vpop.permute.xlu0 %6193  ;;  %6749 = vmatprep.mubr.f32.mxu1 %v6250_v30 }
 0x979   : > { %v6198_v8 = vsel %vm934_vm4, %v6186_v45, %v6194_v23  ;;  %v6202_v1 = vsel %vm934_vm4, %v6194_v23, %v6186_v45 }
 0x97a   : > { %v6221_v52 = vmul.f32 %v6208_v62, %v6198_v8  ;;  %v6222_v4 = vmul.f32 %v6212_v42, %v6202_v1 }
 0x97b   : > { %6750 = vmatmul.mubr.f32.gmra.mrb[12].mxu1 %v6249_v51 }
 0x97c   : > { %v7715_v16 = vpack.c.bf16 %v6221_v52, %v6219_v18  ;;  %6755 = vmatprep.mubr.f32.mxu1 %v6257_v11  ;;  %v7713_v19 = vpack.c.bf16 %v6222_v4, %v6220_v41 }
 0x97e   : > { %7714 = vmatprep.subr.bf16.mxu1 %v7713_v19 }
 0x97f   : > { %6756 = vmatmul.mubr.f32.gmra.mrb[14].mxu1 %v6256_v37 }
 0x980   : > { %7716 = vmatpush1.bf16.msra.mxu1 %v7715_v16  ;;  %6826 = vmatprep.mubr.f32.mxu1 %v14873_v10 }
 0x983   : > { %7058 = vmatmul.mubr.msk.f32.vlgmr.msra.gmra.mrb[8].mxu1 %vm2674_vm15, %v6237_v22 }
 0x984   : > { %6832 = vmatprep.mubr.f32.mxu1 %v14873_v10 }
 0x986   : > { %v6466_v0 = vpop.permute.xlu1 %6465 }
 0x987   : > { %7059 = vmatmul.mubr.msk.f32.gmra.mrb[10].mxu1 %vm2674_vm15, %v6244_v49 }
 0x988   : > { %6838 = vmatprep.mubr.f32.mxu1 %v14873_v10 }
 0x989   : > { %v6471_v3 = vpop.permute.xlu0 %6470 }
 0x98a   : > { %v6476_v34 = vpop.permute.xlu1 %6475 }
 0x98b   : > { %7060 = vmatmul.mubr.msk.f32.gmra.mrb[12].mxu1 %vm2674_vm15, %v6251_v28 }
 0x98c   : > { %6844 = vmatprep.mubr.f32.mxu1 %v14873_v10 }
 0x98d   : > { %v6481_v21 = vpop.permute.xlu0 %6480 }
 0x98f   : > { %7061 = vmatmul.mubr.msk.f32.gmra.mrb[14].mxu1 %vm2674_vm15, %v6258_v25 }
 0xa56   : > { %v6828_v56 = vpop.f32.mrb[8].mxu1 }
 0xa57   : > { %v7749_v24 = vadd.f32 %v6828_v56, %v6466_v0  ;;  %v6830_v12 = vpop.f32.mrb[9].mxu1 }
 0xa58   : > { %v7750_v63 = vadd.f32 %v6830_v12, %v6466_v0 }
 0xa59   : > { %v6851_v54 = vmax.f32 %v7749_v24, 0.0 }
 0xa5a   : > { %v6852_v59 = vmax.f32 %v7750_v63, 0.0  ;;  %v6834_v36 = vpop.f32.mrb[10].mxu1 }
 0xa5b   : > { %6859 = vst [vmem:[%s13749_s0] sm:$0xff] %v6851_v54  ;;  %v7751_v14 = vadd.f32 %v6834_v36, %v6471_v3  ;;  %v6836_v2 = vpop.f32.mrb[11].mxu1 }
 0xa5c   : > { %6860 = vst [vmem:[%s13749_s0 + $0x8] sm:$0xff] %v6852_v59  ;;  %v7752_v26 = vadd.f32 %v6836_v2, %v6471_v3 }
 0xa5d   : > { %v6853_v17 = vmax.f32 %v7751_v14, 0.0 }
 0xa5e   : > { %v6854_v31 = vmax.f32 %v7752_v26, 0.0  ;;  %v6840_v50 = vpop.f32.mrb[12].mxu1 }
 0xa5f   : > { %6861 = vst [vmem:[%s13749_s0 + $0x10] sm:$0xff] %v6853_v17  ;;  %v7753_v6 = vadd.f32 %v6840_v50, %v6476_v34  ;;  %v6842_v44 = vpop.f32.mrb[13].mxu1 }
 0xa60   : > { %6862 = vst [vmem:[%s13749_s0 + $0x18] sm:$0xff] %v6854_v31  ;;  %v7754_v61 = vadd.f32 %v6842_v44, %v6476_v34 }
 0xa61   : > { %v6855_v39 = vmax.f32 %v7753_v6, 0.0 }
 0xa62   : > { %v6856_v35 = vmax.f32 %v7754_v61, 0.0  ;;  %v6846_v55 = vpop.f32.mrb[14].mxu1 }
 0xa63   : > { %6863 = vst [vmem:[%s13749_s0 + $0x20] sm:$0xff] %v6855_v39  ;;  %v7755_v13 = vadd.f32 %v6846_v55, %v6481_v21  ;;  %v6848_v48 = vpop.f32.mrb[15].mxu1 }
 0xa64   : > { %6864 = vst [vmem:[%s13749_s0 + $0x28] sm:$0xff] %v6856_v35  ;;  %v7756_v62 = vadd.f32 %v6848_v48, %v6481_v21 }
 0xa65   : > { %v6857_v42 = vmax.f32 %v7755_v13, 0.0 }
 0xa66   : > { %v6858_v53 = vmax.f32 %v7756_v62, 0.0 }
 0xa67   : > { %6865 = vst [vmem:[%s13749_s0 + $0x30] sm:$0xff] %v6857_v42 }
 0xa68   : > { %6866 = vst [vmem:[%s13749_s0 + $0x38] sm:$0xff] %v6858_v53 }
 0xa69   : > { %7894 = shalt.err (!%p7891_p3)
}
 0xa6a   : > { %s7895_s22 = scalar_lea.hbm %s13762_s5, 1024  ;;  %s7899_s24 = scalar_lea.hbm %s14876_s17, 2048 }
 0xa6b   : > { %p7896_p4 = scmp.ne.s32.totalorder %s13762_s5, %s7895_s22  ;;  %p7900_p9 = scmp.lt.u32.totalorder %s13762_s5, %s14876_s17 }
 0xa6c   : > { %p7901_p10 = scmp.lt.u32.totalorder %s7899_s24, %s7895_s22  ;;  %p7903_p12 = scmp.lt.u32.totalorder %s7895_s22, %s13762_s5 }
 0xa6d   : > { %p7897_p7 = pnand %p7896_p4, %p8066_p5 }
 0xa6e   : > { %p7902_p11 = por %p7901_p10, %p7900_p9 }
 0xa6f   : > { %p7898_p8 = pneg %p7897_p7 }
 0xa70   : > { %p7904_p13 = por %p7903_p12, %p7902_p11 }
 0xa72   : > { %p7905_p0 = pnand %p7904_p13, %p7898_p8 }
 0xa74   : > { %7908 = shalt.err (!%p7905_p0)
}
 0xa75   : > { %s7972_s30 = smov 256  }
 0xa76   : > { %7813 = dma.vmem_to_hbm [thread:$0]  (%p8066_p5), %s13764_s15, 1024, %s13762_s5, %s13770_s4, %s7972_s30, %s7972_s30, %s14236_s16  }
 0xa77 PF: > { %s14877_s21 = sld [smem:[#allocation9_spill]]  ;;  %s14878_s18 = sld [smem:[#allocation6_spill]] }
 0xa7d   : > { %p7819_p1 = scmp.ge.s32.totalorder %s14877_s21, 2  ;;  %s6896_s28 = sand.u32 1, %s14878_s18  }
 0xa7e   : > { %s6897_s26 = scalar_lea.sflag [#allocation4], %s6896_s28 }
 0xa7f   : > { %p7816_p2 = pnand %p7819_p1, %p8070_p6 }
 0xa81   : > { %7926 = dma.done.wait (!%p7816_p2), %s6897_s26, 1024  }
 0xa82   : > { %7928 = vsyncadd (!%p7816_p2), %s6897_s26, 4294966272  ;;  %s14880_s16 = sld [smem:[#allocation11_spill]]  ;;  %s14881_s13 = sld [smem:[#allocation7_spill]] }
 0xa83   : > { %s14882_s14 = sld [smem:[#allocation8_spill]]  ;;  %s14883_s15 = sld [smem:[#allocation12_spill]] }
 0xa88   : > { %p20_p3 = scmp.ge.s32.totalorder %s14880_s16, 4  }
 0xa8a   :  { %22 = sbr.rel (!%p20_p3) target bundleno = 13 (0xd), region = 119 }
 0xa91   :  { %6902 = vsyncpa [#allocation4], 1 }
 0xa92   :  { %6904 = vsyncpa [#allocation4 + $0x1], 1 }

</bundles_post_ra>
